<compile_context>
chip_gen: v6e
topology: v6e:2x2x1
jax: 0.10.0
libtpu: 0.0.40
codegen_flags: <defaults>
</compile_context>

<pallas_src>
import math

import jax
import jax.numpy as jnp
import numpy as np
from jax.experimental import pallas as pl
from jax.experimental.pallas import tpu as pltpu

K = 10  # Bernstein polynomial order (BernNet default)


# ---------------------------------------------------------------------------
# Pallas kernel
# ---------------------------------------------------------------------------
def _bern_poly(feat, Lm, b, tmp_ref, acc_ref):
    """acc = sum_{i=0..K} b[i] * L^i * (2I - L)^{K-i} @ feat, via Horner.

    tmp[j] = (2I - L)^j feat  (K matmuls, M applied as 2*t - L@t)
    acc_j  = L @ acc_{j-1} + b[K-j] * tmp[j]  ==>  acc_K = desired sum (K matmuls)
    """
    tmp_ref[0] = feat
    for j in range(1, K + 1):
        t = tmp_ref[j - 1]
        tmp_ref[j] = 2.0 * t - jnp.dot(Lm, t, preferred_element_type=jnp.float32)

    acc_ref[...] = b[K] * tmp_ref[0]
    for j in range(1, K + 1):
        acc_ref[...] = (jnp.dot(Lm, acc_ref[...], preferred_element_type=jnp.float32)
                        + b[K - j] * tmp_ref[j])
    return acc_ref[...]


def bernnet_kernel(x_ref, w1_ref, w2_ref, fcw_ref, l_ref,
                   coe_ref, binom_ref, fcb_ref, o_ref, tmp_ref, acc_ref):
    Lm = l_ref[...]
    # b[i] = comb(K,i)/2^K * relu(coe[i]); computed once, shared by both convs.
    b = [jnp.maximum(coe_ref[i], 0.0) * binom_ref[i] for i in range(K + 1)]

    # conv1: h1 = relu( P(L) (x @ W1) )           (mix-then-propagate, 32 wide)
    h = jnp.dot(x_ref[...], w1_ref[...], preferred_element_type=jnp.float32)  # [N,32]
    h1 = jnp.maximum(_bern_poly(h, Lm, b, tmp_ref, acc_ref), 0.0)

    # conv2: h2 = relu( (P(L) h1) @ W2 )          (propagate-then-mix, 32 wide)
    p2 = _bern_poly(h1, Lm, b, tmp_ref, acc_ref)                              # [N,32]
    h2 = jnp.maximum(jnp.dot(p2, w2_ref[...],
                             preferred_element_type=jnp.float32), 0.0)        # [N,64]

    # fc2 (weights padded to 128 lanes for a lane-dense store): out = h2 @ Wf + bf
    o_ref[...] = (jnp.dot(h2, fcw_ref[...], preferred_element_type=jnp.float32)
                  + fcb_ref[0])


def bernnet_forward(x_pad, w1_pad, w2, fc_w_pad, fc_b, coe, binom, L):
    n, cin_pad = x_pad.shape
    c1 = w1_pad.shape[1]            # 32
    c2 = w2.shape[1]                # 64
    out_lanes = fc_w_pad.shape[1]   # 128 (lane-dense; real fc2 output is column 0)

    flops = 2 * n * (cin_pad * c1            # x @ W1
                     + 2 * 2 * K * n * c1    # two conv chains, 2K [N,N]@[N,32] each
                     + c1 * c2               # p2 @ W2
                     + c2 * out_lanes)       # fc2
    bytes_accessed = 4 * (x_pad.size + w1_pad.size + w2.size + fc_w_pad.size
                          + L.size + coe.size + binom.size + fc_b.size
                          + n * out_lanes)

    out = pl.pallas_call(
        bernnet_kernel,
        out_shape=jax.ShapeDtypeStruct((n, out_lanes), jnp.float32),
        in_specs=[
            pl.BlockSpec(memory_space=pltpu.MemorySpace.VMEM),   # x_pad  [N, 128]
            pl.BlockSpec(memory_space=pltpu.MemorySpace.VMEM),   # W1     [128, 32]
            pl.BlockSpec(memory_space=pltpu.MemorySpace.VMEM),   # W2     [32, 64]
            pl.BlockSpec(memory_space=pltpu.MemorySpace.VMEM),   # fc W   [64, 128]
            pl.BlockSpec(memory_space=pltpu.MemorySpace.VMEM),   # L      [N, N]
            pl.BlockSpec(memory_space=pltpu.MemorySpace.SMEM),   # coe    [K+1]
            pl.BlockSpec(memory_space=pltpu.MemorySpace.SMEM),   # binom  [K+1]
            pl.BlockSpec(memory_space=pltpu.MemorySpace.SMEM),   # fc b   [1]
        ],
        out_specs=pl.BlockSpec(memory_space=pltpu.MemorySpace.VMEM),
        scratch_shapes=[pltpu.VMEM((K + 1, n, c1), jnp.float32),   # M-chain terms
                        pltpu.VMEM((n, c1), jnp.float32)],         # Horner accumulator
        cost_estimate=pl.CostEstimate(flops=flops, transcendentals=0,
                                      bytes_accessed=bytes_accessed),
    )(x_pad, w1_pad, w2, fc_w_pad, L, coe, binom, fc_b)
    return out[:, :1]                        # real fc2 output is [N, 1]


# ---------------------------------------------------------------------------
# Plain-JAX / NumPy glue: graph construction, Laplacian build, parameters.
# ---------------------------------------------------------------------------
def grid_edge_index(rows, cols):
    """4-neighbor grid graph, undirected, as a [2, E] edge_index (both directions)."""
    src, dst = [], []
    nid = lambda r, c: r * cols + c
    for r in range(rows):
        for c in range(cols):
            if c + 1 < cols:
                src += [nid(r, c), nid(r, c + 1)]
                dst += [nid(r, c + 1), nid(r, c)]
            if r + 1 < rows:
                src += [nid(r, c), nid(r + 1, c)]
                dst += [nid(r + 1, c), nid(r, c)]
    return np.stack([np.array(src, np.int32), np.array(dst, np.int32)])


def build_laplacian(edge_index, n):
    A = np.zeros((n, n), np.float32)
    A[edge_index[0], edge_index[1]] = 1.0
    deg = A.sum(axis=1)
    dinv = np.where(deg > 0, 1.0 / np.sqrt(deg), 0.0).astype(np.float32)
    An = dinv[:, None] * A * dinv[None, :]
    L = np.eye(n, dtype=np.float32) - An          # get_laplacian(..., 'sym')
    return jnp.asarray(L)


def glorot(key, shape):
    fan_in, fan_out = shape
    lim = math.sqrt(6.0 / (fan_in + fan_out))
    return jax.random.uniform(key, shape, jnp.float32, -lim, lim)


def bern_conv_ref(x, w, L, M, coe, binom, apply_relu):
    """Torch-faithful reference (mix-then-propagate, nested L-power loops)."""
    h = jnp.dot(x, w, preferred_element_type=jnp.float32)
    tmp = [h]
    for _ in range(K):
        tmp.append(jnp.dot(M, tmp[-1], preferred_element_type=jnp.float32))
    b = jnp.maximum(coe, 0.0) * binom
    out = b[0] * tmp[K]
    for i in range(K):
        xc = tmp[K - i - 1]
        for _ in range(i + 1):
            xc = jnp.dot(L, xc, preferred_element_type=jnp.float32)
        out = out + b[i + 1] * xc
    return jnp.maximum(out, 0.0) if apply_relu else out


if __name__ == "__main__":
    rows, cols = 8, 16
    N = rows * cols                                   # 128 nodes
    edge_index = grid_edge_index(rows, cols)          # [2, E]
    L = build_laplacian(edge_index, N)
    M = 2.0 * jnp.eye(N, dtype=jnp.float32) - L       # reference only

    key = jax.random.PRNGKey(0)
    kx, kw1, kw2, kwf, kbf = jax.random.split(key, 5)

    # data.x_tmp : [N, 1] node signal
    x = jax.random.normal(kx, (N, 1), jnp.float32)

    # Parameters (deterministic, matching the module's shapes)
    w1 = glorot(kw1, (1, 32))                         # BernConv(1, 32).weight
    w2 = glorot(kw2, (32, 64))                        # BernConv(32, 64).weight
    fc_w = jax.random.uniform(kwf, (64, 1), jnp.float32, -1 / 8.0, 1 / 8.0)
    fc_b = jax.random.uniform(kbf, (1,), jnp.float32, -1 / 8.0, 1 / 8.0)
    coe = jnp.ones((K + 1,), jnp.float32)             # self.coe.data.fill_(1)
    binom = jnp.asarray([math.comb(K, i) / (2.0 ** K) for i in range(K + 1)],
                        jnp.float32)

    # Pad tiny contraction dims with zeros (identical result, TPU-friendly tiles).
    x_pad = jnp.zeros((N, 128), jnp.float32).at[:, :1].set(x)
    w1_pad = jnp.zeros((128, 32), jnp.float32).at[:1, :].set(w1)
    fc_w_pad = jnp.zeros((64, 128), jnp.float32).at[:, :1].set(fc_w)

    # ---- forward pass: one fused Pallas kernel launch ----
    out = bernnet_forward(x_pad, w1_pad, w2, fc_w_pad, fc_b, coe, binom, L)
    out = jax.block_until_ready(out)                  # [N, 1]

    # ---- plain-JAX reference for a sanity check ----
    r1 = bern_conv_ref(x, w1, L, M, coe, binom, True)
    r2 = bern_conv_ref(r1, w2, L, M, coe, binom, True)
    ref = jnp.dot(r2, fc_w, preferred_element_type=jnp.float32) + fc_b

    np.testing.assert_allclose(np.asarray(out), np.asarray(ref),
                               rtol=2e-2, atol=2e-2)
    print("KERNEL_OK")
</pallas_src>

<mosaic_0001>
module attributes {stable_mosaic.version = 11 : i64} {
  func.func @bernnet_kernel(%arg0: memref<128x128xf32, #tpu.memory_space<vmem>>, %arg1: memref<128x32xf32, #tpu.memory_space<vmem>>, %arg2: memref<32x64xf32, #tpu.memory_space<vmem>>, %arg3: memref<64x128xf32, #tpu.memory_space<vmem>>, %arg4: memref<128x128xf32, #tpu.memory_space<vmem>>, %arg5: memref<11xf32, #tpu.memory_space<smem>>, %arg6: memref<11xf32, #tpu.memory_space<smem>>, %arg7: memref<1xf32, #tpu.memory_space<smem>>, %arg8: memref<128x128xf32, #tpu.memory_space<vmem>>, %arg9: memref<11x128x32xf32, #tpu.memory_space<vmem>>, %arg10: memref<128x32xf32, #tpu.memory_space<vmem>>) attributes {dimension_semantics = [], scalar_prefetch = 0 : i64, scratch_operands = 2 : i64, tpu.core_type = #tpu.core_type<tc>} {
    %c0 = arith.constant 0 : index
    %c0_0 = arith.constant 0 : index
    %0 = vector.load %arg4[%c0, %c0_0] : memref<128x128xf32, #tpu.memory_space<vmem>>, vector<128x128xf32>
    %c0_1 = arith.constant 0 : index
    %1 = memref.load %arg5[%c0_1] : memref<11xf32, #tpu.memory_space<smem>>
    %cst = arith.constant 0.000000e+00 : f32
    %2 = arith.maximumf %1, %cst : f32
    %c0_2 = arith.constant 0 : index
    %3 = memref.load %arg6[%c0_2] : memref<11xf32, #tpu.memory_space<smem>>
    %4 = arith.mulf %2, %3 : f32
    %c1 = arith.constant 1 : index
    %5 = memref.load %arg5[%c1] : memref<11xf32, #tpu.memory_space<smem>>
    %cst_3 = arith.constant 0.000000e+00 : f32
    %6 = arith.maximumf %5, %cst_3 : f32
    %c1_4 = arith.constant 1 : index
    %7 = memref.load %arg6[%c1_4] : memref<11xf32, #tpu.memory_space<smem>>
    %8 = arith.mulf %6, %7 : f32
    %c2 = arith.constant 2 : index
    %9 = memref.load %arg5[%c2] : memref<11xf32, #tpu.memory_space<smem>>
    %cst_5 = arith.constant 0.000000e+00 : f32
    %10 = arith.maximumf %9, %cst_5 : f32
    %c2_6 = arith.constant 2 : index
    %11 = memref.load %arg6[%c2_6] : memref<11xf32, #tpu.memory_space<smem>>
    %12 = arith.mulf %10, %11 : f32
    %c3 = arith.constant 3 : index
    %13 = memref.load %arg5[%c3] : memref<11xf32, #tpu.memory_space<smem>>
    %cst_7 = arith.constant 0.000000e+00 : f32
    %14 = arith.maximumf %13, %cst_7 : f32
    %c3_8 = arith.constant 3 : index
    %15 = memref.load %arg6[%c3_8] : memref<11xf32, #tpu.memory_space<smem>>
    %16 = arith.mulf %14, %15 : f32
    %c4 = arith.constant 4 : index
    %17 = memref.load %arg5[%c4] : memref<11xf32, #tpu.memory_space<smem>>
    %cst_9 = arith.constant 0.000000e+00 : f32
    %18 = arith.maximumf %17, %cst_9 : f32
    %c4_10 = arith.constant 4 : index
    %19 = memref.load %arg6[%c4_10] : memref<11xf32, #tpu.memory_space<smem>>
    %20 = arith.mulf %18, %19 : f32
    %c5 = arith.constant 5 : index
    %21 = memref.load %arg5[%c5] : memref<11xf32, #tpu.memory_space<smem>>
    %cst_11 = arith.constant 0.000000e+00 : f32
    %22 = arith.maximumf %21, %cst_11 : f32
    %c5_12 = arith.constant 5 : index
    %23 = memref.load %arg6[%c5_12] : memref<11xf32, #tpu.memory_space<smem>>
    %24 = arith.mulf %22, %23 : f32
    %c6 = arith.constant 6 : index
    %25 = memref.load %arg5[%c6] : memref<11xf32, #tpu.memory_space<smem>>
    %cst_13 = arith.constant 0.000000e+00 : f32
    %26 = arith.maximumf %25, %cst_13 : f32
    %c6_14 = arith.constant 6 : index
    %27 = memref.load %arg6[%c6_14] : memref<11xf32, #tpu.memory_space<smem>>
    %28 = arith.mulf %26, %27 : f32
    %c7 = arith.constant 7 : index
    %29 = memref.load %arg5[%c7] : memref<11xf32, #tpu.memory_space<smem>>
    %cst_15 = arith.constant 0.000000e+00 : f32
    %30 = arith.maximumf %29, %cst_15 : f32
    %c7_16 = arith.constant 7 : index
    %31 = memref.load %arg6[%c7_16] : memref<11xf32, #tpu.memory_space<smem>>
    %32 = arith.mulf %30, %31 : f32
    %c8 = arith.constant 8 : index
    %33 = memref.load %arg5[%c8] : memref<11xf32, #tpu.memory_space<smem>>
    %cst_17 = arith.constant 0.000000e+00 : f32
    %34 = arith.maximumf %33, %cst_17 : f32
    %c8_18 = arith.constant 8 : index
    %35 = memref.load %arg6[%c8_18] : memref<11xf32, #tpu.memory_space<smem>>
    %36 = arith.mulf %34, %35 : f32
    %c9 = arith.constant 9 : index
    %37 = memref.load %arg5[%c9] : memref<11xf32, #tpu.memory_space<smem>>
    %cst_19 = arith.constant 0.000000e+00 : f32
    %38 = arith.maximumf %37, %cst_19 : f32
    %c9_20 = arith.constant 9 : index
    %39 = memref.load %arg6[%c9_20] : memref<11xf32, #tpu.memory_space<smem>>
    %40 = arith.mulf %38, %39 : f32
    %c10 = arith.constant 10 : index
    %41 = memref.load %arg5[%c10] : memref<11xf32, #tpu.memory_space<smem>>
    %cst_21 = arith.constant 0.000000e+00 : f32
    %42 = arith.maximumf %41, %cst_21 : f32
    %c10_22 = arith.constant 10 : index
    %43 = memref.load %arg6[%c10_22] : memref<11xf32, #tpu.memory_space<smem>>
    %44 = arith.mulf %42, %43 : f32
    %c0_23 = arith.constant 0 : index
    %c0_24 = arith.constant 0 : index
    %45 = vector.load %arg0[%c0_23, %c0_24] : memref<128x128xf32, #tpu.memory_space<vmem>>, vector<128x128xf32>
    %c0_25 = arith.constant 0 : index
    %c0_26 = arith.constant 0 : index
    %46 = vector.load %arg1[%c0_25, %c0_26] : memref<128x32xf32, #tpu.memory_space<vmem>>, vector<128x32xf32>
    %cst_27 = arith.constant dense<0.000000e+00> : vector<128x32xf32>
    %47 = tpu.matmul %45, %46, %cst_27 {dimension_numbers = #tpu.dot_dimension_numbers<[1], [0], [0], [1], [0, 0, 1, 1], [], []>} : vector<128x128xf32>, vector<128x32xf32>, vector<128x32xf32> -> vector<128x32xf32>
    %c0_28 = arith.constant 0 : index
    %c0_29 = arith.constant 0 : index
    %c0_30 = arith.constant 0 : index
    %48 = vector.load %arg9[%c0_28, %c0_29, %c0_30] : memref<11x128x32xf32, #tpu.memory_space<vmem>>, vector<1x128x32xf32>
    %49 = vector.shape_cast %48 : vector<1x128x32xf32> to vector<128x32xf32>
    %50 = vector.shape_cast %47 : vector<128x32xf32> to vector<1x128x32xf32>
    tpu.vector_store %arg9[%c0_28, %c0_29, %c0_30], %50 {strides = array<i32>} : memref<11x128x32xf32, #tpu.memory_space<vmem>>, vector<1x128x32xf32>,
    %c0_31 = arith.constant 0 : index
    %c0_32 = arith.constant 0 : index
    %c0_33 = arith.constant 0 : index
    %51 = vector.load %arg9[%c0_31, %c0_32, %c0_33] : memref<11x128x32xf32, #tpu.memory_space<vmem>>, vector<1x128x32xf32>
    %52 = vector.shape_cast %51 : vector<1x128x32xf32> to vector<128x32xf32>
    %cst_34 = arith.constant 2.000000e+00 : f32
    %53 = vector.broadcast %cst_34 : f32 to vector<128x32xf32>
    %54 = arith.mulf %53, %52 : vector<128x32xf32>
    %cst_35 = arith.constant dense<0.000000e+00> : vector<128x32xf32>
    %55 = tpu.matmul %0, %52, %cst_35 {dimension_numbers = #tpu.dot_dimension_numbers<[1], [0], [0], [1], [0, 0, 1, 1], [], []>} : vector<128x128xf32>, vector<128x32xf32>, vector<128x32xf32> -> vector<128x32xf32>
    %56 = arith.subf %54, %55 : vector<128x32xf32>
    %c1_36 = arith.constant 1 : index
    %c0_37 = arith.constant 0 : index
    %c0_38 = arith.constant 0 : index
    %57 = vector.load %arg9[%c1_36, %c0_37, %c0_38] : memref<11x128x32xf32, #tpu.memory_space<vmem>>, vector<1x128x32xf32>
    %58 = vector.shape_cast %57 : vector<1x128x32xf32> to vector<128x32xf32>
    %59 = vector.shape_cast %56 : vector<128x32xf32> to vector<1x128x32xf32>
    tpu.vector_store %arg9[%c1_36, %c0_37, %c0_38], %59 {strides = array<i32>} : memref<11x128x32xf32, #tpu.memory_space<vmem>>, vector<1x128x32xf32>,
    %c1_39 = arith.constant 1 : index
    %c0_40 = arith.constant 0 : index
    %c0_41 = arith.constant 0 : index
    %60 = vector.load %arg9[%c1_39, %c0_40, %c0_41] : memref<11x128x32xf32, #tpu.memory_space<vmem>>, vector<1x128x32xf32>
    %61 = vector.shape_cast %60 : vector<1x128x32xf32> to vector<128x32xf32>
    %cst_42 = arith.constant 2.000000e+00 : f32
    %62 = vector.broadcast %cst_42 : f32 to vector<128x32xf32>
    %63 = arith.mulf %62, %61 : vector<128x32xf32>
    %cst_43 = arith.constant dense<0.000000e+00> : vector<128x32xf32>
    %64 = tpu.matmul %0, %61, %cst_43 {dimension_numbers = #tpu.dot_dimension_numbers<[1], [0], [0], [1], [0, 0, 1, 1], [], []>} : vector<128x128xf32>, vector<128x32xf32>, vector<128x32xf32> -> vector<128x32xf32>
    %65 = arith.subf %63, %64 : vector<128x32xf32>
    %c2_44 = arith.constant 2 : index
    %c0_45 = arith.constant 0 : index
    %c0_46 = arith.constant 0 : index
    %66 = vector.load %arg9[%c2_44, %c0_45, %c0_46] : memref<11x128x32xf32, #tpu.memory_space<vmem>>, vector<1x128x32xf32>
    %67 = vector.shape_cast %66 : vector<1x128x32xf32> to vector<128x32xf32>
    %68 = vector.shape_cast %65 : vector<128x32xf32> to vector<1x128x32xf32>
    tpu.vector_store %arg9[%c2_44, %c0_45, %c0_46], %68 {strides = array<i32>} : memref<11x128x32xf32, #tpu.memory_space<vmem>>, vector<1x128x32xf32>,
    %c2_47 = arith.constant 2 : index
    %c0_48 = arith.constant 0 : index
    %c0_49 = arith.constant 0 : index
    %69 = vector.load %arg9[%c2_47, %c0_48, %c0_49] : memref<11x128x32xf32, #tpu.memory_space<vmem>>, vector<1x128x32xf32>
    %70 = vector.shape_cast %69 : vector<1x128x32xf32> to vector<128x32xf32>
    %cst_50 = arith.constant 2.000000e+00 : f32
    %71 = vector.broadcast %cst_50 : f32 to vector<128x32xf32>
    %72 = arith.mulf %71, %70 : vector<128x32xf32>
    %cst_51 = arith.constant dense<0.000000e+00> : vector<128x32xf32>
    %73 = tpu.matmul %0, %70, %cst_51 {dimension_numbers = #tpu.dot_dimension_numbers<[1], [0], [0], [1], [0, 0, 1, 1], [], []>} : vector<128x128xf32>, vector<128x32xf32>, vector<128x32xf32> -> vector<128x32xf32>
    %74 = arith.subf %72, %73 : vector<128x32xf32>
    %c3_52 = arith.constant 3 : index
    %c0_53 = arith.constant 0 : index
    %c0_54 = arith.constant 0 : index
    %75 = vector.load %arg9[%c3_52, %c0_53, %c0_54] : memref<11x128x32xf32, #tpu.memory_space<vmem>>, vector<1x128x32xf32>
    %76 = vector.shape_cast %75 : vector<1x128x32xf32> to vector<128x32xf32>
    %77 = vector.shape_cast %74 : vector<128x32xf32> to vector<1x128x32xf32>
    tpu.vector_store %arg9[%c3_52, %c0_53, %c0_54], %77 {strides = array<i32>} : memref<11x128x32xf32, #tpu.memory_space<vmem>>, vector<1x128x32xf32>,
    %c3_55 = arith.constant 3 : index
    %c0_56 = arith.constant 0 : index
    %c0_57 = arith.constant 0 : index
    %78 = vector.load %arg9[%c3_55, %c0_56, %c0_57] : memref<11x128x32xf32, #tpu.memory_space<vmem>>, vector<1x128x32xf32>
    %79 = vector.shape_cast %78 : vector<1x128x32xf32> to vector<128x32xf32>
    %cst_58 = arith.constant 2.000000e+00 : f32
    %80 = vector.broadcast %cst_58 : f32 to vector<128x32xf32>
    %81 = arith.mulf %80, %79 : vector<128x32xf32>
    %cst_59 = arith.constant dense<0.000000e+00> : vector<128x32xf32>
    %82 = tpu.matmul %0, %79, %cst_59 {dimension_numbers = #tpu.dot_dimension_numbers<[1], [0], [0], [1], [0, 0, 1, 1], [], []>} : vector<128x128xf32>, vector<128x32xf32>, vector<128x32xf32> -> vector<128x32xf32>
    %83 = arith.subf %81, %82 : vector<128x32xf32>
    %c4_60 = arith.constant 4 : index
    %c0_61 = arith.constant 0 : index
    %c0_62 = arith.constant 0 : index
    %84 = vector.load %arg9[%c4_60, %c0_61, %c0_62] : memref<11x128x32xf32, #tpu.memory_space<vmem>>, vector<1x128x32xf32>
    %85 = vector.shape_cast %84 : vector<1x128x32xf32> to vector<128x32xf32>
    %86 = vector.shape_cast %83 : vector<128x32xf32> to vector<1x128x32xf32>
    tpu.vector_store %arg9[%c4_60, %c0_61, %c0_62], %86 {strides = array<i32>} : memref<11x128x32xf32, #tpu.memory_space<vmem>>, vector<1x128x32xf32>,
    %c4_63 = arith.constant 4 : index
    %c0_64 = arith.constant 0 : index
    %c0_65 = arith.constant 0 : index
    %87 = vector.load %arg9[%c4_63, %c0_64, %c0_65] : memref<11x128x32xf32, #tpu.memory_space<vmem>>, vector<1x128x32xf32>
    %88 = vector.shape_cast %87 : vector<1x128x32xf32> to vector<128x32xf32>
    %cst_66 = arith.constant 2.000000e+00 : f32
    %89 = vector.broadcast %cst_66 : f32 to vector<128x32xf32>
    %90 = arith.mulf %89, %88 : vector<128x32xf32>
    %cst_67 = arith.constant dense<0.000000e+00> : vector<128x32xf32>
    %91 = tpu.matmul %0, %88, %cst_67 {dimension_numbers = #tpu.dot_dimension_numbers<[1], [0], [0], [1], [0, 0, 1, 1], [], []>} : vector<128x128xf32>, vector<128x32xf32>, vector<128x32xf32> -> vector<128x32xf32>
    %92 = arith.subf %90, %91 : vector<128x32xf32>
    %c5_68 = arith.constant 5 : index
    %c0_69 = arith.constant 0 : index
    %c0_70 = arith.constant 0 : index
    %93 = vector.load %arg9[%c5_68, %c0_69, %c0_70] : memref<11x128x32xf32, #tpu.memory_space<vmem>>, vector<1x128x32xf32>
    %94 = vector.shape_cast %93 : vector<1x128x32xf32> to vector<128x32xf32>
    %95 = vector.shape_cast %92 : vector<128x32xf32> to vector<1x128x32xf32>
    tpu.vector_store %arg9[%c5_68, %c0_69, %c0_70], %95 {strides = array<i32>} : memref<11x128x32xf32, #tpu.memory_space<vmem>>, vector<1x128x32xf32>,
    %c5_71 = arith.constant 5 : index
    %c0_72 = arith.constant 0 : index
    %c0_73 = arith.constant 0 : index
    %96 = vector.load %arg9[%c5_71, %c0_72, %c0_73] : memref<11x128x32xf32, #tpu.memory_space<vmem>>, vector<1x128x32xf32>
    %97 = vector.shape_cast %96 : vector<1x128x32xf32> to vector<128x32xf32>
    %cst_74 = arith.constant 2.000000e+00 : f32
    %98 = vector.broadcast %cst_74 : f32 to vector<128x32xf32>
    %99 = arith.mulf %98, %97 : vector<128x32xf32>
    %cst_75 = arith.constant dense<0.000000e+00> : vector<128x32xf32>
    %100 = tpu.matmul %0, %97, %cst_75 {dimension_numbers = #tpu.dot_dimension_numbers<[1], [0], [0], [1], [0, 0, 1, 1], [], []>} : vector<128x128xf32>, vector<128x32xf32>, vector<128x32xf32> -> vector<128x32xf32>
    %101 = arith.subf %99, %100 : vector<128x32xf32>
    %c6_76 = arith.constant 6 : index
    %c0_77 = arith.constant 0 : index
    %c0_78 = arith.constant 0 : index
    %102 = vector.load %arg9[%c6_76, %c0_77, %c0_78] : memref<11x128x32xf32, #tpu.memory_space<vmem>>, vector<1x128x32xf32>
    %103 = vector.shape_cast %102 : vector<1x128x32xf32> to vector<128x32xf32>
    %104 = vector.shape_cast %101 : vector<128x32xf32> to vector<1x128x32xf32>
    tpu.vector_store %arg9[%c6_76, %c0_77, %c0_78], %104 {strides = array<i32>} : memref<11x128x32xf32, #tpu.memory_space<vmem>>, vector<1x128x32xf32>,
    %c6_79 = arith.constant 6 : index
    %c0_80 = arith.constant 0 : index
    %c0_81 = arith.constant 0 : index
    %105 = vector.load %arg9[%c6_79, %c0_80, %c0_81] : memref<11x128x32xf32, #tpu.memory_space<vmem>>, vector<1x128x32xf32>
    %106 = vector.shape_cast %105 : vector<1x128x32xf32> to vector<128x32xf32>
    %cst_82 = arith.constant 2.000000e+00 : f32
    %107 = vector.broadcast %cst_82 : f32 to vector<128x32xf32>
    %108 = arith.mulf %107, %106 : vector<128x32xf32>
    %cst_83 = arith.constant dense<0.000000e+00> : vector<128x32xf32>
    %109 = tpu.matmul %0, %106, %cst_83 {dimension_numbers = #tpu.dot_dimension_numbers<[1], [0], [0], [1], [0, 0, 1, 1], [], []>} : vector<128x128xf32>, vector<128x32xf32>, vector<128x32xf32> -> vector<128x32xf32>
    %110 = arith.subf %108, %109 : vector<128x32xf32>
    %c7_84 = arith.constant 7 : index
    %c0_85 = arith.constant 0 : index
    %c0_86 = arith.constant 0 : index
    %111 = vector.load %arg9[%c7_84, %c0_85, %c0_86] : memref<11x128x32xf32, #tpu.memory_space<vmem>>, vector<1x128x32xf32>
    %112 = vector.shape_cast %111 : vector<1x128x32xf32> to vector<128x32xf32>
    %113 = vector.shape_cast %110 : vector<128x32xf32> to vector<1x128x32xf32>
    tpu.vector_store %arg9[%c7_84, %c0_85, %c0_86], %113 {strides = array<i32>} : memref<11x128x32xf32, #tpu.memory_space<vmem>>, vector<1x128x32xf32>,
    %c7_87 = arith.constant 7 : index
    %c0_88 = arith.constant 0 : index
    %c0_89 = arith.constant 0 : index
    %114 = vector.load %arg9[%c7_87, %c0_88, %c0_89] : memref<11x128x32xf32, #tpu.memory_space<vmem>>, vector<1x128x32xf32>
    %115 = vector.shape_cast %114 : vector<1x128x32xf32> to vector<128x32xf32>
    %cst_90 = arith.constant 2.000000e+00 : f32
    %116 = vector.broadcast %cst_90 : f32 to vector<128x32xf32>
    %117 = arith.mulf %116, %115 : vector<128x32xf32>
    %cst_91 = arith.constant dense<0.000000e+00> : vector<128x32xf32>
    %118 = tpu.matmul %0, %115, %cst_91 {dimension_numbers = #tpu.dot_dimension_numbers<[1], [0], [0], [1], [0, 0, 1, 1], [], []>} : vector<128x128xf32>, vector<128x32xf32>, vector<128x32xf32> -> vector<128x32xf32>
    %119 = arith.subf %117, %118 : vector<128x32xf32>
    %c8_92 = arith.constant 8 : index
    %c0_93 = arith.constant 0 : index
    %c0_94 = arith.constant 0 : index
    %120 = vector.load %arg9[%c8_92, %c0_93, %c0_94] : memref<11x128x32xf32, #tpu.memory_space<vmem>>, vector<1x128x32xf32>
    %121 = vector.shape_cast %120 : vector<1x128x32xf32> to vector<128x32xf32>
    %122 = vector.shape_cast %119 : vector<128x32xf32> to vector<1x128x32xf32>
    tpu.vector_store %arg9[%c8_92, %c0_93, %c0_94], %122 {strides = array<i32>} : memref<11x128x32xf32, #tpu.memory_space<vmem>>, vector<1x128x32xf32>,
    %c8_95 = arith.constant 8 : index
    %c0_96 = arith.constant 0 : index
    %c0_97 = arith.constant 0 : index
    %123 = vector.load %arg9[%c8_95, %c0_96, %c0_97] : memref<11x128x32xf32, #tpu.memory_space<vmem>>, vector<1x128x32xf32>
    %124 = vector.shape_cast %123 : vector<1x128x32xf32> to vector<128x32xf32>
    %cst_98 = arith.constant 2.000000e+00 : f32
    %125 = vector.broadcast %cst_98 : f32 to vector<128x32xf32>
    %126 = arith.mulf %125, %124 : vector<128x32xf32>
    %cst_99 = arith.constant dense<0.000000e+00> : vector<128x32xf32>
    %127 = tpu.matmul %0, %124, %cst_99 {dimension_numbers = #tpu.dot_dimension_numbers<[1], [0], [0], [1], [0, 0, 1, 1], [], []>} : vector<128x128xf32>, vector<128x32xf32>, vector<128x32xf32> -> vector<128x32xf32>
    %128 = arith.subf %126, %127 : vector<128x32xf32>
    %c9_100 = arith.constant 9 : index
    %c0_101 = arith.constant 0 : index
    %c0_102 = arith.constant 0 : index
    %129 = vector.load %arg9[%c9_100, %c0_101, %c0_102] : memref<11x128x32xf32, #tpu.memory_space<vmem>>, vector<1x128x32xf32>
    %130 = vector.shape_cast %129 : vector<1x128x32xf32> to vector<128x32xf32>
    %131 = vector.shape_cast %128 : vector<128x32xf32> to vector<1x128x32xf32>
    tpu.vector_store %arg9[%c9_100, %c0_101, %c0_102], %131 {strides = array<i32>} : memref<11x128x32xf32, #tpu.memory_space<vmem>>, vector<1x128x32xf32>,
    %c9_103 = arith.constant 9 : index
    %c0_104 = arith.constant 0 : index
    %c0_105 = arith.constant 0 : index
    %132 = vector.load %arg9[%c9_103, %c0_104, %c0_105] : memref<11x128x32xf32, #tpu.memory_space<vmem>>, vector<1x128x32xf32>
    %133 = vector.shape_cast %132 : vector<1x128x32xf32> to vector<128x32xf32>
    %cst_106 = arith.constant 2.000000e+00 : f32
    %134 = vector.broadcast %cst_106 : f32 to vector<128x32xf32>
    %135 = arith.mulf %134, %133 : vector<128x32xf32>
    %cst_107 = arith.constant dense<0.000000e+00> : vector<128x32xf32>
    %136 = tpu.matmul %0, %133, %cst_107 {dimension_numbers = #tpu.dot_dimension_numbers<[1], [0], [0], [1], [0, 0, 1, 1], [], []>} : vector<128x128xf32>, vector<128x32xf32>, vector<128x32xf32> -> vector<128x32xf32>
    %137 = arith.subf %135, %136 : vector<128x32xf32>
    %c10_108 = arith.constant 10 : index
    %c0_109 = arith.constant 0 : index
    %c0_110 = arith.constant 0 : index
    %138 = vector.load %arg9[%c10_108, %c0_109, %c0_110] : memref<11x128x32xf32, #tpu.memory_space<vmem>>, vector<1x128x32xf32>
    %139 = vector.shape_cast %138 : vector<1x128x32xf32> to vector<128x32xf32>
    %140 = vector.shape_cast %137 : vector<128x32xf32> to vector<1x128x32xf32>
    tpu.vector_store %arg9[%c10_108, %c0_109, %c0_110], %140 {strides = array<i32>} : memref<11x128x32xf32, #tpu.memory_space<vmem>>, vector<1x128x32xf32>,
    %c0_111 = arith.constant 0 : index
    %c0_112 = arith.constant 0 : index
    %c0_113 = arith.constant 0 : index
    %141 = vector.load %arg9[%c0_111, %c0_112, %c0_113] : memref<11x128x32xf32, #tpu.memory_space<vmem>>, vector<1x128x32xf32>
    %142 = vector.shape_cast %141 : vector<1x128x32xf32> to vector<128x32xf32>
    %143 = vector.broadcast %44 : f32 to vector<128x32xf32>
    %144 = arith.mulf %143, %142 : vector<128x32xf32>
    %c0_114 = arith.constant 0 : index
    %c0_115 = arith.constant 0 : index
    %145 = vector.load %arg10[%c0_114, %c0_115] : memref<128x32xf32, #tpu.memory_space<vmem>>, vector<128x32xf32>
    tpu.vector_store %arg10[%c0_114, %c0_115], %144 {strides = array<i32>} : memref<128x32xf32, #tpu.memory_space<vmem>>, vector<128x32xf32>,
    %c0_116 = arith.constant 0 : index
    %c0_117 = arith.constant 0 : index
    %146 = vector.load %arg10[%c0_116, %c0_117] : memref<128x32xf32, #tpu.memory_space<vmem>>, vector<128x32xf32>
    %cst_118 = arith.constant dense<0.000000e+00> : vector<128x32xf32>
    %147 = tpu.matmul %0, %146, %cst_118 {dimension_numbers = #tpu.dot_dimension_numbers<[1], [0], [0], [1], [0, 0, 1, 1], [], []>} : vector<128x128xf32>, vector<128x32xf32>, vector<128x32xf32> -> vector<128x32xf32>
    %c1_119 = arith.constant 1 : index
    %c0_120 = arith.constant 0 : index
    %c0_121 = arith.constant 0 : index
    %148 = vector.load %arg9[%c1_119, %c0_120, %c0_121] : memref<11x128x32xf32, #tpu.memory_space<vmem>>, vector<1x128x32xf32>
    %149 = vector.shape_cast %148 : vector<1x128x32xf32> to vector<128x32xf32>
    %150 = vector.broadcast %40 : f32 to vector<128x32xf32>
    %151 = arith.mulf %150, %149 : vector<128x32xf32>
    %152 = arith.addf %147, %151 : vector<128x32xf32>
    %c0_122 = arith.constant 0 : index
    %c0_123 = arith.constant 0 : index
    %153 = vector.load %arg10[%c0_122, %c0_123] : memref<128x32xf32, #tpu.memory_space<vmem>>, vector<128x32xf32>
    tpu.vector_store %arg10[%c0_122, %c0_123], %152 {strides = array<i32>} : memref<128x32xf32, #tpu.memory_space<vmem>>, vector<128x32xf32>,
    %c0_124 = arith.constant 0 : index
    %c0_125 = arith.constant 0 : index
    %154 = vector.load %arg10[%c0_124, %c0_125] : memref<128x32xf32, #tpu.memory_space<vmem>>, vector<128x32xf32>
    %cst_126 = arith.constant dense<0.000000e+00> : vector<128x32xf32>
    %155 = tpu.matmul %0, %154, %cst_126 {dimension_numbers = #tpu.dot_dimension_numbers<[1], [0], [0], [1], [0, 0, 1, 1], [], []>} : vector<128x128xf32>, vector<128x32xf32>, vector<128x32xf32> -> vector<128x32xf32>
    %c2_127 = arith.constant 2 : index
    %c0_128 = arith.constant 0 : index
    %c0_129 = arith.constant 0 : index
    %156 = vector.load %arg9[%c2_127, %c0_128, %c0_129] : memref<11x128x32xf32, #tpu.memory_space<vmem>>, vector<1x128x32xf32>
    %157 = vector.shape_cast %156 : vector<1x128x32xf32> to vector<128x32xf32>
    %158 = vector.broadcast %36 : f32 to vector<128x32xf32>
    %159 = arith.mulf %158, %157 : vector<128x32xf32>
    %160 = arith.addf %155, %159 : vector<128x32xf32>
    %c0_130 = arith.constant 0 : index
    %c0_131 = arith.constant 0 : index
    %161 = vector.load %arg10[%c0_130, %c0_131] : memref<128x32xf32, #tpu.memory_space<vmem>>, vector<128x32xf32>
    tpu.vector_store %arg10[%c0_130, %c0_131], %160 {strides = array<i32>} : memref<128x32xf32, #tpu.memory_space<vmem>>, vector<128x32xf32>,
    %c0_132 = arith.constant 0 : index
    %c0_133 = arith.constant 0 : index
    %162 = vector.load %arg10[%c0_132, %c0_133] : memref<128x32xf32, #tpu.memory_space<vmem>>, vector<128x32xf32>
    %cst_134 = arith.constant dense<0.000000e+00> : vector<128x32xf32>
    %163 = tpu.matmul %0, %162, %cst_134 {dimension_numbers = #tpu.dot_dimension_numbers<[1], [0], [0], [1], [0, 0, 1, 1], [], []>} : vector<128x128xf32>, vector<128x32xf32>, vector<128x32xf32> -> vector<128x32xf32>
    %c3_135 = arith.constant 3 : index
    %c0_136 = arith.constant 0 : index
    %c0_137 = arith.constant 0 : index
    %164 = vector.load %arg9[%c3_135, %c0_136, %c0_137] : memref<11x128x32xf32, #tpu.memory_space<vmem>>, vector<1x128x32xf32>
    %165 = vector.shape_cast %164 : vector<1x128x32xf32> to vector<128x32xf32>
    %166 = vector.broadcast %32 : f32 to vector<128x32xf32>
    %167 = arith.mulf %166, %165 : vector<128x32xf32>
    %168 = arith.addf %163, %167 : vector<128x32xf32>
    %c0_138 = arith.constant 0 : index
    %c0_139 = arith.constant 0 : index
    %169 = vector.load %arg10[%c0_138, %c0_139] : memref<128x32xf32, #tpu.memory_space<vmem>>, vector<128x32xf32>
    tpu.vector_store %arg10[%c0_138, %c0_139], %168 {strides = array<i32>} : memref<128x32xf32, #tpu.memory_space<vmem>>, vector<128x32xf32>,
    %c0_140 = arith.constant 0 : index
    %c0_141 = arith.constant 0 : index
    %170 = vector.load %arg10[%c0_140, %c0_141] : memref<128x32xf32, #tpu.memory_space<vmem>>, vector<128x32xf32>
    %cst_142 = arith.constant dense<0.000000e+00> : vector<128x32xf32>
    %171 = tpu.matmul %0, %170, %cst_142 {dimension_numbers = #tpu.dot_dimension_numbers<[1], [0], [0], [1], [0, 0, 1, 1], [], []>} : vector<128x128xf32>, vector<128x32xf32>, vector<128x32xf32> -> vector<128x32xf32>
    %c4_143 = arith.constant 4 : index
    %c0_144 = arith.constant 0 : index
    %c0_145 = arith.constant 0 : index
    %172 = vector.load %arg9[%c4_143, %c0_144, %c0_145] : memref<11x128x32xf32, #tpu.memory_space<vmem>>, vector<1x128x32xf32>
    %173 = vector.shape_cast %172 : vector<1x128x32xf32> to vector<128x32xf32>
    %174 = vector.broadcast %28 : f32 to vector<128x32xf32>
    %175 = arith.mulf %174, %173 : vector<128x32xf32>
    %176 = arith.addf %171, %175 : vector<128x32xf32>
    %c0_146 = arith.constant 0 : index
    %c0_147 = arith.constant 0 : index
    %177 = vector.load %arg10[%c0_146, %c0_147] : memref<128x32xf32, #tpu.memory_space<vmem>>, vector<128x32xf32>
    tpu.vector_store %arg10[%c0_146, %c0_147], %176 {strides = array<i32>} : memref<128x32xf32, #tpu.memory_space<vmem>>, vector<128x32xf32>,
    %c0_148 = arith.constant 0 : index
    %c0_149 = arith.constant 0 : index
    %178 = vector.load %arg10[%c0_148, %c0_149] : memref<128x32xf32, #tpu.memory_space<vmem>>, vector<128x32xf32>
    %cst_150 = arith.constant dense<0.000000e+00> : vector<128x32xf32>
    %179 = tpu.matmul %0, %178, %cst_150 {dimension_numbers = #tpu.dot_dimension_numbers<[1], [0], [0], [1], [0, 0, 1, 1], [], []>} : vector<128x128xf32>, vector<128x32xf32>, vector<128x32xf32> -> vector<128x32xf32>
    %c5_151 = arith.constant 5 : index
    %c0_152 = arith.constant 0 : index
    %c0_153 = arith.constant 0 : index
    %180 = vector.load %arg9[%c5_151, %c0_152, %c0_153] : memref<11x128x32xf32, #tpu.memory_space<vmem>>, vector<1x128x32xf32>
    %181 = vector.shape_cast %180 : vector<1x128x32xf32> to vector<128x32xf32>
    %182 = vector.broadcast %24 : f32 to vector<128x32xf32>
    %183 = arith.mulf %182, %181 : vector<128x32xf32>
    %184 = arith.addf %179, %183 : vector<128x32xf32>
    %c0_154 = arith.constant 0 : index
    %c0_155 = arith.constant 0 : index
    %185 = vector.load %arg10[%c0_154, %c0_155] : memref<128x32xf32, #tpu.memory_space<vmem>>, vector<128x32xf32>
    tpu.vector_store %arg10[%c0_154, %c0_155], %184 {strides = array<i32>} : memref<128x32xf32, #tpu.memory_space<vmem>>, vector<128x32xf32>,
    %c0_156 = arith.constant 0 : index
    %c0_157 = arith.constant 0 : index
    %186 = vector.load %arg10[%c0_156, %c0_157] : memref<128x32xf32, #tpu.memory_space<vmem>>, vector<128x32xf32>
    %cst_158 = arith.constant dense<0.000000e+00> : vector<128x32xf32>
    %187 = tpu.matmul %0, %186, %cst_158 {dimension_numbers = #tpu.dot_dimension_numbers<[1], [0], [0], [1], [0, 0, 1, 1], [], []>} : vector<128x128xf32>, vector<128x32xf32>, vector<128x32xf32> -> vector<128x32xf32>
    %c6_159 = arith.constant 6 : index
    %c0_160 = arith.constant 0 : index
    %c0_161 = arith.constant 0 : index
    %188 = vector.load %arg9[%c6_159, %c0_160, %c0_161] : memref<11x128x32xf32, #tpu.memory_space<vmem>>, vector<1x128x32xf32>
    %189 = vector.shape_cast %188 : vector<1x128x32xf32> to vector<128x32xf32>
    %190 = vector.broadcast %20 : f32 to vector<128x32xf32>
    %191 = arith.mulf %190, %189 : vector<128x32xf32>
    %192 = arith.addf %187, %191 : vector<128x32xf32>
    %c0_162 = arith.constant 0 : index
    %c0_163 = arith.constant 0 : index
    %193 = vector.load %arg10[%c0_162, %c0_163] : memref<128x32xf32, #tpu.memory_space<vmem>>, vector<128x32xf32>
    tpu.vector_store %arg10[%c0_162, %c0_163], %192 {strides = array<i32>} : memref<128x32xf32, #tpu.memory_space<vmem>>, vector<128x32xf32>,
    %c0_164 = arith.constant 0 : index
    %c0_165 = arith.constant 0 : index
    %194 = vector.load %arg10[%c0_164, %c0_165] : memref<128x32xf32, #tpu.memory_space<vmem>>, vector<128x32xf32>
    %cst_166 = arith.constant dense<0.000000e+00> : vector<128x32xf32>
    %195 = tpu.matmul %0, %194, %cst_166 {dimension_numbers = #tpu.dot_dimension_numbers<[1], [0], [0], [1], [0, 0, 1, 1], [], []>} : vector<128x128xf32>, vector<128x32xf32>, vector<128x32xf32> -> vector<128x32xf32>
    %c7_167 = arith.constant 7 : index
    %c0_168 = arith.constant 0 : index
    %c0_169 = arith.constant 0 : index
    %196 = vector.load %arg9[%c7_167, %c0_168, %c0_169] : memref<11x128x32xf32, #tpu.memory_space<vmem>>, vector<1x128x32xf32>
    %197 = vector.shape_cast %196 : vector<1x128x32xf32> to vector<128x32xf32>
    %198 = vector.broadcast %16 : f32 to vector<128x32xf32>
    %199 = arith.mulf %198, %197 : vector<128x32xf32>
    %200 = arith.addf %195, %199 : vector<128x32xf32>
    %c0_170 = arith.constant 0 : index
    %c0_171 = arith.constant 0 : index
    %201 = vector.load %arg10[%c0_170, %c0_171] : memref<128x32xf32, #tpu.memory_space<vmem>>, vector<128x32xf32>
    tpu.vector_store %arg10[%c0_170, %c0_171], %200 {strides = array<i32>} : memref<128x32xf32, #tpu.memory_space<vmem>>, vector<128x32xf32>,
    %c0_172 = arith.constant 0 : index
    %c0_173 = arith.constant 0 : index
    %202 = vector.load %arg10[%c0_172, %c0_173] : memref<128x32xf32, #tpu.memory_space<vmem>>, vector<128x32xf32>
    %cst_174 = arith.constant dense<0.000000e+00> : vector<128x32xf32>
    %203 = tpu.matmul %0, %202, %cst_174 {dimension_numbers = #tpu.dot_dimension_numbers<[1], [0], [0], [1], [0, 0, 1, 1], [], []>} : vector<128x128xf32>, vector<128x32xf32>, vector<128x32xf32> -> vector<128x32xf32>
    %c8_175 = arith.constant 8 : index
    %c0_176 = arith.constant 0 : index
    %c0_177 = arith.constant 0 : index
    %204 = vector.load %arg9[%c8_175, %c0_176, %c0_177] : memref<11x128x32xf32, #tpu.memory_space<vmem>>, vector<1x128x32xf32>
    %205 = vector.shape_cast %204 : vector<1x128x32xf32> to vector<128x32xf32>
    %206 = vector.broadcast %12 : f32 to vector<128x32xf32>
    %207 = arith.mulf %206, %205 : vector<128x32xf32>
    %208 = arith.addf %203, %207 : vector<128x32xf32>
    %c0_178 = arith.constant 0 : index
    %c0_179 = arith.constant 0 : index
    %209 = vector.load %arg10[%c0_178, %c0_179] : memref<128x32xf32, #tpu.memory_space<vmem>>, vector<128x32xf32>
    tpu.vector_store %arg10[%c0_178, %c0_179], %208 {strides = array<i32>} : memref<128x32xf32, #tpu.memory_space<vmem>>, vector<128x32xf32>,
    %c0_180 = arith.constant 0 : index
    %c0_181 = arith.constant 0 : index
    %210 = vector.load %arg10[%c0_180, %c0_181] : memref<128x32xf32, #tpu.memory_space<vmem>>, vector<128x32xf32>
    %cst_182 = arith.constant dense<0.000000e+00> : vector<128x32xf32>
    %211 = tpu.matmul %0, %210, %cst_182 {dimension_numbers = #tpu.dot_dimension_numbers<[1], [0], [0], [1], [0, 0, 1, 1], [], []>} : vector<128x128xf32>, vector<128x32xf32>, vector<128x32xf32> -> vector<128x32xf32>
    %c9_183 = arith.constant 9 : index
    %c0_184 = arith.constant 0 : index
    %c0_185 = arith.constant 0 : index
    %212 = vector.load %arg9[%c9_183, %c0_184, %c0_185] : memref<11x128x32xf32, #tpu.memory_space<vmem>>, vector<1x128x32xf32>
    %213 = vector.shape_cast %212 : vector<1x128x32xf32> to vector<128x32xf32>
    %214 = vector.broadcast %8 : f32 to vector<128x32xf32>
    %215 = arith.mulf %214, %213 : vector<128x32xf32>
    %216 = arith.addf %211, %215 : vector<128x32xf32>
    %c0_186 = arith.constant 0 : index
    %c0_187 = arith.constant 0 : index
    %217 = vector.load %arg10[%c0_186, %c0_187] : memref<128x32xf32, #tpu.memory_space<vmem>>, vector<128x32xf32>
    tpu.vector_store %arg10[%c0_186, %c0_187], %216 {strides = array<i32>} : memref<128x32xf32, #tpu.memory_space<vmem>>, vector<128x32xf32>,
    %c0_188 = arith.constant 0 : index
    %c0_189 = arith.constant 0 : index
    %218 = vector.load %arg10[%c0_188, %c0_189] : memref<128x32xf32, #tpu.memory_space<vmem>>, vector<128x32xf32>
    %cst_190 = arith.constant dense<0.000000e+00> : vector<128x32xf32>
    %219 = tpu.matmul %0, %218, %cst_190 {dimension_numbers = #tpu.dot_dimension_numbers<[1], [0], [0], [1], [0, 0, 1, 1], [], []>} : vector<128x128xf32>, vector<128x32xf32>, vector<128x32xf32> -> vector<128x32xf32>
    %c10_191 = arith.constant 10 : index
    %c0_192 = arith.constant 0 : index
    %c0_193 = arith.constant 0 : index
    %220 = vector.load %arg9[%c10_191, %c0_192, %c0_193] : memref<11x128x32xf32, #tpu.memory_space<vmem>>, vector<1x128x32xf32>
    %221 = vector.shape_cast %220 : vector<1x128x32xf32> to vector<128x32xf32>
    %222 = vector.broadcast %4 : f32 to vector<128x32xf32>
    %223 = arith.mulf %222, %221 : vector<128x32xf32>
    %224 = arith.addf %219, %223 : vector<128x32xf32>
    %c0_194 = arith.constant 0 : index
    %c0_195 = arith.constant 0 : index
    %225 = vector.load %arg10[%c0_194, %c0_195] : memref<128x32xf32, #tpu.memory_space<vmem>>, vector<128x32xf32>
    tpu.vector_store %arg10[%c0_194, %c0_195], %224 {strides = array<i32>} : memref<128x32xf32, #tpu.memory_space<vmem>>, vector<128x32xf32>,
    %c0_196 = arith.constant 0 : index
    %c0_197 = arith.constant 0 : index
    %226 = vector.load %arg10[%c0_196, %c0_197] : memref<128x32xf32, #tpu.memory_space<vmem>>, vector<128x32xf32>
    %cst_198 = arith.constant 0.000000e+00 : f32
    %227 = vector.broadcast %cst_198 : f32 to vector<128x32xf32>
    %228 = arith.maximumf %226, %227 : vector<128x32xf32>
    %c0_199 = arith.constant 0 : index
    %c0_200 = arith.constant 0 : index
    %c0_201 = arith.constant 0 : index
    %229 = vector.load %arg9[%c0_199, %c0_200, %c0_201] : memref<11x128x32xf32, #tpu.memory_space<vmem>>, vector<1x128x32xf32>
    %230 = vector.shape_cast %229 : vector<1x128x32xf32> to vector<128x32xf32>
    %231 = vector.shape_cast %228 : vector<128x32xf32> to vector<1x128x32xf32>
    tpu.vector_store %arg9[%c0_199, %c0_200, %c0_201], %231 {strides = array<i32>} : memref<11x128x32xf32, #tpu.memory_space<vmem>>, vector<1x128x32xf32>,
    %c0_202 = arith.constant 0 : index
    %c0_203 = arith.constant 0 : index
    %c0_204 = arith.constant 0 : index
    %232 = vector.load %arg9[%c0_202, %c0_203, %c0_204] : memref<11x128x32xf32, #tpu.memory_space<vmem>>, vector<1x128x32xf32>
    %233 = vector.shape_cast %232 : vector<1x128x32xf32> to vector<128x32xf32>
    %cst_205 = arith.constant 2.000000e+00 : f32
    %234 = vector.broadcast %cst_205 : f32 to vector<128x32xf32>
    %235 = arith.mulf %234, %233 : vector<128x32xf32>
    %cst_206 = arith.constant dense<0.000000e+00> : vector<128x32xf32>
    %236 = tpu.matmul %0, %233, %cst_206 {dimension_numbers = #tpu.dot_dimension_numbers<[1], [0], [0], [1], [0, 0, 1, 1], [], []>} : vector<128x128xf32>, vector<128x32xf32>, vector<128x32xf32> -> vector<128x32xf32>
    %237 = arith.subf %235, %236 : vector<128x32xf32>
    %c1_207 = arith.constant 1 : index
    %c0_208 = arith.constant 0 : index
    %c0_209 = arith.constant 0 : index
    %238 = vector.load %arg9[%c1_207, %c0_208, %c0_209] : memref<11x128x32xf32, #tpu.memory_space<vmem>>, vector<1x128x32xf32>
    %239 = vector.shape_cast %238 : vector<1x128x32xf32> to vector<128x32xf32>
    %240 = vector.shape_cast %237 : vector<128x32xf32> to vector<1x128x32xf32>
    tpu.vector_store %arg9[%c1_207, %c0_208, %c0_209], %240 {strides = array<i32>} : memref<11x128x32xf32, #tpu.memory_space<vmem>>, vector<1x128x32xf32>,
    %c1_210 = arith.constant 1 : index
    %c0_211 = arith.constant 0 : index
    %c0_212 = arith.constant 0 : index
    %241 = vector.load %arg9[%c1_210, %c0_211, %c0_212] : memref<11x128x32xf32, #tpu.memory_space<vmem>>, vector<1x128x32xf32>
    %242 = vector.shape_cast %241 : vector<1x128x32xf32> to vector<128x32xf32>
    %cst_213 = arith.constant 2.000000e+00 : f32
    %243 = vector.broadcast %cst_213 : f32 to vector<128x32xf32>
    %244 = arith.mulf %243, %242 : vector<128x32xf32>
    %cst_214 = arith.constant dense<0.000000e+00> : vector<128x32xf32>
    %245 = tpu.matmul %0, %242, %cst_214 {dimension_numbers = #tpu.dot_dimension_numbers<[1], [0], [0], [1], [0, 0, 1, 1], [], []>} : vector<128x128xf32>, vector<128x32xf32>, vector<128x32xf32> -> vector<128x32xf32>
    %246 = arith.subf %244, %245 : vector<128x32xf32>
    %c2_215 = arith.constant 2 : index
    %c0_216 = arith.constant 0 : index
    %c0_217 = arith.constant 0 : index
    %247 = vector.load %arg9[%c2_215, %c0_216, %c0_217] : memref<11x128x32xf32, #tpu.memory_space<vmem>>, vector<1x128x32xf32>
    %248 = vector.shape_cast %247 : vector<1x128x32xf32> to vector<128x32xf32>
    %249 = vector.shape_cast %246 : vector<128x32xf32> to vector<1x128x32xf32>
    tpu.vector_store %arg9[%c2_215, %c0_216, %c0_217], %249 {strides = array<i32>} : memref<11x128x32xf32, #tpu.memory_space<vmem>>, vector<1x128x32xf32>,
    %c2_218 = arith.constant 2 : index
    %c0_219 = arith.constant 0 : index
    %c0_220 = arith.constant 0 : index
    %250 = vector.load %arg9[%c2_218, %c0_219, %c0_220] : memref<11x128x32xf32, #tpu.memory_space<vmem>>, vector<1x128x32xf32>
    %251 = vector.shape_cast %250 : vector<1x128x32xf32> to vector<128x32xf32>
    %cst_221 = arith.constant 2.000000e+00 : f32
    %252 = vector.broadcast %cst_221 : f32 to vector<128x32xf32>
    %253 = arith.mulf %252, %251 : vector<128x32xf32>
    %cst_222 = arith.constant dense<0.000000e+00> : vector<128x32xf32>
    %254 = tpu.matmul %0, %251, %cst_222 {dimension_numbers = #tpu.dot_dimension_numbers<[1], [0], [0], [1], [0, 0, 1, 1], [], []>} : vector<128x128xf32>, vector<128x32xf32>, vector<128x32xf32> -> vector<128x32xf32>
    %255 = arith.subf %253, %254 : vector<128x32xf32>
    %c3_223 = arith.constant 3 : index
    %c0_224 = arith.constant 0 : index
    %c0_225 = arith.constant 0 : index
    %256 = vector.load %arg9[%c3_223, %c0_224, %c0_225] : memref<11x128x32xf32, #tpu.memory_space<vmem>>, vector<1x128x32xf32>
    %257 = vector.shape_cast %256 : vector<1x128x32xf32> to vector<128x32xf32>
    %258 = vector.shape_cast %255 : vector<128x32xf32> to vector<1x128x32xf32>
    tpu.vector_store %arg9[%c3_223, %c0_224, %c0_225], %258 {strides = array<i32>} : memref<11x128x32xf32, #tpu.memory_space<vmem>>, vector<1x128x32xf32>,
    %c3_226 = arith.constant 3 : index
    %c0_227 = arith.constant 0 : index
    %c0_228 = arith.constant 0 : index
    %259 = vector.load %arg9[%c3_226, %c0_227, %c0_228] : memref<11x128x32xf32, #tpu.memory_space<vmem>>, vector<1x128x32xf32>
    %260 = vector.shape_cast %259 : vector<1x128x32xf32> to vector<128x32xf32>
    %cst_229 = arith.constant 2.000000e+00 : f32
    %261 = vector.broadcast %cst_229 : f32 to vector<128x32xf32>
    %262 = arith.mulf %261, %260 : vector<128x32xf32>
    %cst_230 = arith.constant dense<0.000000e+00> : vector<128x32xf32>
    %263 = tpu.matmul %0, %260, %cst_230 {dimension_numbers = #tpu.dot_dimension_numbers<[1], [0], [0], [1], [0, 0, 1, 1], [], []>} : vector<128x128xf32>, vector<128x32xf32>, vector<128x32xf32> -> vector<128x32xf32>
    %264 = arith.subf %262, %263 : vector<128x32xf32>
    %c4_231 = arith.constant 4 : index
    %c0_232 = arith.constant 0 : index
    %c0_233 = arith.constant 0 : index
    %265 = vector.load %arg9[%c4_231, %c0_232, %c0_233] : memref<11x128x32xf32, #tpu.memory_space<vmem>>, vector<1x128x32xf32>
    %266 = vector.shape_cast %265 : vector<1x128x32xf32> to vector<128x32xf32>
    %267 = vector.shape_cast %264 : vector<128x32xf32> to vector<1x128x32xf32>
    tpu.vector_store %arg9[%c4_231, %c0_232, %c0_233], %267 {strides = array<i32>} : memref<11x128x32xf32, #tpu.memory_space<vmem>>, vector<1x128x32xf32>,
    %c4_234 = arith.constant 4 : index
    %c0_235 = arith.constant 0 : index
    %c0_236 = arith.constant 0 : index
    %268 = vector.load %arg9[%c4_234, %c0_235, %c0_236] : memref<11x128x32xf32, #tpu.memory_space<vmem>>, vector<1x128x32xf32>
    %269 = vector.shape_cast %268 : vector<1x128x32xf32> to vector<128x32xf32>
    %cst_237 = arith.constant 2.000000e+00 : f32
    %270 = vector.broadcast %cst_237 : f32 to vector<128x32xf32>
    %271 = arith.mulf %270, %269 : vector<128x32xf32>
    %cst_238 = arith.constant dense<0.000000e+00> : vector<128x32xf32>
    %272 = tpu.matmul %0, %269, %cst_238 {dimension_numbers = #tpu.dot_dimension_numbers<[1], [0], [0], [1], [0, 0, 1, 1], [], []>} : vector<128x128xf32>, vector<128x32xf32>, vector<128x32xf32> -> vector<128x32xf32>
    %273 = arith.subf %271, %272 : vector<128x32xf32>
    %c5_239 = arith.constant 5 : index
    %c0_240 = arith.constant 0 : index
    %c0_241 = arith.constant 0 : index
    %274 = vector.load %arg9[%c5_239, %c0_240, %c0_241] : memref<11x128x32xf32, #tpu.memory_space<vmem>>, vector<1x128x32xf32>
    %275 = vector.shape_cast %274 : vector<1x128x32xf32> to vector<128x32xf32>
    %276 = vector.shape_cast %273 : vector<128x32xf32> to vector<1x128x32xf32>
    tpu.vector_store %arg9[%c5_239, %c0_240, %c0_241], %276 {strides = array<i32>} : memref<11x128x32xf32, #tpu.memory_space<vmem>>, vector<1x128x32xf32>,
    %c5_242 = arith.constant 5 : index
    %c0_243 = arith.constant 0 : index
    %c0_244 = arith.constant 0 : index
    %277 = vector.load %arg9[%c5_242, %c0_243, %c0_244] : memref<11x128x32xf32, #tpu.memory_space<vmem>>, vector<1x128x32xf32>
    %278 = vector.shape_cast %277 : vector<1x128x32xf32> to vector<128x32xf32>
    %cst_245 = arith.constant 2.000000e+00 : f32
    %279 = vector.broadcast %cst_245 : f32 to vector<128x32xf32>
    %280 = arith.mulf %279, %278 : vector<128x32xf32>
    %cst_246 = arith.constant dense<0.000000e+00> : vector<128x32xf32>
    %281 = tpu.matmul %0, %278, %cst_246 {dimension_numbers = #tpu.dot_dimension_numbers<[1], [0], [0], [1], [0, 0, 1, 1], [], []>} : vector<128x128xf32>, vector<128x32xf32>, vector<128x32xf32> -> vector<128x32xf32>
    %282 = arith.subf %280, %281 : vector<128x32xf32>
    %c6_247 = arith.constant 6 : index
    %c0_248 = arith.constant 0 : index
    %c0_249 = arith.constant 0 : index
    %283 = vector.load %arg9[%c6_247, %c0_248, %c0_249] : memref<11x128x32xf32, #tpu.memory_space<vmem>>, vector<1x128x32xf32>
    %284 = vector.shape_cast %283 : vector<1x128x32xf32> to vector<128x32xf32>
    %285 = vector.shape_cast %282 : vector<128x32xf32> to vector<1x128x32xf32>
    tpu.vector_store %arg9[%c6_247, %c0_248, %c0_249], %285 {strides = array<i32>} : memref<11x128x32xf32, #tpu.memory_space<vmem>>, vector<1x128x32xf32>,
    %c6_250 = arith.constant 6 : index
    %c0_251 = arith.constant 0 : index
    %c0_252 = arith.constant 0 : index
    %286 = vector.load %arg9[%c6_250, %c0_251, %c0_252] : memref<11x128x32xf32, #tpu.memory_space<vmem>>, vector<1x128x32xf32>
    %287 = vector.shape_cast %286 : vector<1x128x32xf32> to vector<128x32xf32>
    %cst_253 = arith.constant 2.000000e+00 : f32
    %288 = vector.broadcast %cst_253 : f32 to vector<128x32xf32>
    %289 = arith.mulf %288, %287 : vector<128x32xf32>
    %cst_254 = arith.constant dense<0.000000e+00> : vector<128x32xf32>
    %290 = tpu.matmul %0, %287, %cst_254 {dimension_numbers = #tpu.dot_dimension_numbers<[1], [0], [0], [1], [0, 0, 1, 1], [], []>} : vector<128x128xf32>, vector<128x32xf32>, vector<128x32xf32> -> vector<128x32xf32>
    %291 = arith.subf %289, %290 : vector<128x32xf32>
    %c7_255 = arith.constant 7 : index
    %c0_256 = arith.constant 0 : index
    %c0_257 = arith.constant 0 : index
    %292 = vector.load %arg9[%c7_255, %c0_256, %c0_257] : memref<11x128x32xf32, #tpu.memory_space<vmem>>, vector<1x128x32xf32>
    %293 = vector.shape_cast %292 : vector<1x128x32xf32> to vector<128x32xf32>
    %294 = vector.shape_cast %291 : vector<128x32xf32> to vector<1x128x32xf32>
    tpu.vector_store %arg9[%c7_255, %c0_256, %c0_257], %294 {strides = array<i32>} : memref<11x128x32xf32, #tpu.memory_space<vmem>>, vector<1x128x32xf32>,
    %c7_258 = arith.constant 7 : index
    %c0_259 = arith.constant 0 : index
    %c0_260 = arith.constant 0 : index
    %295 = vector.load %arg9[%c7_258, %c0_259, %c0_260] : memref<11x128x32xf32, #tpu.memory_space<vmem>>, vector<1x128x32xf32>
    %296 = vector.shape_cast %295 : vector<1x128x32xf32> to vector<128x32xf32>
    %cst_261 = arith.constant 2.000000e+00 : f32
    %297 = vector.broadcast %cst_261 : f32 to vector<128x32xf32>
    %298 = arith.mulf %297, %296 : vector<128x32xf32>
    %cst_262 = arith.constant dense<0.000000e+00> : vector<128x32xf32>
    %299 = tpu.matmul %0, %296, %cst_262 {dimension_numbers = #tpu.dot_dimension_numbers<[1], [0], [0], [1], [0, 0, 1, 1], [], []>} : vector<128x128xf32>, vector<128x32xf32>, vector<128x32xf32> -> vector<128x32xf32>
    %300 = arith.subf %298, %299 : vector<128x32xf32>
    %c8_263 = arith.constant 8 : index
    %c0_264 = arith.constant 0 : index
    %c0_265 = arith.constant 0 : index
    %301 = vector.load %arg9[%c8_263, %c0_264, %c0_265] : memref<11x128x32xf32, #tpu.memory_space<vmem>>, vector<1x128x32xf32>
    %302 = vector.shape_cast %301 : vector<1x128x32xf32> to vector<128x32xf32>
    %303 = vector.shape_cast %300 : vector<128x32xf32> to vector<1x128x32xf32>
    tpu.vector_store %arg9[%c8_263, %c0_264, %c0_265], %303 {strides = array<i32>} : memref<11x128x32xf32, #tpu.memory_space<vmem>>, vector<1x128x32xf32>,
    %c8_266 = arith.constant 8 : index
    %c0_267 = arith.constant 0 : index
    %c0_268 = arith.constant 0 : index
    %304 = vector.load %arg9[%c8_266, %c0_267, %c0_268] : memref<11x128x32xf32, #tpu.memory_space<vmem>>, vector<1x128x32xf32>
    %305 = vector.shape_cast %304 : vector<1x128x32xf32> to vector<128x32xf32>
    %cst_269 = arith.constant 2.000000e+00 : f32
    %306 = vector.broadcast %cst_269 : f32 to vector<128x32xf32>
    %307 = arith.mulf %306, %305 : vector<128x32xf32>
    %cst_270 = arith.constant dense<0.000000e+00> : vector<128x32xf32>
    %308 = tpu.matmul %0, %305, %cst_270 {dimension_numbers = #tpu.dot_dimension_numbers<[1], [0], [0], [1], [0, 0, 1, 1], [], []>} : vector<128x128xf32>, vector<128x32xf32>, vector<128x32xf32> -> vector<128x32xf32>
    %309 = arith.subf %307, %308 : vector<128x32xf32>
    %c9_271 = arith.constant 9 : index
    %c0_272 = arith.constant 0 : index
    %c0_273 = arith.constant 0 : index
    %310 = vector.load %arg9[%c9_271, %c0_272, %c0_273] : memref<11x128x32xf32, #tpu.memory_space<vmem>>, vector<1x128x32xf32>
    %311 = vector.shape_cast %310 : vector<1x128x32xf32> to vector<128x32xf32>
    %312 = vector.shape_cast %309 : vector<128x32xf32> to vector<1x128x32xf32>
    tpu.vector_store %arg9[%c9_271, %c0_272, %c0_273], %312 {strides = array<i32>} : memref<11x128x32xf32, #tpu.memory_space<vmem>>, vector<1x128x32xf32>,
    %c9_274 = arith.constant 9 : index
    %c0_275 = arith.constant 0 : index
    %c0_276 = arith.constant 0 : index
    %313 = vector.load %arg9[%c9_274, %c0_275, %c0_276] : memref<11x128x32xf32, #tpu.memory_space<vmem>>, vector<1x128x32xf32>
    %314 = vector.shape_cast %313 : vector<1x128x32xf32> to vector<128x32xf32>
    %cst_277 = arith.constant 2.000000e+00 : f32
    %315 = vector.broadcast %cst_277 : f32 to vector<128x32xf32>
    %316 = arith.mulf %315, %314 : vector<128x32xf32>
    %cst_278 = arith.constant dense<0.000000e+00> : vector<128x32xf32>
    %317 = tpu.matmul %0, %314, %cst_278 {dimension_numbers = #tpu.dot_dimension_numbers<[1], [0], [0], [1], [0, 0, 1, 1], [], []>} : vector<128x128xf32>, vector<128x32xf32>, vector<128x32xf32> -> vector<128x32xf32>
    %318 = arith.subf %316, %317 : vector<128x32xf32>
    %c10_279 = arith.constant 10 : index
    %c0_280 = arith.constant 0 : index
    %c0_281 = arith.constant 0 : index
    %319 = vector.load %arg9[%c10_279, %c0_280, %c0_281] : memref<11x128x32xf32, #tpu.memory_space<vmem>>, vector<1x128x32xf32>
    %320 = vector.shape_cast %319 : vector<1x128x32xf32> to vector<128x32xf32>
    %321 = vector.shape_cast %318 : vector<128x32xf32> to vector<1x128x32xf32>
    tpu.vector_store %arg9[%c10_279, %c0_280, %c0_281], %321 {strides = array<i32>} : memref<11x128x32xf32, #tpu.memory_space<vmem>>, vector<1x128x32xf32>,
    %c0_282 = arith.constant 0 : index
    %c0_283 = arith.constant 0 : index
    %c0_284 = arith.constant 0 : index
    %322 = vector.load %arg9[%c0_282, %c0_283, %c0_284] : memref<11x128x32xf32, #tpu.memory_space<vmem>>, vector<1x128x32xf32>
    %323 = vector.shape_cast %322 : vector<1x128x32xf32> to vector<128x32xf32>
    %324 = vector.broadcast %44 : f32 to vector<128x32xf32>
    %325 = arith.mulf %324, %323 : vector<128x32xf32>
    %c0_285 = arith.constant 0 : index
    %c0_286 = arith.constant 0 : index
    %326 = vector.load %arg10[%c0_285, %c0_286] : memref<128x32xf32, #tpu.memory_space<vmem>>, vector<128x32xf32>
    tpu.vector_store %arg10[%c0_285, %c0_286], %325 {strides = array<i32>} : memref<128x32xf32, #tpu.memory_space<vmem>>, vector<128x32xf32>,
    %c0_287 = arith.constant 0 : index
    %c0_288 = arith.constant 0 : index
    %327 = vector.load %arg10[%c0_287, %c0_288] : memref<128x32xf32, #tpu.memory_space<vmem>>, vector<128x32xf32>
    %cst_289 = arith.constant dense<0.000000e+00> : vector<128x32xf32>
    %328 = tpu.matmul %0, %327, %cst_289 {dimension_numbers = #tpu.dot_dimension_numbers<[1], [0], [0], [1], [0, 0, 1, 1], [], []>} : vector<128x128xf32>, vector<128x32xf32>, vector<128x32xf32> -> vector<128x32xf32>
    %c1_290 = arith.constant 1 : index
    %c0_291 = arith.constant 0 : index
    %c0_292 = arith.constant 0 : index
    %329 = vector.load %arg9[%c1_290, %c0_291, %c0_292] : memref<11x128x32xf32, #tpu.memory_space<vmem>>, vector<1x128x32xf32>
    %330 = vector.shape_cast %329 : vector<1x128x32xf32> to vector<128x32xf32>
    %331 = vector.broadcast %40 : f32 to vector<128x32xf32>
    %332 = arith.mulf %331, %330 : vector<128x32xf32>
    %333 = arith.addf %328, %332 : vector<128x32xf32>
    %c0_293 = arith.constant 0 : index
    %c0_294 = arith.constant 0 : index
    %334 = vector.load %arg10[%c0_293, %c0_294] : memref<128x32xf32, #tpu.memory_space<vmem>>, vector<128x32xf32>
    tpu.vector_store %arg10[%c0_293, %c0_294], %333 {strides = array<i32>} : memref<128x32xf32, #tpu.memory_space<vmem>>, vector<128x32xf32>,
    %c0_295 = arith.constant 0 : index
    %c0_296 = arith.constant 0 : index
    %335 = vector.load %arg10[%c0_295, %c0_296] : memref<128x32xf32, #tpu.memory_space<vmem>>, vector<128x32xf32>
    %cst_297 = arith.constant dense<0.000000e+00> : vector<128x32xf32>
    %336 = tpu.matmul %0, %335, %cst_297 {dimension_numbers = #tpu.dot_dimension_numbers<[1], [0], [0], [1], [0, 0, 1, 1], [], []>} : vector<128x128xf32>, vector<128x32xf32>, vector<128x32xf32> -> vector<128x32xf32>
    %c2_298 = arith.constant 2 : index
    %c0_299 = arith.constant 0 : index
    %c0_300 = arith.constant 0 : index
    %337 = vector.load %arg9[%c2_298, %c0_299, %c0_300] : memref<11x128x32xf32, #tpu.memory_space<vmem>>, vector<1x128x32xf32>
    %338 = vector.shape_cast %337 : vector<1x128x32xf32> to vector<128x32xf32>
    %339 = vector.broadcast %36 : f32 to vector<128x32xf32>
    %340 = arith.mulf %339, %338 : vector<128x32xf32>
    %341 = arith.addf %336, %340 : vector<128x32xf32>
    %c0_301 = arith.constant 0 : index
    %c0_302 = arith.constant 0 : index
    %342 = vector.load %arg10[%c0_301, %c0_302] : memref<128x32xf32, #tpu.memory_space<vmem>>, vector<128x32xf32>
    tpu.vector_store %arg10[%c0_301, %c0_302], %341 {strides = array<i32>} : memref<128x32xf32, #tpu.memory_space<vmem>>, vector<128x32xf32>,
    %c0_303 = arith.constant 0 : index
    %c0_304 = arith.constant 0 : index
    %343 = vector.load %arg10[%c0_303, %c0_304] : memref<128x32xf32, #tpu.memory_space<vmem>>, vector<128x32xf32>
    %cst_305 = arith.constant dense<0.000000e+00> : vector<128x32xf32>
    %344 = tpu.matmul %0, %343, %cst_305 {dimension_numbers = #tpu.dot_dimension_numbers<[1], [0], [0], [1], [0, 0, 1, 1], [], []>} : vector<128x128xf32>, vector<128x32xf32>, vector<128x32xf32> -> vector<128x32xf32>
    %c3_306 = arith.constant 3 : index
    %c0_307 = arith.constant 0 : index
    %c0_308 = arith.constant 0 : index
    %345 = vector.load %arg9[%c3_306, %c0_307, %c0_308] : memref<11x128x32xf32, #tpu.memory_space<vmem>>, vector<1x128x32xf32>
    %346 = vector.shape_cast %345 : vector<1x128x32xf32> to vector<128x32xf32>
    %347 = vector.broadcast %32 : f32 to vector<128x32xf32>
    %348 = arith.mulf %347, %346 : vector<128x32xf32>
    %349 = arith.addf %344, %348 : vector<128x32xf32>
    %c0_309 = arith.constant 0 : index
    %c0_310 = arith.constant 0 : index
    %350 = vector.load %arg10[%c0_309, %c0_310] : memref<128x32xf32, #tpu.memory_space<vmem>>, vector<128x32xf32>
    tpu.vector_store %arg10[%c0_309, %c0_310], %349 {strides = array<i32>} : memref<128x32xf32, #tpu.memory_space<vmem>>, vector<128x32xf32>,
    %c0_311 = arith.constant 0 : index
    %c0_312 = arith.constant 0 : index
    %351 = vector.load %arg10[%c0_311, %c0_312] : memref<128x32xf32, #tpu.memory_space<vmem>>, vector<128x32xf32>
    %cst_313 = arith.constant dense<0.000000e+00> : vector<128x32xf32>
    %352 = tpu.matmul %0, %351, %cst_313 {dimension_numbers = #tpu.dot_dimension_numbers<[1], [0], [0], [1], [0, 0, 1, 1], [], []>} : vector<128x128xf32>, vector<128x32xf32>, vector<128x32xf32> -> vector<128x32xf32>
    %c4_314 = arith.constant 4 : index
    %c0_315 = arith.constant 0 : index
    %c0_316 = arith.constant 0 : index
    %353 = vector.load %arg9[%c4_314, %c0_315, %c0_316] : memref<11x128x32xf32, #tpu.memory_space<vmem>>, vector<1x128x32xf32>
    %354 = vector.shape_cast %353 : vector<1x128x32xf32> to vector<128x32xf32>
    %355 = vector.broadcast %28 : f32 to vector<128x32xf32>
    %356 = arith.mulf %355, %354 : vector<128x32xf32>
    %357 = arith.addf %352, %356 : vector<128x32xf32>
    %c0_317 = arith.constant 0 : index
    %c0_318 = arith.constant 0 : index
    %358 = vector.load %arg10[%c0_317, %c0_318] : memref<128x32xf32, #tpu.memory_space<vmem>>, vector<128x32xf32>
    tpu.vector_store %arg10[%c0_317, %c0_318], %357 {strides = array<i32>} : memref<128x32xf32, #tpu.memory_space<vmem>>, vector<128x32xf32>,
    %c0_319 = arith.constant 0 : index
    %c0_320 = arith.constant 0 : index
    %359 = vector.load %arg10[%c0_319, %c0_320] : memref<128x32xf32, #tpu.memory_space<vmem>>, vector<128x32xf32>
    %cst_321 = arith.constant dense<0.000000e+00> : vector<128x32xf32>
    %360 = tpu.matmul %0, %359, %cst_321 {dimension_numbers = #tpu.dot_dimension_numbers<[1], [0], [0], [1], [0, 0, 1, 1], [], []>} : vector<128x128xf32>, vector<128x32xf32>, vector<128x32xf32> -> vector<128x32xf32>
    %c5_322 = arith.constant 5 : index
    %c0_323 = arith.constant 0 : index
    %c0_324 = arith.constant 0 : index
    %361 = vector.load %arg9[%c5_322, %c0_323, %c0_324] : memref<11x128x32xf32, #tpu.memory_space<vmem>>, vector<1x128x32xf32>
    %362 = vector.shape_cast %361 : vector<1x128x32xf32> to vector<128x32xf32>
    %363 = vector.broadcast %24 : f32 to vector<128x32xf32>
    %364 = arith.mulf %363, %362 : vector<128x32xf32>
    %365 = arith.addf %360, %364 : vector<128x32xf32>
    %c0_325 = arith.constant 0 : index
    %c0_326 = arith.constant 0 : index
    %366 = vector.load %arg10[%c0_325, %c0_326] : memref<128x32xf32, #tpu.memory_space<vmem>>, vector<128x32xf32>
    tpu.vector_store %arg10[%c0_325, %c0_326], %365 {strides = array<i32>} : memref<128x32xf32, #tpu.memory_space<vmem>>, vector<128x32xf32>,
    %c0_327 = arith.constant 0 : index
    %c0_328 = arith.constant 0 : index
    %367 = vector.load %arg10[%c0_327, %c0_328] : memref<128x32xf32, #tpu.memory_space<vmem>>, vector<128x32xf32>
    %cst_329 = arith.constant dense<0.000000e+00> : vector<128x32xf32>
    %368 = tpu.matmul %0, %367, %cst_329 {dimension_numbers = #tpu.dot_dimension_numbers<[1], [0], [0], [1], [0, 0, 1, 1], [], []>} : vector<128x128xf32>, vector<128x32xf32>, vector<128x32xf32> -> vector<128x32xf32>
    %c6_330 = arith.constant 6 : index
    %c0_331 = arith.constant 0 : index
    %c0_332 = arith.constant 0 : index
    %369 = vector.load %arg9[%c6_330, %c0_331, %c0_332] : memref<11x128x32xf32, #tpu.memory_space<vmem>>, vector<1x128x32xf32>
    %370 = vector.shape_cast %369 : vector<1x128x32xf32> to vector<128x32xf32>
    %371 = vector.broadcast %20 : f32 to vector<128x32xf32>
    %372 = arith.mulf %371, %370 : vector<128x32xf32>
    %373 = arith.addf %368, %372 : vector<128x32xf32>
    %c0_333 = arith.constant 0 : index
    %c0_334 = arith.constant 0 : index
    %374 = vector.load %arg10[%c0_333, %c0_334] : memref<128x32xf32, #tpu.memory_space<vmem>>, vector<128x32xf32>
    tpu.vector_store %arg10[%c0_333, %c0_334], %373 {strides = array<i32>} : memref<128x32xf32, #tpu.memory_space<vmem>>, vector<128x32xf32>,
    %c0_335 = arith.constant 0 : index
    %c0_336 = arith.constant 0 : index
    %375 = vector.load %arg10[%c0_335, %c0_336] : memref<128x32xf32, #tpu.memory_space<vmem>>, vector<128x32xf32>
    %cst_337 = arith.constant dense<0.000000e+00> : vector<128x32xf32>
    %376 = tpu.matmul %0, %375, %cst_337 {dimension_numbers = #tpu.dot_dimension_numbers<[1], [0], [0], [1], [0, 0, 1, 1], [], []>} : vector<128x128xf32>, vector<128x32xf32>, vector<128x32xf32> -> vector<128x32xf32>
    %c7_338 = arith.constant 7 : index
    %c0_339 = arith.constant 0 : index
    %c0_340 = arith.constant 0 : index
    %377 = vector.load %arg9[%c7_338, %c0_339, %c0_340] : memref<11x128x32xf32, #tpu.memory_space<vmem>>, vector<1x128x32xf32>
    %378 = vector.shape_cast %377 : vector<1x128x32xf32> to vector<128x32xf32>
    %379 = vector.broadcast %16 : f32 to vector<128x32xf32>
    %380 = arith.mulf %379, %378 : vector<128x32xf32>
    %381 = arith.addf %376, %380 : vector<128x32xf32>
    %c0_341 = arith.constant 0 : index
    %c0_342 = arith.constant 0 : index
    %382 = vector.load %arg10[%c0_341, %c0_342] : memref<128x32xf32, #tpu.memory_space<vmem>>, vector<128x32xf32>
    tpu.vector_store %arg10[%c0_341, %c0_342], %381 {strides = array<i32>} : memref<128x32xf32, #tpu.memory_space<vmem>>, vector<128x32xf32>,
    %c0_343 = arith.constant 0 : index
    %c0_344 = arith.constant 0 : index
    %383 = vector.load %arg10[%c0_343, %c0_344] : memref<128x32xf32, #tpu.memory_space<vmem>>, vector<128x32xf32>
    %cst_345 = arith.constant dense<0.000000e+00> : vector<128x32xf32>
    %384 = tpu.matmul %0, %383, %cst_345 {dimension_numbers = #tpu.dot_dimension_numbers<[1], [0], [0], [1], [0, 0, 1, 1], [], []>} : vector<128x128xf32>, vector<128x32xf32>, vector<128x32xf32> -> vector<128x32xf32>
    %c8_346 = arith.constant 8 : index
    %c0_347 = arith.constant 0 : index
    %c0_348 = arith.constant 0 : index
    %385 = vector.load %arg9[%c8_346, %c0_347, %c0_348] : memref<11x128x32xf32, #tpu.memory_space<vmem>>, vector<1x128x32xf32>
    %386 = vector.shape_cast %385 : vector<1x128x32xf32> to vector<128x32xf32>
    %387 = vector.broadcast %12 : f32 to vector<128x32xf32>
    %388 = arith.mulf %387, %386 : vector<128x32xf32>
    %389 = arith.addf %384, %388 : vector<128x32xf32>
    %c0_349 = arith.constant 0 : index
    %c0_350 = arith.constant 0 : index
    %390 = vector.load %arg10[%c0_349, %c0_350] : memref<128x32xf32, #tpu.memory_space<vmem>>, vector<128x32xf32>
    tpu.vector_store %arg10[%c0_349, %c0_350], %389 {strides = array<i32>} : memref<128x32xf32, #tpu.memory_space<vmem>>, vector<128x32xf32>,
    %c0_351 = arith.constant 0 : index
    %c0_352 = arith.constant 0 : index
    %391 = vector.load %arg10[%c0_351, %c0_352] : memref<128x32xf32, #tpu.memory_space<vmem>>, vector<128x32xf32>
    %cst_353 = arith.constant dense<0.000000e+00> : vector<128x32xf32>
    %392 = tpu.matmul %0, %391, %cst_353 {dimension_numbers = #tpu.dot_dimension_numbers<[1], [0], [0], [1], [0, 0, 1, 1], [], []>} : vector<128x128xf32>, vector<128x32xf32>, vector<128x32xf32> -> vector<128x32xf32>
    %c9_354 = arith.constant 9 : index
    %c0_355 = arith.constant 0 : index
    %c0_356 = arith.constant 0 : index
    %393 = vector.load %arg9[%c9_354, %c0_355, %c0_356] : memref<11x128x32xf32, #tpu.memory_space<vmem>>, vector<1x128x32xf32>
    %394 = vector.shape_cast %393 : vector<1x128x32xf32> to vector<128x32xf32>
    %395 = vector.broadcast %8 : f32 to vector<128x32xf32>
    %396 = arith.mulf %395, %394 : vector<128x32xf32>
    %397 = arith.addf %392, %396 : vector<128x32xf32>
    %c0_357 = arith.constant 0 : index
    %c0_358 = arith.constant 0 : index
    %398 = vector.load %arg10[%c0_357, %c0_358] : memref<128x32xf32, #tpu.memory_space<vmem>>, vector<128x32xf32>
    tpu.vector_store %arg10[%c0_357, %c0_358], %397 {strides = array<i32>} : memref<128x32xf32, #tpu.memory_space<vmem>>, vector<128x32xf32>,
    %c0_359 = arith.constant 0 : index
    %c0_360 = arith.constant 0 : index
    %399 = vector.load %arg10[%c0_359, %c0_360] : memref<128x32xf32, #tpu.memory_space<vmem>>, vector<128x32xf32>
    %cst_361 = arith.constant dense<0.000000e+00> : vector<128x32xf32>
    %400 = tpu.matmul %0, %399, %cst_361 {dimension_numbers = #tpu.dot_dimension_numbers<[1], [0], [0], [1], [0, 0, 1, 1], [], []>} : vector<128x128xf32>, vector<128x32xf32>, vector<128x32xf32> -> vector<128x32xf32>
    %c10_362 = arith.constant 10 : index
    %c0_363 = arith.constant 0 : index
    %c0_364 = arith.constant 0 : index
    %401 = vector.load %arg9[%c10_362, %c0_363, %c0_364] : memref<11x128x32xf32, #tpu.memory_space<vmem>>, vector<1x128x32xf32>
    %402 = vector.shape_cast %401 : vector<1x128x32xf32> to vector<128x32xf32>
    %403 = vector.broadcast %4 : f32 to vector<128x32xf32>
    %404 = arith.mulf %403, %402 : vector<128x32xf32>
    %405 = arith.addf %400, %404 : vector<128x32xf32>
    %c0_365 = arith.constant 0 : index
    %c0_366 = arith.constant 0 : index
    %406 = vector.load %arg10[%c0_365, %c0_366] : memref<128x32xf32, #tpu.memory_space<vmem>>, vector<128x32xf32>
    tpu.vector_store %arg10[%c0_365, %c0_366], %405 {strides = array<i32>} : memref<128x32xf32, #tpu.memory_space<vmem>>, vector<128x32xf32>,
    %c0_367 = arith.constant 0 : index
    %c0_368 = arith.constant 0 : index
    %407 = vector.load %arg10[%c0_367, %c0_368] : memref<128x32xf32, #tpu.memory_space<vmem>>, vector<128x32xf32>
    %c0_369 = arith.constant 0 : index
    %c0_370 = arith.constant 0 : index
    %408 = vector.load %arg2[%c0_369, %c0_370] : memref<32x64xf32, #tpu.memory_space<vmem>>, vector<32x64xf32>
    %cst_371 = arith.constant dense<0.000000e+00> : vector<128x64xf32>
    %409 = tpu.matmul %407, %408, %cst_371 {dimension_numbers = #tpu.dot_dimension_numbers<[1], [0], [0], [1], [0, 0, 1, 1], [], []>} : vector<128x32xf32>, vector<32x64xf32>, vector<128x64xf32> -> vector<128x64xf32>
    %cst_372 = arith.constant 0.000000e+00 : f32
    %410 = vector.broadcast %cst_372 : f32 to vector<128x64xf32>
    %411 = arith.maximumf %409, %410 : vector<128x64xf32>
    %c0_373 = arith.constant 0 : index
    %c0_374 = arith.constant 0 : index
    %412 = vector.load %arg3[%c0_373, %c0_374] : memref<64x128xf32, #tpu.memory_space<vmem>>, vector<64x128xf32>
    %cst_375 = arith.constant dense<0.000000e+00> : vector<128x128xf32>
    %413 = tpu.matmul %411, %412, %cst_375 {dimension_numbers = #tpu.dot_dimension_numbers<[1], [0], [0], [1], [0, 0, 1, 1], [], []>} : vector<128x64xf32>, vector<64x128xf32>, vector<128x128xf32> -> vector<128x128xf32>
    %c0_376 = arith.constant 0 : index
    %414 = memref.load %arg7[%c0_376] : memref<1xf32, #tpu.memory_space<smem>>
    %415 = vector.broadcast %414 : f32 to vector<128x128xf32>
    %416 = arith.addf %413, %415 : vector<128x128xf32>
    %c0_377 = arith.constant 0 : index
    %c0_378 = arith.constant 0 : index
    %417 = vector.load %arg8[%c0_377, %c0_378] : memref<128x128xf32, #tpu.memory_space<vmem>>, vector<128x128xf32>
    tpu.vector_store %arg8[%c0_377, %c0_378], %416 {strides = array<i32>} : memref<128x128xf32, #tpu.memory_space<vmem>>, vector<128x128xf32>,
    return
  }
}

</mosaic_0001>

<bundles_post_ra>
// kernel: tpu_custom_call.1
= control target key start
LH: loop header
LB: loop body
LE: loop exit
PB: predicated region body
PF: predicated region fallthrough
CT: control target
= control target key end

     0   :  { %14 = vsyncpa [#allocation6], 0  ;;  %s16884_s0 = inlined_call_operand.vmem [shape: f32[128,128], index: 0, kind: input, shape index: {}]   ;;  %s16885_s1 = inlined_call_operand.vmem [shape: f32[128,32], index: 1, kind: input, shape index: {}]   ;;  %s16886_s2 = inlined_call_operand.vmem [shape: f32[32,64], index: 2, kind: input, shape index: {}]   ;;  %s16887_s3 = inlined_call_operand.hbm [shape: f32[64,128], index: 3, kind: input, shape index: {}]   ;;  %s16888_s4 = inlined_call_operand.hbm [shape: f32[128,128], index: 4, kind: input, shape index: {}]   ;;  %s16889_s5 = inlined_call_operand.vmem [shape: f32[11], index: 5, kind: input, shape index: {}]   ;;  %s16890_s6 = inlined_call_operand.vmem [shape: f32[11], index: 6, kind: input, shape index: {}]   ;;  %s16891_s7 = inlined_call_operand.<no memory space> [shape: f32[1], index: 7, kind: input, shape index: {}]   ;;  %s16892_s8 = inlined_call_operand.hbm [shape: f32[128,128], index: 8, kind: output, shape index: {}]  }
   0x1   :  { %15 = vsyncpa [#allocation10], 0 }
   0x2   :  { %16 = vsyncpa [#allocation8], 0 }
   0x3   :  { %17 = vsyncpa [#allocation13], 0 }
   0x4   :  { %18 = vsyncpa [#allocation7], 0  ;;  %s13386_s27 = smov [#allocation5]  }
   0x5   :  { %s30_s28 = sshll.u32 %s13386_s27, 4  ;;  %s31_s28 = int_to_ptr.vmem [resolvable:$true] %s30_s28 }
   0x6   :  { %s13300_s29 = scalar_lea.vmem %s31_s28, 1024  ;;  %p13305_p1 = scmp.lt.s32.totalorder %s31_s28, %s31_s28 }
   0x7   :  { %p13301_p0 = scmp.ne.s32.totalorder %s31_s28, %s13300_s29  ;;  %p13306_p2 = scmp.lt.s32.totalorder %s13300_s29, %s13300_s29 }
   0x9   :  { %p13307_p3 = por %p13306_p2, %p13305_p1 }
   0xb   :  { %p13308_p4 = pnand %p13307_p3, %p13301_p0 }
   0xd   :  { %13311 = shalt.err (!%p13308_p4)
}
   0xe   :  { %s13387_s30 = smov 128   ;;  %s13388_s9 = smov 8  }
   0xf   :  { %36 = dma.hbm_to_vmem [thread:$0]  %s16887_s3, 1024, %s31_s28, [#allocation6], %s13387_s30, %s13387_s30, %s13388_s9  }
  0x10   :  { %s13389_s12 = smov [#allocation9]   ;;  %s55_s16 = sshll.u32 %s16889_s5, 4  ;;  %s56_s16 = int_to_ptr.vmem [resolvable:$true] %s55_s16 }
  0x11   :  { %s42_s13 = sshll.u32 %s13389_s12, 4  ;;  %s43_s13 = int_to_ptr.vmem [resolvable:$true] %s42_s13 }
  0x12   :  { %s13320_s17 = scalar_lea.vmem %s43_s13, 2048  ;;  %p13325_p6 = scmp.lt.s32.totalorder %s43_s13, %s43_s13 }
  0x13   :  { %p13321_p5 = scmp.ne.s32.totalorder %s43_s13, %s13320_s17  ;;  %p13326_p7 = scmp.lt.s32.totalorder %s13320_s17, %s13320_s17 }
  0x15   :  { %p13327_p8 = por %p13326_p7, %p13325_p6 }
  0x17   :  { %p13328_p9 = pnand %p13327_p8, %p13321_p5 }
  0x19   :  { %13331 = shalt.err (!%p13328_p9)
}
  0x1a   :  { %48 = dma.hbm_to_vmem [thread:$0]  %s16888_s4, 2048, %s43_s13, [#allocation10], %s13387_s30, %s13387_s30, %s13388_s9  }
  0x1b   :  { %s65_s5 = sshll.u32 %s16890_s6, 4  ;;  %s13332_s21 = scalar_lea.vmem %s56_s16, 16  ;;  %s66_s5 = int_to_ptr.vmem [resolvable:$true] %s65_s5 }
  0x1c   :  { %p13333_p10 = scmp.ne.s32.totalorder %s56_s16, %s13332_s21  ;;  %p13337_p11 = scmp.lt.s32.totalorder %s56_s16, %s56_s16 }
  0x1d   :  { %p13338_p12 = scmp.lt.s32.totalorder %s13332_s21, %s13332_s21 }
  0x1f   :  { %p13339_p13 = por %p13338_p12, %p13337_p11 }
  0x21   :  { %p13340_p0 = pnand %p13339_p13, %p13333_p10 }
  0x23   :  { %13343 = shalt.err (!%p13340_p0)
}
  0x24   :  { %s13390_s22 = smov [#allocation11]   ;;  %s13344_s23 = scalar_lea.vmem %s66_s5, 16 }
  0x25   :  { %58 = dma.vmem_to_smem %s56_s16, 16, %s13390_s22, [#allocation8]  }
  0x26   :  { %p13345_p1 = scmp.ne.s32.totalorder %s66_s5, %s13344_s23  ;;  %p13349_p2 = scmp.lt.s32.totalorder %s66_s5, %s66_s5 }
  0x27   :  { %p13350_p3 = scmp.lt.s32.totalorder %s13344_s23, %s13344_s23 }
  0x29   :  { %p13351_p4 = por %p13350_p3, %p13349_p2 }
  0x2b   :  { %p13352_p5 = pnand %p13351_p4, %p13345_p1 }
  0x2d   :  { %13355 = shalt.err (!%p13352_p5)
}
  0x2e   :  { %s13391_s4 = smov [#allocation12]  }
  0x2f   :  { %68 = dma.vmem_to_smem %s66_s5, 16, %s13391_s4, [#allocation13]  }
  0x30   :  { %13376 = dma.done.wait [#allocation6], 1024  }
  0x31   :  { %13377 = vsyncadd [#allocation6], 4294966272 }
  0x32   :  { %13378 = dma.done.wait [#allocation10], 2048  }
  0x33   :  { %13379 = vsyncadd [#allocation10], 4294965248 }
  0x34   :  { %13380 = dma.done.wait [#allocation8], 16  }
  0x35   :  { %13381 = vsyncadd [#allocation8], 4294967280 }
  0x36   :  { %13382 = dma.done.wait [#allocation13], 16  }
  0x37   :  { %13383 = vsyncadd [#allocation13], 4294967280 }
  0x38   :  { %83 = sfence }
  0x39   :  { %v175_v0 = vld [vmem:[%s16885_s1 + $0x78] sm:$0xff]  ;;  %v174_v1 = vld [vmem:[%s16885_s1 + $0x70] sm:$0xff]  ;;  %v173_v2 = vld [vmem:[%s16885_s1 + $0x68] sm:$0xff]  ;;  %s9350_s18 = sld [smem:[#allocation11 + $0xa]]  ;;  %vm321_vm0 = vcmask 261120   ;;  %vm9102_vm1 = vcmask 523264  }
  0x3a   :  { %10740 = vmatprep.subr.mxu0 %v175_v0  ;;  %v172_v3 = vld [vmem:[%s16885_s1 + $0x60] sm:$0xff]  ;;  %v171_v5 = vld [vmem:[%s16885_s1 + $0x58] sm:$0xff]  ;;  %v170_v6 = vld [vmem:[%s16885_s1 + $0x50] sm:$0xff]  ;;  %s9351_s3 = sld [smem:[#allocation12 + $0xa]] }
  0x3b   :  { %10741 = vmatpush3.msra.mxu0 %v175_v0  ;;  %v144_v4 = vld [vmem:[%s16884_s0] sm:$0xff]  ;;  %v169_v7 = vld [vmem:[%s16885_s1 + $0x48] sm:$0xff]  ;;  %v167_v9 = vld [vmem:[%s16885_s1 + $0x38] sm:$0xff]  ;;  %s9349_s5 = sld [smem:[#allocation12 + $0x9]] }
  0x3c   :  { %10742 = vmatprep.subr.mxu0 %v174_v1  ;;  %10772 = vmatprep.mubr.f32.mxu0 %v144_v4  ;;  %v168_v8 = vld [vmem:[%s16885_s1 + $0x40] sm:$0xff]  ;;  %v166_v10 = vld [vmem:[%s16885_s1 + $0x30] sm:$0xff]  ;;  %v165_v11 = vld [vmem:[%s16885_s1 + $0x28] sm:$0xff]  ;;  %s9346_s23 = sld [smem:[#allocation11 + $0x8]] }
  0x3d   :  { %10743 = vmatpush3.msra.mxu0 %v174_v1  ;;  %v164_v12 = vld [vmem:[%s16885_s1 + $0x20] sm:$0xff]  ;;  %v163_v13 = vld [vmem:[%s16885_s1 + $0x18] sm:$0xff]  ;;  %v162_v14 = vld [vmem:[%s16885_s1 + $0x10] sm:$0xff]  ;;  %s9347_s4 = sld [smem:[#allocation12 + $0x8]] }
  0x3e   :  { %10744 = vmatprep.subr.mxu0 %v173_v2  ;;  %v161_v15 = vld [vmem:[%s16885_s1 + $0x8] sm:$0xff]  ;;  %v160_v16 = vld [vmem:[%s16885_s1] sm:$0xff]  ;;  %v146_v18 = vld [vmem:[%s16884_s0 + $0x10] sm:$0xff]  ;;  %s13392_s1 = smov 0.0   ;;  %s9344_s25 = sld [smem:[#allocation11 + $0x7]] }
  0x3f   :  { %10745 = vmatpush3.msra.mxu0 %v173_v2  ;;  %v145_v17 = vld [vmem:[%s16884_s0 + $0x8] sm:$0xff]  ;;  %v147_v19 = vld [vmem:[%s16884_s0 + $0x18] sm:$0xff]  ;;  %v148_v20 = vld [vmem:[%s16884_s0 + $0x20] sm:$0xff]  ;;  %s141_s19 = smax.f32 %s13392_s1, %s9350_s18  ;;  %s9345_s26 = sld [smem:[#allocation12 + $0x7]] }
  0x40   :  { %10746 = vmatprep.subr.mxu0 %v172_v3  ;;  %v149_v21 = vld [vmem:[%s16884_s0 + $0x28] sm:$0xff]  ;;  %v150_v22 = vld [vmem:[%s16884_s0 + $0x30] sm:$0xff]  ;;  %v151_v23 = vld [vmem:[%s16884_s0 + $0x38] sm:$0xff]  ;;  %s143_s20 = smul.f32 %s9351_s3, %s141_s19  ;;  %s9342_s29 = sld [smem:[#allocation11 + $0x6]] }
  0x41   :  { %10747 = vmatpush3.msra.mxu0 %v172_v3  ;;  %v152_v24 = vld [vmem:[%s16884_s0 + $0x40] sm:$0xff]  ;;  %v153_v25 = vld [vmem:[%s16884_s0 + $0x48] sm:$0xff]  ;;  %v154_v26 = vld [vmem:[%s16884_s0 + $0x50] sm:$0xff]  ;;  %s9343_s10 = sld [smem:[#allocation12 + $0x6]] }
  0x42   :  { %10748 = vmatprep.subr.mxu0 %v171_v5  ;;  %v155_v27 = vld [vmem:[%s16884_s0 + $0x58] sm:$0xff]  ;;  %v156_v28 = vld [vmem:[%s16884_s0 + $0x60] sm:$0xff]  ;;  %v157_v29 = vld [vmem:[%s16884_s0 + $0x68] sm:$0xff]  ;;  %v13561_v36 = vstv %s143_s20  ;;  %s133_s6 = smax.f32 %s13392_s1, %s9346_s23  ;;  %s9340_s13 = sld [smem:[#allocation11 + $0x5]] }
  0x43   :  { %10749 = vmatpush3.msra.mxu0 %v171_v5  ;;  %v158_v30 = vld [vmem:[%s16884_s0 + $0x70] sm:$0xff]  ;;  %v159_v31 = vld [vmem:[%s16884_s0 + $0x78] sm:$0xff]  ;;  %v13553_v32 = vld [vmem:[#allocation9] sm:$0xff]  ;;  %s9348_s0 = sld [smem:[#allocation11 + $0x9]]  ;;  %s135_s24 = smul.f32 %s9347_s4, %s133_s6 }
  0x44   :  { %10750 = vmatprep.subr.mxu0 %v170_v6  ;;  %10828 = vmatprep.mubr.f32.mxu1 %v13553_v32  ;;  %s129_s27 = smax.f32 %s13392_s1, %s9344_s25  ;;  %s9341_s14 = sld [smem:[#allocation12 + $0x5]] }
  0x45   :  { %10751 = vmatpush3.msra.mxu0 %v170_v6  ;;  %s131_s28 = smul.f32 %s9345_s26, %s129_s27  ;;  %s9338_s17 = sld [smem:[#allocation11 + $0x4]] }
  0x46   :  { %10752 = vmatprep.subr.mxu0 %v169_v7  ;;  %s125_s11 = smax.f32 %s13392_s1, %s9342_s29  ;;  %s9339_s18 = sld [smem:[#allocation12 + $0x4]] }
  0x47   :  { %10753 = vmatpush3.msra.mxu0 %v169_v7  ;;  %s127_s12 = smul.f32 %s9343_s10, %s125_s11  ;;  %s9336_s20 = sld [smem:[#allocation11 + $0x3]] }
  0x48   :  { %10754 = vmatprep.subr.mxu0 %v168_v8  ;;  %s121_s15 = smax.f32 %s13392_s1, %s9340_s13  ;;  %s9335_s23 = sld [smem:[#allocation12 + $0x2]] }
  0x49   :  { %10755 = vmatpush3.msra.mxu0 %v168_v8  ;;  %s137_s21 = smax.f32 %s13392_s1, %s9348_s0  ;;  %s9337_s0 = sld [smem:[#allocation12 + $0x3]] }
  0x4a   :  { %10756 = vmatprep.subr.mxu0 %v167_v9  ;;  %s139_s22 = smul.f32 %s9349_s5, %s137_s21  ;;  %s9333_s25 = sld [smem:[#allocation12 + $0x1]] }
  0x4b   :  { %10757 = vmatpush3.msra.mxu0 %v167_v9  ;;  %s123_s16 = smul.f32 %s9341_s14, %s121_s15  ;;  %s117_s3 = smax.f32 %s13392_s1, %s9338_s17 }
  0x4c   :  { %10758 = vmatprep.subr.mxu0 %v166_v10  ;;  %s119_s19 = smul.f32 %s9339_s18, %s117_s3  ;;  %s102_s29 = sld [smem:[#allocation12]] }
  0x4d   :  { %10759 = vmatpush3.msra.mxu0 %v166_v10  ;;  %s113_s5 = smax.f32 %s13392_s1, %s9336_s20 }
  0x4e   :  { %10760 = vmatprep.subr.mxu0 %v165_v11 }
  0x4f   :  { %10761 = vmatpush3.msra.mxu0 %v165_v11  ;;  %s115_s21 = smul.f32 %s9337_s0, %s113_s5 }
  0x50   :  { %10762 = vmatprep.subr.mxu0 %v164_v12 }
  0x51   :  { %10763 = vmatpush3.msra.mxu0 %v164_v12 }
  0x52   :  { %10764 = vmatprep.subr.mxu0 %v163_v13 }
  0x53   :  { %10765 = vmatpush3.msra.mxu0 %v163_v13 }
  0x54   :  { %10766 = vmatprep.subr.mxu0 %v162_v14 }
  0x55   :  { %10767 = vmatpush3.msra.mxu0 %v162_v14 }
  0x56   :  { %10768 = vmatprep.subr.mxu0 %v161_v15 }
  0x57   :  { %10769 = vmatpush3.msra.mxu0 %v161_v15 }
  0x58   :  { %10770 = vmatprep.subr.mxu0 %v160_v16 }
  0x59   :  { %10771 = vmatpush3.msra.mxu0 %v160_v16 }
  0x5a   :  { %10773 = vmatmul.mubr.f32.vlgmr.msra.gmra.mxu0 %v145_v17 }
  0x5b   :  { %10775 = vmatprep.mubr.f32.mxu0 %v146_v18  ;;  %v13686_v18 = vld [vmem:[#allocation9 + $0x8] sm:$0xff] }
  0x5e   :  { %10776 = vmatmul.mubr.f32.gmra.mxu0 %v147_v19  ;;  %v13689_v19 = vld [vmem:[#allocation9 + $0x10] sm:$0xff] }
  0x5f   :  { %10778 = vmatprep.mubr.f32.mxu0 %v148_v20  ;;  %v13694_v20 = vld [vmem:[#allocation9 + $0x18] sm:$0xff] }
  0x62   :  { %10779 = vmatmul.mubr.f32.gmra.mxu0 %v149_v21  ;;  %v13696_v21 = vld [vmem:[#allocation9 + $0x20] sm:$0xff] }
  0x63   :  { %10781 = vmatprep.mubr.f32.mxu0 %v150_v22  ;;  %v13700_v22 = vld [vmem:[#allocation9 + $0x28] sm:$0xff] }
  0x66   :  { %10782 = vmatmul.mubr.f32.gmra.mxu0 %v151_v23  ;;  %v13702_v23 = vld [vmem:[#allocation9 + $0x30] sm:$0xff] }
  0x67   :  { %10784 = vmatprep.mubr.f32.mxu0 %v152_v24  ;;  %v13706_v24 = vld [vmem:[#allocation9 + $0x38] sm:$0xff] }
  0x6a   :  { %10785 = vmatmul.mubr.f32.gmra.mxu0 %v153_v25  ;;  %v13708_v25 = vld [vmem:[#allocation9 + $0x40] sm:$0xff] }
  0x6b   :  { %10787 = vmatprep.mubr.f32.mxu0 %v154_v26  ;;  %v13712_v26 = vld [vmem:[#allocation9 + $0x48] sm:$0xff] }
  0x6e   :  { %10788 = vmatmul.mubr.f32.gmra.mxu0 %v155_v27  ;;  %v13714_v27 = vld [vmem:[#allocation9 + $0x50] sm:$0xff] }
  0x6f   :  { %10790 = vmatprep.mubr.f32.mxu0 %v156_v28  ;;  %v13718_v28 = vld [vmem:[#allocation9 + $0x58] sm:$0xff] }
  0x72   :  { %10791 = vmatmul.mubr.f32.gmra.mxu0 %v157_v29  ;;  %v13720_v29 = vld [vmem:[#allocation9 + $0x60] sm:$0xff] }
  0x73   :  { %10793 = vmatprep.mubr.f32.mxu0 %v158_v30  ;;  %v13724_v30 = vld [vmem:[#allocation9 + $0x68] sm:$0xff] }
  0x76   :  { %10794 = vmatmul.mubr.f32.gmra.mxu0 %v159_v31  ;;  %v13726_v31 = vld [vmem:[#allocation9 + $0x70] sm:$0xff] }
  0x77   :  { %10884 = vmatprep.mubr.f32.mxu0 %v13553_v32 }
 0x11a   :  { %v10774_v33 = vpop.f32.mrf.mxu0 }
 0x11b   :  { %323 = vst.msk [vmem:[#allocation2 + $0x8] sm:$0xff] %vm321_vm0, %v10774_v33  ;;  %v13730_v33 = vld [vmem:[#allocation9 + $0x78] sm:$0xff] }
 0x11c   :  { %v242_v34 = vpop.f32.mrf.mxu0 }
 0x11d   :  { %322 = vst.msk [vmem:[#allocation2] sm:$0xff] %vm321_vm0, %v242_v34 }
 0x11e   :  { %v10777_v35 = vpop.f32.mrf.mxu0 }
 0x11f   :  { %325 = vst.msk [vmem:[#allocation2 + $0x18] sm:$0xff] %vm321_vm0, %v10777_v35 }
 0x120   :  { %v252_v37 = vpop.f32.mrf.mxu0 }
 0x121   :  { %324 = vst.msk [vmem:[#allocation2 + $0x10] sm:$0xff] %vm321_vm0, %v252_v37 }
 0x122   :  { %v13564_v38 = vld [vmem:[#allocation2 + $0x8] sm:$0xff]  ;;  %v10780_v39 = vpop.f32.mrf.mxu0 }
 0x123   :  { %v2456_v40 = vmul.f32 %v13561_v36, %v13564_v38  ;;  %327 = vst.msk [vmem:[#allocation2 + $0x28] sm:$0xff] %vm321_vm0, %v10780_v39  ;;  %v355_v34 = vmul.f32 2.0, %v13564_v38 }
 0x124   :  { %v13569_v41 = vld [vmem:[#allocation2] sm:$0xff]  ;;  %v262_v42 = vpop.f32.mrf.mxu0 }
 0x125   :  { %2472 = vst.msk [vmem:[#allocation3 + $0x8] sm:$0xff] %vm321_vm0, %v2456_v40  ;;  %v2455_v43 = vmul.f32 %v13561_v36, %v13569_v41  ;;  %326 = vst.msk [vmem:[#allocation2 + $0x20] sm:$0xff] %vm321_vm0, %v262_v42  ;;  %v354_v39 = vmul.f32 2.0, %v13569_v41 }
 0x126   :  { %v13575_v44 = vld [vmem:[#allocation2 + $0x18] sm:$0xff]  ;;  %v10783_v45 = vpop.f32.mrf.mxu0 }
 0x127   :  { %2471 = vst.msk [vmem:[#allocation3] sm:$0xff] %vm321_vm0, %v2455_v43  ;;  %v2458_v46 = vmul.f32 %v13561_v36, %v13575_v44  ;;  %329 = vst.msk [vmem:[#allocation2 + $0x38] sm:$0xff] %vm321_vm0, %v10783_v45  ;;  %v357_v43 = vmul.f32 2.0, %v13575_v44 }
 0x128   :  { %v13581_v47 = vld [vmem:[#allocation2 + $0x10] sm:$0xff]  ;;  %v272_v48 = vpop.f32.mrf.mxu0 }
 0x129   :  { %2474 = vst.msk [vmem:[#allocation3 + $0x18] sm:$0xff] %vm321_vm0, %v2458_v46  ;;  %v2457_v49 = vmul.f32 %v13561_v36, %v13581_v47  ;;  %328 = vst.msk [vmem:[#allocation2 + $0x30] sm:$0xff] %vm321_vm0, %v272_v48  ;;  %v356_v48 = vmul.f32 2.0, %v13581_v47 }
 0x12a   :  { %v13587_v50 = vld [vmem:[#allocation2 + $0x28] sm:$0xff]  ;;  %v10786_v51 = vpop.f32.mrf.mxu0 }
 0x12b   :  { %2473 = vst.msk [vmem:[#allocation3 + $0x10] sm:$0xff] %vm321_vm0, %v2457_v49  ;;  %v2460_v52 = vmul.f32 %v13561_v36, %v13587_v50  ;;  %331 = vst.msk [vmem:[#allocation2 + $0x48] sm:$0xff] %vm321_vm0, %v10786_v51  ;;  %v359_v51 = vmul.f32 2.0, %v13587_v50 }
 0x12c   :  { %v13593_v53 = vld [vmem:[#allocation2 + $0x20] sm:$0xff]  ;;  %v282_v54 = vpop.f32.mrf.mxu0 }
 0x12d   :  { %2476 = vst.msk [vmem:[#allocation3 + $0x28] sm:$0xff] %vm321_vm0, %v2460_v52  ;;  %v2459_v55 = vmul.f32 %v13561_v36, %v13593_v53  ;;  %330 = vst.msk [vmem:[#allocation2 + $0x40] sm:$0xff] %vm321_vm0, %v282_v54  ;;  %v358_v54 = vmul.f32 2.0, %v13593_v53 }
 0x12e   :  { %v13599_v56 = vld [vmem:[#allocation2 + $0x38] sm:$0xff]  ;;  %v10789_v57 = vpop.f32.mrf.mxu0 }
 0x12f   :  { %2475 = vst.msk [vmem:[#allocation3 + $0x20] sm:$0xff] %vm321_vm0, %v2459_v55  ;;  %v2462_v58 = vmul.f32 %v13561_v36, %v13599_v56  ;;  %333 = vst.msk [vmem:[#allocation2 + $0x58] sm:$0xff] %vm321_vm0, %v10789_v57  ;;  %v361_v57 = vmul.f32 2.0, %v13599_v56 }
 0x130   :  { %v13605_v59 = vld [vmem:[#allocation2 + $0x30] sm:$0xff]  ;;  %v292_v60 = vpop.f32.mrf.mxu0 }
 0x131   :  { %2478 = vst.msk [vmem:[#allocation3 + $0x38] sm:$0xff] %vm321_vm0, %v2462_v58  ;;  %v2461_v61 = vmul.f32 %v13561_v36, %v13605_v59  ;;  %332 = vst.msk [vmem:[#allocation2 + $0x50] sm:$0xff] %vm321_vm0, %v292_v60  ;;  %v360_v60 = vmul.f32 2.0, %v13605_v59 }
 0x132   :  { %v13611_v62 = vld [vmem:[#allocation2 + $0x48] sm:$0xff]  ;;  %v10792_v63 = vpop.f32.mrf.mxu0 }
 0x133   :  { %2477 = vst.msk [vmem:[#allocation3 + $0x30] sm:$0xff] %vm321_vm0, %v2461_v61  ;;  %v2464_v0 = vmul.f32 %v13561_v36, %v13611_v62  ;;  %335 = vst.msk [vmem:[#allocation2 + $0x68] sm:$0xff] %vm321_vm0, %v10792_v63  ;;  %v363_v63 = vmul.f32 2.0, %v13611_v62 }
 0x134   :  { %v13617_v1 = vld [vmem:[#allocation2 + $0x40] sm:$0xff]  ;;  %v302_v2 = vpop.f32.mrf.mxu0 }
 0x135   :  { %2480 = vst.msk [vmem:[#allocation3 + $0x48] sm:$0xff] %vm321_vm0, %v2464_v0  ;;  %v2463_v3 = vmul.f32 %v13561_v36, %v13617_v1  ;;  %334 = vst.msk [vmem:[#allocation2 + $0x60] sm:$0xff] %vm321_vm0, %v302_v2  ;;  %v362_v2 = vmul.f32 2.0, %v13617_v1 }
 0x136   :  { %v13623_v4 = vld [vmem:[#allocation2 + $0x58] sm:$0xff]  ;;  %v10795_v5 = vpop.f32.mrf.mxu0 }
 0x137   :  { %2479 = vst.msk [vmem:[#allocation3 + $0x40] sm:$0xff] %vm321_vm0, %v2463_v3  ;;  %v2466_v6 = vmul.f32 %v13561_v36, %v13623_v4  ;;  %337 = vst.msk [vmem:[#allocation2 + $0x78] sm:$0xff] %vm321_vm0, %v10795_v5  ;;  %v365_v5 = vmul.f32 2.0, %v13623_v4 }
 0x138   :  { %v13629_v7 = vld [vmem:[#allocation2 + $0x50] sm:$0xff]  ;;  %v312_v8 = vpop.f32.mrf.mxu0 }
 0x139   :  { %2482 = vst.msk [vmem:[#allocation3 + $0x58] sm:$0xff] %vm321_vm0, %v2466_v6  ;;  %v2465_v9 = vmul.f32 %v13561_v36, %v13629_v7  ;;  %336 = vst.msk [vmem:[#allocation2 + $0x70] sm:$0xff] %vm321_vm0, %v312_v8  ;;  %v364_v8 = vmul.f32 2.0, %v13629_v7 }
 0x13a   :  { %v13635_v10 = vld [vmem:[#allocation2 + $0x68] sm:$0xff] }
 0x13b   :  { %2481 = vst.msk [vmem:[#allocation3 + $0x50] sm:$0xff] %vm321_vm0, %v2465_v9  ;;  %v2468_v11 = vmul.f32 %v13561_v36, %v13635_v10 }
 0x13c   :  { %v13640_v12 = vld [vmem:[#allocation2 + $0x60] sm:$0xff] }
 0x13d   :  { %2484 = vst.msk [vmem:[#allocation3 + $0x68] sm:$0xff] %vm321_vm0, %v2468_v11  ;;  %v2467_v13 = vmul.f32 %v13561_v36, %v13640_v12  ;;  %v367_v11 = vmul.f32 2.0, %v13635_v10 }
 0x13e   :  { %v13645_v14 = vld [vmem:[#allocation2 + $0x78] sm:$0xff] }
 0x13f   :  { %2483 = vst.msk [vmem:[#allocation3 + $0x60] sm:$0xff] %vm321_vm0, %v2467_v13  ;;  %v2470_v15 = vmul.f32 %v13561_v36, %v13645_v14  ;;  %10796 = vmatprep.subr.mxu1 %v13645_v14 }
 0x140   :  { %v13651_v16 = vld [vmem:[#allocation2 + $0x70] sm:$0xff]  ;;  %10797 = vmatpush3.msra.mxu1 %v13645_v14 }
 0x141   :  { %2486 = vst.msk [vmem:[#allocation3 + $0x78] sm:$0xff] %vm321_vm0, %v2470_v15  ;;  %v2469_v17 = vmul.f32 %v13561_v36, %v13651_v16  ;;  %10798 = vmatprep.subr.mxu1 %v13651_v16  ;;  %v366_v15 = vmul.f32 2.0, %v13640_v12 }
 0x142   :  { %10799 = vmatpush3.msra.mxu1 %v13651_v16 }
 0x143   :  { %2485 = vst.msk [vmem:[#allocation3 + $0x70] sm:$0xff] %vm321_vm0, %v2469_v17  ;;  %10800 = vmatprep.subr.mxu1 %v13635_v10 }
 0x144   :  { %10801 = vmatpush3.msra.mxu1 %v13635_v10 }
 0x145   :  { %10802 = vmatprep.subr.mxu1 %v13640_v12 }
 0x146   :  { %10803 = vmatpush3.msra.mxu1 %v13640_v12 }
 0x147   :  { %10804 = vmatprep.subr.mxu1 %v13623_v4 }
 0x148   :  { %10805 = vmatpush3.msra.mxu1 %v13623_v4 }
 0x149   :  { %10806 = vmatprep.subr.mxu1 %v13629_v7 }
 0x14a   :  { %10807 = vmatpush3.msra.mxu1 %v13629_v7 }
 0x14b   :  { %10808 = vmatprep.subr.mxu1 %v13611_v62 }
 0x14c   :  { %10809 = vmatpush3.msra.mxu1 %v13611_v62 }
 0x14d   :  { %10810 = vmatprep.subr.mxu1 %v13617_v1 }
 0x14e   :  { %10811 = vmatpush3.msra.mxu1 %v13617_v1 }
 0x14f   :  { %10812 = vmatprep.subr.mxu1 %v13599_v56 }
 0x150   :  { %10813 = vmatpush3.msra.mxu1 %v13599_v56 }
 0x151   :  { %10814 = vmatprep.subr.mxu1 %v13605_v59 }
 0x152   :  { %10815 = vmatpush3.msra.mxu1 %v13605_v59 }
 0x153   :  { %10816 = vmatprep.subr.mxu1 %v13587_v50 }
 0x154   :  { %10817 = vmatpush3.msra.mxu1 %v13587_v50 }
 0x155   :  { %10818 = vmatprep.subr.mxu1 %v13593_v53 }
 0x156   :  { %10819 = vmatpush3.msra.mxu1 %v13593_v53 }
 0x157   :  { %10820 = vmatprep.subr.mxu1 %v13575_v44 }
 0x158   :  { %10821 = vmatpush3.msra.mxu1 %v13575_v44 }
 0x159   :  { %10822 = vmatprep.subr.mxu1 %v13581_v47 }
 0x15a   :  { %10823 = vmatpush3.msra.mxu1 %v13581_v47 }
 0x15b   :  { %10824 = vmatprep.subr.mxu1 %v13564_v38 }
 0x15c   :  { %10825 = vmatpush3.msra.mxu1 %v13564_v38 }
 0x15d   :  { %10826 = vmatprep.subr.mxu1 %v13569_v41 }
 0x15e   :  { %10827 = vmatpush3.msra.mxu1 %v13569_v41 }
 0x15f   :  { %10829 = vmatmul.mubr.f32.vlgmr.msra.gmra.mxu1 %v13686_v18 }
 0x160   :  { %10831 = vmatprep.mubr.f32.mxu1 %v13689_v19 }
 0x163   :  { %10832 = vmatmul.mubr.f32.gmra.mxu1 %v13694_v20 }
 0x164   :  { %10834 = vmatprep.mubr.f32.mxu1 %v13696_v21 }
 0x167   :  { %10835 = vmatmul.mubr.f32.gmra.mxu1 %v13700_v22 }
 0x168   :  { %10837 = vmatprep.mubr.f32.mxu1 %v13702_v23 }
 0x16b   :  { %10838 = vmatmul.mubr.f32.gmra.mxu1 %v13706_v24 }
 0x16c   :  { %10840 = vmatprep.mubr.f32.mxu1 %v13708_v25 }
 0x16f   :  { %10841 = vmatmul.mubr.f32.gmra.mxu1 %v13712_v26 }
 0x170   :  { %10843 = vmatprep.mubr.f32.mxu1 %v13714_v27 }
 0x173   :  { %10844 = vmatmul.mubr.f32.gmra.mxu1 %v13718_v28 }
 0x174   :  { %10846 = vmatprep.mubr.f32.mxu1 %v13720_v29 }
 0x177   :  { %10847 = vmatmul.mubr.f32.gmra.mxu1 %v13724_v30 }
 0x178   :  { %10849 = vmatprep.mubr.f32.mxu1 %v13726_v31 }
 0x17b   :  { %10850 = vmatmul.mubr.f32.gmra.mxu1 %v13730_v33 }
 0x17c   :  { %10940 = vmatprep.mubr.f32.mxu1 %v13553_v32 }
 0x21f   :  { %v10830_v35 = vpop.f32.mrf.mxu1 }
 0x220   :  { %v516_v37 = vsub.f32 %v355_v34, %v10830_v35  ;;  %v369_v34 = vmul.f32 2.0, %v13645_v14 }
 0x221   :  { %v436_v40 = vpop.f32.mrf.mxu1 }
 0x222   :  { %533 = vst.msk [vmem:[#allocation2 + $0x88] sm:$0xff] %vm321_vm0, %v516_v37  ;;  %v515_v42 = vsub.f32 %v354_v39, %v436_v40  ;;  %v368_v37 = vmul.f32 2.0, %v13651_v16 }
 0x223   :  { %v10833_v45 = vpop.f32.mrf.mxu1 }
 0x224   :  { %532 = vst.msk [vmem:[#allocation2 + $0x80] sm:$0xff] %vm321_vm0, %v515_v42  ;;  %v518_v46 = vsub.f32 %v357_v43, %v10833_v45 }
 0x225   :  { %v446_v49 = vpop.f32.mrf.mxu1 }
 0x226   :  { %535 = vst.msk [vmem:[#allocation2 + $0x98] sm:$0xff] %vm321_vm0, %v518_v46  ;;  %v517_v38 = vsub.f32 %v356_v48, %v446_v49 }
 0x227   :  { %v10836_v52 = vpop.f32.mrf.mxu1 }
 0x228   :  { %534 = vst.msk [vmem:[#allocation2 + $0x90] sm:$0xff] %vm321_vm0, %v517_v38  ;;  %v520_v41 = vsub.f32 %v359_v51, %v10836_v52 }
 0x229   :  { %v456_v55 = vpop.f32.mrf.mxu1 }
 0x22a   :  { %537 = vst.msk [vmem:[#allocation2 + $0xa8] sm:$0xff] %vm321_vm0, %v520_v41  ;;  %v519_v44 = vsub.f32 %v358_v54, %v456_v55  ;;  %v549_v54 = vld [vmem:[#allocation2 + $0x88] sm:$0xff] }
 0x22b   :  { %v10839_v58 = vpop.f32.mrf.mxu1  ;;  %v548_v55 = vld [vmem:[#allocation2 + $0x80] sm:$0xff] }
 0x22c   :  { %536 = vst.msk [vmem:[#allocation2 + $0xa0] sm:$0xff] %vm321_vm0, %v519_v44  ;;  %v522_v47 = vsub.f32 %v361_v57, %v10839_v58  ;;  %v565_v44 = vmul.f32 2.0, %v549_v54 }
 0x22d   :  { %v466_v61 = vpop.f32.mrf.mxu1  ;;  %v551_v52 = vld [vmem:[#allocation2 + $0x98] sm:$0xff] }
 0x22e   :  { %539 = vst.msk [vmem:[#allocation2 + $0xb8] sm:$0xff] %vm321_vm0, %v522_v47  ;;  %v521_v50 = vsub.f32 %v360_v60, %v466_v61  ;;  %v564_v47 = vmul.f32 2.0, %v548_v55 }
 0x22f   :  { %v10842_v0 = vpop.f32.mrf.mxu1  ;;  %v550_v41 = vld [vmem:[#allocation2 + $0x90] sm:$0xff] }
 0x230   :  { %538 = vst.msk [vmem:[#allocation2 + $0xb0] sm:$0xff] %vm321_vm0, %v521_v50  ;;  %v524_v53 = vsub.f32 %v363_v63, %v10842_v0  ;;  %v567_v50 = vmul.f32 2.0, %v551_v52 }
 0x231   :  { %v476_v3 = vpop.f32.mrf.mxu1  ;;  %v553_v38 = vld [vmem:[#allocation2 + $0xa8] sm:$0xff] }
 0x232   :  { %541 = vst.msk [vmem:[#allocation2 + $0xc8] sm:$0xff] %vm321_vm0, %v524_v53  ;;  %v523_v56 = vsub.f32 %v362_v2, %v476_v3  ;;  %v566_v53 = vmul.f32 2.0, %v550_v41 }
 0x233   :  { %v10845_v6 = vpop.f32.mrf.mxu1  ;;  %v552_v51 = vld [vmem:[#allocation2 + $0xa0] sm:$0xff] }
 0x234   :  { %540 = vst.msk [vmem:[#allocation2 + $0xc0] sm:$0xff] %vm321_vm0, %v523_v56  ;;  %v526_v59 = vsub.f32 %v365_v5, %v10845_v6  ;;  %v569_v56 = vmul.f32 2.0, %v553_v38 }
 0x235   :  { %v486_v9 = vpop.f32.mrf.mxu1  ;;  %v13798_v48 = vld [vmem:[#allocation2 + $0xb8] sm:$0xff] }
 0x236   :  { %543 = vst.msk [vmem:[#allocation2 + $0xd8] sm:$0xff] %vm321_vm0, %v526_v59  ;;  %v525_v62 = vsub.f32 %v364_v8, %v486_v9  ;;  %v568_v59 = vmul.f32 2.0, %v552_v51 }
 0x237   :  { %v10848_v13 = vpop.f32.mrf.mxu1  ;;  %v13802_v49 = vld [vmem:[#allocation2 + $0xb0] sm:$0xff] }
 0x238   :  { %542 = vst.msk [vmem:[#allocation2 + $0xd0] sm:$0xff] %vm321_vm0, %v525_v62  ;;  %v528_v1 = vsub.f32 %v367_v11, %v10848_v13  ;;  %v571_v62 = vmul.f32 2.0, %v13798_v48 }
 0x239   :  { %v496_v17 = vpop.f32.mrf.mxu1  ;;  %v13790_v45 = vld [vmem:[#allocation2 + $0xc8] sm:$0xff] }
 0x23a   :  { %545 = vst.msk [vmem:[#allocation2 + $0xe8] sm:$0xff] %vm321_vm0, %v528_v1  ;;  %v527_v4 = vsub.f32 %v366_v15, %v496_v17  ;;  %v570_v1 = vmul.f32 2.0, %v13802_v49 }
 0x23b   :  { %v10851_v35 = vpop.f32.mrf.mxu1  ;;  %v13794_v46 = vld [vmem:[#allocation2 + $0xc0] sm:$0xff] }
 0x23c   :  { %544 = vst.msk [vmem:[#allocation2 + $0xe0] sm:$0xff] %vm321_vm0, %v527_v4  ;;  %v530_v7 = vsub.f32 %v369_v34, %v10851_v35  ;;  %v573_v4 = vmul.f32 2.0, %v13790_v45 }
 0x23d   :  { %v506_v39 = vpop.f32.mrf.mxu1  ;;  %v13782_v42 = vld [vmem:[#allocation2 + $0xd8] sm:$0xff] }
 0x23e   :  { %547 = vst.msk [vmem:[#allocation2 + $0xf8] sm:$0xff] %vm321_vm0, %v530_v7  ;;  %v529_v10 = vsub.f32 %v368_v37, %v506_v39  ;;  %v572_v7 = vmul.f32 2.0, %v13794_v46 }
 0x23f   :  { %v13786_v43 = vld [vmem:[#allocation2 + $0xd0] sm:$0xff] }
 0x240   :  { %546 = vst.msk [vmem:[#allocation2 + $0xf0] sm:$0xff] %vm321_vm0, %v529_v10  ;;  %v575_v10 = vmul.f32 2.0, %v13782_v42 }
 0x241   :  { %v13774_v14 = vld [vmem:[#allocation2 + $0xe8] sm:$0xff] }
 0x243   :  { %v13778_v16 = vld [vmem:[#allocation2 + $0xe0] sm:$0xff] }
 0x245   :  { %v13766_v40 = vld [vmem:[#allocation2 + $0xf8] sm:$0xff] }
 0x246   :  { %10852 = vmatprep.subr.mxu0 %v13766_v40 }
 0x247   :  { %10853 = vmatpush3.msra.mxu0 %v13766_v40  ;;  %v13770_v12 = vld [vmem:[#allocation2 + $0xf0] sm:$0xff] }
 0x248   :  { %10854 = vmatprep.subr.mxu0 %v13770_v12 }
 0x249   :  { %10855 = vmatpush3.msra.mxu0 %v13770_v12 }
 0x24a   :  { %10856 = vmatprep.subr.mxu0 %v13774_v14 }
 0x24b   :  { %10857 = vmatpush3.msra.mxu0 %v13774_v14 }
 0x24c   :  { %10858 = vmatprep.subr.mxu0 %v13778_v16 }
 0x24d   :  { %10859 = vmatpush3.msra.mxu0 %v13778_v16 }
 0x24e   :  { %10860 = vmatprep.subr.mxu0 %v13782_v42 }
 0x24f   :  { %10861 = vmatpush3.msra.mxu0 %v13782_v42 }
 0x250   :  { %10862 = vmatprep.subr.mxu0 %v13786_v43 }
 0x251   :  { %10863 = vmatpush3.msra.mxu0 %v13786_v43 }
 0x252   :  { %10864 = vmatprep.subr.mxu0 %v13790_v45 }
 0x253   :  { %10865 = vmatpush3.msra.mxu0 %v13790_v45 }
 0x254   :  { %10866 = vmatprep.subr.mxu0 %v13794_v46 }
 0x255   :  { %10867 = vmatpush3.msra.mxu0 %v13794_v46 }
 0x256   :  { %10868 = vmatprep.subr.mxu0 %v13798_v48 }
 0x257   :  { %10869 = vmatpush3.msra.mxu0 %v13798_v48 }
 0x258   :  { %10870 = vmatprep.subr.mxu0 %v13802_v49 }
 0x259   :  { %10871 = vmatpush3.msra.mxu0 %v13802_v49 }
 0x25a   :  { %10872 = vmatprep.subr.mxu0 %v553_v38 }
 0x25b   :  { %10873 = vmatpush3.msra.mxu0 %v553_v38  ;;  %v574_v38 = vmul.f32 2.0, %v13786_v43 }
 0x25c   :  { %10874 = vmatprep.subr.mxu0 %v552_v51 }
 0x25d   :  { %10875 = vmatpush3.msra.mxu0 %v552_v51 }
 0x25e   :  { %10876 = vmatprep.subr.mxu0 %v551_v52 }
 0x25f   :  { %10877 = vmatpush3.msra.mxu0 %v551_v52  ;;  %v577_v52 = vmul.f32 2.0, %v13774_v14 }
 0x260   :  { %10878 = vmatprep.subr.mxu0 %v550_v41 }
 0x261   :  { %10879 = vmatpush3.msra.mxu0 %v550_v41 }
 0x262   :  { %10880 = vmatprep.subr.mxu0 %v549_v54 }
 0x263   :  { %10881 = vmatpush3.msra.mxu0 %v549_v54  ;;  %v576_v54 = vmul.f32 2.0, %v13778_v16 }
 0x264   :  { %10882 = vmatprep.subr.mxu0 %v548_v55 }
 0x265   :  { %10883 = vmatpush3.msra.mxu0 %v548_v55 }
 0x266   :  { %10885 = vmatmul.mubr.f32.vlgmr.msra.gmra.mxu0 %v13686_v18 }
 0x267   :  { %10887 = vmatprep.mubr.f32.mxu0 %v13689_v19 }
 0x26a   :  { %10888 = vmatmul.mubr.f32.gmra.mxu0 %v13694_v20 }
 0x26b   :  { %10890 = vmatprep.mubr.f32.mxu0 %v13696_v21 }
 0x26e   :  { %10891 = vmatmul.mubr.f32.gmra.mxu0 %v13700_v22 }
 0x26f   :  { %10893 = vmatprep.mubr.f32.mxu0 %v13702_v23 }
 0x272   :  { %10894 = vmatmul.mubr.f32.gmra.mxu0 %v13706_v24 }
 0x273   :  { %10896 = vmatprep.mubr.f32.mxu0 %v13708_v25 }
 0x276   :  { %10897 = vmatmul.mubr.f32.gmra.mxu0 %v13712_v26 }
 0x277   :  { %10899 = vmatprep.mubr.f32.mxu0 %v13714_v27 }
 0x27a   :  { %10900 = vmatmul.mubr.f32.gmra.mxu0 %v13718_v28 }
 0x27b   :  { %10902 = vmatprep.mubr.f32.mxu0 %v13720_v29 }
 0x27e   :  { %10903 = vmatmul.mubr.f32.gmra.mxu0 %v13724_v30 }
 0x27f   :  { %10905 = vmatprep.mubr.f32.mxu0 %v13726_v31 }
 0x282   :  { %10906 = vmatmul.mubr.f32.gmra.mxu0 %v13730_v33 }
 0x283   :  { %10996 = vmatprep.mubr.f32.mxu0 %v13553_v32 }
 0x326   :  { %v10886_v57 = vpop.f32.mrf.mxu0 }
 0x327   :  { %v726_v58 = vsub.f32 %v565_v44, %v10886_v57  ;;  %v579_v44 = vmul.f32 2.0, %v13766_v40 }
 0x328   :  { %v646_v60 = vpop.f32.mrf.mxu0 }
 0x329   :  { %743 = vst.msk [vmem:[#allocation2 + $0x108] sm:$0xff] %vm321_vm0, %v726_v58  ;;  %v725_v61 = vsub.f32 %v564_v47, %v646_v60  ;;  %v578_v58 = vmul.f32 2.0, %v13770_v12 }
 0x32a   :  { %v10889_v63 = vpop.f32.mrf.mxu0 }
 0x32b   :  { %742 = vst.msk [vmem:[#allocation2 + $0x100] sm:$0xff] %vm321_vm0, %v725_v61  ;;  %v728_v0 = vsub.f32 %v567_v50, %v10889_v63 }
 0x32c   :  { %v656_v2 = vpop.f32.mrf.mxu0 }
 0x32d   :  { %745 = vst.msk [vmem:[#allocation2 + $0x118] sm:$0xff] %vm321_vm0, %v728_v0  ;;  %v727_v3 = vsub.f32 %v566_v53, %v656_v2 }
 0x32e   :  { %v10892_v5 = vpop.f32.mrf.mxu0 }
 0x32f   :  { %744 = vst.msk [vmem:[#allocation2 + $0x110] sm:$0xff] %vm321_vm0, %v727_v3  ;;  %v730_v6 = vsub.f32 %v569_v56, %v10892_v5 }
 0x330   :  { %v666_v8 = vpop.f32.mrf.mxu0 }
 0x331   :  { %747 = vst.msk [vmem:[#allocation2 + $0x128] sm:$0xff] %vm321_vm0, %v730_v6  ;;  %v729_v9 = vsub.f32 %v568_v59, %v666_v8  ;;  %v759_v59 = vld [vmem:[#allocation2 + $0x108] sm:$0xff] }
 0x332   :  { %v10895_v11 = vpop.f32.mrf.mxu0  ;;  %v758_v8 = vld [vmem:[#allocation2 + $0x100] sm:$0xff] }
 0x333   :  { %746 = vst.msk [vmem:[#allocation2 + $0x120] sm:$0xff] %vm321_vm0, %v729_v9  ;;  %v732_v13 = vsub.f32 %v571_v62, %v10895_v11  ;;  %v775_v9 = vmul.f32 2.0, %v759_v59 }
 0x334   :  { %v676_v15 = vpop.f32.mrf.mxu0  ;;  %v761_v5 = vld [vmem:[#allocation2 + $0x118] sm:$0xff] }
 0x335   :  { %749 = vst.msk [vmem:[#allocation2 + $0x138] sm:$0xff] %vm321_vm0, %v732_v13  ;;  %v731_v17 = vsub.f32 %v570_v1, %v676_v15  ;;  %v774_v13 = vmul.f32 2.0, %v758_v8 }
 0x336   :  { %v10898_v34 = vpop.f32.mrf.mxu0  ;;  %v760_v6 = vld [vmem:[#allocation2 + $0x110] sm:$0xff] }
 0x337   :  { %748 = vst.msk [vmem:[#allocation2 + $0x130] sm:$0xff] %vm321_vm0, %v731_v17  ;;  %v734_v35 = vsub.f32 %v573_v4, %v10898_v34  ;;  %v777_v17 = vmul.f32 2.0, %v761_v5 }
 0x338   :  { %v686_v37 = vpop.f32.mrf.mxu0  ;;  %v763_v3 = vld [vmem:[#allocation2 + $0x128] sm:$0xff] }
 0x339   :  { %751 = vst.msk [vmem:[#allocation2 + $0x148] sm:$0xff] %vm321_vm0, %v734_v35  ;;  %v733_v39 = vsub.f32 %v572_v7, %v686_v37  ;;  %v776_v35 = vmul.f32 2.0, %v760_v6 }
 0x33a   :  { %v10901_v48 = vpop.f32.mrf.mxu0  ;;  %v762_v56 = vld [vmem:[#allocation2 + $0x120] sm:$0xff] }
 0x33b   :  { %750 = vst.msk [vmem:[#allocation2 + $0x140] sm:$0xff] %vm321_vm0, %v733_v39  ;;  %v736_v49 = vsub.f32 %v575_v10, %v10901_v48  ;;  %v779_v39 = vmul.f32 2.0, %v763_v3  ;;  %v778_v48 = vmul.f32 2.0, %v762_v56 }
 0x33c   :  { %v696_v51 = vpop.f32.mrf.mxu0  ;;  %v13880_v53 = vld [vmem:[#allocation2 + $0x138] sm:$0xff] }
 0x33d   :  { %753 = vst.msk [vmem:[#allocation2 + $0x158] sm:$0xff] %vm321_vm0, %v736_v49  ;;  %v735_v45 = vsub.f32 %v574_v38, %v696_v51  ;;  %v781_v51 = vmul.f32 2.0, %v13880_v53 }
 0x33e   :  { %v10904_v41 = vpop.f32.mrf.mxu0  ;;  %v13884_v2 = vld [vmem:[#allocation2 + $0x130] sm:$0xff] }
 0x33f   :  { %752 = vst.msk [vmem:[#allocation2 + $0x150] sm:$0xff] %vm321_vm0, %v735_v45  ;;  %v738_v46 = vsub.f32 %v577_v52, %v10904_v41  ;;  %v780_v41 = vmul.f32 2.0, %v13884_v2 }
 0x340   :  { %v706_v55 = vpop.f32.mrf.mxu0  ;;  %v13872_v63 = vld [vmem:[#allocation2 + $0x148] sm:$0xff] }
 0x341   :  { %755 = vst.msk [vmem:[#allocation2 + $0x168] sm:$0xff] %vm321_vm0, %v738_v46  ;;  %v737_v42 = vsub.f32 %v576_v54, %v706_v55  ;;  %v783_v55 = vmul.f32 2.0, %v13872_v63 }
 0x342   :  { %v10907_v57 = vpop.f32.mrf.mxu0  ;;  %v13876_v0 = vld [vmem:[#allocation2 + $0x140] sm:$0xff] }
 0x343   :  { %754 = vst.msk [vmem:[#allocation2 + $0x160] sm:$0xff] %vm321_vm0, %v737_v42  ;;  %v740_v43 = vsub.f32 %v579_v44, %v10907_v57  ;;  %v782_v57 = vmul.f32 2.0, %v13876_v0 }
 0x344   :  { %v716_v47 = vpop.f32.mrf.mxu0  ;;  %v13864_v61 = vld [vmem:[#allocation2 + $0x158] sm:$0xff] }
 0x345   :  { %757 = vst.msk [vmem:[#allocation2 + $0x178] sm:$0xff] %vm321_vm0, %v740_v43  ;;  %v739_v14 = vsub.f32 %v578_v58, %v716_v47  ;;  %v785_v47 = vmul.f32 2.0, %v13864_v61 }
 0x346   :  { %v13868_v50 = vld [vmem:[#allocation2 + $0x150] sm:$0xff] }
 0x347   :  { %756 = vst.msk [vmem:[#allocation2 + $0x170] sm:$0xff] %vm321_vm0, %v739_v14 }
 0x348   :  { %v13856_v40 = vld [vmem:[#allocation2 + $0x168] sm:$0xff] }
 0x34a   :  { %v13860_v12 = vld [vmem:[#allocation2 + $0x160] sm:$0xff] }
 0x34c   :  { %v13848_v60 = vld [vmem:[#allocation2 + $0x178] sm:$0xff] }
 0x34d   :  { %10908 = vmatprep.subr.mxu1 %v13848_v60 }
 0x34e   :  { %10909 = vmatpush3.msra.mxu1 %v13848_v60  ;;  %v13852_v16 = vld [vmem:[#allocation2 + $0x170] sm:$0xff] }
 0x34f   :  { %10910 = vmatprep.subr.mxu1 %v13852_v16 }
 0x350   :  { %10911 = vmatpush3.msra.mxu1 %v13852_v16 }
 0x351   :  { %10912 = vmatprep.subr.mxu1 %v13856_v40 }
 0x352   :  { %10913 = vmatpush3.msra.mxu1 %v13856_v40 }
 0x353   :  { %10914 = vmatprep.subr.mxu1 %v13860_v12 }
 0x354   :  { %10915 = vmatpush3.msra.mxu1 %v13860_v12 }
 0x355   :  { %10916 = vmatprep.subr.mxu1 %v13864_v61 }
 0x356   :  { %10917 = vmatpush3.msra.mxu1 %v13864_v61 }
 0x357   :  { %10918 = vmatprep.subr.mxu1 %v13868_v50 }
 0x358   :  { %10919 = vmatpush3.msra.mxu1 %v13868_v50 }
 0x359   :  { %10920 = vmatprep.subr.mxu1 %v13872_v63 }
 0x35a   :  { %10921 = vmatpush3.msra.mxu1 %v13872_v63 }
 0x35b   :  { %10922 = vmatprep.subr.mxu1 %v13876_v0 }
 0x35c   :  { %10923 = vmatpush3.msra.mxu1 %v13876_v0 }
 0x35d   :  { %10924 = vmatprep.subr.mxu1 %v13880_v53 }
 0x35e   :  { %10925 = vmatpush3.msra.mxu1 %v13880_v53 }
 0x35f   :  { %10926 = vmatprep.subr.mxu1 %v13884_v2 }
 0x360   :  { %10927 = vmatpush3.msra.mxu1 %v13884_v2  ;;  %v784_v2 = vmul.f32 2.0, %v13868_v50 }
 0x361   :  { %10928 = vmatprep.subr.mxu1 %v763_v3 }
 0x362   :  { %10929 = vmatpush3.msra.mxu1 %v763_v3 }
 0x363   :  { %10930 = vmatprep.subr.mxu1 %v762_v56 }
 0x364   :  { %10931 = vmatpush3.msra.mxu1 %v762_v56  ;;  %v787_v56 = vmul.f32 2.0, %v13856_v40 }
 0x365   :  { %10932 = vmatprep.subr.mxu1 %v761_v5 }
 0x366   :  { %10933 = vmatpush3.msra.mxu1 %v761_v5 }
 0x367   :  { %10934 = vmatprep.subr.mxu1 %v760_v6 }
 0x368   :  { %10935 = vmatpush3.msra.mxu1 %v760_v6  ;;  %v786_v6 = vmul.f32 2.0, %v13860_v12 }
 0x369   :  { %10936 = vmatprep.subr.mxu1 %v759_v59 }
 0x36a   :  { %10937 = vmatpush3.msra.mxu1 %v759_v59 }
 0x36b   :  { %10938 = vmatprep.subr.mxu1 %v758_v8 }
 0x36c   :  { %10939 = vmatpush3.msra.mxu1 %v758_v8  ;;  %v789_v8 = vmul.f32 2.0, %v13848_v60 }
 0x36d   :  { %10941 = vmatmul.mubr.f32.vlgmr.msra.gmra.mxu1 %v13686_v18 }
 0x36e   :  { %10943 = vmatprep.mubr.f32.mxu1 %v13689_v19 }
 0x371   :  { %10944 = vmatmul.mubr.f32.gmra.mxu1 %v13694_v20 }
 0x372   :  { %10946 = vmatprep.mubr.f32.mxu1 %v13696_v21 }
 0x375   :  { %10947 = vmatmul.mubr.f32.gmra.mxu1 %v13700_v22 }
 0x376   :  { %10949 = vmatprep.mubr.f32.mxu1 %v13702_v23 }
 0x379   :  { %10950 = vmatmul.mubr.f32.gmra.mxu1 %v13706_v24 }
 0x37a   :  { %10952 = vmatprep.mubr.f32.mxu1 %v13708_v25 }
 0x37d   :  { %10953 = vmatmul.mubr.f32.gmra.mxu1 %v13712_v26 }
 0x37e   :  { %10955 = vmatprep.mubr.f32.mxu1 %v13714_v27 }
 0x381   :  { %10956 = vmatmul.mubr.f32.gmra.mxu1 %v13718_v28 }
 0x382   :  { %10958 = vmatprep.mubr.f32.mxu1 %v13720_v29 }
 0x385   :  { %10959 = vmatmul.mubr.f32.gmra.mxu1 %v13724_v30 }
 0x386   :  { %10961 = vmatprep.mubr.f32.mxu1 %v13726_v31 }
 0x389   :  { %10962 = vmatmul.mubr.f32.gmra.mxu1 %v13730_v33 }
 0x38a   :  { %11052 = vmatprep.mubr.f32.mxu1 %v13553_v32 }
 0x42d   :  { %v10942_v62 = vpop.f32.mrf.mxu1 }
 0x42e   :  { %v936_v11 = vsub.f32 %v775_v9, %v10942_v62  ;;  %v788_v62 = vmul.f32 2.0, %v13852_v16 }
 0x42f   :  { %v856_v1 = vpop.f32.mrf.mxu1 }
 0x430   :  { %953 = vst.msk [vmem:[#allocation2 + $0x188] sm:$0xff] %vm321_vm0, %v936_v11  ;;  %v935_v15 = vsub.f32 %v774_v13, %v856_v1 }
 0x431   :  { %v10945_v4 = vpop.f32.mrf.mxu1 }
 0x432   :  { %952 = vst.msk [vmem:[#allocation2 + $0x180] sm:$0xff] %vm321_vm0, %v935_v15  ;;  %v938_v34 = vsub.f32 %v777_v17, %v10945_v4 }
 0x433   :  { %v866_v7 = vpop.f32.mrf.mxu1 }
 0x434   :  { %955 = vst.msk [vmem:[#allocation2 + $0x198] sm:$0xff] %vm321_vm0, %v938_v34  ;;  %v937_v37 = vsub.f32 %v776_v35, %v866_v7 }
 0x435   :  { %v10948_v32 = vpop.f32.mrf.mxu1 }
 0x436   :  { %954 = vst.msk [vmem:[#allocation2 + $0x190] sm:$0xff] %vm321_vm0, %v937_v37  ;;  %v940_v10 = vsub.f32 %v779_v39, %v10948_v32 }
 0x437   :  { %v876_v49 = vpop.f32.mrf.mxu1 }
 0x438   :  { %957 = vst.msk [vmem:[#allocation2 + $0x1a8] sm:$0xff] %vm321_vm0, %v940_v10  ;;  %v939_v38 = vsub.f32 %v778_v48, %v876_v49  ;;  %v969_v10 = vld [vmem:[#allocation2 + $0x188] sm:$0xff] }
 0x439   :  { %v10951_v45 = vpop.f32.mrf.mxu1  ;;  %v968_v48 = vld [vmem:[#allocation2 + $0x180] sm:$0xff] }
 0x43a   :  { %956 = vst.msk [vmem:[#allocation2 + $0x1a0] sm:$0xff] %vm321_vm0, %v939_v38  ;;  %v942_v52 = vsub.f32 %v781_v51, %v10951_v45 }
 0x43b   :  { %v886_v46 = vpop.f32.mrf.mxu1  ;;  %v971_v39 = vld [vmem:[#allocation2 + $0x198] sm:$0xff] }
 0x43c   :  { %959 = vst.msk [vmem:[#allocation2 + $0x1b8] sm:$0xff] %vm321_vm0, %v942_v52  ;;  %v941_v54 = vsub.f32 %v780_v41, %v886_v46 }
 0x43d   :  { %v10954_v42 = vpop.f32.mrf.mxu1  ;;  %v970_v32 = vld [vmem:[#allocation2 + $0x190] sm:$0xff] }
 0x43e   :  { %958 = vst.msk [vmem:[#allocation2 + $0x1b0] sm:$0xff] %vm321_vm0, %v941_v54  ;;  %v944_v44 = vsub.f32 %v783_v55, %v10954_v42 }
 0x43f   :  { %v896_v43 = vpop.f32.mrf.mxu1  ;;  %v973_v7 = vld [vmem:[#allocation2 + $0x1a8] sm:$0xff] }
 0x440   :  { %961 = vst.msk [vmem:[#allocation2 + $0x1c8] sm:$0xff] %vm321_vm0, %v944_v44  ;;  %v943_v58 = vsub.f32 %v782_v57, %v896_v43 }
 0x441   :  { %v10957_v14 = vpop.f32.mrf.mxu1  ;;  %v972_v37 = vld [vmem:[#allocation2 + $0x1a0] sm:$0xff] }
 0x442   :  { %960 = vst.msk [vmem:[#allocation2 + $0x1c0] sm:$0xff] %vm321_vm0, %v943_v58  ;;  %v946_v53 = vsub.f32 %v785_v47, %v10957_v14  ;;  %v988_v38 = vmul.f32 2.0, %v972_v37 }
 0x443   :  { %v906_v3 = vpop.f32.mrf.mxu1  ;;  %v13962_v34 = vld [vmem:[#allocation2 + $0x1b8] sm:$0xff] }
 0x444   :  { %963 = vst.msk [vmem:[#allocation2 + $0x1d8] sm:$0xff] %vm321_vm0, %v946_v53  ;;  %v945_v63 = vsub.f32 %v784_v2, %v906_v3  ;;  %v991_v52 = vmul.f32 2.0, %v13962_v34 }
 0x445   :  { %v10960_v5 = vpop.f32.mrf.mxu1  ;;  %v13966_v35 = vld [vmem:[#allocation2 + $0x1b0] sm:$0xff] }
 0x446   :  { %962 = vst.msk [vmem:[#allocation2 + $0x1d0] sm:$0xff] %vm321_vm0, %v945_v63  ;;  %v948_v0 = vsub.f32 %v787_v56, %v10960_v5  ;;  %v990_v54 = vmul.f32 2.0, %v13966_v35 }
 0x447   :  { %v916_v59 = vpop.f32.mrf.mxu1  ;;  %v13954_v17 = vld [vmem:[#allocation2 + $0x1c8] sm:$0xff] }
 0x448   :  { %965 = vst.msk [vmem:[#allocation2 + $0x1e8] sm:$0xff] %vm321_vm0, %v948_v0  ;;  %v947_v61 = vsub.f32 %v786_v6, %v916_v59  ;;  %v993_v44 = vmul.f32 2.0, %v13954_v17 }
 0x449   :  { %v10963_v9 = vpop.f32.mrf.mxu1  ;;  %v13958_v4 = vld [vmem:[#allocation2 + $0x1c0] sm:$0xff] }
 0x44a   :  { %964 = vst.msk [vmem:[#allocation2 + $0x1e0] sm:$0xff] %vm321_vm0, %v947_v61  ;;  %v950_v50 = vsub.f32 %v789_v8, %v10963_v9  ;;  %v992_v58 = vmul.f32 2.0, %v13958_v4 }
 0x44b   :  { %v926_v11 = vpop.f32.mrf.mxu1  ;;  %v13946_v1 = vld [vmem:[#allocation2 + $0x1d8] sm:$0xff] }
 0x44c   :  { %967 = vst.msk [vmem:[#allocation2 + $0x1f8] sm:$0xff] %vm321_vm0, %v950_v50  ;;  %v949_v40 = vsub.f32 %v788_v62, %v926_v11  ;;  %v995_v53 = vmul.f32 2.0, %v13946_v1 }
 0x44d   :  { %v13950_v15 = vld [vmem:[#allocation2 + $0x1d0] sm:$0xff] }
 0x44e   :  { %966 = vst.msk [vmem:[#allocation2 + $0x1f0] sm:$0xff] %vm321_vm0, %v949_v40  ;;  %v994_v63 = vmul.f32 2.0, %v13950_v15 }
 0x44f   :  { %v13938_v60 = vld [vmem:[#allocation2 + $0x1e8] sm:$0xff] }
 0x450   :  { %v997_v0 = vmul.f32 2.0, %v13938_v60 }
 0x451   :  { %v13942_v16 = vld [vmem:[#allocation2 + $0x1e0] sm:$0xff] }
 0x452   :  { %v996_v61 = vmul.f32 2.0, %v13942_v16 }
 0x453   :  { %v13930_v13 = vld [vmem:[#allocation2 + $0x1f8] sm:$0xff] }
 0x454   :  { %10964 = vmatprep.subr.mxu0 %v13930_v13  ;;  %v999_v50 = vmul.f32 2.0, %v13930_v13 }
 0x455   :  { %10965 = vmatpush3.msra.mxu0 %v13930_v13  ;;  %v13934_v12 = vld [vmem:[#allocation2 + $0x1f0] sm:$0xff] }
 0x456   :  { %10966 = vmatprep.subr.mxu0 %v13934_v12  ;;  %v998_v40 = vmul.f32 2.0, %v13934_v12 }
 0x457   :  { %10967 = vmatpush3.msra.mxu0 %v13934_v12 }
 0x458   :  { %10968 = vmatprep.subr.mxu0 %v13938_v60 }
 0x459   :  { %10969 = vmatpush3.msra.mxu0 %v13938_v60 }
 0x45a   :  { %10970 = vmatprep.subr.mxu0 %v13942_v16 }
 0x45b   :  { %10971 = vmatpush3.msra.mxu0 %v13942_v16 }
 0x45c   :  { %10972 = vmatprep.subr.mxu0 %v13946_v1 }
 0x45d   :  { %10973 = vmatpush3.msra.mxu0 %v13946_v1 }
 0x45e   :  { %10974 = vmatprep.subr.mxu0 %v13950_v15 }
 0x45f   :  { %10975 = vmatpush3.msra.mxu0 %v13950_v15 }
 0x460   :  { %10976 = vmatprep.subr.mxu0 %v13954_v17 }
 0x461   :  { %10977 = vmatpush3.msra.mxu0 %v13954_v17 }
 0x462   :  { %10978 = vmatprep.subr.mxu0 %v13958_v4 }
 0x463   :  { %10979 = vmatpush3.msra.mxu0 %v13958_v4 }
 0x464   :  { %10980 = vmatprep.subr.mxu0 %v13962_v34 }
 0x465   :  { %10981 = vmatpush3.msra.mxu0 %v13962_v34 }
 0x466   :  { %10982 = vmatprep.subr.mxu0 %v13966_v35 }
 0x467   :  { %10983 = vmatpush3.msra.mxu0 %v13966_v35 }
 0x468   :  { %10984 = vmatprep.subr.mxu0 %v973_v7 }
 0x469   :  { %10985 = vmatpush3.msra.mxu0 %v973_v7 }
 0x46a   :  { %10986 = vmatprep.subr.mxu0 %v972_v37 }
 0x46b   :  { %10987 = vmatpush3.msra.mxu0 %v972_v37 }
 0x46c   :  { %10988 = vmatprep.subr.mxu0 %v971_v39 }
 0x46d   :  { %10989 = vmatpush3.msra.mxu0 %v971_v39 }
 0x46e   :  { %10990 = vmatprep.subr.mxu0 %v970_v32 }
 0x46f   :  { %10991 = vmatpush3.msra.mxu0 %v970_v32 }
 0x470   :  { %10992 = vmatprep.subr.mxu0 %v969_v10 }
 0x471   :  { %10993 = vmatpush3.msra.mxu0 %v969_v10 }
 0x472   :  { %10994 = vmatprep.subr.mxu0 %v968_v48 }
 0x473   :  { %10995 = vmatpush3.msra.mxu0 %v968_v48 }
 0x474   :  { %10997 = vmatmul.mubr.f32.vlgmr.msra.gmra.mxu0 %v13686_v18  ;;  %v13985_v18 = vld [vmem:[#allocation9] sm:$0xff] }
 0x475   :  { %10999 = vmatprep.mubr.f32.mxu0 %v13689_v19  ;;  %v985_v19 = vmul.f32 2.0, %v969_v10 }
 0x478   :  { %11000 = vmatmul.mubr.f32.gmra.mxu0 %v13694_v20 }
 0x479   :  { %11002 = vmatprep.mubr.f32.mxu0 %v13696_v21 }
 0x47c   :  { %11003 = vmatmul.mubr.f32.gmra.mxu0 %v13700_v22  ;;  %v984_v22 = vmul.f32 2.0, %v968_v48 }
 0x47d   :  { %11005 = vmatprep.mubr.f32.mxu0 %v13702_v23 }
 0x480   :  { %11006 = vmatmul.mubr.f32.gmra.mxu0 %v13706_v24 }
 0x481   :  { %11008 = vmatprep.mubr.f32.mxu0 %v13708_v25  ;;  %v987_v25 = vmul.f32 2.0, %v971_v39 }
 0x484   :  { %11009 = vmatmul.mubr.f32.gmra.mxu0 %v13712_v26 }
 0x485   :  { %11011 = vmatprep.mubr.f32.mxu0 %v13714_v27 }
 0x488   :  { %11012 = vmatmul.mubr.f32.gmra.mxu0 %v13718_v28  ;;  %v986_v28 = vmul.f32 2.0, %v970_v32 }
 0x489   :  { %11014 = vmatprep.mubr.f32.mxu0 %v13720_v29 }
 0x48c   :  { %11015 = vmatmul.mubr.f32.gmra.mxu0 %v13724_v30 }
 0x48d   :  { %11017 = vmatprep.mubr.f32.mxu0 %v13726_v31  ;;  %v989_v31 = vmul.f32 2.0, %v973_v7 }
 0x490   :  { %11018 = vmatmul.mubr.f32.gmra.mxu0 %v13730_v33 }
 0x491   :  { %11108 = vmatprep.mubr.f32.mxu0 %v13985_v18 }
 0x534   :  { %v10998_v20 = vpop.f32.mrf.mxu0 }
 0x535   :  { %v1146_v21 = vsub.f32 %v985_v19, %v10998_v20 }
 0x536   :  { %v1066_v23 = vpop.f32.mrf.mxu0 }
 0x537   :  { %1163 = vst.msk [vmem:[#allocation2 + $0x208] sm:$0xff] %vm321_vm0, %v1146_v21  ;;  %v1145_v24 = vsub.f32 %v984_v22, %v1066_v23  ;;  %v14062_v21 = vld [vmem:[#allocation9 + $0x8] sm:$0xff]  ;;  %v14065_v22 = vld [vmem:[#allocation9 + $0x10] sm:$0xff]  ;;  %v14068_v23 = vld [vmem:[#allocation9 + $0x18] sm:$0xff] }
 0x538   :  { %v11001_v26 = vpop.f32.mrf.mxu0 }
 0x539   :  { %1162 = vst.msk [vmem:[#allocation2 + $0x200] sm:$0xff] %vm321_vm0, %v1145_v24  ;;  %v1148_v27 = vsub.f32 %v987_v25, %v11001_v26  ;;  %v14071_v24 = vld [vmem:[#allocation9 + $0x20] sm:$0xff]  ;;  %v14074_v25 = vld [vmem:[#allocation9 + $0x28] sm:$0xff]  ;;  %v14077_v26 = vld [vmem:[#allocation9 + $0x30] sm:$0xff] }
 0x53a   :  { %v1076_v29 = vpop.f32.mrf.mxu0 }
 0x53b   :  { %1165 = vst.msk [vmem:[#allocation2 + $0x218] sm:$0xff] %vm321_vm0, %v1148_v27  ;;  %v1147_v30 = vsub.f32 %v986_v28, %v1076_v29  ;;  %v14080_v27 = vld [vmem:[#allocation9 + $0x38] sm:$0xff]  ;;  %v14083_v28 = vld [vmem:[#allocation9 + $0x40] sm:$0xff]  ;;  %v14086_v29 = vld [vmem:[#allocation9 + $0x48] sm:$0xff] }
 0x53c   :  { %v11004_v33 = vpop.f32.mrf.mxu0 }
 0x53d   :  { %1164 = vst.msk [vmem:[#allocation2 + $0x210] sm:$0xff] %vm321_vm0, %v1147_v30  ;;  %v1150_v49 = vsub.f32 %v989_v31, %v11004_v33  ;;  %v14089_v30 = vld [vmem:[#allocation9 + $0x50] sm:$0xff]  ;;  %v14092_v31 = vld [vmem:[#allocation9 + $0x58] sm:$0xff]  ;;  %v14095_v33 = vld [vmem:[#allocation9 + $0x60] sm:$0xff] }
 0x53e   :  { %v1086_v51 = vpop.f32.mrf.mxu0  ;;  %v1179_v19 = vld [vmem:[#allocation2 + $0x208] sm:$0xff] }
 0x53f   :  { %1167 = vst.msk [vmem:[#allocation2 + $0x228] sm:$0xff] %vm321_vm0, %v1150_v49  ;;  %v1149_v45 = vsub.f32 %v988_v38, %v1086_v51  ;;  %v14098_v49 = vld [vmem:[#allocation9 + $0x68] sm:$0xff]  ;;  %v14101_v38 = vld [vmem:[#allocation9 + $0x70] sm:$0xff]  ;;  %v14104_v51 = vld [vmem:[#allocation9 + $0x78] sm:$0xff] }
 0x540   :  { %v11007_v41 = vpop.f32.mrf.mxu0  ;;  %v1178_v20 = vld [vmem:[#allocation2 + $0x200] sm:$0xff] }
 0x541   :  { %1166 = vst.msk [vmem:[#allocation2 + $0x220] sm:$0xff] %vm321_vm0, %v1149_v45  ;;  %v1152_v46 = vsub.f32 %v991_v52, %v11007_v41  ;;  %v1195_v45 = vmul.f32 2.0, %v1179_v19 }
 0x542   :  { %v1096_v55 = vpop.f32.mrf.mxu0  ;;  %v1181_v10 = vld [vmem:[#allocation2 + $0x218] sm:$0xff] }
 0x543   :  { %1169 = vst.msk [vmem:[#allocation2 + $0x238] sm:$0xff] %vm321_vm0, %v1152_v46  ;;  %v1151_v42 = vsub.f32 %v990_v54, %v1096_v55  ;;  %v1194_v46 = vmul.f32 2.0, %v1178_v20 }
 0x544   :  { %v11010_v57 = vpop.f32.mrf.mxu0  ;;  %v1180_v48 = vld [vmem:[#allocation2 + $0x210] sm:$0xff] }
 0x545   :  { %1168 = vst.msk [vmem:[#allocation2 + $0x230] sm:$0xff] %vm321_vm0, %v1151_v42  ;;  %v1154_v43 = vsub.f32 %v993_v44, %v11010_v57  ;;  %v1197_v42 = vmul.f32 2.0, %v1181_v10 }
 0x546   :  { %v1106_v47 = vpop.f32.mrf.mxu0  ;;  %v14054_v39 = vld [vmem:[#allocation2 + $0x228] sm:$0xff] }
 0x547   :  { %1171 = vst.msk [vmem:[#allocation2 + $0x248] sm:$0xff] %vm321_vm0, %v1154_v43  ;;  %v1153_v14 = vsub.f32 %v992_v58, %v1106_v47  ;;  %v1196_v43 = vmul.f32 2.0, %v1180_v48 }
 0x548   :  { %v11013_v2 = vpop.f32.mrf.mxu0  ;;  %v14058_v32 = vld [vmem:[#allocation2 + $0x220] sm:$0xff] }
 0x549   :  { %1170 = vst.msk [vmem:[#allocation2 + $0x240] sm:$0xff] %vm321_vm0, %v1153_v14  ;;  %v1156_v3 = vsub.f32 %v995_v53, %v11013_v2  ;;  %v1199_v14 = vmul.f32 2.0, %v14054_v39 }
 0x54a   :  { %v1116_v56 = vpop.f32.mrf.mxu0  ;;  %v14046_v7 = vld [vmem:[#allocation2 + $0x238] sm:$0xff] }
 0x54b   :  { %1173 = vst.msk [vmem:[#allocation2 + $0x258] sm:$0xff] %vm321_vm0, %v1156_v3  ;;  %v1155_v5 = vsub.f32 %v994_v63, %v1116_v56  ;;  %v1198_v3 = vmul.f32 2.0, %v14058_v32 }
 0x54c   :  { %v11016_v6 = vpop.f32.mrf.mxu0  ;;  %v14050_v37 = vld [vmem:[#allocation2 + $0x230] sm:$0xff] }
 0x54d   :  { %1172 = vst.msk [vmem:[#allocation2 + $0x250] sm:$0xff] %vm321_vm0, %v1155_v5  ;;  %v1158_v59 = vsub.f32 %v997_v0, %v11016_v6  ;;  %v1201_v5 = vmul.f32 2.0, %v14046_v7 }
 0x54e   :  { %v1126_v8 = vpop.f32.mrf.mxu0  ;;  %v14038_v34 = vld [vmem:[#allocation2 + $0x248] sm:$0xff] }
 0x54f   :  { %1175 = vst.msk [vmem:[#allocation2 + $0x268] sm:$0xff] %vm321_vm0, %v1158_v59  ;;  %v1157_v9 = vsub.f32 %v996_v61, %v1126_v8  ;;  %v1200_v59 = vmul.f32 2.0, %v14050_v37 }
 0x550   :  { %v11019_v62 = vpop.f32.mrf.mxu0  ;;  %v14042_v35 = vld [vmem:[#allocation2 + $0x240] sm:$0xff] }
 0x551   :  { %1174 = vst.msk [vmem:[#allocation2 + $0x260] sm:$0xff] %vm321_vm0, %v1157_v9  ;;  %v1160_v11 = vsub.f32 %v999_v50, %v11019_v62  ;;  %v1203_v9 = vmul.f32 2.0, %v14038_v34 }
 0x552   :  { %v1136_v1 = vpop.f32.mrf.mxu0  ;;  %v14030_v17 = vld [vmem:[#allocation2 + $0x258] sm:$0xff] }
 0x553   :  { %1177 = vst.msk [vmem:[#allocation2 + $0x278] sm:$0xff] %vm321_vm0, %v1160_v11  ;;  %v1159_v60 = vsub.f32 %v998_v40, %v1136_v1  ;;  %v1202_v11 = vmul.f32 2.0, %v14042_v35 }
 0x554   :  { %v14034_v4 = vld [vmem:[#allocation2 + $0x250] sm:$0xff] }
 0x555   :  { %1176 = vst.msk [vmem:[#allocation2 + $0x270] sm:$0xff] %vm321_vm0, %v1159_v60  ;;  %v1205_v60 = vmul.f32 2.0, %v14030_v17 }
 0x556   :  { %v14022_v13 = vld [vmem:[#allocation2 + $0x268] sm:$0xff] }
 0x558   :  { %v14026_v12 = vld [vmem:[#allocation2 + $0x260] sm:$0xff] }
 0x55a   :  { %v14014_v15 = vld [vmem:[#allocation2 + $0x278] sm:$0xff] }
 0x55b   :  { %11020 = vmatprep.subr.mxu1 %v14014_v15 }
 0x55c   :  { %11021 = vmatpush3.msra.mxu1 %v14014_v15  ;;  %v14018_v16 = vld [vmem:[#allocation2 + $0x270] sm:$0xff] }
 0x55d   :  { %11022 = vmatprep.subr.mxu1 %v14018_v16 }
 0x55e   :  { %11023 = vmatpush3.msra.mxu1 %v14018_v16 }
 0x55f   :  { %11024 = vmatprep.subr.mxu1 %v14022_v13 }
 0x560   :  { %11025 = vmatpush3.msra.mxu1 %v14022_v13 }
 0x561   :  { %11026 = vmatprep.subr.mxu1 %v14026_v12 }
 0x562   :  { %11027 = vmatpush3.msra.mxu1 %v14026_v12 }
 0x563   :  { %11028 = vmatprep.subr.mxu1 %v14030_v17 }
 0x564   :  { %11029 = vmatpush3.msra.mxu1 %v14030_v17 }
 0x565   :  { %11030 = vmatprep.subr.mxu1 %v14034_v4 }
 0x566   :  { %11031 = vmatpush3.msra.mxu1 %v14034_v4 }
 0x567   :  { %11032 = vmatprep.subr.mxu1 %v14038_v34 }
 0x568   :  { %11033 = vmatpush3.msra.mxu1 %v14038_v34 }
 0x569   :  { %11034 = vmatprep.subr.mxu1 %v14042_v35 }
 0x56a   :  { %11035 = vmatpush3.msra.mxu1 %v14042_v35 }
 0x56b   :  { %11036 = vmatprep.subr.mxu1 %v14046_v7 }
 0x56c   :  { %11037 = vmatpush3.msra.mxu1 %v14046_v7 }
 0x56d   :  { %11038 = vmatprep.subr.mxu1 %v14050_v37 }
 0x56e   :  { %11039 = vmatpush3.msra.mxu1 %v14050_v37 }
 0x56f   :  { %11040 = vmatprep.subr.mxu1 %v14054_v39 }
 0x570   :  { %11041 = vmatpush3.msra.mxu1 %v14054_v39  ;;  %v1204_v39 = vmul.f32 2.0, %v14034_v4 }
 0x571   :  { %11042 = vmatprep.subr.mxu1 %v14058_v32 }
 0x572   :  { %11043 = vmatpush3.msra.mxu1 %v14058_v32 }
 0x573   :  { %11044 = vmatprep.subr.mxu1 %v1181_v10 }
 0x574   :  { %11045 = vmatpush3.msra.mxu1 %v1181_v10  ;;  %v1207_v10 = vmul.f32 2.0, %v14022_v13 }
 0x575   :  { %11046 = vmatprep.subr.mxu1 %v1180_v48 }
 0x576   :  { %11047 = vmatpush3.msra.mxu1 %v1180_v48 }
 0x577   :  { %11048 = vmatprep.subr.mxu1 %v1179_v19 }
 0x578   :  { %11049 = vmatpush3.msra.mxu1 %v1179_v19  ;;  %v1206_v19 = vmul.f32 2.0, %v14026_v12 }
 0x579   :  { %11050 = vmatprep.subr.mxu1 %v1178_v20 }
 0x57a   :  { %11051 = vmatpush3.msra.mxu1 %v1178_v20 }
 0x57b   :  { %11053 = vmatmul.mubr.f32.vlgmr.msra.gmra.mxu1 %v14062_v21 }
 0x57c   :  { %11055 = vmatprep.mubr.f32.mxu1 %v14065_v22 }
 0x57f   :  { %11056 = vmatmul.mubr.f32.gmra.mxu1 %v14068_v23 }
 0x580   :  { %11058 = vmatprep.mubr.f32.mxu1 %v14071_v24 }
 0x583   :  { %11059 = vmatmul.mubr.f32.gmra.mxu1 %v14074_v25 }
 0x584   :  { %11061 = vmatprep.mubr.f32.mxu1 %v14077_v26 }
 0x587   :  { %11062 = vmatmul.mubr.f32.gmra.mxu1 %v14080_v27 }
 0x588   :  { %11064 = vmatprep.mubr.f32.mxu1 %v14083_v28 }
 0x58b   :  { %11065 = vmatmul.mubr.f32.gmra.mxu1 %v14086_v29 }
 0x58c   :  { %11067 = vmatprep.mubr.f32.mxu1 %v14089_v30 }
 0x58f   :  { %11068 = vmatmul.mubr.f32.gmra.mxu1 %v14092_v31 }
 0x590   :  { %11070 = vmatprep.mubr.f32.mxu1 %v14095_v33 }
 0x593   :  { %11071 = vmatmul.mubr.f32.gmra.mxu1 %v14098_v49 }
 0x594   :  { %11073 = vmatprep.mubr.f32.mxu1 %v14101_v38 }
 0x597   :  { %11074 = vmatmul.mubr.f32.gmra.mxu1 %v14104_v51 }
 0x598   :  { %11164 = vmatprep.mubr.f32.mxu1 %v13985_v18 }
 0x63b   :  { %v11054_v52 = vpop.f32.mrf.mxu1 }
 0x63c   :  { %v1356_v41 = vsub.f32 %v1195_v45, %v11054_v52  ;;  %v1209_v45 = vmul.f32 2.0, %v14014_v15 }
 0x63d   :  { %v1276_v54 = vpop.f32.mrf.mxu1 }
 0x63e   :  { %1373 = vst.msk [vmem:[#allocation2 + $0x288] sm:$0xff] %vm321_vm0, %v1356_v41  ;;  %v1355_v55 = vsub.f32 %v1194_v46, %v1276_v54  ;;  %v1208_v41 = vmul.f32 2.0, %v14018_v16 }
 0x63f   :  { %v11057_v44 = vpop.f32.mrf.mxu1 }
 0x640   :  { %1372 = vst.msk [vmem:[#allocation2 + $0x280] sm:$0xff] %vm321_vm0, %v1355_v55  ;;  %v1358_v57 = vsub.f32 %v1197_v42, %v11057_v44 }
 0x641   :  { %v1286_v58 = vpop.f32.mrf.mxu1 }
 0x642   :  { %1375 = vst.msk [vmem:[#allocation2 + $0x298] sm:$0xff] %vm321_vm0, %v1358_v57  ;;  %v1357_v47 = vsub.f32 %v1196_v43, %v1286_v58 }
 0x643   :  { %v11060_v53 = vpop.f32.mrf.mxu1 }
 0x644   :  { %1374 = vst.msk [vmem:[#allocation2 + $0x290] sm:$0xff] %vm321_vm0, %v1357_v47  ;;  %v1360_v2 = vsub.f32 %v1199_v14, %v11060_v53 }
 0x645   :  { %v1296_v63 = vpop.f32.mrf.mxu1 }
 0x646   :  { %1377 = vst.msk [vmem:[#allocation2 + $0x2a8] sm:$0xff] %vm321_vm0, %v1360_v2  ;;  %v1359_v56 = vsub.f32 %v1198_v3, %v1296_v63  ;;  %v1389_v3 = vld [vmem:[#allocation2 + $0x288] sm:$0xff] }
 0x647   :  { %v11063_v0 = vpop.f32.mrf.mxu1  ;;  %v1388_v63 = vld [vmem:[#allocation2 + $0x280] sm:$0xff] }
 0x648   :  { %1376 = vst.msk [vmem:[#allocation2 + $0x2a0] sm:$0xff] %vm321_vm0, %v1359_v56  ;;  %v1362_v6 = vsub.f32 %v1201_v5, %v11063_v0  ;;  %v1405_v56 = vmul.f32 2.0, %v1389_v3 }
 0x649   :  { %v1306_v61 = vpop.f32.mrf.mxu1  ;;  %v1391_v53 = vld [vmem:[#allocation2 + $0x298] sm:$0xff] }
 0x64a   :  { %1379 = vst.msk [vmem:[#allocation2 + $0x2b8] sm:$0xff] %vm321_vm0, %v1362_v6  ;;  %v1361_v8 = vsub.f32 %v1200_v59, %v1306_v61  ;;  %v1404_v6 = vmul.f32 2.0, %v1388_v63 }
 0x64b   :  { %v11066_v50 = vpop.f32.mrf.mxu1  ;;  %v1390_v2 = vld [vmem:[#allocation2 + $0x290] sm:$0xff] }
 0x64c   :  { %1378 = vst.msk [vmem:[#allocation2 + $0x2b0] sm:$0xff] %vm321_vm0, %v1361_v8  ;;  %v1364_v62 = vsub.f32 %v1203_v9, %v11066_v50  ;;  %v1407_v8 = vmul.f32 2.0, %v1391_v53 }
 0x64d   :  { %v1316_v40 = vpop.f32.mrf.mxu1  ;;  %v1393_v47 = vld [vmem:[#allocation2 + $0x2a8] sm:$0xff] }
 0x64e   :  { %1381 = vst.msk [vmem:[#allocation2 + $0x2c8] sm:$0xff] %vm321_vm0, %v1364_v62  ;;  %v1363_v1 = vsub.f32 %v1202_v11, %v1316_v40  ;;  %v1406_v62 = vmul.f32 2.0, %v1390_v2 }
 0x64f   :  { %v11069_v7 = vpop.f32.mrf.mxu1  ;;  %v1392_v14 = vld [vmem:[#allocation2 + $0x2a0] sm:$0xff] }
 0x650   :  { %1380 = vst.msk [vmem:[#allocation2 + $0x2c0] sm:$0xff] %vm321_vm0, %v1363_v1  ;;  %v1366_v37 = vsub.f32 %v1205_v60, %v11069_v7  ;;  %v1409_v1 = vmul.f32 2.0, %v1393_v47 }
 0x651   :  { %v1326_v32 = vpop.f32.mrf.mxu1  ;;  %v14168_v43 = vld [vmem:[#allocation2 + $0x2b8] sm:$0xff] }
 0x652   :  { %1383 = vst.msk [vmem:[#allocation2 + $0x2d8] sm:$0xff] %vm321_vm0, %v1366_v37  ;;  %v1365_v34 = vsub.f32 %v1204_v39, %v1326_v32  ;;  %v1408_v37 = vmul.f32 2.0, %v1392_v14 }
 0x653   :  { %v11072_v48 = vpop.f32.mrf.mxu1  ;;  %v14172_v58 = vld [vmem:[#allocation2 + $0x2b0] sm:$0xff] }
 0x654   :  { %1382 = vst.msk [vmem:[#allocation2 + $0x2d0] sm:$0xff] %vm321_vm0, %v1365_v34  ;;  %v1368_v35 = vsub.f32 %v1207_v10, %v11072_v48  ;;  %v1411_v34 = vmul.f32 2.0, %v14168_v43 }
 0x655   :  { %v1336_v20 = vpop.f32.mrf.mxu1  ;;  %v14160_v44 = vld [vmem:[#allocation2 + $0x2c8] sm:$0xff] }
 0x656   :  { %1385 = vst.msk [vmem:[#allocation2 + $0x2e8] sm:$0xff] %vm321_vm0, %v1368_v35  ;;  %v1367_v17 = vsub.f32 %v1206_v19, %v1336_v20  ;;  %v1410_v35 = vmul.f32 2.0, %v14172_v58 }
 0x657   :  { %v11075_v52 = vpop.f32.mrf.mxu1  ;;  %v14164_v57 = vld [vmem:[#allocation2 + $0x2c0] sm:$0xff] }
 0x658   :  { %1384 = vst.msk [vmem:[#allocation2 + $0x2e0] sm:$0xff] %vm321_vm0, %v1367_v17  ;;  %v1370_v4 = vsub.f32 %v1209_v45, %v11075_v52  ;;  %v1413_v17 = vmul.f32 2.0, %v14160_v44 }
 0x659   :  { %v1346_v46 = vpop.f32.mrf.mxu1  ;;  %v14152_v55 = vld [vmem:[#allocation2 + $0x2d8] sm:$0xff] }
 0x65a   :  { %1387 = vst.msk [vmem:[#allocation2 + $0x2f8] sm:$0xff] %vm321_vm0, %v1370_v4  ;;  %v1369_v13 = vsub.f32 %v1208_v41, %v1346_v46  ;;  %v1412_v4 = vmul.f32 2.0, %v14164_v57 }
 0x65b   :  { %v14156_v42 = vld [vmem:[#allocation2 + $0x2d0] sm:$0xff] }
 0x65c   :  { %1386 = vst.msk [vmem:[#allocation2 + $0x2f0] sm:$0xff] %vm321_vm0, %v1369_v13  ;;  %v1415_v13 = vmul.f32 2.0, %v14152_v55 }
 0x65d   :  { %v14144_v15 = vld [vmem:[#allocation2 + $0x2e8] sm:$0xff] }
 0x65f   :  { %v14148_v16 = vld [vmem:[#allocation2 + $0x2e0] sm:$0xff] }
 0x661   :  { %v14136_v54 = vld [vmem:[#allocation2 + $0x2f8] sm:$0xff] }
 0x662   :  { %11076 = vmatprep.subr.mxu0 %v14136_v54 }
 0x663   :  { %11077 = vmatpush3.msra.mxu0 %v14136_v54  ;;  %v14140_v12 = vld [vmem:[#allocation2 + $0x2f0] sm:$0xff] }
 0x664   :  { %11078 = vmatprep.subr.mxu0 %v14140_v12 }
 0x665   :  { %11079 = vmatpush3.msra.mxu0 %v14140_v12 }
 0x666   :  { %11080 = vmatprep.subr.mxu0 %v14144_v15 }
 0x667   :  { %11081 = vmatpush3.msra.mxu0 %v14144_v15 }
 0x668   :  { %11082 = vmatprep.subr.mxu0 %v14148_v16 }
 0x669   :  { %11083 = vmatpush3.msra.mxu0 %v14148_v16 }
 0x66a   :  { %11084 = vmatprep.subr.mxu0 %v14152_v55 }
 0x66b   :  { %11085 = vmatpush3.msra.mxu0 %v14152_v55 }
 0x66c   :  { %11086 = vmatprep.subr.mxu0 %v14156_v42 }
 0x66d   :  { %11087 = vmatpush3.msra.mxu0 %v14156_v42 }
 0x66e   :  { %11088 = vmatprep.subr.mxu0 %v14160_v44 }
 0x66f   :  { %11089 = vmatpush3.msra.mxu0 %v14160_v44 }
 0x670   :  { %11090 = vmatprep.subr.mxu0 %v14164_v57 }
 0x671   :  { %11091 = vmatpush3.msra.mxu0 %v14164_v57 }
 0x672   :  { %11092 = vmatprep.subr.mxu0 %v14168_v43 }
 0x673   :  { %11093 = vmatpush3.msra.mxu0 %v14168_v43 }
 0x674   :  { %11094 = vmatprep.subr.mxu0 %v14172_v58 }
 0x675   :  { %11095 = vmatpush3.msra.mxu0 %v14172_v58 }
 0x676   :  { %11096 = vmatprep.subr.mxu0 %v1393_v47 }
 0x677   :  { %11097 = vmatpush3.msra.mxu0 %v1393_v47  ;;  %v1414_v47 = vmul.f32 2.0, %v14156_v42 }
 0x678   :  { %11098 = vmatprep.subr.mxu0 %v1392_v14 }
 0x679   :  { %11099 = vmatpush3.msra.mxu0 %v1392_v14 }
 0x67a   :  { %11100 = vmatprep.subr.mxu0 %v1391_v53 }
 0x67b   :  { %11101 = vmatpush3.msra.mxu0 %v1391_v53  ;;  %v1417_v53 = vmul.f32 2.0, %v14144_v15 }
 0x67c   :  { %11102 = vmatprep.subr.mxu0 %v1390_v2 }
 0x67d   :  { %11103 = vmatpush3.msra.mxu0 %v1390_v2 }
 0x67e   :  { %11104 = vmatprep.subr.mxu0 %v1389_v3 }
 0x67f   :  { %11105 = vmatpush3.msra.mxu0 %v1389_v3  ;;  %v1416_v3 = vmul.f32 2.0, %v14148_v16 }
 0x680   :  { %11106 = vmatprep.subr.mxu0 %v1388_v63 }
 0x681   :  { %11107 = vmatpush3.msra.mxu0 %v1388_v63 }
 0x682   :  { %11109 = vmatmul.mubr.f32.vlgmr.msra.gmra.mxu0 %v14062_v21 }
 0x683   :  { %11111 = vmatprep.mubr.f32.mxu0 %v14065_v22 }
 0x686   :  { %11112 = vmatmul.mubr.f32.gmra.mxu0 %v14068_v23 }
 0x687   :  { %11114 = vmatprep.mubr.f32.mxu0 %v14071_v24 }
 0x68a   :  { %11115 = vmatmul.mubr.f32.gmra.mxu0 %v14074_v25 }
 0x68b   :  { %11117 = vmatprep.mubr.f32.mxu0 %v14077_v26 }
 0x68e   :  { %11118 = vmatmul.mubr.f32.gmra.mxu0 %v14080_v27 }
 0x68f   :  { %11120 = vmatprep.mubr.f32.mxu0 %v14083_v28 }
 0x692   :  { %11121 = vmatmul.mubr.f32.gmra.mxu0 %v14086_v29 }
 0x693   :  { %11123 = vmatprep.mubr.f32.mxu0 %v14089_v30 }
 0x696   :  { %11124 = vmatmul.mubr.f32.gmra.mxu0 %v14092_v31 }
 0x697   :  { %11126 = vmatprep.mubr.f32.mxu0 %v14095_v33 }
 0x69a   :  { %11127 = vmatmul.mubr.f32.gmra.mxu0 %v14098_v49 }
 0x69b   :  { %11129 = vmatprep.mubr.f32.mxu0 %v14101_v38 }
 0x69e   :  { %11130 = vmatmul.mubr.f32.gmra.mxu0 %v14104_v51 }
 0x69f   :  { %11220 = vmatprep.mubr.f32.mxu0 %v13985_v18 }
 0x742   :  { %v11110_v5 = vpop.f32.mrf.mxu0 }
 0x743   :  { %v1566_v0 = vsub.f32 %v1405_v56, %v11110_v5  ;;  %v1419_v56 = vmul.f32 2.0, %v14136_v54 }
 0x744   :  { %v1486_v59 = vpop.f32.mrf.mxu0 }
 0x745   :  { %1583 = vst.msk [vmem:[#allocation2 + $0x308] sm:$0xff] %vm321_vm0, %v1566_v0  ;;  %v1565_v61 = vsub.f32 %v1404_v6, %v1486_v59  ;;  %v1418_v0 = vmul.f32 2.0, %v14140_v12 }
 0x746   :  { %v11113_v9 = vpop.f32.mrf.mxu0 }
 0x747   :  { %1582 = vst.msk [vmem:[#allocation2 + $0x300] sm:$0xff] %vm321_vm0, %v1565_v61  ;;  %v1568_v50 = vsub.f32 %v1407_v8, %v11113_v9 }
 0x748   :  { %v1496_v11 = vpop.f32.mrf.mxu0 }
 0x749   :  { %1585 = vst.msk [vmem:[#allocation2 + $0x318] sm:$0xff] %vm321_vm0, %v1568_v50  ;;  %v1567_v40 = vsub.f32 %v1406_v62, %v1496_v11 }
 0x74a   :  { %v11116_v60 = vpop.f32.mrf.mxu0 }
 0x74b   :  { %1584 = vst.msk [vmem:[#allocation2 + $0x310] sm:$0xff] %vm321_vm0, %v1567_v40  ;;  %v1570_v7 = vsub.f32 %v1409_v1, %v11116_v60 }
 0x74c   :  { %v1506_v39 = vpop.f32.mrf.mxu0 }
 0x74d   :  { %1587 = vst.msk [vmem:[#allocation2 + $0x328] sm:$0xff] %vm321_vm0, %v1570_v7  ;;  %v1569_v32 = vsub.f32 %v1408_v37, %v1506_v39  ;;  %v1599_v37 = vld [vmem:[#allocation2 + $0x308] sm:$0xff] }
 0x74e   :  { %v11119_v10 = vpop.f32.mrf.mxu0  ;;  %v1598_v39 = vld [vmem:[#allocation2 + $0x300] sm:$0xff] }
 0x74f   :  { %1586 = vst.msk [vmem:[#allocation2 + $0x320] sm:$0xff] %vm321_vm0, %v1569_v32  ;;  %v1572_v48 = vsub.f32 %v1411_v34, %v11119_v10  ;;  %v1615_v32 = vmul.f32 2.0, %v1599_v37 }
 0x750   :  { %v1516_v19 = vpop.f32.mrf.mxu0  ;;  %v1601_v60 = vld [vmem:[#allocation2 + $0x318] sm:$0xff] }
 0x751   :  { %1589 = vst.msk [vmem:[#allocation2 + $0x338] sm:$0xff] %vm321_vm0, %v1572_v48  ;;  %v1571_v20 = vsub.f32 %v1410_v35, %v1516_v19  ;;  %v1614_v48 = vmul.f32 2.0, %v1598_v39 }
 0x752   :  { %v11122_v45 = vpop.f32.mrf.mxu0  ;;  %v1600_v7 = vld [vmem:[#allocation2 + $0x310] sm:$0xff] }
 0x753   :  { %1588 = vst.msk [vmem:[#allocation2 + $0x330] sm:$0xff] %vm321_vm0, %v1571_v20  ;;  %v1574_v52 = vsub.f32 %v1413_v17, %v11122_v45  ;;  %v1617_v20 = vmul.f32 2.0, %v1601_v60 }
 0x754   :  { %v1526_v41 = vpop.f32.mrf.mxu0  ;;  %v1603_v40 = vld [vmem:[#allocation2 + $0x328] sm:$0xff] }
 0x755   :  { %1591 = vst.msk [vmem:[#allocation2 + $0x348] sm:$0xff] %vm321_vm0, %v1574_v52  ;;  %v1573_v46 = vsub.f32 %v1412_v4, %v1526_v41  ;;  %v1616_v52 = vmul.f32 2.0, %v1600_v7 }
 0x756   :  { %v11125_v43 = vpop.f32.mrf.mxu0  ;;  %v1602_v1 = vld [vmem:[#allocation2 + $0x320] sm:$0xff] }
 0x757   :  { %1590 = vst.msk [vmem:[#allocation2 + $0x340] sm:$0xff] %vm321_vm0, %v1573_v46  ;;  %v1576_v58 = vsub.f32 %v1415_v13, %v11125_v43  ;;  %v1619_v46 = vmul.f32 2.0, %v1603_v40  ;;  %v1618_v43 = vmul.f32 2.0, %v1602_v1 }
 0x758   :  { %v1536_v14 = vpop.f32.mrf.mxu0  ;;  %v14250_v62 = vld [vmem:[#allocation2 + $0x338] sm:$0xff] }
 0x759   :  { %1593 = vst.msk [vmem:[#allocation2 + $0x358] sm:$0xff] %vm321_vm0, %v1576_v58  ;;  %v1575_v44 = vsub.f32 %v1414_v47, %v1536_v14  ;;  %v1621_v14 = vmul.f32 2.0, %v14250_v62 }
 0x75a   :  { %v11128_v2 = vpop.f32.mrf.mxu0  ;;  %v14254_v11 = vld [vmem:[#allocation2 + $0x330] sm:$0xff] }
 0x75b   :  { %1592 = vst.msk [vmem:[#allocation2 + $0x350] sm:$0xff] %vm321_vm0, %v1575_v44  ;;  %v1578_v57 = vsub.f32 %v1417_v53, %v11128_v2  ;;  %v1620_v2 = vmul.f32 2.0, %v14254_v11 }
 0x75c   :  { %v1546_v63 = vpop.f32.mrf.mxu0  ;;  %v14242_v9 = vld [vmem:[#allocation2 + $0x348] sm:$0xff] }
 0x75d   :  { %1595 = vst.msk [vmem:[#allocation2 + $0x368] sm:$0xff] %vm321_vm0, %v1578_v57  ;;  %v1577_v55 = vsub.f32 %v1416_v3, %v1546_v63  ;;  %v1623_v63 = vmul.f32 2.0, %v14242_v9 }
 0x75e   :  { %v11131_v5 = vpop.f32.mrf.mxu0  ;;  %v14246_v50 = vld [vmem:[#allocation2 + $0x340] sm:$0xff] }
 0x75f   :  { %1594 = vst.msk [vmem:[#allocation2 + $0x360] sm:$0xff] %vm321_vm0, %v1577_v55  ;;  %v1580_v42 = vsub.f32 %v1419_v56, %v11131_v5  ;;  %v1622_v5 = vmul.f32 2.0, %v14246_v50 }
 0x760   :  { %v1556_v6 = vpop.f32.mrf.mxu0  ;;  %v14234_v61 = vld [vmem:[#allocation2 + $0x358] sm:$0xff] }
 0x761   :  { %1597 = vst.msk [vmem:[#allocation2 + $0x378] sm:$0xff] %vm321_vm0, %v1580_v42  ;;  %v1579_v15 = vsub.f32 %v1418_v0, %v1556_v6  ;;  %v1625_v6 = vmul.f32 2.0, %v14234_v61 }
 0x762   :  { %v14238_v8 = vld [vmem:[#allocation2 + $0x350] sm:$0xff] }
 0x763   :  { %1596 = vst.msk [vmem:[#allocation2 + $0x370] sm:$0xff] %vm321_vm0, %v1579_v15 }
 0x764   :  { %v14226_v54 = vld [vmem:[#allocation2 + $0x368] sm:$0xff] }
 0x766   :  { %v14230_v12 = vld [vmem:[#allocation2 + $0x360] sm:$0xff] }
 0x768   :  { %v14218_v59 = vld [vmem:[#allocation2 + $0x378] sm:$0xff] }
 0x769   :  { %11132 = vmatprep.subr.mxu1 %v14218_v59 }
 0x76a   :  { %11133 = vmatpush3.msra.mxu1 %v14218_v59  ;;  %v14222_v16 = vld [vmem:[#allocation2 + $0x370] sm:$0xff] }
 0x76b   :  { %11134 = vmatprep.subr.mxu1 %v14222_v16 }
 0x76c   :  { %11135 = vmatpush3.msra.mxu1 %v14222_v16 }
 0x76d   :  { %11136 = vmatprep.subr.mxu1 %v14226_v54 }
 0x76e   :  { %11137 = vmatpush3.msra.mxu1 %v14226_v54 }
 0x76f   :  { %11138 = vmatprep.subr.mxu1 %v14230_v12 }
 0x770   :  { %11139 = vmatpush3.msra.mxu1 %v14230_v12 }
 0x771   :  { %11140 = vmatprep.subr.mxu1 %v14234_v61 }
 0x772   :  { %11141 = vmatpush3.msra.mxu1 %v14234_v61 }
 0x773   :  { %11142 = vmatprep.subr.mxu1 %v14238_v8 }
 0x774   :  { %11143 = vmatpush3.msra.mxu1 %v14238_v8 }
 0x775   :  { %11144 = vmatprep.subr.mxu1 %v14242_v9 }
 0x776   :  { %11145 = vmatpush3.msra.mxu1 %v14242_v9 }
 0x777   :  { %11146 = vmatprep.subr.mxu1 %v14246_v50 }
 0x778   :  { %11147 = vmatpush3.msra.mxu1 %v14246_v50 }
 0x779   :  { %11148 = vmatprep.subr.mxu1 %v14250_v62 }
 0x77a   :  { %11149 = vmatpush3.msra.mxu1 %v14250_v62 }
 0x77b   :  { %11150 = vmatprep.subr.mxu1 %v14254_v11 }
 0x77c   :  { %11151 = vmatpush3.msra.mxu1 %v14254_v11  ;;  %v1624_v11 = vmul.f32 2.0, %v14238_v8 }
 0x77d   :  { %11152 = vmatprep.subr.mxu1 %v1603_v40 }
 0x77e   :  { %11153 = vmatpush3.msra.mxu1 %v1603_v40 }
 0x77f   :  { %11154 = vmatprep.subr.mxu1 %v1602_v1 }
 0x780   :  { %11155 = vmatpush3.msra.mxu1 %v1602_v1  ;;  %v1627_v1 = vmul.f32 2.0, %v14226_v54 }
 0x781   :  { %11156 = vmatprep.subr.mxu1 %v1601_v60 }
 0x782   :  { %11157 = vmatpush3.msra.mxu1 %v1601_v60 }
 0x783   :  { %11158 = vmatprep.subr.mxu1 %v1600_v7 }
 0x784   :  { %11159 = vmatpush3.msra.mxu1 %v1600_v7  ;;  %v1626_v7 = vmul.f32 2.0, %v14230_v12 }
 0x785   :  { %11160 = vmatprep.subr.mxu1 %v1599_v37 }
 0x786   :  { %11161 = vmatpush3.msra.mxu1 %v1599_v37 }
 0x787   :  { %11162 = vmatprep.subr.mxu1 %v1598_v39 }
 0x788   :  { %11163 = vmatpush3.msra.mxu1 %v1598_v39  ;;  %v1629_v39 = vmul.f32 2.0, %v14218_v59 }
 0x789   :  { %11165 = vmatmul.mubr.f32.vlgmr.msra.gmra.mxu1 %v14062_v21 }
 0x78a   :  { %11167 = vmatprep.mubr.f32.mxu1 %v14065_v22 }
 0x78d   :  { %11168 = vmatmul.mubr.f32.gmra.mxu1 %v14068_v23 }
 0x78e   :  { %11170 = vmatprep.mubr.f32.mxu1 %v14071_v24 }
 0x791   :  { %11171 = vmatmul.mubr.f32.gmra.mxu1 %v14074_v25 }
 0x792   :  { %11173 = vmatprep.mubr.f32.mxu1 %v14077_v26 }
 0x795   :  { %11174 = vmatmul.mubr.f32.gmra.mxu1 %v14080_v27 }
 0x796   :  { %11176 = vmatprep.mubr.f32.mxu1 %v14083_v28 }
 0x799   :  { %11177 = vmatmul.mubr.f32.gmra.mxu1 %v14086_v29 }
 0x79a   :  { %11179 = vmatprep.mubr.f32.mxu1 %v14089_v30 }
 0x79d   :  { %11180 = vmatmul.mubr.f32.gmra.mxu1 %v14092_v31 }
 0x79e   :  { %11182 = vmatprep.mubr.f32.mxu1 %v14095_v33 }
 0x7a1   :  { %11183 = vmatmul.mubr.f32.gmra.mxu1 %v14098_v49 }
 0x7a2   :  { %11185 = vmatprep.mubr.f32.mxu1 %v14101_v38 }
 0x7a5   :  { %11186 = vmatmul.mubr.f32.gmra.mxu1 %v14104_v51 }
 0x7a6   :  { %11276 = vmatprep.mubr.f32.mxu1 %v13985_v18 }
 0x849   :  { %v11166_v34 = vpop.f32.mrf.mxu1 }
 0x84a   :  { %v1776_v10 = vsub.f32 %v1615_v32, %v11166_v34  ;;  %v1628_v34 = vmul.f32 2.0, %v14222_v16 }
 0x84b   :  { %v1696_v35 = vpop.f32.mrf.mxu1 }
 0x84c   :  { %1793 = vst.msk [vmem:[#allocation2 + $0x388] sm:$0xff] %vm321_vm0, %v1776_v10  ;;  %v1775_v19 = vsub.f32 %v1614_v48, %v1696_v35 }
 0x84d   :  { %v11169_v17 = vpop.f32.mrf.mxu1 }
 0x84e   :  { %1792 = vst.msk [vmem:[#allocation2 + $0x380] sm:$0xff] %vm321_vm0, %v1775_v19  ;;  %v1778_v45 = vsub.f32 %v1617_v20, %v11169_v17 }
 0x84f   :  { %v1706_v4 = vpop.f32.mrf.mxu1 }
 0x850   :  { %1795 = vst.msk [vmem:[#allocation2 + $0x398] sm:$0xff] %vm321_vm0, %v1778_v45  ;;  %v1777_v41 = vsub.f32 %v1616_v52, %v1706_v4 }
 0x851   :  { %v11172_v18 = vpop.f32.mrf.mxu1 }
 0x852   :  { %1794 = vst.msk [vmem:[#allocation2 + $0x390] sm:$0xff] %vm321_vm0, %v1777_v41  ;;  %v1780_v13 = vsub.f32 %v1619_v46, %v11172_v18 }
 0x853   :  { %v1716_v58 = vpop.f32.mrf.mxu1 }
 0x854   :  { %1797 = vst.msk [vmem:[#allocation2 + $0x3a8] sm:$0xff] %vm321_vm0, %v1780_v13  ;;  %v1779_v47 = vsub.f32 %v1618_v43, %v1716_v58  ;;  %v1809_v13 = vld [vmem:[#allocation2 + $0x388] sm:$0xff] }
 0x855   :  { %v11175_v44 = vpop.f32.mrf.mxu1  ;;  %v1808_v43 = vld [vmem:[#allocation2 + $0x380] sm:$0xff] }
 0x856   :  { %1796 = vst.msk [vmem:[#allocation2 + $0x3a0] sm:$0xff] %vm321_vm0, %v1779_v47  ;;  %v1782_v53 = vsub.f32 %v1621_v14, %v11175_v44 }
 0x857   :  { %v1726_v57 = vpop.f32.mrf.mxu1  ;;  %v1811_v46 = vld [vmem:[#allocation2 + $0x398] sm:$0xff] }
 0x858   :  { %1799 = vst.msk [vmem:[#allocation2 + $0x3b8] sm:$0xff] %vm321_vm0, %v1782_v53  ;;  %v1781_v3 = vsub.f32 %v1620_v2, %v1726_v57 }
 0x859   :  { %v11178_v55 = vpop.f32.mrf.mxu1  ;;  %v1810_v18 = vld [vmem:[#allocation2 + $0x390] sm:$0xff] }
 0x85a   :  { %1798 = vst.msk [vmem:[#allocation2 + $0x3b0] sm:$0xff] %vm321_vm0, %v1781_v3  ;;  %v1784_v56 = vsub.f32 %v1623_v63, %v11178_v55 }
 0x85b   :  { %v1736_v42 = vpop.f32.mrf.mxu1  ;;  %v1813_v4 = vld [vmem:[#allocation2 + $0x3a8] sm:$0xff] }
 0x85c   :  { %1801 = vst.msk [vmem:[#allocation2 + $0x3c8] sm:$0xff] %vm321_vm0, %v1784_v56  ;;  %v1783_v0 = vsub.f32 %v1622_v5, %v1736_v42 }
 0x85d   :  { %v11181_v15 = vpop.f32.mrf.mxu1  ;;  %v1812_v41 = vld [vmem:[#allocation2 + $0x3a0] sm:$0xff] }
 0x85e   :  { %1800 = vst.msk [vmem:[#allocation2 + $0x3c0] sm:$0xff] %vm321_vm0, %v1783_v0  ;;  %v1786_v62 = vsub.f32 %v1625_v6, %v11181_v15  ;;  %v1828_v47 = vmul.f32 2.0, %v1812_v41 }
 0x85f   :  { %v1746_v40 = vpop.f32.mrf.mxu1  ;;  %v14332_v45 = vld [vmem:[#allocation2 + $0x3b8] sm:$0xff] }
 0x860   :  { %1803 = vst.msk [vmem:[#allocation2 + $0x3d8] sm:$0xff] %vm321_vm0, %v1786_v62  ;;  %v1785_v9 = vsub.f32 %v1624_v11, %v1746_v40  ;;  %v1831_v53 = vmul.f32 2.0, %v14332_v45 }
 0x861   :  { %v11184_v60 = vpop.f32.mrf.mxu1  ;;  %v14336_v52 = vld [vmem:[#allocation2 + $0x3b0] sm:$0xff] }
 0x862   :  { %1802 = vst.msk [vmem:[#allocation2 + $0x3d0] sm:$0xff] %vm321_vm0, %v1785_v9  ;;  %v1788_v50 = vsub.f32 %v1627_v1, %v11184_v60  ;;  %v1830_v3 = vmul.f32 2.0, %v14336_v52 }
 0x863   :  { %v1756_v37 = vpop.f32.mrf.mxu1  ;;  %v14324_v20 = vld [vmem:[#allocation2 + $0x3c8] sm:$0xff] }
 0x864   :  { %1805 = vst.msk [vmem:[#allocation2 + $0x3e8] sm:$0xff] %vm321_vm0, %v1788_v50  ;;  %v1787_v61 = vsub.f32 %v1626_v7, %v1756_v37  ;;  %v1833_v56 = vmul.f32 2.0, %v14324_v20 }
 0x865   :  { %v11187_v32 = vpop.f32.mrf.mxu1  ;;  %v14328_v17 = vld [vmem:[#allocation2 + $0x3c0] sm:$0xff] }
 0x866   :  { %1804 = vst.msk [vmem:[#allocation2 + $0x3e0] sm:$0xff] %vm321_vm0, %v1787_v61  ;;  %v1790_v8 = vsub.f32 %v1629_v39, %v11187_v32  ;;  %v1832_v0 = vmul.f32 2.0, %v14328_v17 }
 0x867   :  { %v1766_v10 = vpop.f32.mrf.mxu1  ;;  %v14316_v35 = vld [vmem:[#allocation2 + $0x3d8] sm:$0xff] }
 0x868   :  { %1807 = vst.msk [vmem:[#allocation2 + $0x3f8] sm:$0xff] %vm321_vm0, %v1790_v8  ;;  %v1789_v54 = vsub.f32 %v1628_v34, %v1766_v10  ;;  %v1835_v62 = vmul.f32 2.0, %v14316_v35 }
 0x869   :  { %v14320_v19 = vld [vmem:[#allocation2 + $0x3d0] sm:$0xff] }
 0x86a   :  { %1806 = vst.msk [vmem:[#allocation2 + $0x3f0] sm:$0xff] %vm321_vm0, %v1789_v54  ;;  %v1834_v9 = vmul.f32 2.0, %v14320_v19 }
 0x86b   :  { %v14308_v59 = vld [vmem:[#allocation2 + $0x3e8] sm:$0xff] }
 0x86c   :  { %v1837_v50 = vmul.f32 2.0, %v14308_v59 }
 0x86d   :  { %v14312_v16 = vld [vmem:[#allocation2 + $0x3e0] sm:$0xff] }
 0x86e   :  { %v1836_v61 = vmul.f32 2.0, %v14312_v16 }
 0x86f   :  { %v14300_v48 = vld [vmem:[#allocation2 + $0x3f8] sm:$0xff] }
 0x870   :  { %11188 = vmatprep.subr.mxu0 %v14300_v48  ;;  %v1839_v8 = vmul.f32 2.0, %v14300_v48 }
 0x871   :  { %11189 = vmatpush3.msra.mxu0 %v14300_v48  ;;  %v14304_v12 = vld [vmem:[#allocation2 + $0x3f0] sm:$0xff] }
 0x872   :  { %11190 = vmatprep.subr.mxu0 %v14304_v12  ;;  %v1838_v54 = vmul.f32 2.0, %v14304_v12 }
 0x873   :  { %11191 = vmatpush3.msra.mxu0 %v14304_v12 }
 0x874   :  { %11192 = vmatprep.subr.mxu0 %v14308_v59 }
 0x875   :  { %11193 = vmatpush3.msra.mxu0 %v14308_v59 }
 0x876   :  { %11194 = vmatprep.subr.mxu0 %v14312_v16 }
 0x877   :  { %11195 = vmatpush3.msra.mxu0 %v14312_v16 }
 0x878   :  { %11196 = vmatprep.subr.mxu0 %v14316_v35 }
 0x879   :  { %11197 = vmatpush3.msra.mxu0 %v14316_v35 }
 0x87a   :  { %11198 = vmatprep.subr.mxu0 %v14320_v19 }
 0x87b   :  { %11199 = vmatpush3.msra.mxu0 %v14320_v19 }
 0x87c   :  { %11200 = vmatprep.subr.mxu0 %v14324_v20 }
 0x87d   :  { %11201 = vmatpush3.msra.mxu0 %v14324_v20 }
 0x87e   :  { %11202 = vmatprep.subr.mxu0 %v14328_v17 }
 0x87f   :  { %11203 = vmatpush3.msra.mxu0 %v14328_v17 }
 0x880   :  { %11204 = vmatprep.subr.mxu0 %v14332_v45 }
 0x881   :  { %11205 = vmatpush3.msra.mxu0 %v14332_v45 }
 0x882   :  { %11206 = vmatprep.subr.mxu0 %v14336_v52 }
 0x883   :  { %11207 = vmatpush3.msra.mxu0 %v14336_v52 }
 0x884   :  { %11208 = vmatprep.subr.mxu0 %v1813_v4 }
 0x885   :  { %11209 = vmatpush3.msra.mxu0 %v1813_v4 }
 0x886   :  { %11210 = vmatprep.subr.mxu0 %v1812_v41 }
 0x887   :  { %11211 = vmatpush3.msra.mxu0 %v1812_v41 }
 0x888   :  { %11212 = vmatprep.subr.mxu0 %v1811_v46 }
 0x889   :  { %11213 = vmatpush3.msra.mxu0 %v1811_v46 }
 0x88a   :  { %11214 = vmatprep.subr.mxu0 %v1810_v18 }
 0x88b   :  { %11215 = vmatpush3.msra.mxu0 %v1810_v18 }
 0x88c   :  { %11216 = vmatprep.subr.mxu0 %v1809_v13 }
 0x88d   :  { %11217 = vmatpush3.msra.mxu0 %v1809_v13 }
 0x88e   :  { %11218 = vmatprep.subr.mxu0 %v1808_v43 }
 0x88f   :  { %11219 = vmatpush3.msra.mxu0 %v1808_v43 }
 0x890   :  { %11221 = vmatmul.mubr.f32.vlgmr.msra.gmra.mxu0 %v14062_v21  ;;  %v14355_v21 = vld [vmem:[#allocation9] sm:$0xff] }
 0x891   :  { %11223 = vmatprep.mubr.f32.mxu0 %v14065_v22  ;;  %v1825_v22 = vmul.f32 2.0, %v1809_v13 }
 0x894   :  { %11224 = vmatmul.mubr.f32.gmra.mxu0 %v14068_v23 }
 0x895   :  { %11226 = vmatprep.mubr.f32.mxu0 %v14071_v24 }
 0x898   :  { %11227 = vmatmul.mubr.f32.gmra.mxu0 %v14074_v25  ;;  %v1824_v25 = vmul.f32 2.0, %v1808_v43 }
 0x899   :  { %11229 = vmatprep.mubr.f32.mxu0 %v14077_v26 }
 0x89c   :  { %11230 = vmatmul.mubr.f32.gmra.mxu0 %v14080_v27 }
 0x89d   :  { %11232 = vmatprep.mubr.f32.mxu0 %v14083_v28  ;;  %v1827_v28 = vmul.f32 2.0, %v1811_v46 }
 0x8a0   :  { %11233 = vmatmul.mubr.f32.gmra.mxu0 %v14086_v29 }
 0x8a1   :  { %11235 = vmatprep.mubr.f32.mxu0 %v14089_v30 }
 0x8a4   :  { %11236 = vmatmul.mubr.f32.gmra.mxu0 %v14092_v31  ;;  %v1826_v31 = vmul.f32 2.0, %v1810_v18 }
 0x8a5   :  { %11238 = vmatprep.mubr.f32.mxu0 %v14095_v33 }
 0x8a8   :  { %11239 = vmatmul.mubr.f32.gmra.mxu0 %v14098_v49 }
 0x8a9   :  { %11241 = vmatprep.mubr.f32.mxu0 %v14101_v38  ;;  %v1829_v38 = vmul.f32 2.0, %v1813_v4 }
 0x8ac   :  { %11242 = vmatmul.mubr.f32.gmra.mxu0 %v14104_v51 }
 0x8ad   :  { %11332 = vmatprep.mubr.f32.mxu0 %v14355_v21 }
 0x950   :  { %v11222_v23 = vpop.f32.mrf.mxu0 }
 0x951   :  { %v1986_v24 = vsub.f32 %v1825_v22, %v11222_v23 }
 0x952   :  { %v1906_v26 = vpop.f32.mrf.mxu0 }
 0x953   :  { %2003 = vst.msk [vmem:[#allocation2 + $0x408] sm:$0xff] %vm321_vm0, %v1986_v24  ;;  %v1985_v27 = vsub.f32 %v1824_v25, %v1906_v26  ;;  %v2502_v24 = vld [vmem:[#allocation3 + $0x78] sm:$0xff]  ;;  %v14448_v25 = vld [vmem:[#allocation9 + $0x8] sm:$0xff]  ;;  %v2501_v26 = vld [vmem:[#allocation3 + $0x70] sm:$0xff] }
 0x954   :  { %v11225_v29 = vpop.f32.mrf.mxu0 }
 0x955   :  { %2002 = vst.msk [vmem:[#allocation2 + $0x400] sm:$0xff] %vm321_vm0, %v1985_v27  ;;  %v1988_v30 = vsub.f32 %v1827_v28, %v11225_v29  ;;  %v14451_v27 = vld [vmem:[#allocation9 + $0x10] sm:$0xff]  ;;  %v2500_v28 = vld [vmem:[#allocation3 + $0x68] sm:$0xff]  ;;  %v14454_v29 = vld [vmem:[#allocation9 + $0x18] sm:$0xff] }
 0x956   :  { %v1916_v33 = vpop.f32.mrf.mxu0 }
 0x957   :  { %2005 = vst.msk [vmem:[#allocation2 + $0x418] sm:$0xff] %vm321_vm0, %v1988_v30  ;;  %v1987_v49 = vsub.f32 %v1826_v31, %v1916_v33  ;;  %v2499_v30 = vld [vmem:[#allocation3 + $0x60] sm:$0xff]  ;;  %v2498_v33 = vld [vmem:[#allocation3 + $0x58] sm:$0xff] }
 0x958   :  { %v11228_v51 = vpop.f32.mrf.mxu0  ;;  %v14457_v31 = vld [vmem:[#allocation9 + $0x20] sm:$0xff] }
 0x959   :  { %2004 = vst.msk [vmem:[#allocation2 + $0x410] sm:$0xff] %vm321_vm0, %v1987_v49  ;;  %v1990_v58 = vsub.f32 %v1829_v38, %v11228_v51  ;;  %v14460_v49 = vld [vmem:[#allocation9 + $0x28] sm:$0xff]  ;;  %v2497_v38 = vld [vmem:[#allocation3 + $0x50] sm:$0xff] }
 0x95a   :  { %v1926_v14 = vpop.f32.mrf.mxu0  ;;  %v14440_v22 = vld [vmem:[#allocation2 + $0x408] sm:$0xff]  ;;  %v14463_v51 = vld [vmem:[#allocation9 + $0x30] sm:$0xff] }
 0x95b   :  { %2007 = vst.msk [vmem:[#allocation2 + $0x428] sm:$0xff] %vm321_vm0, %v1990_v58  ;;  %v1989_v44 = vsub.f32 %v1828_v47, %v1926_v14  ;;  %v2496_v58 = vld [vmem:[#allocation3 + $0x48] sm:$0xff]  ;;  %v14466_v47 = vld [vmem:[#allocation9 + $0x38] sm:$0xff]  ;;  %v2495_v14 = vld [vmem:[#allocation3 + $0x40] sm:$0xff] }
 0x95c   :  { %v11231_v2 = vpop.f32.mrf.mxu0  ;;  %v14444_v23 = vld [vmem:[#allocation2 + $0x400] sm:$0xff] }
 0x95d   :  { %2006 = vst.msk [vmem:[#allocation2 + $0x420] sm:$0xff] %vm321_vm0, %v1989_v44  ;;  %v1992_v57 = vsub.f32 %v1831_v53, %v11231_v2  ;;  %v14469_v44 = vld [vmem:[#allocation9 + $0x40] sm:$0xff]  ;;  %v2494_v53 = vld [vmem:[#allocation3 + $0x38] sm:$0xff]  ;;  %v14472_v2 = vld [vmem:[#allocation9 + $0x48] sm:$0xff] }
 0x95e   :  { %v1936_v63 = vpop.f32.mrf.mxu0  ;;  %v14432_v13 = vld [vmem:[#allocation2 + $0x418] sm:$0xff] }
 0x95f   :  { %2009 = vst.msk [vmem:[#allocation2 + $0x438] sm:$0xff] %vm321_vm0, %v1992_v57  ;;  %v1991_v55 = vsub.f32 %v1830_v3, %v1936_v63  ;;  %v2493_v57 = vld [vmem:[#allocation3 + $0x30] sm:$0xff]  ;;  %v2492_v63 = vld [vmem:[#allocation3 + $0x28] sm:$0xff] }
 0x960   :  { %v11234_v5 = vpop.f32.mrf.mxu0  ;;  %v14436_v43 = vld [vmem:[#allocation2 + $0x410] sm:$0xff] }
 0x961   :  { %2008 = vst.msk [vmem:[#allocation2 + $0x430] sm:$0xff] %vm321_vm0, %v1991_v55  ;;  %v1994_v42 = vsub.f32 %v1833_v56, %v11234_v5  ;;  %v14475_v3 = vld [vmem:[#allocation9 + $0x50] sm:$0xff]  ;;  %v14478_v55 = vld [vmem:[#allocation9 + $0x58] sm:$0xff]  ;;  %v2491_v56 = vld [vmem:[#allocation3 + $0x20] sm:$0xff] }
 0x962   :  { %v1946_v6 = vpop.f32.mrf.mxu0  ;;  %v14424_v46 = vld [vmem:[#allocation2 + $0x428] sm:$0xff]  ;;  %v14481_v5 = vld [vmem:[#allocation9 + $0x60] sm:$0xff] }
 0x963   :  { %2011 = vst.msk [vmem:[#allocation2 + $0x448] sm:$0xff] %vm321_vm0, %v1994_v42  ;;  %v1993_v15 = vsub.f32 %v1832_v0, %v1946_v6  ;;  %v2490_v42 = vld [vmem:[#allocation3 + $0x18] sm:$0xff]  ;;  %v14484_v0 = vld [vmem:[#allocation9 + $0x68] sm:$0xff]  ;;  %v2489_v6 = vld [vmem:[#allocation3 + $0x10] sm:$0xff] }
 0x964   :  { %v11237_v11 = vpop.f32.mrf.mxu0  ;;  %v14428_v18 = vld [vmem:[#allocation2 + $0x420] sm:$0xff] }
 0x965   :  { %2010 = vst.msk [vmem:[#allocation2 + $0x440] sm:$0xff] %vm321_vm0, %v1993_v15  ;;  %v1996_v40 = vsub.f32 %v1835_v62, %v11237_v11  ;;  %v14487_v15 = vld [vmem:[#allocation9 + $0x70] sm:$0xff]  ;;  %v2488_v62 = vld [vmem:[#allocation3 + $0x8] sm:$0xff]  ;;  %v14490_v11 = vld [vmem:[#allocation9 + $0x78] sm:$0xff] }
 0x966   :  { %v1956_v1 = vpop.f32.mrf.mxu0  ;;  %v14416_v4 = vld [vmem:[#allocation2 + $0x438] sm:$0xff] }
 0x967   :  { %2013 = vst.msk [vmem:[#allocation2 + $0x458] sm:$0xff] %vm321_vm0, %v1996_v40  ;;  %v1995_v60 = vsub.f32 %v1834_v9, %v1956_v1  ;;  %v2487_v40 = vld [vmem:[#allocation3] sm:$0xff]  ;;  %v2035_v9 = vmul.f32 2.0, %v14440_v22 }
 0x968   :  { %v11240_v7 = vpop.f32.mrf.mxu0  ;;  %v14420_v41 = vld [vmem:[#allocation2 + $0x430] sm:$0xff] }
 0x969   :  { %2012 = vst.msk [vmem:[#allocation2 + $0x450] sm:$0xff] %vm321_vm0, %v1995_v60  ;;  %v1998_v37 = vsub.f32 %v1837_v50, %v11240_v7  ;;  %v2034_v50 = vmul.f32 2.0, %v14444_v23 }
 0x96a   :  { %v1966_v39 = vpop.f32.mrf.mxu0  ;;  %v14408_v45 = vld [vmem:[#allocation2 + $0x448] sm:$0xff] }
 0x96b   :  { %2015 = vst.msk [vmem:[#allocation2 + $0x468] sm:$0xff] %vm321_vm0, %v1998_v37  ;;  %v1997_v32 = vsub.f32 %v1836_v61, %v1966_v39  ;;  %v2037_v61 = vmul.f32 2.0, %v14432_v13 }
 0x96c   :  { %v11243_v34 = vpop.f32.mrf.mxu0  ;;  %v14412_v52 = vld [vmem:[#allocation2 + $0x440] sm:$0xff] }
 0x96d   :  { %2014 = vst.msk [vmem:[#allocation2 + $0x460] sm:$0xff] %vm321_vm0, %v1997_v32  ;;  %v2000_v10 = vsub.f32 %v1839_v8, %v11243_v34  ;;  %v2036_v8 = vmul.f32 2.0, %v14436_v43 }
 0x96e   :  { %v1976_v35 = vpop.f32.mrf.mxu0  ;;  %v14400_v20 = vld [vmem:[#allocation2 + $0x458] sm:$0xff] }
 0x96f   :  { %2017 = vst.msk [vmem:[#allocation2 + $0x478] sm:$0xff] %vm321_vm0, %v2000_v10  ;;  %v1999_v59 = vsub.f32 %v1838_v54, %v1976_v35  ;;  %v2039_v54 = vmul.f32 2.0, %v14424_v46 }
 0x970   :  { %v14404_v17 = vld [vmem:[#allocation2 + $0x450] sm:$0xff] }
 0x971   :  { %2016 = vst.msk [vmem:[#allocation2 + $0x470] sm:$0xff] %vm321_vm0, %v1999_v59 }
 0x972   :  { %v14392_v48 = vld [vmem:[#allocation2 + $0x468] sm:$0xff] }
 0x974   :  { %v14396_v12 = vld [vmem:[#allocation2 + $0x460] sm:$0xff] }
 0x976   :  { %v14384_v19 = vld [vmem:[#allocation2 + $0x478] sm:$0xff] }
 0x977   :  { %11244 = vmatprep.subr.mxu1 %v14384_v19 }
 0x978   :  { %11245 = vmatpush3.msra.mxu1 %v14384_v19  ;;  %v14388_v16 = vld [vmem:[#allocation2 + $0x470] sm:$0xff] }
 0x979   :  { %11246 = vmatprep.subr.mxu1 %v14388_v16 }
 0x97a   :  { %11247 = vmatpush3.msra.mxu1 %v14388_v16 }
 0x97b   :  { %11248 = vmatprep.subr.mxu1 %v14392_v48 }
 0x97c   :  { %11249 = vmatpush3.msra.mxu1 %v14392_v48 }
 0x97d   :  { %11250 = vmatprep.subr.mxu1 %v14396_v12 }
 0x97e   :  { %11251 = vmatpush3.msra.mxu1 %v14396_v12 }
 0x97f   :  { %11252 = vmatprep.subr.mxu1 %v14400_v20 }
 0x980   :  { %11253 = vmatpush3.msra.mxu1 %v14400_v20 }
 0x981   :  { %11254 = vmatprep.subr.mxu1 %v14404_v17 }
 0x982   :  { %11255 = vmatpush3.msra.mxu1 %v14404_v17 }
 0x983   :  { %11256 = vmatprep.subr.mxu1 %v14408_v45 }
 0x984   :  { %11257 = vmatpush3.msra.mxu1 %v14408_v45 }
 0x985   :  { %11258 = vmatprep.subr.mxu1 %v14412_v52 }
 0x986   :  { %11259 = vmatpush3.msra.mxu1 %v14412_v52 }
 0x987   :  { %11260 = vmatprep.subr.mxu1 %v14416_v4 }
 0x988   :  { %11261 = vmatpush3.msra.mxu1 %v14416_v4 }
 0x989   :  { %11262 = vmatprep.subr.mxu1 %v14420_v41 }
 0x98a   :  { %11263 = vmatpush3.msra.mxu1 %v14420_v41 }
 0x98b   :  { %11264 = vmatprep.subr.mxu1 %v14424_v46 }
 0x98c   :  { %11265 = vmatpush3.msra.mxu1 %v14424_v46 }
 0x98d   :  { %11266 = vmatprep.subr.mxu1 %v14428_v18 }
 0x98e   :  { %11267 = vmatpush3.msra.mxu1 %v14428_v18 }
 0x98f   :  { %11268 = vmatprep.subr.mxu1 %v14432_v13 }
 0x990   :  { %11269 = vmatpush3.msra.mxu1 %v14432_v13 }
 0x991   :  { %11270 = vmatprep.subr.mxu1 %v14436_v43 }
 0x992   :  { %11271 = vmatpush3.msra.mxu1 %v14436_v43 }
 0x993   :  { %11272 = vmatprep.subr.mxu1 %v14440_v22 }
 0x994   :  { %11273 = vmatpush3.msra.mxu1 %v14440_v22  ;;  %v2038_v22 = vmul.f32 2.0, %v14428_v18 }
 0x995   :  { %11274 = vmatprep.subr.mxu1 %v14444_v23 }
 0x996   :  { %11275 = vmatpush3.msra.mxu1 %v14444_v23 }
 0x997   :  { %11277 = vmatmul.mubr.f32.vlgmr.msra.gmra.mxu1 %v14448_v25  ;;  %11356 = vmatprep.subr.mxu1 %v2502_v24 }
 0x998   :  { %11357 = vmatpush3.msra.mxu1 %v2502_v24  ;;  %11279 = vmatprep.mubr.f32.mxu1 %v14451_v27  ;;  %v2041_v24 = vmul.f32 2.0, %v14416_v4  ;;  %v2042_v4 = vmul.f32 2.0, %v14412_v52  ;;  %v2047_v52 = vmul.f32 2.0, %v14392_v48 }
 0x999   :  { %11358 = vmatprep.subr.mxu1 %v2501_v26 }
 0x99a   :  { %11359 = vmatpush3.msra.mxu1 %v2501_v26 }
 0x99b   :  { %11280 = vmatmul.mubr.f32.gmra.mxu1 %v14454_v29  ;;  %11360 = vmatprep.subr.mxu1 %v2500_v28 }
 0x99c   :  { %11361 = vmatpush3.msra.mxu1 %v2500_v28  ;;  %11282 = vmatprep.mubr.f32.mxu1 %v14457_v31  ;;  %v2040_v28 = vmul.f32 2.0, %v14420_v41  ;;  %v2045_v41 = vmul.f32 2.0, %v14400_v20  ;;  %v2046_v20 = vmul.f32 2.0, %v14396_v12 }
 0x99d   :  { %11362 = vmatprep.subr.mxu1 %v2499_v30 }
 0x99e   :  { %11363 = vmatpush3.msra.mxu1 %v2499_v30 }
 0x99f   :  { %11283 = vmatmul.mubr.f32.gmra.mxu1 %v14460_v49  ;;  %11364 = vmatprep.subr.mxu1 %v2498_v33 }
 0x9a0   :  { %11365 = vmatpush3.msra.mxu1 %v2498_v33  ;;  %11285 = vmatprep.mubr.f32.mxu1 %v14463_v51  ;;  %v2043_v33 = vmul.f32 2.0, %v14408_v45 }
 0x9a1   :  { %11366 = vmatprep.subr.mxu1 %v2497_v38 }
 0x9a2   :  { %11367 = vmatpush3.msra.mxu1 %v2497_v38 }
 0x9a3   :  { %11286 = vmatmul.mubr.f32.gmra.mxu1 %v14466_v47  ;;  %11368 = vmatprep.subr.mxu1 %v2496_v58 }
 0x9a4   :  { %11369 = vmatpush3.msra.mxu1 %v2496_v58  ;;  %11288 = vmatprep.mubr.f32.mxu1 %v14469_v44 }
 0x9a5   :  { %11370 = vmatprep.subr.mxu1 %v2495_v14 }
 0x9a6   :  { %11371 = vmatpush3.msra.mxu1 %v2495_v14 }
 0x9a7   :  { %11289 = vmatmul.mubr.f32.gmra.mxu1 %v14472_v2  ;;  %11372 = vmatprep.subr.mxu1 %v2494_v53 }
 0x9a8   :  { %11373 = vmatpush3.msra.mxu1 %v2494_v53  ;;  %11291 = vmatprep.mubr.f32.mxu1 %v14475_v3 }
 0x9a9   :  { %11374 = vmatprep.subr.mxu1 %v2493_v57 }
 0x9aa   :  { %11375 = vmatpush3.msra.mxu1 %v2493_v57 }
 0x9ab   :  { %11292 = vmatmul.mubr.f32.gmra.mxu1 %v14478_v55  ;;  %11376 = vmatprep.subr.mxu1 %v2492_v63 }
 0x9ac   :  { %11377 = vmatpush3.msra.mxu1 %v2492_v63  ;;  %11294 = vmatprep.mubr.f32.mxu1 %v14481_v5  ;;  %v2044_v63 = vmul.f32 2.0, %v14404_v17  ;;  %v2049_v17 = vmul.f32 2.0, %v14384_v19 }
 0x9ad   :  { %11378 = vmatprep.subr.mxu1 %v2491_v56 }
 0x9ae   :  { %11379 = vmatpush3.msra.mxu1 %v2491_v56 }
 0x9af   :  { %11295 = vmatmul.mubr.f32.gmra.mxu1 %v14484_v0  ;;  %11380 = vmatprep.subr.mxu1 %v2490_v42 }
 0x9b0   :  { %11381 = vmatpush3.msra.mxu1 %v2490_v42  ;;  %11297 = vmatprep.mubr.f32.mxu1 %v14487_v15 }
 0x9b1   :  { %11382 = vmatprep.subr.mxu1 %v2489_v6 }
 0x9b2   :  { %11383 = vmatpush3.msra.mxu1 %v2489_v6 }
 0x9b3   :  { %11298 = vmatmul.mubr.f32.gmra.mxu1 %v14490_v11  ;;  %11384 = vmatprep.subr.mxu1 %v2488_v62 }
 0x9b4   :  { %11385 = vmatpush3.msra.mxu1 %v2488_v62  ;;  %11388 = vmatprep.mubr.f32.mxu1 %v14355_v21 }
 0x9b5   :  { %11386 = vmatprep.subr.mxu1 %v2487_v40 }
 0x9b6   :  { %11387 = vmatpush3.msra.mxu1 %v2487_v40 }
 0x9b7   :  { %11389 = vmatmul.mubr.f32.vlgmr.msra.gmra.mxu1 %v14448_v25 }
 0x9b8   :  { %11391 = vmatprep.mubr.f32.mxu1 %v14451_v27 }
 0x9bb   :  { %11392 = vmatmul.mubr.f32.gmra.mxu1 %v14454_v29 }
 0x9bc   :  { %11394 = vmatprep.mubr.f32.mxu1 %v14457_v31 }
 0x9bf   :  { %11395 = vmatmul.mubr.f32.gmra.mxu1 %v14460_v49 }
 0x9c0   :  { %11397 = vmatprep.mubr.f32.mxu1 %v14463_v51 }
 0x9c3   :  { %11398 = vmatmul.mubr.f32.gmra.mxu1 %v14466_v47 }
 0x9c4   :  { %11400 = vmatprep.mubr.f32.mxu1 %v14469_v44 }
 0x9c7   :  { %11401 = vmatmul.mubr.f32.gmra.mxu1 %v14472_v2 }
 0x9c8   :  { %11403 = vmatprep.mubr.f32.mxu1 %v14475_v3 }
 0x9cb   :  { %11404 = vmatmul.mubr.f32.gmra.mxu1 %v14478_v55 }
 0x9cc   :  { %11406 = vmatprep.mubr.f32.mxu1 %v14481_v5 }
 0x9cf   :  { %11407 = vmatmul.mubr.f32.gmra.mxu1 %v14484_v0 }
 0x9d0   :  { %11409 = vmatprep.mubr.f32.mxu1 %v14487_v15 }
 0x9d3   :  { %11410 = vmatmul.mubr.f32.gmra.mxu1 %v14490_v11 }
 0x9d4   :  { %11500 = vmatprep.mubr.f32.mxu1 %v14355_v21 }
 0xa57   :  { %v11278_v1 = vpop.f32.mrf.mxu1 }
 0xa58   :  { %v2196_v60 = vsub.f32 %v2035_v9, %v11278_v1  ;;  %v2504_v1 = vld [vmem:[#allocation2 + $0x88] sm:$0xff] }
 0xa59   :  { %v2116_v7 = vpop.f32.mrf.mxu1 }
 0xa5a   :  { %2213 = vst.msk [vmem:[#allocation2 + $0x488] sm:$0xff] %vm321_vm0, %v2196_v60  ;;  %v2195_v37 = vsub.f32 %v2034_v50, %v2116_v7  ;;  %v14539_v60 = vstv %s139_s22  ;;  %v2048_v50 = vmul.f32 2.0, %v14388_v16  ;;  %s9334_s22 = sld [smem:[#allocation11 + $0x2]] }
 0xa5b   :  { %v11281_v39 = vpop.f32.mrf.mxu1 }
 0xa5c   :  { %2212 = vst.msk [vmem:[#allocation2 + $0x480] sm:$0xff] %vm321_vm0, %v2195_v37  ;;  %v2198_v32 = vsub.f32 %v2037_v61, %v11281_v39  ;;  %v2503_v37 = vld [vmem:[#allocation2 + $0x80] sm:$0xff]  ;;  %v2521_v61 = vmul.f32 %v14539_v60, %v2504_v1  ;;  %v2514_v1 = vld [vmem:[#allocation2 + $0xd8] sm:$0xff] }
 0xa5d   :  { %v2126_v34 = vpop.f32.mrf.mxu1 }
 0xa5e   :  { %2215 = vst.msk [vmem:[#allocation2 + $0x498] sm:$0xff] %vm321_vm0, %v2198_v32  ;;  %v2197_v10 = vsub.f32 %v2036_v8, %v2126_v34  ;;  %v2506_v32 = vld [vmem:[#allocation2 + $0x98] sm:$0xff]  ;;  %v2520_v8 = vmul.f32 %v14539_v60, %v2503_v37 }
 0xa5f   :  { %v11284_v35 = vpop.f32.mrf.mxu1  ;;  %v2523_v16 = vmul.f32 %v14539_v60, %v2506_v32 }
 0xa60   :  { %2214 = vst.msk [vmem:[#allocation2 + $0x490] sm:$0xff] %vm321_vm0, %v2197_v10  ;;  %v2200_v59 = vsub.f32 %v2039_v54, %v11284_v35  ;;  %v2505_v10 = vld [vmem:[#allocation2 + $0x90] sm:$0xff]  ;;  %s109_s4 = smax.f32 %s13392_s1, %s9334_s22 }
 0xa61   :  { %v2136_v23 = vpop.f32.mrf.mxu1  ;;  %s111_s6 = smul.f32 %s9335_s23, %s109_s4 }
 0xa62   :  { %2217 = vst.msk [vmem:[#allocation2 + $0x4a8] sm:$0xff] %vm321_vm0, %v2200_v59  ;;  %v2199_v13 = vsub.f32 %v2038_v22, %v2136_v23  ;;  %v2508_v59 = vld [vmem:[#allocation2 + $0xa8] sm:$0xff]  ;;  %v2522_v23 = vmul.f32 %v14539_v60, %v2505_v10 }
 0xa63   :  { %v11287_v26 = vpop.f32.mrf.mxu1 }
 0xa64   :  { %2216 = vst.msk [vmem:[#allocation2 + $0x4a0] sm:$0xff] %vm321_vm0, %v2199_v13  ;;  %v2202_v43 = vsub.f32 %v2041_v24, %v11287_v26  ;;  %v2507_v26 = vld [vmem:[#allocation2 + $0xa0] sm:$0xff] }
 0xa65   :  { %v2146_v46 = vpop.f32.mrf.mxu1 }
 0xa66   :  { %2219 = vst.msk [vmem:[#allocation2 + $0x4b8] sm:$0xff] %vm321_vm0, %v2202_v43  ;;  %v2201_v30 = vsub.f32 %v2040_v28, %v2146_v46  ;;  %v2525_v28 = vmul.f32 %v14539_v60, %v2508_v59 }
 0xa67   :  { %v11290_v18 = vpop.f32.mrf.mxu1 }
 0xa68   :  { %2218 = vst.msk [vmem:[#allocation2 + $0x4b0] sm:$0xff] %vm321_vm0, %v2201_v30  ;;  %v2204_v38 = vsub.f32 %v2043_v33, %v11290_v18  ;;  %v2510_v33 = vld [vmem:[#allocation2 + $0xb8] sm:$0xff] }
 0xa69   :  { %v2156_v58 = vpop.f32.mrf.mxu1 }
 0xa6a   :  { %2221 = vst.msk [vmem:[#allocation2 + $0x4c8] sm:$0xff] %vm321_vm0, %v2204_v38  ;;  %v2203_v14 = vsub.f32 %v2042_v4, %v2156_v58  ;;  %v2524_v38 = vmul.f32 %v14539_v60, %v2507_v26  ;;  %v2518_v26 = vld [vmem:[#allocation2 + $0xf8] sm:$0xff] }
 0xa6b   :  { %v11293_v53 = vpop.f32.mrf.mxu1 }
 0xa6c   :  { %2220 = vst.msk [vmem:[#allocation2 + $0x4c0] sm:$0xff] %vm321_vm0, %v2203_v14  ;;  %v2206_v57 = vsub.f32 %v2045_v41, %v11293_v53  ;;  %v2509_v14 = vld [vmem:[#allocation2 + $0xb0] sm:$0xff]  ;;  %v2527_v53 = vmul.f32 %v14539_v60, %v2510_v33  ;;  %v14611_v33 = vld [vmem:[#allocation2 + $0x4a8] sm:$0xff] }
 0xa6d   :  { %v2166_v45 = vpop.f32.mrf.mxu1 }
 0xa6e   :  { %2223 = vst.msk [vmem:[#allocation2 + $0x4d8] sm:$0xff] %vm321_vm0, %v2206_v57  ;;  %v2205_v56 = vsub.f32 %v2044_v63, %v2166_v45  ;;  %v2512_v45 = vld [vmem:[#allocation2 + $0xc8] sm:$0xff] }
 0xa6f   :  { %v11296_v42 = vpop.f32.mrf.mxu1 }
 0xa70   :  { %2222 = vst.msk [vmem:[#allocation2 + $0x4d0] sm:$0xff] %vm321_vm0, %v2205_v56  ;;  %v2208_v6 = vsub.f32 %v2047_v52, %v11296_v42  ;;  %v2526_v52 = vmul.f32 %v14539_v60, %v2509_v14 }
 0xa71   :  { %v2176_v62 = vpop.f32.mrf.mxu1  ;;  %v14587_v37 = vld [vmem:[#allocation2 + $0x4c8] sm:$0xff] }
 0xa72   :  { %2225 = vst.msk [vmem:[#allocation2 + $0x4e8] sm:$0xff] %vm321_vm0, %v2208_v6  ;;  %v2207_v40 = vsub.f32 %v2046_v20, %v2176_v62  ;;  %v2511_v20 = vld [vmem:[#allocation2 + $0xc0] sm:$0xff] }
 0xa73   :  { %v11299_v9 = vpop.f32.mrf.mxu1 }
 0xa74   :  { %2224 = vst.msk [vmem:[#allocation2 + $0x4e0] sm:$0xff] %vm321_vm0, %v2207_v40  ;;  %v2210_v48 = vsub.f32 %v2049_v17, %v11299_v9  ;;  %v2529_v40 = vmul.f32 %v14539_v60, %v2512_v45 }
 0xa75   :  { %v2186_v7 = vpop.f32.mrf.mxu1  ;;  %v14575_v6 = vld [vmem:[#allocation2 + $0x4d8] sm:$0xff] }
 0xa76   :  { %2227 = vst.msk [vmem:[#allocation2 + $0x4f8] sm:$0xff] %vm321_vm0, %v2210_v48  ;;  %v2209_v12 = vsub.f32 %v2048_v50, %v2186_v7  ;;  %v2528_v50 = vmul.f32 %v14539_v60, %v2511_v20  ;;  %v14633_v20 = vld [vmem:[#allocation2 + $0x488] sm:$0xff] }
 0xa77   :  { %v11390_v39 = vpop.f32.mrf.mxu1  ;;  %v14581_v9 = vld [vmem:[#allocation2 + $0x4d0] sm:$0xff] }
 0xa78   :  { %2226 = vst.msk [vmem:[#allocation2 + $0x4f0] sm:$0xff] %vm321_vm0, %v2209_v12  ;;  %v2608_v19 = vadd.f32 %v11390_v39, %v2521_v61  ;;  %v2513_v12 = vld [vmem:[#allocation2 + $0xd0] sm:$0xff]  ;;  %v2531_v39 = vmul.f32 %v14539_v60, %v2514_v1 }
 0xa79   :  { %v2602_v34 = vpop.f32.mrf.mxu1  ;;  %v14563_v58 = vld [vmem:[#allocation2 + $0x4e8] sm:$0xff]  ;;  %v2530_v10 = vmul.f32 %v14539_v60, %v2513_v12 }
 0xa7a   :  { %2682 = vst.msk [vmem:[#allocation3 + $0x8] sm:$0xff] %vm321_vm0, %v2608_v19  ;;  %v2603_v54 = vadd.f32 %v2602_v34, %v2520_v8  ;;  %v14593_v19 = vld [vmem:[#allocation2 + $0x4c0] sm:$0xff]  ;;  %v2516_v8 = vld [vmem:[#allocation2 + $0xe8] sm:$0xff] }
 0xa7b   :  { %v11393_v35 = vpop.f32.mrf.mxu1  ;;  %v14569_v63 = vld [vmem:[#allocation2 + $0x4e0] sm:$0xff] }
 0xa7c   :  { %2681 = vst.msk [vmem:[#allocation3] sm:$0xff] %vm321_vm0, %v2603_v54  ;;  %v2618_v22 = vadd.f32 %v11393_v35, %v2523_v16  ;;  %v14599_v16 = vld [vmem:[#allocation2 + $0x4b8] sm:$0xff]  ;;  %v2515_v35 = vld [vmem:[#allocation2 + $0xe0] sm:$0xff] }
 0xa7d   :  { %v2612_v13 = vpop.f32.mrf.mxu1  ;;  %v14551_v24 = vld [vmem:[#allocation2 + $0x4f8] sm:$0xff] }
 0xa7e   :  { %2684 = vst.msk [vmem:[#allocation3 + $0x18] sm:$0xff] %vm321_vm0, %v2618_v22  ;;  %v2613_v43 = vadd.f32 %v2612_v13, %v2522_v23  ;;  %11300 = vmatprep.subr.mxu0 %v14551_v24  ;;  %v2533_v22 = vmul.f32 %v14539_v60, %v2516_v8  ;;  %v14605_v13 = vld [vmem:[#allocation2 + $0x4b0] sm:$0xff] }
 0xa7f   :  { %11301 = vmatpush3.msra.mxu0 %v14551_v24  ;;  %v11396_v46 = vpop.f32.mrf.mxu1  ;;  %v14557_v30 = vld [vmem:[#allocation2 + $0x4f0] sm:$0xff] }
 0xa80   :  { %2683 = vst.msk [vmem:[#allocation3 + $0x10] sm:$0xff] %vm321_vm0, %v2613_v43  ;;  %v2628_v18 = vadd.f32 %v11396_v46, %v2525_v28  ;;  %11302 = vmatprep.subr.mxu0 %v14557_v30  ;;  %v2532_v28 = vmul.f32 %v14539_v60, %v2515_v35 }
 0xa81   :  { %11303 = vmatpush3.msra.mxu0 %v14557_v30  ;;  %v2622_v4 = vpop.f32.mrf.mxu1  ;;  %v2698_v35 = vld [vmem:[#allocation3 + $0x8] sm:$0xff] }
 0xa82   :  { %2686 = vst.msk [vmem:[#allocation3 + $0x28] sm:$0xff] %vm321_vm0, %v2628_v18  ;;  %v2623_v41 = vadd.f32 %v2622_v4, %v2524_v38  ;;  %11304 = vmatprep.subr.mxu0 %v14563_v58  ;;  %v2517_v18 = vld [vmem:[#allocation2 + $0xf0] sm:$0xff]  ;;  %v2535_v4 = vmul.f32 %v14539_v60, %v2518_v26 }
 0xa83   :  { %11305 = vmatpush3.msra.mxu0 %v14563_v58  ;;  %v11399_v57 = vpop.f32.mrf.mxu1 }
 0xa84   :  { %2685 = vst.msk [vmem:[#allocation3 + $0x20] sm:$0xff] %vm321_vm0, %v2623_v41  ;;  %v2638_v56 = vadd.f32 %v11399_v57, %v2527_v53  ;;  %11306 = vmatprep.subr.mxu0 %v14569_v63  ;;  %v14617_v41 = vld [vmem:[#allocation2 + $0x4a0] sm:$0xff]  ;;  %v2534_v57 = vmul.f32 %v14539_v60, %v2517_v18  ;;  %v2250_v18 = vmul.f32 2.0, %v14605_v13 }
 0xa85   :  { %11307 = vmatpush3.msra.mxu0 %v14569_v63  ;;  %v2632_v42 = vpop.f32.mrf.mxu1 }
 0xa86   :  { %2688 = vst.msk [vmem:[#allocation3 + $0x38] sm:$0xff] %vm321_vm0, %v2638_v56  ;;  %v2633_v62 = vadd.f32 %v2632_v42, %v2526_v52  ;;  %11308 = vmatprep.subr.mxu0 %v14575_v6  ;;  %v14623_v56 = vld [vmem:[#allocation2 + $0x498] sm:$0xff]  ;;  %v14628_v42 = vld [vmem:[#allocation2 + $0x490] sm:$0xff] }
 0xa87   :  { %11309 = vmatpush3.msra.mxu0 %v14575_v6  ;;  %v11402_v17 = vpop.f32.mrf.mxu1 }
 0xa88   :  { %2687 = vst.msk [vmem:[#allocation3 + $0x30] sm:$0xff] %vm321_vm0, %v2633_v62  ;;  %v2648_v48 = vadd.f32 %v11402_v17, %v2529_v40  ;;  %11310 = vmatprep.subr.mxu0 %v14581_v9  ;;  %v14637_v62 = vld [vmem:[#allocation2 + $0x480] sm:$0xff] }
 0xa89   :  { %11311 = vmatpush3.msra.mxu0 %v14581_v9  ;;  %v2642_v7 = vpop.f32.mrf.mxu1  ;;  %v2702_v8 = vld [vmem:[#allocation3 + $0x28] sm:$0xff] }
 0xa8a   :  { %2690 = vst.msk [vmem:[#allocation3 + $0x48] sm:$0xff] %vm321_vm0, %v2648_v48  ;;  %v2643_v61 = vadd.f32 %v2642_v7, %v2528_v50  ;;  %11312 = vmatprep.subr.mxu0 %v14587_v37 }
 0xa8b   :  { %11313 = vmatpush3.msra.mxu0 %v14587_v37  ;;  %v11405_v32 = vpop.f32.mrf.mxu1 }
 0xa8c   :  { %2689 = vst.msk [vmem:[#allocation3 + $0x40] sm:$0xff] %vm321_vm0, %v2643_v61  ;;  %v2658_v34 = vadd.f32 %v11405_v32, %v2531_v39  ;;  %11314 = vmatprep.subr.mxu0 %v14593_v19 }
 0xa8d   :  { %11315 = vmatpush3.msra.mxu0 %v14593_v19  ;;  %v2652_v54 = vpop.f32.mrf.mxu1  ;;  %v2704_v39 = vld [vmem:[#allocation3 + $0x38] sm:$0xff] }
 0xa8e   :  { %2692 = vst.msk [vmem:[#allocation3 + $0x58] sm:$0xff] %vm321_vm0, %v2658_v34  ;;  %v2653_v59 = vadd.f32 %v2652_v54, %v2530_v10  ;;  %11316 = vmatprep.subr.mxu0 %v14599_v16  ;;  %v2701_v34 = vld [vmem:[#allocation3 + $0x20] sm:$0xff]  ;;  %v2700_v10 = vld [vmem:[#allocation3 + $0x18] sm:$0xff]  ;;  %v2699_v54 = vld [vmem:[#allocation3 + $0x10] sm:$0xff] }
 0xa8f   :  { %11317 = vmatpush3.msra.mxu0 %v14599_v16  ;;  %v11408_v23 = vpop.f32.mrf.mxu1  ;;  %v2703_v32 = vld [vmem:[#allocation3 + $0x30] sm:$0xff] }
 0xa90   :  { %2691 = vst.msk [vmem:[#allocation3 + $0x50] sm:$0xff] %vm321_vm0, %v2653_v59  ;;  %v2668_v43 = vadd.f32 %v11408_v23, %v2533_v22  ;;  %11318 = vmatprep.subr.mxu0 %v14605_v13  ;;  %v2697_v59 = vld [vmem:[#allocation3] sm:$0xff]  ;;  %v2248_v22 = vmul.f32 2.0, %v14617_v41 }
 0xa91   :  { %11319 = vmatpush3.msra.mxu0 %v14605_v13  ;;  %v2662_v46 = vpop.f32.mrf.mxu1  ;;  %v2706_v12 = vld [vmem:[#allocation3 + $0x48] sm:$0xff]  ;;  %v2255_v13 = vmul.f32 2.0, %v14575_v6  ;;  %v2256_v6 = vmul.f32 2.0, %v14569_v63 }
 0xa92   :  { %2694 = vst.msk [vmem:[#allocation3 + $0x68] sm:$0xff] %vm321_vm0, %v2668_v43  ;;  %v2663_v38 = vadd.f32 %v2662_v46, %v2532_v28  ;;  %11320 = vmatprep.subr.mxu0 %v14611_v33  ;;  %v2251_v43 = vmul.f32 2.0, %v14599_v16  ;;  %v2252_v16 = vmul.f32 2.0, %v14593_v19  ;;  %v2257_v19 = vmul.f32 2.0, %v14563_v58 }
 0xa93   :  { %11321 = vmatpush3.msra.mxu0 %v14611_v33  ;;  %v11411_v14 = vpop.f32.mrf.mxu1  ;;  %v2705_v61 = vld [vmem:[#allocation3 + $0x40] sm:$0xff] }
 0xa94   :  { %2693 = vst.msk [vmem:[#allocation3 + $0x60] sm:$0xff] %vm321_vm0, %v2663_v38  ;;  %v2678_v53 = vadd.f32 %v11411_v14, %v2535_v4  ;;  %11322 = vmatprep.subr.mxu0 %v14617_v41  ;;  %v2253_v4 = vmul.f32 2.0, %v14587_v37 }
 0xa95   :  { %11323 = vmatpush3.msra.mxu0 %v14617_v41  ;;  %v2672_v45 = vpop.f32.mrf.mxu1  ;;  %v2708_v50 = vld [vmem:[#allocation3 + $0x58] sm:$0xff] }
 0xa96   :  { %2696 = vst.msk [vmem:[#allocation3 + $0x78] sm:$0xff] %vm321_vm0, %v2678_v53  ;;  %v2673_v52 = vadd.f32 %v2672_v45, %v2534_v57  ;;  %11324 = vmatprep.subr.mxu0 %v14623_v56 }
 0xa97   :  { %11325 = vmatpush3.msra.mxu0 %v14623_v56  ;;  %v2707_v7 = vld [vmem:[#allocation3 + $0x50] sm:$0xff] }
 0xa98   :  { %2695 = vst.msk [vmem:[#allocation3 + $0x70] sm:$0xff] %vm321_vm0, %v2673_v52  ;;  %11326 = vmatprep.subr.mxu0 %v14628_v42  ;;  %v2254_v52 = vmul.f32 2.0, %v14581_v9  ;;  %v2259_v9 = vmul.f32 2.0, %v14551_v24 }
 0xa99   :  { %11327 = vmatpush3.msra.mxu0 %v14628_v42  ;;  %v2710_v1 = vld [vmem:[#allocation3 + $0x68] sm:$0xff] }
 0xa9a   :  { %11328 = vmatprep.subr.mxu0 %v14633_v20 }
 0xa9b   :  { %11329 = vmatpush3.msra.mxu0 %v14633_v20  ;;  %v2709_v48 = vld [vmem:[#allocation3 + $0x60] sm:$0xff] }
 0xa9c   :  { %11330 = vmatprep.subr.mxu0 %v14637_v62 }
 0xa9d   :  { %11331 = vmatpush3.msra.mxu0 %v14637_v62  ;;  %v2712_v40 = vld [vmem:[#allocation3 + $0x78] sm:$0xff] }
 0xa9e   :  { %11333 = vmatmul.mubr.f32.vlgmr.msra.gmra.mxu0 %v14448_v25  ;;  %11412 = vmatprep.subr.mxu0 %v2712_v40 }
 0xa9f   :  { %11413 = vmatpush3.msra.mxu0 %v2712_v40  ;;  %v2711_v17 = vld [vmem:[#allocation3 + $0x70] sm:$0xff]  ;;  %11335 = vmatprep.mubr.f32.mxu0 %v14451_v27 }
 0xaa0   :  { %11414 = vmatprep.subr.mxu0 %v2711_v17 }
 0xaa1   :  { %11415 = vmatpush3.msra.mxu0 %v2711_v17 }
 0xaa2   :  { %11336 = vmatmul.mubr.f32.gmra.mxu0 %v14454_v29  ;;  %11416 = vmatprep.subr.mxu0 %v2710_v1 }
 0xaa3   :  { %11417 = vmatpush3.msra.mxu0 %v2710_v1  ;;  %11338 = vmatprep.mubr.f32.mxu0 %v14457_v31 }
 0xaa4   :  { %11418 = vmatprep.subr.mxu0 %v2709_v48 }
 0xaa5   :  { %11419 = vmatpush3.msra.mxu0 %v2709_v48  ;;  %v2714_v48 = vld [vmem:[#allocation2 + $0x108] sm:$0xff] }
 0xaa6   :  { %11339 = vmatmul.mubr.f32.gmra.mxu0 %v14460_v49  ;;  %11420 = vmatprep.subr.mxu0 %v2708_v50 }
 0xaa7   :  { %11421 = vmatpush3.msra.mxu0 %v2708_v50  ;;  %11341 = vmatprep.mubr.f32.mxu0 %v14463_v51  ;;  %v14702_v50 = vstv %s135_s24  ;;  %s9332_s24 = sld [smem:[#allocation11 + $0x1]] }
 0xaa8   :  { %11422 = vmatprep.subr.mxu0 %v2707_v7 }
 0xaa9   :  { %11423 = vmatpush3.msra.mxu0 %v2707_v7  ;;  %v2258_v7 = vmul.f32 2.0, %v14557_v30 }
 0xaaa   :  { %11342 = vmatmul.mubr.f32.gmra.mxu0 %v14466_v47  ;;  %11424 = vmatprep.subr.mxu0 %v2706_v12 }
 0xaab   :  { %11425 = vmatpush3.msra.mxu0 %v2706_v12  ;;  %11344 = vmatprep.mubr.f32.mxu0 %v14469_v44 }
 0xaac   :  { %11426 = vmatprep.subr.mxu0 %v2705_v61 }
 0xaad   :  { %11427 = vmatpush3.msra.mxu0 %v2705_v61  ;;  %v2713_v61 = vld [vmem:[#allocation2 + $0x100] sm:$0xff]  ;;  %s105_s26 = smax.f32 %s13392_s1, %s9332_s24 }
 0xaae   :  { %11345 = vmatmul.mubr.f32.gmra.mxu0 %v14472_v2  ;;  %11428 = vmatprep.subr.mxu0 %v2704_v39  ;;  %s107_s27 = smul.f32 %s9333_s25, %s105_s26 }
 0xaaf   :  { %11429 = vmatpush3.msra.mxu0 %v2704_v39  ;;  %11347 = vmatprep.mubr.f32.mxu0 %v14475_v3  ;;  %v2731_v39 = vmul.f32 %v14702_v50, %v2714_v48  ;;  %v2727_v48 = vld [vmem:[#allocation2 + $0x170] sm:$0xff] }
 0xab0   :  { %11430 = vmatprep.subr.mxu0 %v2703_v32 }
 0xab1   :  { %11431 = vmatpush3.msra.mxu0 %v2703_v32 }
 0xab2   :  { %11348 = vmatmul.mubr.f32.gmra.mxu0 %v14478_v55  ;;  %11432 = vmatprep.subr.mxu0 %v2702_v8 }
 0xab3   :  { %11433 = vmatpush3.msra.mxu0 %v2702_v8  ;;  %11350 = vmatprep.mubr.f32.mxu0 %v14481_v5  ;;  %v2716_v8 = vld [vmem:[#allocation2 + $0x118] sm:$0xff] }
 0xab4   :  { %11434 = vmatprep.subr.mxu0 %v2701_v34  ;;  %v2733_v30 = vmul.f32 %v14702_v50, %v2716_v8 }
 0xab5   :  { %11435 = vmatpush3.msra.mxu0 %v2701_v34  ;;  %v2730_v34 = vmul.f32 %v14702_v50, %v2713_v61 }
 0xab6   :  { %11351 = vmatmul.mubr.f32.gmra.mxu0 %v14484_v0  ;;  %11436 = vmatprep.subr.mxu0 %v2700_v10 }
 0xab7   :  { %11437 = vmatpush3.msra.mxu0 %v2700_v10  ;;  %11353 = vmatprep.mubr.f32.mxu0 %v14487_v15 }
 0xab8   :  { %11438 = vmatprep.subr.mxu0 %v2699_v54 }
 0xab9   :  { %11439 = vmatpush3.msra.mxu0 %v2699_v54  ;;  %v2715_v54 = vld [vmem:[#allocation2 + $0x110] sm:$0xff] }
 0xaba   :  { %11354 = vmatmul.mubr.f32.gmra.mxu0 %v14490_v11  ;;  %11440 = vmatprep.subr.mxu0 %v2698_v35 }
 0xabb   :  { %11441 = vmatpush3.msra.mxu0 %v2698_v35  ;;  %11444 = vmatprep.mubr.f32.mxu0 %v14355_v21 }
 0xabc   :  { %11442 = vmatprep.subr.mxu0 %v2697_v59 }
 0xabd   :  { %11443 = vmatpush3.msra.mxu0 %v2697_v59 }
 0xabe   :  { %11445 = vmatmul.mubr.f32.vlgmr.msra.gmra.mxu0 %v14448_v25  ;;  %v2245_v25 = vmul.f32 2.0, %v14633_v20 }
 0xabf   :  { %11447 = vmatprep.mubr.f32.mxu0 %v14451_v27 }
 0xac2   :  { %11448 = vmatmul.mubr.f32.gmra.mxu0 %v14454_v29 }
 0xac3   :  { %11450 = vmatprep.mubr.f32.mxu0 %v14457_v31  ;;  %v2244_v31 = vmul.f32 2.0, %v14637_v62 }
 0xac6   :  { %11451 = vmatmul.mubr.f32.gmra.mxu0 %v14460_v49 }
 0xac7   :  { %11453 = vmatprep.mubr.f32.mxu0 %v14463_v51 }
 0xaca   :  { %11454 = vmatmul.mubr.f32.gmra.mxu0 %v14466_v47  ;;  %v2247_v47 = vmul.f32 2.0, %v14623_v56 }
 0xacb   :  { %11456 = vmatprep.mubr.f32.mxu0 %v14469_v44 }
 0xace   :  { %11457 = vmatmul.mubr.f32.gmra.mxu0 %v14472_v2 }
 0xacf   :  { %11459 = vmatprep.mubr.f32.mxu0 %v14475_v3  ;;  %v2246_v3 = vmul.f32 2.0, %v14628_v42 }
 0xad2   :  { %11460 = vmatmul.mubr.f32.gmra.mxu0 %v14478_v55 }
 0xad3   :  { %11462 = vmatprep.mubr.f32.mxu0 %v14481_v5  ;;  %v2249_v5 = vmul.f32 2.0, %v14611_v33 }
 0xad6   :  { %11463 = vmatmul.mubr.f32.gmra.mxu0 %v14484_v0 }
 0xad7   :  { %11465 = vmatprep.mubr.f32.mxu0 %v14487_v15 }
 0xada   :  { %11466 = vmatmul.mubr.f32.gmra.mxu0 %v14490_v11 }
 0xadb   :  { %11556 = vmatprep.mubr.f32.mxu0 %v14355_v21 }
 0xb5e   :  { %v11334_v27 = vpop.f32.mrf.mxu0 }
 0xb5f   :  { %v2406_v29 = vsub.f32 %v2245_v25, %v11334_v27  ;;  %v2718_v25 = vld [vmem:[#allocation2 + $0x128] sm:$0xff] }
 0xb60   :  { %v2326_v49 = vpop.f32.mrf.mxu0 }
 0xb61   :  { %2423 = vst.msk [vmem:[#allocation2 + $0x508] sm:$0xff] %vm321_vm0, %v2406_v29  ;;  %v2405_v51 = vsub.f32 %v2244_v31, %v2326_v49  ;;  %v2732_v29 = vmul.f32 %v14702_v50, %v2715_v54  ;;  %v2717_v49 = vld [vmem:[#allocation2 + $0x120] sm:$0xff] }
 0xb62   :  { %v11337_v44 = vpop.f32.mrf.mxu0 }
 0xb63   :  { %2422 = vst.msk [vmem:[#allocation2 + $0x500] sm:$0xff] %vm321_vm0, %v2405_v51  ;;  %v2408_v2 = vsub.f32 %v2247_v47, %v11337_v44  ;;  %v2735_v47 = vmul.f32 %v14702_v50, %v2718_v25 }
 0xb64   :  { %v2336_v55 = vpop.f32.mrf.mxu0 }
 0xb65   :  { %2425 = vst.msk [vmem:[#allocation2 + $0x518] sm:$0xff] %vm321_vm0, %v2408_v2  ;;  %v2407_v21 = vsub.f32 %v2246_v3, %v2336_v55  ;;  %v2720_v2 = vld [vmem:[#allocation2 + $0x138] sm:$0xff]  ;;  %v2734_v55 = vmul.f32 %v14702_v50, %v2717_v49 }
 0xb66   :  { %v11340_v0 = vpop.f32.mrf.mxu0 }
 0xb67   :  { %2424 = vst.msk [vmem:[#allocation2 + $0x510] sm:$0xff] %vm321_vm0, %v2407_v21  ;;  %v2410_v15 = vsub.f32 %v2249_v5, %v11340_v0  ;;  %v2719_v5 = vld [vmem:[#allocation2 + $0x130] sm:$0xff] }
 0xb68   :  { %v2346_v23 = vpop.f32.mrf.mxu0 }
 0xb69   :  { %2427 = vst.msk [vmem:[#allocation2 + $0x528] sm:$0xff] %vm321_vm0, %v2410_v15  ;;  %v2409_v26 = vsub.f32 %v2248_v22, %v2346_v23  ;;  %v2737_v15 = vmul.f32 %v14702_v50, %v2720_v2  ;;  %v2722_v23 = vld [vmem:[#allocation2 + $0x148] sm:$0xff] }
 0xb6a   :  { %v11343_v28 = vpop.f32.mrf.mxu0  ;;  %v14740_v2 = vld [vmem:[#allocation9 + $0x8] sm:$0xff] }
 0xb6b   :  { %2426 = vst.msk [vmem:[#allocation2 + $0x520] sm:$0xff] %vm321_vm0, %v2409_v26  ;;  %v2412_v46 = vsub.f32 %v2251_v43, %v11343_v28  ;;  %v2736_v43 = vmul.f32 %v14702_v50, %v2719_v5  ;;  %v14752_v5 = vld [vmem:[#allocation9 + $0x28] sm:$0xff] }
 0xb6c   :  { %v2356_v33 = vpop.f32.mrf.mxu0 }
 0xb6d   :  { %2429 = vst.msk [vmem:[#allocation2 + $0x538] sm:$0xff] %vm321_vm0, %v2412_v46  ;;  %v2411_v38 = vsub.f32 %v2250_v18, %v2356_v33  ;;  %v2721_v46 = vld [vmem:[#allocation2 + $0x140] sm:$0xff]  ;;  %v2739_v33 = vmul.f32 %v14702_v50, %v2722_v23  ;;  %v14764_v23 = vld [vmem:[#allocation9 + $0x48] sm:$0xff] }
 0xb6e   :  { %v11346_v14 = vpop.f32.mrf.mxu0 }
 0xb6f   :  { %2428 = vst.msk [vmem:[#allocation2 + $0x530] sm:$0xff] %vm321_vm0, %v2411_v38  ;;  %v2414_v41 = vsub.f32 %v2253_v4, %v11346_v14  ;;  %v2724_v4 = vld [vmem:[#allocation2 + $0x158] sm:$0xff] }
 0xb70   :  { %v2366_v53 = vpop.f32.mrf.mxu0 }
 0xb71   :  { %2431 = vst.msk [vmem:[#allocation2 + $0x548] sm:$0xff] %vm321_vm0, %v2414_v41  ;;  %v2413_v57 = vsub.f32 %v2252_v16, %v2366_v53  ;;  %v2738_v41 = vmul.f32 %v14702_v50, %v2721_v46  ;;  %v2723_v53 = vld [vmem:[#allocation2 + $0x150] sm:$0xff]  ;;  %v14776_v46 = vld [vmem:[#allocation9 + $0x68] sm:$0xff] }
 0xb72   :  { %v11349_v45 = vpop.f32.mrf.mxu0 }
 0xb73   :  { %2430 = vst.msk [vmem:[#allocation2 + $0x540] sm:$0xff] %vm321_vm0, %v2413_v57  ;;  %v2416_v56 = vsub.f32 %v2255_v13, %v11349_v45  ;;  %v2741_v13 = vmul.f32 %v14702_v50, %v2724_v4  ;;  %v14787_v4 = vstv %s131_s28  ;;  %s100_s28 = sld [smem:[#allocation11]] }
 0xb74   :  { %v2376_v37 = vpop.f32.mrf.mxu0 }
 0xb75   :  { %2433 = vst.msk [vmem:[#allocation2 + $0x558] sm:$0xff] %vm321_vm0, %v2416_v56  ;;  %v2415_v42 = vsub.f32 %v2254_v52, %v2376_v37  ;;  %v2726_v56 = vld [vmem:[#allocation2 + $0x168] sm:$0xff]  ;;  %v2740_v37 = vmul.f32 %v14702_v50, %v2723_v53  ;;  %v2926_v53 = vld [vmem:[#allocation2 + $0x198] sm:$0xff] }
 0xb76   :  { %v11352_v20 = vpop.f32.mrf.mxu0 }
 0xb77   :  { %2432 = vst.msk [vmem:[#allocation2 + $0x550] sm:$0xff] %vm321_vm0, %v2415_v42  ;;  %v2418_v62 = vsub.f32 %v2257_v19, %v11352_v20  ;;  %v2725_v19 = vld [vmem:[#allocation2 + $0x160] sm:$0xff] }
 0xb78   :  { %v2386_v40 = vpop.f32.mrf.mxu0 }
 0xb79   :  { %2435 = vst.msk [vmem:[#allocation2 + $0x568] sm:$0xff] %vm321_vm0, %v2418_v62  ;;  %v2417_v17 = vsub.f32 %v2256_v6, %v2386_v40  ;;  %v2743_v62 = vmul.f32 %v14702_v50, %v2726_v56  ;;  %v2728_v40 = vld [vmem:[#allocation2 + $0x178] sm:$0xff]  ;;  %s101_s10 = smax.f32 %s13392_s1, %s100_s28 }
 0xb7a   :  { %v11355_v1 = vpop.f32.mrf.mxu0  ;;  %s103_s11 = smul.f32 %s102_s29, %s101_s10 }
 0xb7b   :  { %2434 = vst.msk [vmem:[#allocation2 + $0x560] sm:$0xff] %vm321_vm0, %v2417_v17  ;;  %v2420_v58 = vsub.f32 %v2259_v9, %v11355_v1  ;;  %v2742_v9 = vmul.f32 %v14702_v50, %v2725_v19 }
 0xb7c   :  { %v2396_v12 = vpop.f32.mrf.mxu0 }
 0xb7d   :  { %2437 = vst.msk [vmem:[#allocation2 + $0x578] sm:$0xff] %vm321_vm0, %v2420_v58  ;;  %v2419_v63 = vsub.f32 %v2258_v7, %v2396_v12  ;;  %v2745_v7 = vmul.f32 %v14702_v50, %v2728_v40 }
 0xb7e   :  { %v11446_v32 = vpop.f32.mrf.mxu0 }
 0xb7f   :  { %2436 = vst.msk [vmem:[#allocation2 + $0x570] sm:$0xff] %vm321_vm0, %v2419_v63  ;;  %v2818_v24 = vadd.f32 %v11446_v32, %v2731_v39  ;;  %v2744_v63 = vmul.f32 %v14702_v50, %v2727_v48 }
 0xb80   :  { %v2812_v10 = vpop.f32.mrf.mxu0 }
 0xb81   :  { %2892 = vst.msk [vmem:[#allocation3 + $0x8] sm:$0xff] %vm321_vm0, %v2818_v24  ;;  %v2813_v35 = vadd.f32 %v2812_v10, %v2730_v34 }
 0xb82   :  { %v11449_v59 = vpop.f32.mrf.mxu0 }
 0xb83   :  { %2891 = vst.msk [vmem:[#allocation3] sm:$0xff] %vm321_vm0, %v2813_v35  ;;  %v2828_v27 = vadd.f32 %v11449_v59, %v2733_v30 }
 0xb84   :  { %v2822_v31 = vpop.f32.mrf.mxu0 }
 0xb85   :  { %2894 = vst.msk [vmem:[#allocation3 + $0x18] sm:$0xff] %vm321_vm0, %v2828_v27  ;;  %v2823_v51 = vadd.f32 %v2822_v31, %v2732_v29 }
 0xb86   :  { %v11452_v44 = vpop.f32.mrf.mxu0 }
 0xb87   :  { %2893 = vst.msk [vmem:[#allocation3 + $0x10] sm:$0xff] %vm321_vm0, %v2823_v51  ;;  %v2838_v3 = vadd.f32 %v11452_v44, %v2735_v47 }
 0xb88   :  { %v2832_v21 = vpop.f32.mrf.mxu0  ;;  %v2908_v47 = vld [vmem:[#allocation3 + $0x8] sm:$0xff] }
 0xb89   :  { %2896 = vst.msk [vmem:[#allocation3 + $0x28] sm:$0xff] %vm321_vm0, %v2838_v3  ;;  %v2833_v0 = vadd.f32 %v2832_v21, %v2734_v55  ;;  %v14743_v3 = vld [vmem:[#allocation9 + $0x10] sm:$0xff]  ;;  %v14746_v55 = vld [vmem:[#allocation9 + $0x18] sm:$0xff]  ;;  %v14749_v21 = vld [vmem:[#allocation9 + $0x20] sm:$0xff] }
 0xb8a   :  { %v11455_v22 = vpop.f32.mrf.mxu0  ;;  %v2907_v44 = vld [vmem:[#allocation3] sm:$0xff] }
 0xb8b   :  { %2895 = vst.msk [vmem:[#allocation3 + $0x20] sm:$0xff] %vm321_vm0, %v2833_v0  ;;  %v2848_v26 = vadd.f32 %v11455_v22, %v2737_v15  ;;  %v14755_v0 = vld [vmem:[#allocation9 + $0x30] sm:$0xff]  ;;  %v14758_v15 = vld [vmem:[#allocation9 + $0x38] sm:$0xff]  ;;  %v14761_v22 = vld [vmem:[#allocation9 + $0x40] sm:$0xff] }
 0xb8c   :  { %v2842_v28 = vpop.f32.mrf.mxu0  ;;  %v2910_v49 = vld [vmem:[#allocation3 + $0x18] sm:$0xff] }
 0xb8d   :  { %2898 = vst.msk [vmem:[#allocation3 + $0x38] sm:$0xff] %vm321_vm0, %v2848_v26  ;;  %v2843_v18 = vadd.f32 %v2842_v28, %v2736_v43  ;;  %v14767_v26 = vld [vmem:[#allocation9 + $0x50] sm:$0xff]  ;;  %v14770_v43 = vld [vmem:[#allocation9 + $0x58] sm:$0xff]  ;;  %v14773_v28 = vld [vmem:[#allocation9 + $0x60] sm:$0xff] }
 0xb8e   :  { %v11458_v38 = vpop.f32.mrf.mxu0  ;;  %v2909_v51 = vld [vmem:[#allocation3 + $0x10] sm:$0xff] }
 0xb8f   :  { %2897 = vst.msk [vmem:[#allocation3 + $0x30] sm:$0xff] %vm321_vm0, %v2843_v18  ;;  %v2858_v14 = vadd.f32 %v11458_v38, %v2739_v33  ;;  %v14779_v18 = vld [vmem:[#allocation9 + $0x70] sm:$0xff]  ;;  %v14783_v33 = vld [vmem:[#allocation9] sm:$0xff]  ;;  %v2924_v38 = vld [vmem:[#allocation2 + $0x188] sm:$0xff] }
 0xb90   :  { %v2852_v16 = vpop.f32.mrf.mxu0  ;;  %v2912_v29 = vld [vmem:[#allocation3 + $0x28] sm:$0xff] }
 0xb91   :  { %2900 = vst.msk [vmem:[#allocation3 + $0x48] sm:$0xff] %vm321_vm0, %v2858_v14  ;;  %v2853_v57 = vadd.f32 %v2852_v16, %v2738_v41  ;;  %v2923_v14 = vld [vmem:[#allocation2 + $0x180] sm:$0xff]  ;;  %v2941_v41 = vmul.f32 %v14787_v4, %v2924_v38 }
 0xb92   :  { %v11461_v45 = vpop.f32.mrf.mxu0  ;;  %v2911_v31 = vld [vmem:[#allocation3 + $0x20] sm:$0xff] }
 0xb93   :  { %2899 = vst.msk [vmem:[#allocation3 + $0x40] sm:$0xff] %vm321_vm0, %v2853_v57  ;;  %v2868_v52 = vadd.f32 %v11461_v45, %v2741_v13  ;;  %v2925_v45 = vld [vmem:[#allocation2 + $0x190] sm:$0xff] }
 0xb94   :  { %v2862_v42 = vpop.f32.mrf.mxu0  ;;  %v2914_v25 = vld [vmem:[#allocation3 + $0x38] sm:$0xff] }
 0xb95   :  { %2902 = vst.msk [vmem:[#allocation3 + $0x58] sm:$0xff] %vm321_vm0, %v2868_v52  ;;  %v2863_v20 = vadd.f32 %v2862_v42, %v2740_v37  ;;  %v2943_v52 = vmul.f32 %v14787_v4, %v2926_v53  ;;  %v2928_v42 = vld [vmem:[#allocation2 + $0x1a8] sm:$0xff] }
 0xb96   :  { %v11464_v6 = vpop.f32.mrf.mxu0  ;;  %v2913_v27 = vld [vmem:[#allocation3 + $0x30] sm:$0xff] }
 0xb97   :  { %2901 = vst.msk [vmem:[#allocation3 + $0x50] sm:$0xff] %vm321_vm0, %v2863_v20  ;;  %v2878_v17 = vadd.f32 %v11464_v6, %v2743_v62  ;;  %v2942_v20 = vmul.f32 %v14787_v4, %v2925_v45  ;;  %v2927_v6 = vld [vmem:[#allocation2 + $0x1a0] sm:$0xff] }
 0xb98   :  { %v2872_v1 = vpop.f32.mrf.mxu0  ;;  %v2916_v30 = vld [vmem:[#allocation3 + $0x48] sm:$0xff] }
 0xb99   :  { %2904 = vst.msk [vmem:[#allocation3 + $0x68] sm:$0xff] %vm321_vm0, %v2878_v17  ;;  %v2873_v58 = vadd.f32 %v2872_v1, %v2742_v9  ;;  %v2945_v17 = vmul.f32 %v14787_v4, %v2928_v42  ;;  %v2930_v1 = vld [vmem:[#allocation2 + $0x1b8] sm:$0xff] }
 0xb9a   :  { %v11467_v12 = vpop.f32.mrf.mxu0  ;;  %v2915_v59 = vld [vmem:[#allocation3 + $0x40] sm:$0xff] }
 0xb9b   :  { %2903 = vst.msk [vmem:[#allocation3 + $0x60] sm:$0xff] %vm321_vm0, %v2873_v58  ;;  %v2888_v61 = vadd.f32 %v11467_v12, %v2745_v7  ;;  %v2944_v58 = vmul.f32 %v14787_v4, %v2927_v6  ;;  %v2929_v12 = vld [vmem:[#allocation2 + $0x1b0] sm:$0xff] }
 0xb9c   :  { %v2882_v39 = vpop.f32.mrf.mxu0  ;;  %v2918_v54 = vld [vmem:[#allocation3 + $0x58] sm:$0xff] }
 0xb9d   :  { %2906 = vst.msk [vmem:[#allocation3 + $0x78] sm:$0xff] %vm321_vm0, %v2888_v61  ;;  %v2883_v32 = vadd.f32 %v2882_v39, %v2744_v63  ;;  %v2947_v63 = vmul.f32 %v14787_v4, %v2930_v1 }
 0xb9e   :  { %v2917_v35 = vld [vmem:[#allocation3 + $0x50] sm:$0xff] }
 0xb9f   :  { %2905 = vst.msk [vmem:[#allocation3 + $0x70] sm:$0xff] %vm321_vm0, %v2883_v32  ;;  %v2932_v32 = vld [vmem:[#allocation2 + $0x1c8] sm:$0xff] }
 0xba0   :  { %v2920_v34 = vld [vmem:[#allocation3 + $0x68] sm:$0xff] }
 0xba2   :  { %v2919_v10 = vld [vmem:[#allocation3 + $0x60] sm:$0xff] }
 0xba4   :  { %v2922_v8 = vld [vmem:[#allocation3 + $0x78] sm:$0xff] }
 0xba5   :  { %11468 = vmatprep.subr.mxu1 %v2922_v8 }
 0xba6   :  { %11469 = vmatpush3.msra.mxu1 %v2922_v8  ;;  %v2921_v24 = vld [vmem:[#allocation3 + $0x70] sm:$0xff] }
 0xba7   :  { %11470 = vmatprep.subr.mxu1 %v2921_v24 }
 0xba8   :  { %11471 = vmatpush3.msra.mxu1 %v2921_v24  ;;  %v2946_v24 = vmul.f32 %v14787_v4, %v2929_v12 }
 0xba9   :  { %11472 = vmatprep.subr.mxu1 %v2920_v34 }
 0xbaa   :  { %11473 = vmatpush3.msra.mxu1 %v2920_v34 }
 0xbab   :  { %11474 = vmatprep.subr.mxu1 %v2919_v10 }
 0xbac   :  { %11475 = vmatpush3.msra.mxu1 %v2919_v10  ;;  %v2931_v10 = vld [vmem:[#allocation2 + $0x1c0] sm:$0xff] }
 0xbad   :  { %11476 = vmatprep.subr.mxu1 %v2918_v54 }
 0xbae   :  { %11477 = vmatpush3.msra.mxu1 %v2918_v54 }
 0xbaf   :  { %11478 = vmatprep.subr.mxu1 %v2917_v35 }
 0xbb0   :  { %11479 = vmatpush3.msra.mxu1 %v2917_v35  ;;  %v2949_v35 = vmul.f32 %v14787_v4, %v2932_v32 }
 0xbb1   :  { %11480 = vmatprep.subr.mxu1 %v2916_v30 }
 0xbb2   :  { %11481 = vmatpush3.msra.mxu1 %v2916_v30 }
 0xbb3   :  { %11482 = vmatprep.subr.mxu1 %v2915_v59 }
 0xbb4   :  { %11483 = vmatpush3.msra.mxu1 %v2915_v59  ;;  %v2934_v59 = vld [vmem:[#allocation2 + $0x1d8] sm:$0xff] }
 0xbb5   :  { %11484 = vmatprep.subr.mxu1 %v2914_v25 }
 0xbb6   :  { %11485 = vmatpush3.msra.mxu1 %v2914_v25 }
 0xbb7   :  { %11486 = vmatprep.subr.mxu1 %v2913_v27 }
 0xbb8   :  { %11487 = vmatpush3.msra.mxu1 %v2913_v27  ;;  %v2948_v27 = vmul.f32 %v14787_v4, %v2931_v10 }
 0xbb9   :  { %11488 = vmatprep.subr.mxu1 %v2912_v29 }
 0xbba   :  { %11489 = vmatpush3.msra.mxu1 %v2912_v29 }
 0xbbb   :  { %11490 = vmatprep.subr.mxu1 %v2911_v31 }
 0xbbc   :  { %11491 = vmatpush3.msra.mxu1 %v2911_v31  ;;  %v2933_v31 = vld [vmem:[#allocation2 + $0x1d0] sm:$0xff] }
 0xbbd   :  { %11492 = vmatprep.subr.mxu1 %v2910_v49 }
 0xbbe   :  { %11493 = vmatpush3.msra.mxu1 %v2910_v49 }
 0xbbf   :  { %11494 = vmatprep.subr.mxu1 %v2909_v51 }
 0xbc0   :  { %11495 = vmatpush3.msra.mxu1 %v2909_v51  ;;  %v2951_v51 = vmul.f32 %v14787_v4, %v2934_v59  ;;  %v3134_v59 = vld [vmem:[#allocation2 + $0x208] sm:$0xff] }
 0xbc1   :  { %11496 = vmatprep.subr.mxu1 %v2908_v47 }
 0xbc2   :  { %11497 = vmatpush3.msra.mxu1 %v2908_v47 }
 0xbc3   :  { %11498 = vmatprep.subr.mxu1 %v2907_v44 }
 0xbc4   :  { %11499 = vmatpush3.msra.mxu1 %v2907_v44  ;;  %v2936_v44 = vld [vmem:[#allocation2 + $0x1e8] sm:$0xff] }
 0xbc5   :  { %11501 = vmatmul.mubr.f32.vlgmr.msra.gmra.mxu1 %v14740_v2 }
 0xbc6   :  { %11503 = vmatprep.mubr.f32.mxu1 %v14743_v3 }
 0xbc9   :  { %11504 = vmatmul.mubr.f32.gmra.mxu1 %v14746_v55 }
 0xbca   :  { %11506 = vmatprep.mubr.f32.mxu1 %v14749_v21 }
 0xbcd   :  { %11507 = vmatmul.mubr.f32.gmra.mxu1 %v14752_v5 }
 0xbce   :  { %11509 = vmatprep.mubr.f32.mxu1 %v14755_v0 }
 0xbd1   :  { %11510 = vmatmul.mubr.f32.gmra.mxu1 %v14758_v15 }
 0xbd2   :  { %11512 = vmatprep.mubr.f32.mxu1 %v14761_v22 }
 0xbd5   :  { %11513 = vmatmul.mubr.f32.gmra.mxu1 %v14764_v23 }
 0xbd6   :  { %11515 = vmatprep.mubr.f32.mxu1 %v14767_v26 }
 0xbd9   :  { %11516 = vmatmul.mubr.f32.gmra.mxu1 %v14770_v43 }
 0xbda   :  { %11518 = vmatprep.mubr.f32.mxu1 %v14773_v28 }
 0xbdd   :  { %11519 = vmatmul.mubr.f32.gmra.mxu1 %v14776_v46 }
 0xbde   :  { %11521 = vmatprep.mubr.f32.mxu1 %v14779_v18 }
 0xbe1   :  { %11522 = vmatmul.mubr.f32.gmra.mxu1 %v14490_v11  ;;  %v2940_v11 = vmul.f32 %v14787_v4, %v2923_v14  ;;  %v2950_v14 = vmul.f32 %v14787_v4, %v2933_v31 }
 0xbe2   :  { %11612 = vmatprep.mubr.f32.mxu1 %v14783_v33 }
 0xc85   :  { %v11502_v16 = vpop.f32.mrf.mxu1 }
 0xc86   :  { %v3028_v57 = vadd.f32 %v11502_v16, %v2941_v41  ;;  %v2935_v16 = vld [vmem:[#allocation2 + $0x1e0] sm:$0xff] }
 0xc87   :  { %v3022_v13 = vpop.f32.mrf.mxu1 }
 0xc88   :  { %3102 = vst.msk [vmem:[#allocation3 + $0x8] sm:$0xff] %vm321_vm0, %v3028_v57  ;;  %v3023_v56 = vadd.f32 %v3022_v13, %v2940_v11  ;;  %v2953_v57 = vmul.f32 %v14787_v4, %v2936_v44  ;;  %v2938_v13 = vld [vmem:[#allocation2 + $0x1f8] sm:$0xff] }
 0xc89   :  { %v11505_v37 = vpop.f32.mrf.mxu1 }
 0xc8a   :  { %3101 = vst.msk [vmem:[#allocation3] sm:$0xff] %vm321_vm0, %v3023_v56  ;;  %v3038_v19 = vadd.f32 %v11505_v37, %v2943_v52  ;;  %v2952_v56 = vmul.f32 %v14787_v4, %v2935_v16  ;;  %v2937_v37 = vld [vmem:[#allocation2 + $0x1f0] sm:$0xff] }
 0xc8b   :  { %v3032_v62 = vpop.f32.mrf.mxu1  ;;  %v2954_v6 = vmul.f32 %v14787_v4, %v2937_v37 }
 0xc8c   :  { %3104 = vst.msk [vmem:[#allocation3 + $0x18] sm:$0xff] %vm321_vm0, %v3038_v19  ;;  %v3033_v40 = vadd.f32 %v3032_v62, %v2942_v20  ;;  %v2955_v19 = vmul.f32 %v14787_v4, %v2938_v13 }
 0xc8d   :  { %v11508_v9 = vpop.f32.mrf.mxu1 }
 0xc8e   :  { %3103 = vst.msk [vmem:[#allocation3 + $0x10] sm:$0xff] %vm321_vm0, %v3033_v40  ;;  %v3048_v48 = vadd.f32 %v11508_v9, %v2945_v17 }
 0xc8f   :  { %v3042_v7 = vpop.f32.mrf.mxu1 }
 0xc90   :  { %3106 = vst.msk [vmem:[#allocation3 + $0x28] sm:$0xff] %vm321_vm0, %v3048_v48  ;;  %v3043_v61 = vadd.f32 %v3042_v7, %v2944_v58 }
 0xc91   :  { %v11511_v39 = vpop.f32.mrf.mxu1 }
 0xc92   :  { %3105 = vst.msk [vmem:[#allocation3 + $0x20] sm:$0xff] %vm321_vm0, %v3043_v61  ;;  %v3058_v8 = vadd.f32 %v11511_v39, %v2947_v63 }
 0xc93   :  { %v3052_v34 = vpop.f32.mrf.mxu1 }
 0xc94   :  { %3108 = vst.msk [vmem:[#allocation3 + $0x38] sm:$0xff] %vm321_vm0, %v3058_v8  ;;  %v3053_v54 = vadd.f32 %v3052_v34, %v2946_v24  ;;  %v3120_v34 = vld [vmem:[#allocation3 + $0x18] sm:$0xff] }
 0xc95   :  { %v11514_v30 = vpop.f32.mrf.mxu1  ;;  %v3119_v10 = vld [vmem:[#allocation3 + $0x10] sm:$0xff] }
 0xc96   :  { %3107 = vst.msk [vmem:[#allocation3 + $0x30] sm:$0xff] %vm321_vm0, %v3053_v54  ;;  %v3068_v25 = vadd.f32 %v11514_v30, %v2949_v35  ;;  %v3118_v54 = vld [vmem:[#allocation3 + $0x8] sm:$0xff]  ;;  %v3117_v35 = vld [vmem:[#allocation3] sm:$0xff]  ;;  %v14835_v30 = vld [vmem:[#allocation9 + $0x78] sm:$0xff] }
 0xc97   :  { %v3062_v29 = vpop.f32.mrf.mxu1  ;;  %v3122_v8 = vld [vmem:[#allocation3 + $0x28] sm:$0xff] }
 0xc98   :  { %3110 = vst.msk [vmem:[#allocation3 + $0x48] sm:$0xff] %vm321_vm0, %v3068_v25  ;;  %v3063_v49 = vadd.f32 %v3062_v29, %v2948_v27  ;;  %v14840_v25 = vstv %s127_s12  ;;  %v3133_v27 = vld [vmem:[#allocation2 + $0x200] sm:$0xff] }
 0xc99   :  { %v11517_v47 = vpop.f32.mrf.mxu1  ;;  %v3121_v24 = vld [vmem:[#allocation3 + $0x20] sm:$0xff]  ;;  %v3151_v29 = vmul.f32 %v14840_v25, %v3134_v59 }
 0xc9a   :  { %3109 = vst.msk [vmem:[#allocation3 + $0x40] sm:$0xff] %vm321_vm0, %v3063_v49  ;;  %v3078_v38 = vadd.f32 %v11517_v47, %v2951_v51  ;;  %v3136_v49 = vld [vmem:[#allocation2 + $0x218] sm:$0xff]  ;;  %v3150_v47 = vmul.f32 %v14840_v25, %v3133_v27  ;;  %v3146_v27 = vld [vmem:[#allocation2 + $0x268] sm:$0xff] }
 0xc9b   :  { %v3072_v41 = vpop.f32.mrf.mxu1  ;;  %v3124_v39 = vld [vmem:[#allocation3 + $0x38] sm:$0xff] }
 0xc9c   :  { %3112 = vst.msk [vmem:[#allocation3 + $0x58] sm:$0xff] %vm321_vm0, %v3078_v38  ;;  %v3073_v53 = vadd.f32 %v3072_v41, %v2950_v14  ;;  %v3135_v38 = vld [vmem:[#allocation2 + $0x210] sm:$0xff]  ;;  %v3153_v41 = vmul.f32 %v14840_v25, %v3136_v49 }
 0xc9d   :  { %v11520_v11 = vpop.f32.mrf.mxu1  ;;  %v3123_v32 = vld [vmem:[#allocation3 + $0x30] sm:$0xff] }
 0xc9e   :  { %3111 = vst.msk [vmem:[#allocation3 + $0x50] sm:$0xff] %vm321_vm0, %v3073_v53  ;;  %v3088_v45 = vadd.f32 %v11520_v11, %v2953_v57  ;;  %v3138_v53 = vld [vmem:[#allocation2 + $0x228] sm:$0xff]  ;;  %v3152_v11 = vmul.f32 %v14840_v25, %v3135_v38 }
 0xc9f   :  { %v3082_v52 = vpop.f32.mrf.mxu1  ;;  %v3126_v61 = vld [vmem:[#allocation3 + $0x48] sm:$0xff] }
 0xca0   :  { %3114 = vst.msk [vmem:[#allocation3 + $0x68] sm:$0xff] %vm321_vm0, %v3088_v45  ;;  %v3083_v42 = vadd.f32 %v3082_v52, %v2952_v56  ;;  %v3137_v45 = vld [vmem:[#allocation2 + $0x220] sm:$0xff]  ;;  %v3155_v52 = vmul.f32 %v14840_v25, %v3138_v53 }
 0xca1   :  { %v11523_v20 = vpop.f32.mrf.mxu1  ;;  %v3125_v63 = vld [vmem:[#allocation3 + $0x40] sm:$0xff] }
 0xca2   :  { %3113 = vst.msk [vmem:[#allocation3 + $0x60] sm:$0xff] %vm321_vm0, %v3083_v42  ;;  %v3098_v62 = vadd.f32 %v11523_v20, %v2955_v19  ;;  %v3140_v42 = vld [vmem:[#allocation2 + $0x238] sm:$0xff]  ;;  %v3154_v20 = vmul.f32 %v14840_v25, %v3137_v45 }
 0xca3   :  { %v3092_v40 = vpop.f32.mrf.mxu1  ;;  %v3128_v7 = vld [vmem:[#allocation3 + $0x58] sm:$0xff] }
 0xca4   :  { %3116 = vst.msk [vmem:[#allocation3 + $0x78] sm:$0xff] %vm321_vm0, %v3098_v62  ;;  %v3093_v17 = vadd.f32 %v3092_v40, %v2954_v6  ;;  %v3139_v6 = vld [vmem:[#allocation2 + $0x230] sm:$0xff] }
 0xca5   :  { %v3127_v12 = vld [vmem:[#allocation3 + $0x50] sm:$0xff] }
 0xca6   :  { %3115 = vst.msk [vmem:[#allocation3 + $0x70] sm:$0xff] %vm321_vm0, %v3093_v17  ;;  %v3157_v17 = vmul.f32 %v14840_v25, %v3140_v42 }
 0xca7   :  { %v3130_v48 = vld [vmem:[#allocation3 + $0x68] sm:$0xff] }
 0xca9   :  { %v3129_v58 = vld [vmem:[#allocation3 + $0x60] sm:$0xff] }
 0xcab   :  { %v3132_v9 = vld [vmem:[#allocation3 + $0x78] sm:$0xff] }
 0xcac   :  { %11524 = vmatprep.subr.mxu0 %v3132_v9 }
 0xcad   :  { %11525 = vmatpush3.msra.mxu0 %v3132_v9  ;;  %v3131_v1 = vld [vmem:[#allocation3 + $0x70] sm:$0xff] }
 0xcae   :  { %11526 = vmatprep.subr.mxu0 %v3131_v1 }
 0xcaf   :  { %11527 = vmatpush3.msra.mxu0 %v3131_v1  ;;  %v3142_v1 = vld [vmem:[#allocation2 + $0x248] sm:$0xff] }
 0xcb0   :  { %11528 = vmatprep.subr.mxu0 %v3130_v48 }
 0xcb1   :  { %11529 = vmatpush3.msra.mxu0 %v3130_v48 }
 0xcb2   :  { %11530 = vmatprep.subr.mxu0 %v3129_v58 }
 0xcb3   :  { %11531 = vmatpush3.msra.mxu0 %v3129_v58  ;;  %v3156_v58 = vmul.f32 %v14840_v25, %v3139_v6 }
 0xcb4   :  { %11532 = vmatprep.subr.mxu0 %v3128_v7 }
 0xcb5   :  { %11533 = vmatpush3.msra.mxu0 %v3128_v7 }
 0xcb6   :  { %11534 = vmatprep.subr.mxu0 %v3127_v12 }
 0xcb7   :  { %11535 = vmatpush3.msra.mxu0 %v3127_v12  ;;  %v3141_v12 = vld [vmem:[#allocation2 + $0x240] sm:$0xff] }
 0xcb8   :  { %11536 = vmatprep.subr.mxu0 %v3126_v61 }
 0xcb9   :  { %11537 = vmatpush3.msra.mxu0 %v3126_v61 }
 0xcba   :  { %11538 = vmatprep.subr.mxu0 %v3125_v63 }
 0xcbb   :  { %11539 = vmatpush3.msra.mxu0 %v3125_v63  ;;  %v3159_v63 = vmul.f32 %v14840_v25, %v3142_v1 }
 0xcbc   :  { %11540 = vmatprep.subr.mxu0 %v3124_v39 }
 0xcbd   :  { %11541 = vmatpush3.msra.mxu0 %v3124_v39 }
 0xcbe   :  { %11542 = vmatprep.subr.mxu0 %v3123_v32 }
 0xcbf   :  { %11543 = vmatpush3.msra.mxu0 %v3123_v32  ;;  %v3144_v32 = vld [vmem:[#allocation2 + $0x258] sm:$0xff] }
 0xcc0   :  { %11544 = vmatprep.subr.mxu0 %v3122_v8 }
 0xcc1   :  { %11545 = vmatpush3.msra.mxu0 %v3122_v8 }
 0xcc2   :  { %11546 = vmatprep.subr.mxu0 %v3121_v24 }
 0xcc3   :  { %11547 = vmatpush3.msra.mxu0 %v3121_v24  ;;  %v3158_v24 = vmul.f32 %v14840_v25, %v3141_v12 }
 0xcc4   :  { %11548 = vmatprep.subr.mxu0 %v3120_v34 }
 0xcc5   :  { %11549 = vmatpush3.msra.mxu0 %v3120_v34 }
 0xcc6   :  { %11550 = vmatprep.subr.mxu0 %v3119_v10 }
 0xcc7   :  { %11551 = vmatpush3.msra.mxu0 %v3119_v10  ;;  %v3143_v10 = vld [vmem:[#allocation2 + $0x250] sm:$0xff] }
 0xcc8   :  { %11552 = vmatprep.subr.mxu0 %v3118_v54 }
 0xcc9   :  { %11553 = vmatpush3.msra.mxu0 %v3118_v54 }
 0xcca   :  { %11554 = vmatprep.subr.mxu0 %v3117_v35 }
 0xccb   :  { %11555 = vmatpush3.msra.mxu0 %v3117_v35  ;;  %v3161_v35 = vmul.f32 %v14840_v25, %v3144_v32 }
 0xccc   :  { %11557 = vmatmul.mubr.f32.vlgmr.msra.gmra.mxu0 %v14740_v2 }
 0xccd   :  { %11559 = vmatprep.mubr.f32.mxu0 %v14743_v3 }
 0xcd0   :  { %11560 = vmatmul.mubr.f32.gmra.mxu0 %v14746_v55 }
 0xcd1   :  { %11562 = vmatprep.mubr.f32.mxu0 %v14749_v21 }
 0xcd4   :  { %11563 = vmatmul.mubr.f32.gmra.mxu0 %v14752_v5 }
 0xcd5   :  { %11565 = vmatprep.mubr.f32.mxu0 %v14755_v0 }
 0xcd8   :  { %11566 = vmatmul.mubr.f32.gmra.mxu0 %v14758_v15 }
 0xcd9   :  { %11568 = vmatprep.mubr.f32.mxu0 %v14761_v22 }
 0xcdc   :  { %11569 = vmatmul.mubr.f32.gmra.mxu0 %v14764_v23 }
 0xcdd   :  { %11571 = vmatprep.mubr.f32.mxu0 %v14767_v26 }
 0xce0   :  { %11572 = vmatmul.mubr.f32.gmra.mxu0 %v14770_v43 }
 0xce1   :  { %11574 = vmatprep.mubr.f32.mxu0 %v14773_v28 }
 0xce4   :  { %11575 = vmatmul.mubr.f32.gmra.mxu0 %v14776_v46 }
 0xce5   :  { %11577 = vmatprep.mubr.f32.mxu0 %v14779_v18 }
 0xce8   :  { %11578 = vmatmul.mubr.f32.gmra.mxu0 %v14835_v30 }
 0xce9   :  { %11668 = vmatprep.mubr.f32.mxu0 %v14783_v33 }
 0xd8c   :  { %v11558_v31 = vpop.f32.mrf.mxu0 }
 0xd8d   :  { %v3238_v51 = vadd.f32 %v11558_v31, %v3151_v29  ;;  %v3160_v31 = vmul.f32 %v14840_v25, %v3143_v10 }
 0xd8e   :  { %v3232_v44 = vpop.f32.mrf.mxu0 }
 0xd8f   :  { %3312 = vst.msk [vmem:[#allocation3 + $0x8] sm:$0xff] %vm321_vm0, %v3238_v51  ;;  %v3233_v14 = vadd.f32 %v3232_v44, %v3150_v47  ;;  %v3145_v51 = vld [vmem:[#allocation2 + $0x260] sm:$0xff]  ;;  %v3163_v44 = vmul.f32 %v14840_v25, %v3146_v27 }
 0xd90   :  { %v11561_v16 = vpop.f32.mrf.mxu0 }
 0xd91   :  { %3311 = vst.msk [vmem:[#allocation3] sm:$0xff] %vm321_vm0, %v3233_v14  ;;  %v3248_v57 = vadd.f32 %v11561_v16, %v3153_v41  ;;  %v3148_v14 = vld [vmem:[#allocation2 + $0x278] sm:$0xff]  ;;  %v3162_v16 = vmul.f32 %v14840_v25, %v3145_v51 }
 0xd92   :  { %v3242_v13 = vpop.f32.mrf.mxu0 }
 0xd93   :  { %3314 = vst.msk [vmem:[#allocation3 + $0x18] sm:$0xff] %vm321_vm0, %v3248_v57  ;;  %v3243_v56 = vadd.f32 %v3242_v13, %v3152_v11  ;;  %v3147_v57 = vld [vmem:[#allocation2 + $0x270] sm:$0xff]  ;;  %v3165_v13 = vmul.f32 %v14840_v25, %v3148_v14 }
 0xd94   :  { %v11564_v37 = vpop.f32.mrf.mxu0 }
 0xd95   :  { %3313 = vst.msk [vmem:[#allocation3 + $0x10] sm:$0xff] %vm321_vm0, %v3243_v56  ;;  %v3258_v19 = vadd.f32 %v11564_v37, %v3155_v52  ;;  %v3164_v52 = vmul.f32 %v14840_v25, %v3147_v57 }
 0xd96   :  { %v3252_v62 = vpop.f32.mrf.mxu0 }
 0xd97   :  { %3316 = vst.msk [vmem:[#allocation3 + $0x28] sm:$0xff] %vm321_vm0, %v3258_v19  ;;  %v3253_v40 = vadd.f32 %v3252_v62, %v3154_v20 }
 0xd98   :  { %v11567_v9 = vpop.f32.mrf.mxu0  ;;  %v3327_v32 = vld [vmem:[#allocation3] sm:$0xff] }
 0xd99   :  { %3315 = vst.msk [vmem:[#allocation3 + $0x20] sm:$0xff] %vm321_vm0, %v3253_v40  ;;  %v3268_v48 = vadd.f32 %v11567_v9, %v3157_v17 }
 0xd9a   :  { %v3262_v7 = vpop.f32.mrf.mxu0 }
 0xd9b   :  { %3318 = vst.msk [vmem:[#allocation3 + $0x38] sm:$0xff] %vm321_vm0, %v3268_v48  ;;  %v3263_v61 = vadd.f32 %v3262_v7, %v3156_v58 }
 0xd9c   :  { %v11570_v39 = vpop.f32.mrf.mxu0 }
 0xd9d   :  { %3317 = vst.msk [vmem:[#allocation3 + $0x30] sm:$0xff] %vm321_vm0, %v3263_v61  ;;  %v3278_v8 = vadd.f32 %v11570_v39, %v3159_v63  ;;  %v3330_v61 = vld [vmem:[#allocation3 + $0x18] sm:$0xff]  ;;  %v3329_v63 = vld [vmem:[#allocation3 + $0x10] sm:$0xff]  ;;  %v3328_v39 = vld [vmem:[#allocation3 + $0x8] sm:$0xff] }
 0xd9e   :  { %v3272_v34 = vpop.f32.mrf.mxu0  ;;  %v3332_v7 = vld [vmem:[#allocation3 + $0x28] sm:$0xff] }
 0xd9f   :  { %3320 = vst.msk [vmem:[#allocation3 + $0x48] sm:$0xff] %vm321_vm0, %v3278_v8  ;;  %v3273_v54 = vadd.f32 %v3272_v34, %v3158_v24  ;;  %v3344_v8 = vld [vmem:[#allocation2 + $0x288] sm:$0xff]  ;;  %v14891_v24 = vstv %s123_s16  ;;  %v3343_v34 = vld [vmem:[#allocation2 + $0x280] sm:$0xff] }
 0xda0   :  { %v11573_v59 = vpop.f32.mrf.mxu0  ;;  %v3331_v12 = vld [vmem:[#allocation3 + $0x20] sm:$0xff]  ;;  %v3361_v10 = vmul.f32 %v14891_v24, %v3344_v8  ;;  %v3360_v27 = vmul.f32 %v14891_v24, %v3343_v34 }
 0xda1   :  { %3319 = vst.msk [vmem:[#allocation3 + $0x40] sm:$0xff] %vm321_vm0, %v3273_v54  ;;  %v3288_v29 = vadd.f32 %v11573_v59, %v3161_v35  ;;  %v3346_v35 = vld [vmem:[#allocation2 + $0x298] sm:$0xff] }
 0xda2   :  { %v3282_v49 = vpop.f32.mrf.mxu0  ;;  %v3334_v48 = vld [vmem:[#allocation3 + $0x38] sm:$0xff]  ;;  %v3363_v51 = vmul.f32 %v14891_v24, %v3346_v35 }
 0xda3   :  { %3322 = vst.msk [vmem:[#allocation3 + $0x58] sm:$0xff] %vm321_vm0, %v3288_v29  ;;  %v3283_v47 = vadd.f32 %v3282_v49, %v3160_v31  ;;  %v3345_v31 = vld [vmem:[#allocation2 + $0x290] sm:$0xff] }
 0xda4   :  { %v11576_v38 = vpop.f32.mrf.mxu0  ;;  %v3333_v58 = vld [vmem:[#allocation3 + $0x30] sm:$0xff]  ;;  %v3362_v14 = vmul.f32 %v14891_v24, %v3345_v31 }
 0xda5   :  { %3321 = vst.msk [vmem:[#allocation3 + $0x50] sm:$0xff] %vm321_vm0, %v3283_v47  ;;  %v3298_v41 = vadd.f32 %v11576_v38, %v3163_v44  ;;  %v3348_v44 = vld [vmem:[#allocation2 + $0x2a8] sm:$0xff] }
 0xda6   :  { %v3292_v53 = vpop.f32.mrf.mxu0  ;;  %v3336_v9 = vld [vmem:[#allocation3 + $0x48] sm:$0xff]  ;;  %v3365_v57 = vmul.f32 %v14891_v24, %v3348_v44 }
 0xda7   :  { %3324 = vst.msk [vmem:[#allocation3 + $0x68] sm:$0xff] %vm321_vm0, %v3298_v41  ;;  %v3293_v11 = vadd.f32 %v3292_v53, %v3162_v16  ;;  %v3347_v16 = vld [vmem:[#allocation2 + $0x2a0] sm:$0xff] }
 0xda8   :  { %v11579_v45 = vpop.f32.mrf.mxu0  ;;  %v3335_v1 = vld [vmem:[#allocation3 + $0x40] sm:$0xff] }
 0xda9   :  { %3323 = vst.msk [vmem:[#allocation3 + $0x60] sm:$0xff] %vm321_vm0, %v3293_v11  ;;  %v3308_v56 = vadd.f32 %v11579_v45, %v3165_v13  ;;  %v3350_v13 = vld [vmem:[#allocation2 + $0x2b8] sm:$0xff] }
 0xdaa   :  { %v3302_v37 = vpop.f32.mrf.mxu0  ;;  %v3338_v40 = vld [vmem:[#allocation3 + $0x58] sm:$0xff] }
 0xdab   :  { %3326 = vst.msk [vmem:[#allocation3 + $0x78] sm:$0xff] %vm321_vm0, %v3308_v56  ;;  %v3303_v42 = vadd.f32 %v3302_v37, %v3164_v52  ;;  %v3364_v56 = vmul.f32 %v14891_v24, %v3347_v16  ;;  %v3349_v37 = vld [vmem:[#allocation2 + $0x2b0] sm:$0xff] }
 0xdac   :  { %v3337_v17 = vld [vmem:[#allocation3 + $0x50] sm:$0xff] }
 0xdad   :  { %3325 = vst.msk [vmem:[#allocation3 + $0x70] sm:$0xff] %vm321_vm0, %v3303_v42 }
 0xdae   :  { %v3340_v62 = vld [vmem:[#allocation3 + $0x68] sm:$0xff] }
 0xdb0   :  { %v3339_v6 = vld [vmem:[#allocation3 + $0x60] sm:$0xff] }
 0xdb2   :  { %v3342_v19 = vld [vmem:[#allocation3 + $0x78] sm:$0xff] }
 0xdb3   :  { %11580 = vmatprep.subr.mxu1 %v3342_v19 }
 0xdb4   :  { %11581 = vmatpush3.msra.mxu1 %v3342_v19  ;;  %v3341_v20 = vld [vmem:[#allocation3 + $0x70] sm:$0xff]  ;;  %v3367_v19 = vmul.f32 %v14891_v24, %v3350_v13 }
 0xdb5   :  { %11582 = vmatprep.subr.mxu1 %v3341_v20 }
 0xdb6   :  { %11583 = vmatpush3.msra.mxu1 %v3341_v20 }
 0xdb7   :  { %11584 = vmatprep.subr.mxu1 %v3340_v62 }
 0xdb8   :  { %11585 = vmatpush3.msra.mxu1 %v3340_v62  ;;  %v3352_v62 = vld [vmem:[#allocation2 + $0x2c8] sm:$0xff] }
 0xdb9   :  { %11586 = vmatprep.subr.mxu1 %v3339_v6 }
 0xdba   :  { %11587 = vmatpush3.msra.mxu1 %v3339_v6 }
 0xdbb   :  { %11588 = vmatprep.subr.mxu1 %v3338_v40 }
 0xdbc   :  { %11589 = vmatpush3.msra.mxu1 %v3338_v40  ;;  %v3366_v40 = vmul.f32 %v14891_v24, %v3349_v37 }
 0xdbd   :  { %11590 = vmatprep.subr.mxu1 %v3337_v17 }
 0xdbe   :  { %11591 = vmatpush3.msra.mxu1 %v3337_v17 }
 0xdbf   :  { %11592 = vmatprep.subr.mxu1 %v3336_v9 }
 0xdc0   :  { %11593 = vmatpush3.msra.mxu1 %v3336_v9  ;;  %v3351_v9 = vld [vmem:[#allocation2 + $0x2c0] sm:$0xff] }
 0xdc1   :  { %11594 = vmatprep.subr.mxu1 %v3335_v1 }
 0xdc2   :  { %11595 = vmatpush3.msra.mxu1 %v3335_v1 }
 0xdc3   :  { %11596 = vmatprep.subr.mxu1 %v3334_v48 }
 0xdc4   :  { %11597 = vmatpush3.msra.mxu1 %v3334_v48  ;;  %v3369_v48 = vmul.f32 %v14891_v24, %v3352_v62 }
 0xdc5   :  { %11598 = vmatprep.subr.mxu1 %v3333_v58 }
 0xdc6   :  { %11599 = vmatpush3.msra.mxu1 %v3333_v58 }
 0xdc7   :  { %11600 = vmatprep.subr.mxu1 %v3332_v7 }
 0xdc8   :  { %11601 = vmatpush3.msra.mxu1 %v3332_v7  ;;  %v3354_v7 = vld [vmem:[#allocation2 + $0x2d8] sm:$0xff] }
 0xdc9   :  { %11602 = vmatprep.subr.mxu1 %v3331_v12  ;;  %v3371_v8 = vmul.f32 %v14891_v24, %v3354_v7 }
 0xdca   :  { %11603 = vmatpush3.msra.mxu1 %v3331_v12 }
 0xdcb   :  { %11604 = vmatprep.subr.mxu1 %v3330_v61 }
 0xdcc   :  { %11605 = vmatpush3.msra.mxu1 %v3330_v61  ;;  %v3368_v61 = vmul.f32 %v14891_v24, %v3351_v9 }
 0xdcd   :  { %11606 = vmatprep.subr.mxu1 %v3329_v63 }
 0xdce   :  { %11607 = vmatpush3.msra.mxu1 %v3329_v63 }
 0xdcf   :  { %11608 = vmatprep.subr.mxu1 %v3328_v39 }
 0xdd0   :  { %11609 = vmatpush3.msra.mxu1 %v3328_v39  ;;  %v3353_v39 = vld [vmem:[#allocation2 + $0x2d0] sm:$0xff] }
 0xdd1   :  { %11610 = vmatprep.subr.mxu1 %v3327_v32  ;;  %v3370_v35 = vmul.f32 %v14891_v24, %v3353_v39  ;;  %v3557_v39 = vld [vmem:[#allocation2 + $0x320] sm:$0xff] }
 0xdd2   :  { %11611 = vmatpush3.msra.mxu1 %v3327_v32 }
 0xdd3   :  { %11613 = vmatmul.mubr.f32.vlgmr.msra.gmra.mxu1 %v14740_v2 }
 0xdd4   :  { %11615 = vmatprep.mubr.f32.mxu1 %v14743_v3 }
 0xdd7   :  { %11616 = vmatmul.mubr.f32.gmra.mxu1 %v14746_v55 }
 0xdd8   :  { %11618 = vmatprep.mubr.f32.mxu1 %v14749_v21 }
 0xddb   :  { %11619 = vmatmul.mubr.f32.gmra.mxu1 %v14752_v5 }
 0xddc   :  { %11621 = vmatprep.mubr.f32.mxu1 %v14755_v0 }
 0xddf   :  { %11622 = vmatmul.mubr.f32.gmra.mxu1 %v14758_v15 }
 0xde0   :  { %11624 = vmatprep.mubr.f32.mxu1 %v14761_v22 }
 0xde3   :  { %11625 = vmatmul.mubr.f32.gmra.mxu1 %v14764_v23 }
 0xde4   :  { %11627 = vmatprep.mubr.f32.mxu1 %v14767_v26 }
 0xde7   :  { %11628 = vmatmul.mubr.f32.gmra.mxu1 %v14770_v43 }
 0xde8   :  { %11630 = vmatprep.mubr.f32.mxu1 %v14773_v28 }
 0xdeb   :  { %11631 = vmatmul.mubr.f32.gmra.mxu1 %v14776_v46 }
 0xdec   :  { %11633 = vmatprep.mubr.f32.mxu1 %v14779_v18 }
 0xdef   :  { %11634 = vmatmul.mubr.f32.gmra.mxu1 %v14835_v30 }
 0xdf0   :  { %11724 = vmatprep.mubr.f32.mxu1 %v14783_v33 }
 0xe93   :  { %v11614_v54 = vpop.f32.mrf.mxu1 }
 0xe94   :  { %v3448_v59 = vadd.f32 %v11614_v54, %v3361_v10  ;;  %v3356_v10 = vld [vmem:[#allocation2 + $0x2e8] sm:$0xff] }
 0xe95   :  { %v3442_v29 = vpop.f32.mrf.mxu1  ;;  %v3373_v31 = vmul.f32 %v14891_v24, %v3356_v10  ;;  %v3560_v10 = vld [vmem:[#allocation2 + $0x338] sm:$0xff] }
 0xe96   :  { %3522 = vst.msk [vmem:[#allocation3 + $0x8] sm:$0xff] %vm321_vm0, %v3448_v59  ;;  %v3443_v49 = vadd.f32 %v3442_v29, %v3360_v27  ;;  %v3355_v27 = vld [vmem:[#allocation2 + $0x2e0] sm:$0xff] }
 0xe97   :  { %v11617_v47 = vpop.f32.mrf.mxu1  ;;  %v3372_v44 = vmul.f32 %v14891_v24, %v3355_v27  ;;  %v3559_v27 = vld [vmem:[#allocation2 + $0x330] sm:$0xff] }
 0xe98   :  { %3521 = vst.msk [vmem:[#allocation3] sm:$0xff] %vm321_vm0, %v3443_v49  ;;  %v3458_v38 = vadd.f32 %v11617_v47, %v3363_v51  ;;  %v3358_v51 = vld [vmem:[#allocation2 + $0x2f8] sm:$0xff] }
 0xe99   :  { %v3452_v41 = vpop.f32.mrf.mxu1  ;;  %v3375_v16 = vmul.f32 %v14891_v24, %v3358_v51  ;;  %v3562_v51 = vld [vmem:[#allocation2 + $0x348] sm:$0xff] }
 0xe9a   :  { %3524 = vst.msk [vmem:[#allocation3 + $0x18] sm:$0xff] %vm321_vm0, %v3458_v38  ;;  %v3453_v53 = vadd.f32 %v3452_v41, %v3362_v14  ;;  %v3357_v14 = vld [vmem:[#allocation2 + $0x2f0] sm:$0xff] }
 0xe9b   :  { %v11620_v11 = vpop.f32.mrf.mxu1 }
 0xe9c   :  { %3523 = vst.msk [vmem:[#allocation3 + $0x10] sm:$0xff] %vm321_vm0, %v3453_v53  ;;  %v3468_v45 = vadd.f32 %v11620_v11, %v3365_v57  ;;  %v3374_v11 = vmul.f32 %v14891_v24, %v3357_v14  ;;  %v3561_v14 = vld [vmem:[#allocation2 + $0x340] sm:$0xff] }
 0xe9d   :  { %v3462_v52 = vpop.f32.mrf.mxu1  ;;  %v3538_v7 = vld [vmem:[#allocation3 + $0x8] sm:$0xff] }
 0xe9e   :  { %3526 = vst.msk [vmem:[#allocation3 + $0x28] sm:$0xff] %vm321_vm0, %v3468_v45  ;;  %v3463_v42 = vadd.f32 %v3462_v52, %v3364_v56 }
 0xe9f   :  { %v11623_v20 = vpop.f32.mrf.mxu1 }
 0xea0   :  { %3525 = vst.msk [vmem:[#allocation3 + $0x20] sm:$0xff] %vm321_vm0, %v3463_v42  ;;  %v3478_v6 = vadd.f32 %v11623_v20, %v3367_v19 }
 0xea1   :  { %v3472_v17 = vpop.f32.mrf.mxu1 }
 0xea2   :  { %3528 = vst.msk [vmem:[#allocation3 + $0x38] sm:$0xff] %vm321_vm0, %v3478_v6  ;;  %v3473_v1 = vadd.f32 %v3472_v17, %v3366_v40 }
 0xea3   :  { %v11626_v58 = vpop.f32.mrf.mxu1 }
 0xea4   :  { %3527 = vst.msk [vmem:[#allocation3 + $0x30] sm:$0xff] %vm321_vm0, %v3473_v1  ;;  %v3488_v12 = vadd.f32 %v11626_v58, %v3369_v48  ;;  %v3540_v48 = vld [vmem:[#allocation3 + $0x18] sm:$0xff]  ;;  %v3539_v58 = vld [vmem:[#allocation3 + $0x10] sm:$0xff] }
 0xea5   :  { %v3482_v63 = vpop.f32.mrf.mxu1  ;;  %v3542_v9 = vld [vmem:[#allocation3 + $0x28] sm:$0xff] }
 0xea6   :  { %3530 = vst.msk [vmem:[#allocation3 + $0x48] sm:$0xff] %vm321_vm0, %v3488_v12  ;;  %v3483_v32 = vadd.f32 %v3482_v63, %v3368_v61  ;;  %v3537_v12 = vld [vmem:[#allocation3] sm:$0xff] }
 0xea7   :  { %v11629_v34 = vpop.f32.mrf.mxu1  ;;  %v3541_v1 = vld [vmem:[#allocation3 + $0x20] sm:$0xff] }
 0xea8   :  { %3529 = vst.msk [vmem:[#allocation3 + $0x40] sm:$0xff] %vm321_vm0, %v3483_v32  ;;  %v3498_v54 = vadd.f32 %v11629_v34, %v3371_v8 }
 0xea9   :  { %v3492_v59 = vpop.f32.mrf.mxu1  ;;  %v3544_v40 = vld [vmem:[#allocation3 + $0x38] sm:$0xff] }
 0xeaa   :  { %3532 = vst.msk [vmem:[#allocation3 + $0x58] sm:$0xff] %vm321_vm0, %v3498_v54  ;;  %v3493_v29 = vadd.f32 %v3492_v59, %v3370_v35 }
 0xeab   :  { %v11632_v49 = vpop.f32.mrf.mxu1  ;;  %v3543_v17 = vld [vmem:[#allocation3 + $0x30] sm:$0xff] }
 0xeac   :  { %3531 = vst.msk [vmem:[#allocation3 + $0x50] sm:$0xff] %vm321_vm0, %v3493_v29  ;;  %v3508_v47 = vadd.f32 %v11632_v49, %v3373_v31 }
 0xead   :  { %v3502_v38 = vpop.f32.mrf.mxu1  ;;  %v3546_v62 = vld [vmem:[#allocation3 + $0x48] sm:$0xff] }
 0xeae   :  { %3534 = vst.msk [vmem:[#allocation3 + $0x68] sm:$0xff] %vm321_vm0, %v3508_v47  ;;  %v3503_v41 = vadd.f32 %v3502_v38, %v3372_v44 }
 0xeaf   :  { %v11635_v53 = vpop.f32.mrf.mxu1  ;;  %v3545_v6 = vld [vmem:[#allocation3 + $0x40] sm:$0xff] }
 0xeb0   :  { %3533 = vst.msk [vmem:[#allocation3 + $0x60] sm:$0xff] %vm321_vm0, %v3503_v41  ;;  %v3518_v57 = vadd.f32 %v11635_v53, %v3375_v16 }
 0xeb1   :  { %v3512_v13 = vpop.f32.mrf.mxu1  ;;  %v3548_v19 = vld [vmem:[#allocation3 + $0x58] sm:$0xff] }
 0xeb2   :  { %3536 = vst.msk [vmem:[#allocation3 + $0x78] sm:$0xff] %vm321_vm0, %v3518_v57  ;;  %v3513_v45 = vadd.f32 %v3512_v13, %v3374_v11  ;;  %v3564_v57 = vld [vmem:[#allocation2 + $0x358] sm:$0xff] }
 0xeb3   :  { %v3547_v20 = vld [vmem:[#allocation3 + $0x50] sm:$0xff] }
 0xeb4   :  { %3535 = vst.msk [vmem:[#allocation3 + $0x70] sm:$0xff] %vm321_vm0, %v3513_v45 }
 0xeb5   :  { %v3550_v37 = vld [vmem:[#allocation3 + $0x68] sm:$0xff] }
 0xeb7   :  { %v3549_v42 = vld [vmem:[#allocation3 + $0x60] sm:$0xff] }
 0xeb9   :  { %v3552_v56 = vld [vmem:[#allocation3 + $0x78] sm:$0xff] }
 0xeba   :  { %11636 = vmatprep.subr.mxu0 %v3552_v56 }
 0xebb   :  { %11637 = vmatpush3.msra.mxu0 %v3552_v56  ;;  %v3551_v52 = vld [vmem:[#allocation3 + $0x70] sm:$0xff] }
 0xebc   :  { %11638 = vmatprep.subr.mxu0 %v3551_v52  ;;  %v3563_v56 = vld [vmem:[#allocation2 + $0x350] sm:$0xff] }
 0xebd   :  { %11639 = vmatpush3.msra.mxu0 %v3551_v52 }
 0xebe   :  { %11640 = vmatprep.subr.mxu0 %v3550_v37 }
 0xebf   :  { %11641 = vmatpush3.msra.mxu0 %v3550_v37 }
 0xec0   :  { %11642 = vmatprep.subr.mxu0 %v3549_v42 }
 0xec1   :  { %11643 = vmatpush3.msra.mxu0 %v3549_v42 }
 0xec2   :  { %11644 = vmatprep.subr.mxu0 %v3548_v19 }
 0xec3   :  { %11645 = vmatpush3.msra.mxu0 %v3548_v19  ;;  %v3566_v19 = vld [vmem:[#allocation2 + $0x368] sm:$0xff] }
 0xec4   :  { %11646 = vmatprep.subr.mxu0 %v3547_v20 }
 0xec5   :  { %11647 = vmatpush3.msra.mxu0 %v3547_v20 }
 0xec6   :  { %11648 = vmatprep.subr.mxu0 %v3546_v62 }
 0xec7   :  { %11649 = vmatpush3.msra.mxu0 %v3546_v62 }
 0xec8   :  { %11650 = vmatprep.subr.mxu0 %v3545_v6 }
 0xec9   :  { %11651 = vmatpush3.msra.mxu0 %v3545_v6 }
 0xeca   :  { %11652 = vmatprep.subr.mxu0 %v3544_v40 }
 0xecb   :  { %11653 = vmatpush3.msra.mxu0 %v3544_v40  ;;  %v3565_v40 = vld [vmem:[#allocation2 + $0x360] sm:$0xff] }
 0xecc   :  { %11654 = vmatprep.subr.mxu0 %v3543_v17 }
 0xecd   :  { %11655 = vmatpush3.msra.mxu0 %v3543_v17 }
 0xece   :  { %11656 = vmatprep.subr.mxu0 %v3542_v9 }
 0xecf   :  { %11657 = vmatpush3.msra.mxu0 %v3542_v9 }
 0xed0   :  { %11658 = vmatprep.subr.mxu0 %v3541_v1 }
 0xed1   :  { %11659 = vmatpush3.msra.mxu0 %v3541_v1 }
 0xed2   :  { %11660 = vmatprep.subr.mxu0 %v3540_v48 }
 0xed3   :  { %11661 = vmatpush3.msra.mxu0 %v3540_v48  ;;  %v3568_v48 = vld [vmem:[#allocation2 + $0x378] sm:$0xff] }
 0xed4   :  { %11662 = vmatprep.subr.mxu0 %v3539_v58 }
 0xed5   :  { %11663 = vmatpush3.msra.mxu0 %v3539_v58 }
 0xed6   :  { %11664 = vmatprep.subr.mxu0 %v3538_v7 }
 0xed7   :  { %11665 = vmatpush3.msra.mxu0 %v3538_v7 }
 0xed8   :  { %11666 = vmatprep.subr.mxu0 %v3537_v12 }
 0xed9   :  { %11667 = vmatpush3.msra.mxu0 %v3537_v12 }
 0xeda   :  { %11669 = vmatmul.mubr.f32.vlgmr.msra.gmra.mxu0 %v14740_v2  ;;  %v3554_v2 = vld [vmem:[#allocation2 + $0x308] sm:$0xff] }
 0xedb   :  { %11671 = vmatprep.mubr.f32.mxu0 %v14743_v3  ;;  %v14942_v3 = vstv %s119_s19 }
 0xedc   :  { %v3574_v35 = vmul.f32 %v14942_v3, %v3557_v39  ;;  %v3577_v31 = vmul.f32 %v14942_v3, %v3560_v10  ;;  %v3576_v44 = vmul.f32 %v14942_v3, %v3559_v27  ;;  %v3579_v16 = vmul.f32 %v14942_v3, %v3562_v51  ;;  %v14976_v27 = vld [vmem:[#allocation9 + $0x8] sm:$0xff] }
 0xedd   :  { %v3578_v13 = vmul.f32 %v14942_v3, %v3561_v14  ;;  %v3581_v37 = vmul.f32 %v14942_v3, %v3564_v57  ;;  %v3580_v62 = vmul.f32 %v14942_v3, %v3563_v56  ;;  %v3583_v9 = vmul.f32 %v14942_v3, %v3566_v19  ;;  %v14988_v51 = vld [vmem:[#allocation9 + $0x28] sm:$0xff]  ;;  %v3766_v19 = vld [vmem:[#allocation2 + $0x398] sm:$0xff] }
 0xede   :  { %11672 = vmatmul.mubr.f32.gmra.mxu0 %v14746_v55  ;;  %v3553_v55 = vld [vmem:[#allocation2 + $0x300] sm:$0xff]  ;;  %v3582_v7 = vmul.f32 %v14942_v3, %v3565_v40  ;;  %v15000_v14 = vld [vmem:[#allocation9 + $0x48] sm:$0xff]  ;;  %v15023_v56 = vstv %s115_s21 }
 0xedf   :  { %11674 = vmatprep.mubr.f32.mxu0 %v14749_v21  ;;  %v3571_v21 = vmul.f32 %v14942_v3, %v3554_v2  ;;  %v3567_v2 = vld [vmem:[#allocation2 + $0x370] sm:$0xff]  ;;  %v15012_v57 = vld [vmem:[#allocation9 + $0x68] sm:$0xff] }
 0xee2   :  { %11675 = vmatmul.mubr.f32.gmra.mxu0 %v14752_v5 }
 0xee3   :  { %11677 = vmatprep.mubr.f32.mxu0 %v14755_v0  ;;  %v3556_v0 = vld [vmem:[#allocation2 + $0x318] sm:$0xff] }
 0xee6   :  { %11678 = vmatmul.mubr.f32.gmra.mxu0 %v14758_v15 }
 0xee7   :  { %11680 = vmatprep.mubr.f32.mxu0 %v14761_v22  ;;  %v3570_v22 = vmul.f32 %v14942_v3, %v3553_v55 }
 0xeea   :  { %11681 = vmatmul.mubr.f32.gmra.mxu0 %v14764_v23 }
 0xeeb   :  { %11683 = vmatprep.mubr.f32.mxu0 %v14767_v26  ;;  %v3555_v26 = vld [vmem:[#allocation2 + $0x310] sm:$0xff] }
 0xeec   :  { %v3572_v61 = vmul.f32 %v14942_v3, %v3555_v26 }
 0xeee   :  { %11684 = vmatmul.mubr.f32.gmra.mxu0 %v14770_v43 }
 0xeef   :  { %11686 = vmatprep.mubr.f32.mxu0 %v14773_v28  ;;  %v3573_v28 = vmul.f32 %v14942_v3, %v3556_v0 }
 0xef2   :  { %11687 = vmatmul.mubr.f32.gmra.mxu0 %v14776_v46 }
 0xef3   :  { %11689 = vmatprep.mubr.f32.mxu0 %v14779_v18  ;;  %v3558_v18 = vld [vmem:[#allocation2 + $0x328] sm:$0xff] }
 0xef4   :  { %v3575_v8 = vmul.f32 %v14942_v3, %v3558_v18 }
 0xef6   :  { %11690 = vmatmul.mubr.f32.gmra.mxu0 %v14835_v30 }
 0xef7   :  { %11780 = vmatprep.mubr.f32.mxu0 %v14783_v33 }
 0xf9a   :  { %v11670_v5 = vpop.f32.mrf.mxu0 }
 0xf9b   :  { %v3658_v15 = vadd.f32 %v11670_v5, %v3571_v21  ;;  %v3585_v21 = vmul.f32 %v14942_v3, %v3568_v48 }
 0xf9c   :  { %v3652_v23 = vpop.f32.mrf.mxu0 }
 0xf9d   :  { %3732 = vst.msk [vmem:[#allocation3 + $0x8] sm:$0xff] %vm321_vm0, %v3658_v15  ;;  %v3653_v43 = vadd.f32 %v3652_v23, %v3570_v22  ;;  %v3584_v15 = vmul.f32 %v14942_v3, %v3567_v2 }
 0xf9e   :  { %v11673_v46 = vpop.f32.mrf.mxu0 }
 0xf9f   :  { %3731 = vst.msk [vmem:[#allocation3] sm:$0xff] %vm321_vm0, %v3653_v43  ;;  %v3668_v33 = vadd.f32 %v11673_v46, %v3573_v28 }
 0xfa0   :  { %v3662_v63 = vpop.f32.mrf.mxu0 }
 0xfa1   :  { %3734 = vst.msk [vmem:[#allocation3 + $0x18] sm:$0xff] %vm321_vm0, %v3668_v33  ;;  %v3663_v32 = vadd.f32 %v3662_v63, %v3572_v61 }
 0xfa2   :  { %v11676_v34 = vpop.f32.mrf.mxu0 }
 0xfa3   :  { %3733 = vst.msk [vmem:[#allocation3 + $0x10] sm:$0xff] %vm321_vm0, %v3663_v32  ;;  %v3678_v54 = vadd.f32 %v11676_v34, %v3575_v8 }
 0xfa4   :  { %v3672_v59 = vpop.f32.mrf.mxu0 }
 0xfa5   :  { %3736 = vst.msk [vmem:[#allocation3 + $0x28] sm:$0xff] %vm321_vm0, %v3678_v54  ;;  %v3673_v29 = vadd.f32 %v3672_v59, %v3574_v35  ;;  %v3748_v35 = vld [vmem:[#allocation3 + $0x8] sm:$0xff] }
 0xfa6   :  { %v11679_v49 = vpop.f32.mrf.mxu0  ;;  %v3747_v59 = vld [vmem:[#allocation3] sm:$0xff] }
 0xfa7   :  { %3735 = vst.msk [vmem:[#allocation3 + $0x20] sm:$0xff] %vm321_vm0, %v3673_v29  ;;  %v3688_v47 = vadd.f32 %v11679_v49, %v3577_v31  ;;  %v14979_v29 = vld [vmem:[#allocation9 + $0x10] sm:$0xff]  ;;  %v14982_v31 = vld [vmem:[#allocation9 + $0x18] sm:$0xff]  ;;  %v14985_v49 = vld [vmem:[#allocation9 + $0x20] sm:$0xff] }
 0xfa8   :  { %v3682_v38 = vpop.f32.mrf.mxu0  ;;  %v3750_v10 = vld [vmem:[#allocation3 + $0x18] sm:$0xff] }
 0xfa9   :  { %3738 = vst.msk [vmem:[#allocation3 + $0x38] sm:$0xff] %vm321_vm0, %v3688_v47  ;;  %v3683_v41 = vadd.f32 %v3682_v38, %v3576_v44  ;;  %v14991_v47 = vld [vmem:[#allocation9 + $0x30] sm:$0xff]  ;;  %v14994_v44 = vld [vmem:[#allocation9 + $0x38] sm:$0xff]  ;;  %v14997_v38 = vld [vmem:[#allocation9 + $0x40] sm:$0xff] }
 0xfaa   :  { %v11682_v53 = vpop.f32.mrf.mxu0  ;;  %v3749_v54 = vld [vmem:[#allocation3 + $0x10] sm:$0xff] }
 0xfab   :  { %3737 = vst.msk [vmem:[#allocation3 + $0x30] sm:$0xff] %vm321_vm0, %v3683_v41  ;;  %v3698_v11 = vadd.f32 %v11682_v53, %v3579_v16  ;;  %v15003_v41 = vld [vmem:[#allocation9 + $0x50] sm:$0xff]  ;;  %v15006_v16 = vld [vmem:[#allocation9 + $0x58] sm:$0xff]  ;;  %v15009_v53 = vld [vmem:[#allocation9 + $0x60] sm:$0xff] }
 0xfac   :  { %v3692_v45 = vpop.f32.mrf.mxu0  ;;  %v3752_v8 = vld [vmem:[#allocation3 + $0x28] sm:$0xff] }
 0xfad   :  { %3740 = vst.msk [vmem:[#allocation3 + $0x48] sm:$0xff] %vm321_vm0, %v3698_v11  ;;  %v3693_v52 = vadd.f32 %v3692_v45, %v3578_v13  ;;  %v15015_v11 = vld [vmem:[#allocation9 + $0x70] sm:$0xff]  ;;  %v15019_v13 = vld [vmem:[#allocation9] sm:$0xff]  ;;  %v3764_v45 = vld [vmem:[#allocation2 + $0x388] sm:$0xff] }
 0xfae   :  { %v11685_v42 = vpop.f32.mrf.mxu0  ;;  %v3751_v34 = vld [vmem:[#allocation3 + $0x20] sm:$0xff] }
 0xfaf   :  { %3739 = vst.msk [vmem:[#allocation3 + $0x40] sm:$0xff] %vm321_vm0, %v3693_v52  ;;  %v3708_v20 = vadd.f32 %v11685_v42, %v3581_v37  ;;  %v3763_v52 = vld [vmem:[#allocation2 + $0x380] sm:$0xff]  ;;  %v3781_v37 = vmul.f32 %v15023_v56, %v3764_v45 }
 0xfb0   :  { %v3702_v6 = vpop.f32.mrf.mxu0  ;;  %v3754_v39 = vld [vmem:[#allocation3 + $0x38] sm:$0xff] }
 0xfb1   :  { %3742 = vst.msk [vmem:[#allocation3 + $0x58] sm:$0xff] %vm321_vm0, %v3708_v20  ;;  %v3703_v17 = vadd.f32 %v3702_v6, %v3580_v62  ;;  %v3765_v6 = vld [vmem:[#allocation2 + $0x390] sm:$0xff] }
 0xfb2   :  { %v11688_v1 = vpop.f32.mrf.mxu0  ;;  %v3753_v32 = vld [vmem:[#allocation3 + $0x30] sm:$0xff] }
 0xfb3   :  { %3741 = vst.msk [vmem:[#allocation3 + $0x50] sm:$0xff] %vm321_vm0, %v3703_v17  ;;  %v3718_v58 = vadd.f32 %v11688_v1, %v3583_v9  ;;  %v3783_v17 = vmul.f32 %v15023_v56, %v3766_v19  ;;  %v3768_v1 = vld [vmem:[#allocation2 + $0x3a8] sm:$0xff] }
 0xfb4   :  { %v3712_v12 = vpop.f32.mrf.mxu0  ;;  %v3756_v61 = vld [vmem:[#allocation3 + $0x48] sm:$0xff] }
 0xfb5   :  { %3744 = vst.msk [vmem:[#allocation3 + $0x68] sm:$0xff] %vm321_vm0, %v3718_v58  ;;  %v3713_v55 = vadd.f32 %v3712_v12, %v3582_v7  ;;  %v3782_v58 = vmul.f32 %v15023_v56, %v3765_v6  ;;  %v3767_v12 = vld [vmem:[#allocation2 + $0x3a0] sm:$0xff] }
 0xfb6   :  { %v11691_v5 = vpop.f32.mrf.mxu0  ;;  %v3755_v63 = vld [vmem:[#allocation3 + $0x40] sm:$0xff] }
 0xfb7   :  { %3743 = vst.msk [vmem:[#allocation3 + $0x60] sm:$0xff] %vm321_vm0, %v3713_v55  ;;  %v3728_v0 = vadd.f32 %v11691_v5, %v3585_v21  ;;  %v3785_v55 = vmul.f32 %v15023_v56, %v3768_v1  ;;  %v3770_v5 = vld [vmem:[#allocation2 + $0x3b8] sm:$0xff] }
 0xfb8   :  { %v3722_v22 = vpop.f32.mrf.mxu0  ;;  %v3758_v18 = vld [vmem:[#allocation3 + $0x58] sm:$0xff] }
 0xfb9   :  { %3746 = vst.msk [vmem:[#allocation3 + $0x78] sm:$0xff] %vm321_vm0, %v3728_v0  ;;  %v3723_v23 = vadd.f32 %v3722_v22, %v3584_v15  ;;  %v3784_v15 = vmul.f32 %v15023_v56, %v3767_v12 }
 0xfba   :  { %v3757_v33 = vld [vmem:[#allocation3 + $0x50] sm:$0xff] }
 0xfbb   :  { %3745 = vst.msk [vmem:[#allocation3 + $0x70] sm:$0xff] %vm321_vm0, %v3723_v23  ;;  %v3769_v23 = vld [vmem:[#allocation2 + $0x3b0] sm:$0xff] }
 0xfbc   :  { %v3760_v28 = vld [vmem:[#allocation3 + $0x68] sm:$0xff] }
 0xfbe   :  { %v3759_v46 = vld [vmem:[#allocation3 + $0x60] sm:$0xff] }
 0xfc0   :  { %v3762_v26 = vld [vmem:[#allocation3 + $0x78] sm:$0xff] }
 0xfc1   :  { %11692 = vmatprep.subr.mxu1 %v3762_v26 }
 0xfc2   :  { %11693 = vmatpush3.msra.mxu1 %v3762_v26  ;;  %v3761_v43 = vld [vmem:[#allocation3 + $0x70] sm:$0xff] }
 0xfc3   :  { %11694 = vmatprep.subr.mxu1 %v3761_v43 }
 0xfc4   :  { %11695 = vmatpush3.msra.mxu1 %v3761_v43  ;;  %v3787_v43 = vmul.f32 %v15023_v56, %v3770_v5 }
 0xfc5   :  { %11696 = vmatprep.subr.mxu1 %v3760_v28 }
 0xfc6   :  { %11697 = vmatpush3.msra.mxu1 %v3760_v28 }
 0xfc7   :  { %11698 = vmatprep.subr.mxu1 %v3759_v46 }
 0xfc8   :  { %11699 = vmatpush3.msra.mxu1 %v3759_v46  ;;  %v3772_v46 = vld [vmem:[#allocation2 + $0x3c8] sm:$0xff] }
 0xfc9   :  { %11700 = vmatprep.subr.mxu1 %v3758_v18 }
 0xfca   :  { %11701 = vmatpush3.msra.mxu1 %v3758_v18 }
 0xfcb   :  { %11702 = vmatprep.subr.mxu1 %v3757_v33 }
 0xfcc   :  { %11703 = vmatpush3.msra.mxu1 %v3757_v33  ;;  %v3786_v33 = vmul.f32 %v15023_v56, %v3769_v23 }
 0xfcd   :  { %11704 = vmatprep.subr.mxu1 %v3756_v61 }
 0xfce   :  { %11705 = vmatpush3.msra.mxu1 %v3756_v61 }
 0xfcf   :  { %11706 = vmatprep.subr.mxu1 %v3755_v63 }
 0xfd0   :  { %11707 = vmatpush3.msra.mxu1 %v3755_v63  ;;  %v3771_v63 = vld [vmem:[#allocation2 + $0x3c0] sm:$0xff] }
 0xfd1   :  { %11708 = vmatprep.subr.mxu1 %v3754_v39 }
 0xfd2   :  { %11709 = vmatpush3.msra.mxu1 %v3754_v39 }
 0xfd3   :  { %11710 = vmatprep.subr.mxu1 %v3753_v32 }
 0xfd4   :  { %11711 = vmatpush3.msra.mxu1 %v3753_v32  ;;  %v3789_v32 = vmul.f32 %v15023_v56, %v3772_v46 }
 0xfd5   :  { %11712 = vmatprep.subr.mxu1 %v3752_v8 }
 0xfd6   :  { %11713 = vmatpush3.msra.mxu1 %v3752_v8 }
 0xfd7   :  { %11714 = vmatprep.subr.mxu1 %v3751_v34 }
 0xfd8   :  { %11715 = vmatpush3.msra.mxu1 %v3751_v34  ;;  %v3774_v34 = vld [vmem:[#allocation2 + $0x3d8] sm:$0xff] }
 0xfd9   :  { %11716 = vmatprep.subr.mxu1 %v3750_v10 }
 0xfda   :  { %11717 = vmatpush3.msra.mxu1 %v3750_v10 }
 0xfdb   :  { %11718 = vmatprep.subr.mxu1 %v3749_v54 }
 0xfdc   :  { %11719 = vmatpush3.msra.mxu1 %v3749_v54  ;;  %v3788_v54 = vmul.f32 %v15023_v56, %v3771_v63 }
 0xfdd   :  { %11720 = vmatprep.subr.mxu1 %v3748_v35 }
 0xfde   :  { %11721 = vmatpush3.msra.mxu1 %v3748_v35 }
 0xfdf   :  { %11722 = vmatprep.subr.mxu1 %v3747_v59 }
 0xfe0   :  { %11723 = vmatpush3.msra.mxu1 %v3747_v59  ;;  %v3773_v59 = vld [vmem:[#allocation2 + $0x3d0] sm:$0xff] }
 0xfe1   :  { %11725 = vmatmul.mubr.f32.vlgmr.msra.gmra.mxu1 %v14976_v27 }
 0xfe2   :  { %11727 = vmatprep.mubr.f32.mxu1 %v14979_v29 }
 0xfe5   :  { %11728 = vmatmul.mubr.f32.gmra.mxu1 %v14982_v31 }
 0xfe6   :  { %11730 = vmatprep.mubr.f32.mxu1 %v14985_v49 }
 0xfe9   :  { %11731 = vmatmul.mubr.f32.gmra.mxu1 %v14988_v51 }
 0xfea   :  { %11733 = vmatprep.mubr.f32.mxu1 %v14991_v47 }
 0xfed   :  { %11734 = vmatmul.mubr.f32.gmra.mxu1 %v14994_v44 }
 0xfee   :  { %11736 = vmatprep.mubr.f32.mxu1 %v14997_v38 }
 0xff1   :  { %11737 = vmatmul.mubr.f32.gmra.mxu1 %v15000_v14 }
 0xff2   :  { %11739 = vmatprep.mubr.f32.mxu1 %v15003_v41 }
 0xff5   :  { %11740 = vmatmul.mubr.f32.gmra.mxu1 %v15006_v16 }
 0xff6   :  { %11742 = vmatprep.mubr.f32.mxu1 %v15009_v53 }
 0xff9   :  { %11743 = vmatmul.mubr.f32.gmra.mxu1 %v15012_v57 }
 0xffa   :  { %11745 = vmatprep.mubr.f32.mxu1 %v15015_v11 }
 0xffd   :  { %11746 = vmatmul.mubr.f32.gmra.mxu1 %v14835_v30  ;;  %v3780_v30 = vmul.f32 %v15023_v56, %v3763_v52  ;;  %v3791_v52 = vmul.f32 %v15023_v56, %v3774_v34 }
 0xffe   :  { %11836 = vmatprep.mubr.f32.mxu1 %v15019_v13 }
0x10a1   :  { %v11726_v42 = vpop.f32.mrf.mxu1 }
0x10a2   :  { %v3868_v20 = vadd.f32 %v11726_v42, %v3781_v37  ;;  %v3776_v42 = vld [vmem:[#allocation2 + $0x3e8] sm:$0xff] }
0x10a3   :  { %v3862_v62 = vpop.f32.mrf.mxu1 }
0x10a4   :  { %3942 = vst.msk [vmem:[#allocation3 + $0x8] sm:$0xff] %vm321_vm0, %v3868_v20  ;;  %v3863_v40 = vadd.f32 %v3862_v62, %v3780_v30  ;;  %v3790_v20 = vmul.f32 %v15023_v56, %v3773_v59  ;;  %v3775_v62 = vld [vmem:[#allocation2 + $0x3e0] sm:$0xff]  ;;  %v3974_v59 = vld [vmem:[#allocation2 + $0x408] sm:$0xff] }
0x10a5   :  { %v11729_v9 = vpop.f32.mrf.mxu1 }
0x10a6   :  { %3941 = vst.msk [vmem:[#allocation3] sm:$0xff] %vm321_vm0, %v3863_v40  ;;  %v3878_v48 = vadd.f32 %v11729_v9, %v3783_v17  ;;  %v3793_v40 = vmul.f32 %v15023_v56, %v3776_v42  ;;  %v3778_v9 = vld [vmem:[#allocation2 + $0x3f8] sm:$0xff] }
0x10a7   :  { %v3872_v7 = vpop.f32.mrf.mxu1 }
0x10a8   :  { %3944 = vst.msk [vmem:[#allocation3 + $0x18] sm:$0xff] %vm321_vm0, %v3878_v48  ;;  %v3873_v2 = vadd.f32 %v3872_v7, %v3782_v58  ;;  %v3792_v48 = vmul.f32 %v15023_v56, %v3775_v62  ;;  %v3777_v7 = vld [vmem:[#allocation2 + $0x3f0] sm:$0xff] }
0x10a9   :  { %v11732_v21 = vpop.f32.mrf.mxu1  ;;  %v3794_v5 = vmul.f32 %v15023_v56, %v3777_v7 }
0x10aa   :  { %3943 = vst.msk [vmem:[#allocation3 + $0x10] sm:$0xff] %vm321_vm0, %v3873_v2  ;;  %v3888_v0 = vadd.f32 %v11732_v21, %v3785_v55  ;;  %v3795_v2 = vmul.f32 %v15023_v56, %v3778_v9 }
0x10ab   :  { %v3882_v22 = vpop.f32.mrf.mxu1 }
0x10ac   :  { %3946 = vst.msk [vmem:[#allocation3 + $0x28] sm:$0xff] %vm321_vm0, %v3888_v0  ;;  %v3883_v26 = vadd.f32 %v3882_v22, %v3784_v15 }
0x10ad   :  { %v11735_v28 = vpop.f32.mrf.mxu1 }
0x10ae   :  { %3945 = vst.msk [vmem:[#allocation3 + $0x20] sm:$0xff] %vm321_vm0, %v3883_v26  ;;  %v3898_v18 = vadd.f32 %v11735_v28, %v3787_v43 }
0x10af   :  { %v3892_v61 = vpop.f32.mrf.mxu1 }
0x10b0   :  { %3948 = vst.msk [vmem:[#allocation3 + $0x38] sm:$0xff] %vm321_vm0, %v3898_v18  ;;  %v3893_v39 = vadd.f32 %v3892_v61, %v3786_v33 }
0x10b1   :  { %v11738_v8 = vpop.f32.mrf.mxu1  ;;  %v3959_v34 = vld [vmem:[#allocation3 + $0x10] sm:$0xff] }
0x10b2   :  { %3947 = vst.msk [vmem:[#allocation3 + $0x30] sm:$0xff] %vm321_vm0, %v3893_v39  ;;  %v3908_v10 = vadd.f32 %v11738_v8, %v3789_v32  ;;  %v3960_v8 = vld [vmem:[#allocation3 + $0x18] sm:$0xff] }
0x10b3   :  { %v3902_v35 = vpop.f32.mrf.mxu1  ;;  %v3962_v39 = vld [vmem:[#allocation3 + $0x28] sm:$0xff] }
0x10b4   :  { %3950 = vst.msk [vmem:[#allocation3 + $0x48] sm:$0xff] %vm321_vm0, %v3908_v10  ;;  %v3903_v45 = vadd.f32 %v3902_v35, %v3788_v54  ;;  %v3958_v10 = vld [vmem:[#allocation3 + $0x8] sm:$0xff]  ;;  %v3957_v54 = vld [vmem:[#allocation3] sm:$0xff]  ;;  %v15071_v35 = vld [vmem:[#allocation9 + $0x78] sm:$0xff] }
0x10b5   :  { %v11741_v37 = vpop.f32.mrf.mxu1  ;;  %v3961_v32 = vld [vmem:[#allocation3 + $0x20] sm:$0xff] }
0x10b6   :  { %3949 = vst.msk [vmem:[#allocation3 + $0x40] sm:$0xff] %vm321_vm0, %v3903_v45  ;;  %v3918_v19 = vadd.f32 %v11741_v37, %v3791_v52  ;;  %v15076_v45 = vstv %s111_s6  ;;  %v3973_v52 = vld [vmem:[#allocation2 + $0x400] sm:$0xff] }
0x10b7   :  { %v3912_v30 = vpop.f32.mrf.mxu1  ;;  %v3964_v61 = vld [vmem:[#allocation3 + $0x38] sm:$0xff]  ;;  %v3991_v37 = vmul.f32 %v15076_v45, %v3974_v59 }
0x10b8   :  { %3952 = vst.msk [vmem:[#allocation3 + $0x58] sm:$0xff] %vm321_vm0, %v3918_v19  ;;  %v3913_v6 = vadd.f32 %v3912_v30, %v3790_v20  ;;  %v3976_v19 = vld [vmem:[#allocation2 + $0x418] sm:$0xff]  ;;  %v3990_v30 = vmul.f32 %v15076_v45, %v3973_v52  ;;  %v3983_v52 = vld [vmem:[#allocation2 + $0x450] sm:$0xff] }
0x10b9   :  { %v11744_v17 = vpop.f32.mrf.mxu1  ;;  %v3963_v63 = vld [vmem:[#allocation3 + $0x30] sm:$0xff] }
0x10ba   :  { %3951 = vst.msk [vmem:[#allocation3 + $0x50] sm:$0xff] %vm321_vm0, %v3913_v6  ;;  %v3928_v1 = vadd.f32 %v11744_v17, %v3793_v40  ;;  %v3975_v6 = vld [vmem:[#allocation2 + $0x410] sm:$0xff]  ;;  %v3993_v17 = vmul.f32 %v15076_v45, %v3976_v19 }
0x10bb   :  { %v3922_v58 = vpop.f32.mrf.mxu1  ;;  %v3966_v18 = vld [vmem:[#allocation3 + $0x48] sm:$0xff] }
0x10bc   :  { %3954 = vst.msk [vmem:[#allocation3 + $0x68] sm:$0xff] %vm321_vm0, %v3928_v1  ;;  %v3923_v12 = vadd.f32 %v3922_v58, %v3792_v48  ;;  %v3978_v1 = vld [vmem:[#allocation2 + $0x428] sm:$0xff]  ;;  %v3992_v58 = vmul.f32 %v15076_v45, %v3975_v6 }
0x10bd   :  { %v11747_v55 = vpop.f32.mrf.mxu1  ;;  %v3965_v33 = vld [vmem:[#allocation3 + $0x40] sm:$0xff] }
0x10be   :  { %3953 = vst.msk [vmem:[#allocation3 + $0x60] sm:$0xff] %vm321_vm0, %v3923_v12  ;;  %v3938_v21 = vadd.f32 %v11747_v55, %v3795_v2  ;;  %v3977_v12 = vld [vmem:[#allocation2 + $0x420] sm:$0xff]  ;;  %v3995_v55 = vmul.f32 %v15076_v45, %v3978_v1 }
0x10bf   :  { %v3932_v0 = vpop.f32.mrf.mxu1  ;;  %v3968_v28 = vld [vmem:[#allocation3 + $0x58] sm:$0xff] }
0x10c0   :  { %3956 = vst.msk [vmem:[#allocation3 + $0x78] sm:$0xff] %vm321_vm0, %v3938_v21  ;;  %v3933_v15 = vadd.f32 %v3932_v0, %v3794_v5  ;;  %v3980_v5 = vld [vmem:[#allocation2 + $0x438] sm:$0xff] }
0x10c1   :  { %v3967_v46 = vld [vmem:[#allocation3 + $0x50] sm:$0xff] }
0x10c2   :  { %3955 = vst.msk [vmem:[#allocation3 + $0x70] sm:$0xff] %vm321_vm0, %v3933_v15  ;;  %v3994_v15 = vmul.f32 %v15076_v45, %v3977_v12 }
0x10c3   :  { %v3970_v26 = vld [vmem:[#allocation3 + $0x68] sm:$0xff] }
0x10c5   :  { %v3969_v43 = vld [vmem:[#allocation3 + $0x60] sm:$0xff] }
0x10c7   :  { %v3972_v22 = vld [vmem:[#allocation3 + $0x78] sm:$0xff] }
0x10c8   :  { %11748 = vmatprep.subr.mxu0 %v3972_v22 }
0x10c9   :  { %11749 = vmatpush3.msra.mxu0 %v3972_v22  ;;  %v3971_v23 = vld [vmem:[#allocation3 + $0x70] sm:$0xff] }
0x10ca   :  { %11750 = vmatprep.subr.mxu0 %v3971_v23 }
0x10cb   :  { %11751 = vmatpush3.msra.mxu0 %v3971_v23  ;;  %v3979_v23 = vld [vmem:[#allocation2 + $0x430] sm:$0xff] }
0x10cc   :  { %11752 = vmatprep.subr.mxu0 %v3970_v26 }
0x10cd   :  { %11753 = vmatpush3.msra.mxu0 %v3970_v26 }
0x10ce   :  { %11754 = vmatprep.subr.mxu0 %v3969_v43 }
0x10cf   :  { %11755 = vmatpush3.msra.mxu0 %v3969_v43  ;;  %v3997_v43 = vmul.f32 %v15076_v45, %v3980_v5 }
0x10d0   :  { %11756 = vmatprep.subr.mxu0 %v3968_v28 }
0x10d1   :  { %11757 = vmatpush3.msra.mxu0 %v3968_v28 }
0x10d2   :  { %11758 = vmatprep.subr.mxu0 %v3967_v46 }
0x10d3   :  { %11759 = vmatpush3.msra.mxu0 %v3967_v46  ;;  %v3982_v46 = vld [vmem:[#allocation2 + $0x448] sm:$0xff] }
0x10d4   :  { %11760 = vmatprep.subr.mxu0 %v3966_v18 }
0x10d5   :  { %11761 = vmatpush3.msra.mxu0 %v3966_v18 }
0x10d6   :  { %11762 = vmatprep.subr.mxu0 %v3965_v33 }
0x10d7   :  { %11763 = vmatpush3.msra.mxu0 %v3965_v33  ;;  %v3996_v33 = vmul.f32 %v15076_v45, %v3979_v23 }
0x10d8   :  { %11764 = vmatprep.subr.mxu0 %v3964_v61 }
0x10d9   :  { %11765 = vmatpush3.msra.mxu0 %v3964_v61 }
0x10da   :  { %11766 = vmatprep.subr.mxu0 %v3963_v63 }
0x10db   :  { %11767 = vmatpush3.msra.mxu0 %v3963_v63  ;;  %v3981_v63 = vld [vmem:[#allocation2 + $0x440] sm:$0xff] }
0x10dc   :  { %11768 = vmatprep.subr.mxu0 %v3962_v39 }
0x10dd   :  { %11769 = vmatpush3.msra.mxu0 %v3962_v39 }
0x10de   :  { %11770 = vmatprep.subr.mxu0 %v3961_v32 }
0x10df   :  { %11771 = vmatpush3.msra.mxu0 %v3961_v32  ;;  %v3999_v32 = vmul.f32 %v15076_v45, %v3982_v46 }
0x10e0   :  { %11772 = vmatprep.subr.mxu0 %v3960_v8 }
0x10e1   :  { %11773 = vmatpush3.msra.mxu0 %v3960_v8 }
0x10e2   :  { %11774 = vmatprep.subr.mxu0 %v3959_v34 }
0x10e3   :  { %11775 = vmatpush3.msra.mxu0 %v3959_v34  ;;  %v3984_v34 = vld [vmem:[#allocation2 + $0x458] sm:$0xff] }
0x10e4   :  { %11776 = vmatprep.subr.mxu0 %v3958_v10 }
0x10e5   :  { %11777 = vmatpush3.msra.mxu0 %v3958_v10 }
0x10e6   :  { %11778 = vmatprep.subr.mxu0 %v3957_v54 }
0x10e7   :  { %11779 = vmatpush3.msra.mxu0 %v3957_v54  ;;  %v3998_v54 = vmul.f32 %v15076_v45, %v3981_v63 }
0x10e8   :  { %11781 = vmatmul.mubr.f32.vlgmr.msra.gmra.mxu0 %v14976_v27 }
0x10e9   :  { %11783 = vmatprep.mubr.f32.mxu0 %v14979_v29 }
0x10ec   :  { %11784 = vmatmul.mubr.f32.gmra.mxu0 %v14982_v31 }
0x10ed   :  { %11786 = vmatprep.mubr.f32.mxu0 %v14985_v49 }
0x10f0   :  { %11787 = vmatmul.mubr.f32.gmra.mxu0 %v14988_v51 }
0x10f1   :  { %11789 = vmatprep.mubr.f32.mxu0 %v14991_v47 }
0x10f4   :  { %11790 = vmatmul.mubr.f32.gmra.mxu0 %v14994_v44 }
0x10f5   :  { %11792 = vmatprep.mubr.f32.mxu0 %v14997_v38 }
0x10f8   :  { %11793 = vmatmul.mubr.f32.gmra.mxu0 %v15000_v14 }
0x10f9   :  { %11795 = vmatprep.mubr.f32.mxu0 %v15003_v41 }
0x10fc   :  { %11796 = vmatmul.mubr.f32.gmra.mxu0 %v15006_v16 }
0x10fd   :  { %11798 = vmatprep.mubr.f32.mxu0 %v15009_v53 }
0x1100   :  { %11799 = vmatmul.mubr.f32.gmra.mxu0 %v15012_v57 }
0x1101   :  { %11801 = vmatprep.mubr.f32.mxu0 %v15015_v11 }
0x1104   :  { %11802 = vmatmul.mubr.f32.gmra.mxu0 %v15071_v35 }
0x1105   :  { %11892 = vmatprep.mubr.f32.mxu0 %v15019_v13 }
0x11a8   :  { %v11782_v42 = vpop.f32.mrf.mxu0 }
0x11a9   :  { %v4078_v20 = vadd.f32 %v11782_v42, %v3991_v37  ;;  %v4001_v42 = vmul.f32 %v15076_v45, %v3984_v34 }
0x11aa   :  { %v4072_v62 = vpop.f32.mrf.mxu0 }
0x11ab   :  { %4152 = vst.msk [vmem:[#allocation3 + $0x8] sm:$0xff] %vm321_vm0, %v4078_v20  ;;  %v4073_v40 = vadd.f32 %v4072_v62, %v3990_v30  ;;  %v3986_v20 = vld [vmem:[#allocation2 + $0x468] sm:$0xff]  ;;  %v4000_v62 = vmul.f32 %v15076_v45, %v3983_v52 }
0x11ac   :  { %v11785_v9 = vpop.f32.mrf.mxu0 }
0x11ad   :  { %4151 = vst.msk [vmem:[#allocation3] sm:$0xff] %vm321_vm0, %v4073_v40  ;;  %v4088_v48 = vadd.f32 %v11785_v9, %v3993_v17  ;;  %v3985_v40 = vld [vmem:[#allocation2 + $0x460] sm:$0xff]  ;;  %v4003_v9 = vmul.f32 %v15076_v45, %v3986_v20 }
0x11ae   :  { %v4082_v7 = vpop.f32.mrf.mxu0 }
0x11af   :  { %4154 = vst.msk [vmem:[#allocation3 + $0x18] sm:$0xff] %vm321_vm0, %v4088_v48  ;;  %v4083_v2 = vadd.f32 %v4082_v7, %v3992_v58  ;;  %v3988_v48 = vld [vmem:[#allocation2 + $0x478] sm:$0xff]  ;;  %v4002_v7 = vmul.f32 %v15076_v45, %v3985_v40 }
0x11b0   :  { %v11788_v21 = vpop.f32.mrf.mxu0 }
0x11b1   :  { %4153 = vst.msk [vmem:[#allocation3 + $0x10] sm:$0xff] %vm321_vm0, %v4083_v2  ;;  %v4098_v0 = vadd.f32 %v11788_v21, %v3995_v55  ;;  %v3987_v2 = vld [vmem:[#allocation2 + $0x470] sm:$0xff]  ;;  %v4005_v21 = vmul.f32 %v15076_v45, %v3988_v48 }
0x11b2   :  { %v4092_v22 = vpop.f32.mrf.mxu0 }
0x11b3   :  { %4156 = vst.msk [vmem:[#allocation3 + $0x28] sm:$0xff] %vm321_vm0, %v4098_v0  ;;  %v4093_v26 = vadd.f32 %v4092_v22, %v3994_v15  ;;  %v4004_v15 = vmul.f32 %v15076_v45, %v3987_v2 }
0x11b4   :  { %v11791_v28 = vpop.f32.mrf.mxu0  ;;  %v4167_v52 = vld [vmem:[#allocation3] sm:$0xff] }
0x11b5   :  { %4155 = vst.msk [vmem:[#allocation3 + $0x20] sm:$0xff] %vm321_vm0, %v4093_v26  ;;  %v4108_v18 = vadd.f32 %v11791_v28, %v3997_v43 }
0x11b6   :  { %v4102_v61 = vpop.f32.mrf.mxu0 }
0x11b7   :  { %4158 = vst.msk [vmem:[#allocation3 + $0x38] sm:$0xff] %vm321_vm0, %v4108_v18  ;;  %v4103_v39 = vadd.f32 %v4102_v61, %v3996_v33 }
0x11b8   :  { %v11794_v8 = vpop.f32.mrf.mxu0 }
0x11b9   :  { %4157 = vst.msk [vmem:[#allocation3 + $0x30] sm:$0xff] %vm321_vm0, %v4103_v39  ;;  %v4118_v10 = vadd.f32 %v11794_v8, %v3999_v32 }
0x11ba   :  { %v4112_v59 = vpop.f32.mrf.mxu0  ;;  %v4172_v8 = vld [vmem:[#allocation3 + $0x28] sm:$0xff] }
0x11bb   :  { %4160 = vst.msk [vmem:[#allocation3 + $0x48] sm:$0xff] %vm321_vm0, %v4118_v10  ;;  %v4113_v37 = vadd.f32 %v4112_v59, %v3998_v54  ;;  %v4170_v10 = vld [vmem:[#allocation3 + $0x18] sm:$0xff]  ;;  %v4169_v54 = vld [vmem:[#allocation3 + $0x10] sm:$0xff]  ;;  %v4168_v59 = vld [vmem:[#allocation3 + $0x8] sm:$0xff] }
0x11bc   :  { %v11797_v19 = vpop.f32.mrf.mxu0  ;;  %v4171_v34 = vld [vmem:[#allocation3 + $0x20] sm:$0xff] }
0x11bd   :  { %4159 = vst.msk [vmem:[#allocation3 + $0x40] sm:$0xff] %vm321_vm0, %v4113_v37  ;;  %v4128_v30 = vadd.f32 %v11797_v19, %v4001_v42  ;;  %v4184_v37 = vld [vmem:[#allocation2 + $0x488] sm:$0xff]  ;;  %v15127_v42 = vstv %s107_s27  ;;  %v4183_v19 = vld [vmem:[#allocation2 + $0x480] sm:$0xff] }
0x11be   :  { %v4122_v6 = vpop.f32.mrf.mxu0  ;;  %v4174_v39 = vld [vmem:[#allocation3 + $0x38] sm:$0xff]  ;;  %v4201_v20 = vmul.f32 %v15127_v42, %v4184_v37  ;;  %v4200_v40 = vmul.f32 %v15127_v42, %v4183_v19 }
0x11bf   :  { %4162 = vst.msk [vmem:[#allocation3 + $0x58] sm:$0xff] %vm321_vm0, %v4128_v30  ;;  %v4123_v17 = vadd.f32 %v4122_v6, %v4000_v62  ;;  %v4186_v62 = vld [vmem:[#allocation2 + $0x498] sm:$0xff] }
0x11c0   :  { %v11800_v1 = vpop.f32.mrf.mxu0  ;;  %v4173_v32 = vld [vmem:[#allocation3 + $0x30] sm:$0xff]  ;;  %v4203_v48 = vmul.f32 %v15127_v42, %v4186_v62 }
0x11c1   :  { %4161 = vst.msk [vmem:[#allocation3 + $0x50] sm:$0xff] %vm321_vm0, %v4123_v17  ;;  %v4138_v58 = vadd.f32 %v11800_v1, %v4003_v9  ;;  %v4185_v9 = vld [vmem:[#allocation2 + $0x490] sm:$0xff] }
0x11c2   :  { %v4132_v12 = vpop.f32.mrf.mxu0  ;;  %v4176_v61 = vld [vmem:[#allocation3 + $0x48] sm:$0xff]  ;;  %v4202_v2 = vmul.f32 %v15127_v42, %v4185_v9 }
0x11c3   :  { %4164 = vst.msk [vmem:[#allocation3 + $0x68] sm:$0xff] %vm321_vm0, %v4138_v58  ;;  %v4133_v55 = vadd.f32 %v4132_v12, %v4002_v7  ;;  %v4188_v7 = vld [vmem:[#allocation2 + $0x4a8] sm:$0xff] }
0x11c4   :  { %v11803_v5 = vpop.f32.mrf.mxu0  ;;  %v4175_v63 = vld [vmem:[#allocation3 + $0x40] sm:$0xff] }
0x11c5   :  { %4163 = vst.msk [vmem:[#allocation3 + $0x60] sm:$0xff] %vm321_vm0, %v4133_v55  ;;  %v4148_v0 = vadd.f32 %v11803_v5, %v4005_v21  ;;  %v4187_v21 = vld [vmem:[#allocation2 + $0x4a0] sm:$0xff] }
0x11c6   :  { %v4142_v22 = vpop.f32.mrf.mxu0  ;;  %v4178_v18 = vld [vmem:[#allocation3 + $0x58] sm:$0xff] }
0x11c7   :  { %4166 = vst.msk [vmem:[#allocation3 + $0x78] sm:$0xff] %vm321_vm0, %v4148_v0  ;;  %v4143_v23 = vadd.f32 %v4142_v22, %v4004_v15  ;;  %v4205_v0 = vmul.f32 %v15127_v42, %v4188_v7  ;;  %v4190_v22 = vld [vmem:[#allocation2 + $0x4b8] sm:$0xff] }
0x11c8   :  { %v4177_v33 = vld [vmem:[#allocation3 + $0x50] sm:$0xff] }
0x11c9   :  { %4165 = vst.msk [vmem:[#allocation3 + $0x70] sm:$0xff] %vm321_vm0, %v4143_v23 }
0x11ca   :  { %v4180_v28 = vld [vmem:[#allocation3 + $0x68] sm:$0xff] }
0x11cc   :  { %v4179_v46 = vld [vmem:[#allocation3 + $0x60] sm:$0xff] }
0x11ce   :  { %v4182_v26 = vld [vmem:[#allocation3 + $0x78] sm:$0xff] }
0x11cf   :  { %11804 = vmatprep.subr.mxu1 %v4182_v26 }
0x11d0   :  { %11805 = vmatpush3.msra.mxu1 %v4182_v26  ;;  %v4181_v43 = vld [vmem:[#allocation3 + $0x70] sm:$0xff]  ;;  %v4204_v26 = vmul.f32 %v15127_v42, %v4187_v21 }
0x11d1   :  { %11806 = vmatprep.subr.mxu1 %v4181_v43 }
0x11d2   :  { %11807 = vmatpush3.msra.mxu1 %v4181_v43 }
0x11d3   :  { %11808 = vmatprep.subr.mxu1 %v4180_v28 }
0x11d4   :  { %11809 = vmatpush3.msra.mxu1 %v4180_v28  ;;  %v4189_v28 = vld [vmem:[#allocation2 + $0x4b0] sm:$0xff] }
0x11d5   :  { %11810 = vmatprep.subr.mxu1 %v4179_v46 }
0x11d6   :  { %11811 = vmatpush3.msra.mxu1 %v4179_v46 }
0x11d7   :  { %11812 = vmatprep.subr.mxu1 %v4178_v18 }
0x11d8   :  { %11813 = vmatpush3.msra.mxu1 %v4178_v18  ;;  %v4207_v18 = vmul.f32 %v15127_v42, %v4190_v22 }
0x11d9   :  { %11814 = vmatprep.subr.mxu1 %v4177_v33 }
0x11da   :  { %11815 = vmatpush3.msra.mxu1 %v4177_v33 }
0x11db   :  { %11816 = vmatprep.subr.mxu1 %v4176_v61 }
0x11dc   :  { %11817 = vmatpush3.msra.mxu1 %v4176_v61  ;;  %v4192_v61 = vld [vmem:[#allocation2 + $0x4c8] sm:$0xff] }
0x11dd   :  { %11818 = vmatprep.subr.mxu1 %v4175_v63 }
0x11de   :  { %11819 = vmatpush3.msra.mxu1 %v4175_v63 }
0x11df   :  { %11820 = vmatprep.subr.mxu1 %v4174_v39 }
0x11e0   :  { %11821 = vmatpush3.msra.mxu1 %v4174_v39  ;;  %v4206_v39 = vmul.f32 %v15127_v42, %v4189_v28 }
0x11e1   :  { %11822 = vmatprep.subr.mxu1 %v4173_v32 }
0x11e2   :  { %11823 = vmatpush3.msra.mxu1 %v4173_v32 }
0x11e3   :  { %11824 = vmatprep.subr.mxu1 %v4172_v8 }
0x11e4   :  { %11825 = vmatpush3.msra.mxu1 %v4172_v8  ;;  %v4191_v8 = vld [vmem:[#allocation2 + $0x4c0] sm:$0xff] }
0x11e5   :  { %11826 = vmatprep.subr.mxu1 %v4171_v34  ;;  %v4208_v37 = vmul.f32 %v15127_v42, %v4191_v8 }
0x11e6   :  { %11827 = vmatpush3.msra.mxu1 %v4171_v34 }
0x11e7   :  { %11828 = vmatprep.subr.mxu1 %v4170_v10 }
0x11e8   :  { %11829 = vmatpush3.msra.mxu1 %v4170_v10  ;;  %v4209_v10 = vmul.f32 %v15127_v42, %v4192_v61 }
0x11e9   :  { %11830 = vmatprep.subr.mxu1 %v4169_v54 }
0x11ea   :  { %11831 = vmatpush3.msra.mxu1 %v4169_v54 }
0x11eb   :  { %11832 = vmatprep.subr.mxu1 %v4168_v59 }
0x11ec   :  { %11833 = vmatpush3.msra.mxu1 %v4168_v59  ;;  %v4194_v59 = vld [vmem:[#allocation2 + $0x4d8] sm:$0xff] }
0x11ed   :  { %11834 = vmatprep.subr.mxu1 %v4167_v52  ;;  %v4211_v62 = vmul.f32 %v15127_v42, %v4194_v59 }
0x11ee   :  { %11835 = vmatpush3.msra.mxu1 %v4167_v52 }
0x11ef   :  { %11837 = vmatmul.mubr.f32.vlgmr.msra.gmra.mxu1 %v14976_v27 }
0x11f0   :  { %11839 = vmatprep.mubr.f32.mxu1 %v14979_v29 }
0x11f3   :  { %11840 = vmatmul.mubr.f32.gmra.mxu1 %v14982_v31 }
0x11f4   :  { %11842 = vmatprep.mubr.f32.mxu1 %v14985_v49 }
0x11f7   :  { %11843 = vmatmul.mubr.f32.gmra.mxu1 %v14988_v51 }
0x11f8   :  { %11845 = vmatprep.mubr.f32.mxu1 %v14991_v47 }
0x11fb   :  { %11846 = vmatmul.mubr.f32.gmra.mxu1 %v14994_v44 }
0x11fc   :  { %11848 = vmatprep.mubr.f32.mxu1 %v14997_v38 }
0x11ff   :  { %11849 = vmatmul.mubr.f32.gmra.mxu1 %v15000_v14 }
0x1200   :  { %11851 = vmatprep.mubr.f32.mxu1 %v15003_v41 }
0x1203   :  { %11852 = vmatmul.mubr.f32.gmra.mxu1 %v15006_v16 }
0x1204   :  { %11854 = vmatprep.mubr.f32.mxu1 %v15009_v53 }
0x1207   :  { %11855 = vmatmul.mubr.f32.gmra.mxu1 %v15012_v57 }
0x1208   :  { %11857 = vmatprep.mubr.f32.mxu1 %v15015_v11 }
0x120b   :  { %11858 = vmatmul.mubr.f32.gmra.mxu1 %v15071_v35 }
0x120c   :  { %11948 = vmatprep.mubr.f32.mxu1 %v15019_v13 }
0x12af   :  { %v11838_v30 = vpop.f32.mrf.mxu1 }
0x12b0   :  { %v4288_v6 = vadd.f32 %v11838_v30, %v4201_v20  ;;  %v4193_v20 = vld [vmem:[#allocation2 + $0x4d0] sm:$0xff] }
0x12b1   :  { %v4282_v17 = vpop.f32.mrf.mxu1  ;;  %v4210_v9 = vmul.f32 %v15127_v42, %v4193_v20 }
0x12b2   :  { %4362 = vst.msk [vmem:[#allocation3 + $0x8] sm:$0xff] %vm321_vm0, %v4288_v6  ;;  %v4283_v1 = vadd.f32 %v4282_v17, %v4200_v40  ;;  %v4196_v40 = vld [vmem:[#allocation2 + $0x4e8] sm:$0xff] }
0x12b3   :  { %v11841_v58 = vpop.f32.mrf.mxu1  ;;  %v4213_v7 = vmul.f32 %v15127_v42, %v4196_v40 }
0x12b4   :  { %4361 = vst.msk [vmem:[#allocation3] sm:$0xff] %vm321_vm0, %v4283_v1  ;;  %v4298_v12 = vadd.f32 %v11841_v58, %v4203_v48  ;;  %v4195_v48 = vld [vmem:[#allocation2 + $0x4e0] sm:$0xff] }
0x12b5   :  { %v4292_v55 = vpop.f32.mrf.mxu1  ;;  %v4212_v21 = vmul.f32 %v15127_v42, %v4195_v48 }
0x12b6   :  { %4364 = vst.msk [vmem:[#allocation3 + $0x18] sm:$0xff] %vm321_vm0, %v4298_v12  ;;  %v4293_v5 = vadd.f32 %v4292_v55, %v4202_v2  ;;  %v4198_v2 = vld [vmem:[#allocation2 + $0x4f8] sm:$0xff] }
0x12b7   :  { %v11844_v15 = vpop.f32.mrf.mxu1  ;;  %v4215_v22 = vmul.f32 %v15127_v42, %v4198_v2  ;;  %v4399_v2 = vld [vmem:[#allocation2 + $0x530] sm:$0xff] }
0x12b8   :  { %4363 = vst.msk [vmem:[#allocation3 + $0x10] sm:$0xff] %vm321_vm0, %v4293_v5  ;;  %v4308_v23 = vadd.f32 %v11844_v15, %v4205_v0  ;;  %v4197_v0 = vld [vmem:[#allocation2 + $0x4f0] sm:$0xff] }
0x12b9   :  { %v4302_v43 = vpop.f32.mrf.mxu1  ;;  %v4378_v20 = vld [vmem:[#allocation3 + $0x8] sm:$0xff] }
0x12ba   :  { %4366 = vst.msk [vmem:[#allocation3 + $0x28] sm:$0xff] %vm321_vm0, %v4308_v23  ;;  %v4303_v46 = vadd.f32 %v4302_v43, %v4204_v26  ;;  %v4214_v43 = vmul.f32 %v15127_v42, %v4197_v0 }
0x12bb   :  { %v11847_v33 = vpop.f32.mrf.mxu1 }
0x12bc   :  { %4365 = vst.msk [vmem:[#allocation3 + $0x20] sm:$0xff] %vm321_vm0, %v4303_v46  ;;  %v4318_v63 = vadd.f32 %v11847_v33, %v4207_v18 }
0x12bd   :  { %v4312_v32 = vpop.f32.mrf.mxu1 }
0x12be   :  { %4368 = vst.msk [vmem:[#allocation3 + $0x38] sm:$0xff] %vm321_vm0, %v4318_v63  ;;  %v4313_v34 = vadd.f32 %v4312_v32, %v4206_v39 }
0x12bf   :  { %v11850_v54 = vpop.f32.mrf.mxu1 }
0x12c0   :  { %4367 = vst.msk [vmem:[#allocation3 + $0x30] sm:$0xff] %vm321_vm0, %v4313_v34  ;;  %v4328_v52 = vadd.f32 %v11850_v54, %v4209_v10 }
0x12c1   :  { %v4322_v19 = vpop.f32.mrf.mxu1  ;;  %v4382_v59 = vld [vmem:[#allocation3 + $0x28] sm:$0xff] }
0x12c2   :  { %4370 = vst.msk [vmem:[#allocation3 + $0x48] sm:$0xff] %vm321_vm0, %v4328_v52  ;;  %v4323_v30 = vadd.f32 %v4322_v19, %v4208_v37  ;;  %v4380_v37 = vld [vmem:[#allocation3 + $0x18] sm:$0xff]  ;;  %v4379_v19 = vld [vmem:[#allocation3 + $0x10] sm:$0xff] }
0x12c3   :  { %v11853_v6 = vpop.f32.mrf.mxu1  ;;  %v4381_v52 = vld [vmem:[#allocation3 + $0x20] sm:$0xff] }
0x12c4   :  { %4369 = vst.msk [vmem:[#allocation3 + $0x40] sm:$0xff] %vm321_vm0, %v4323_v30  ;;  %v4338_v17 = vadd.f32 %v11853_v6, %v4211_v62  ;;  %v4377_v30 = vld [vmem:[#allocation3] sm:$0xff] }
0x12c5   :  { %v4332_v1 = vpop.f32.mrf.mxu1  ;;  %v4384_v10 = vld [vmem:[#allocation3 + $0x38] sm:$0xff]  ;;  %v4397_v6 = vld [vmem:[#allocation2 + $0x520] sm:$0xff] }
0x12c6   :  { %4372 = vst.msk [vmem:[#allocation3 + $0x58] sm:$0xff] %vm321_vm0, %v4338_v17  ;;  %v4333_v58 = vadd.f32 %v4332_v1, %v4210_v9  ;;  %v4400_v1 = vld [vmem:[#allocation2 + $0x538] sm:$0xff] }
0x12c7   :  { %v11856_v12 = vpop.f32.mrf.mxu1  ;;  %v4383_v54 = vld [vmem:[#allocation3 + $0x30] sm:$0xff] }
0x12c8   :  { %4371 = vst.msk [vmem:[#allocation3 + $0x50] sm:$0xff] %vm321_vm0, %v4333_v58  ;;  %v4348_v55 = vadd.f32 %v11856_v12, %v4213_v7 }
0x12c9   :  { %v4342_v5 = vpop.f32.mrf.mxu1  ;;  %v4386_v8 = vld [vmem:[#allocation3 + $0x48] sm:$0xff] }
0x12ca   :  { %4374 = vst.msk [vmem:[#allocation3 + $0x68] sm:$0xff] %vm321_vm0, %v4348_v55  ;;  %v4343_v15 = vadd.f32 %v4342_v5, %v4212_v21 }
0x12cb   :  { %v11859_v23 = vpop.f32.mrf.mxu1  ;;  %v4385_v34 = vld [vmem:[#allocation3 + $0x40] sm:$0xff] }
0x12cc   :  { %4373 = vst.msk [vmem:[#allocation3 + $0x60] sm:$0xff] %vm321_vm0, %v4343_v15  ;;  %v4358_v26 = vadd.f32 %v11859_v23, %v4215_v22  ;;  %v4402_v22 = vld [vmem:[#allocation2 + $0x548] sm:$0xff] }
0x12cd   :  { %v4352_v28 = vpop.f32.mrf.mxu1  ;;  %v4388_v39 = vld [vmem:[#allocation3 + $0x58] sm:$0xff] }
0x12ce   :  { %4376 = vst.msk [vmem:[#allocation3 + $0x78] sm:$0xff] %vm321_vm0, %v4358_v26  ;;  %v4353_v46 = vadd.f32 %v4352_v28, %v4214_v43 }
0x12cf   :  { %v4387_v32 = vld [vmem:[#allocation3 + $0x50] sm:$0xff] }
0x12d0   :  { %4375 = vst.msk [vmem:[#allocation3 + $0x70] sm:$0xff] %vm321_vm0, %v4353_v46 }
0x12d1   :  { %v4390_v61 = vld [vmem:[#allocation3 + $0x68] sm:$0xff] }
0x12d3   :  { %v4389_v63 = vld [vmem:[#allocation3 + $0x60] sm:$0xff] }
0x12d5   :  { %v4392_v18 = vld [vmem:[#allocation3 + $0x78] sm:$0xff] }
0x12d6   :  { %11860 = vmatprep.subr.mxu0 %v4392_v18 }
0x12d7   :  { %11861 = vmatpush3.msra.mxu0 %v4392_v18  ;;  %v4391_v33 = vld [vmem:[#allocation3 + $0x70] sm:$0xff]  ;;  %v4401_v18 = vld [vmem:[#allocation2 + $0x540] sm:$0xff] }
0x12d8   :  { %11862 = vmatprep.subr.mxu0 %v4391_v33 }
0x12d9   :  { %11863 = vmatpush3.msra.mxu0 %v4391_v33 }
0x12da   :  { %11864 = vmatprep.subr.mxu0 %v4390_v61 }
0x12db   :  { %11865 = vmatpush3.msra.mxu0 %v4390_v61 }
0x12dc   :  { %11866 = vmatprep.subr.mxu0 %v4389_v63 }
0x12dd   :  { %11867 = vmatpush3.msra.mxu0 %v4389_v63 }
0x12de   :  { %11868 = vmatprep.subr.mxu0 %v4388_v39 }
0x12df   :  { %11869 = vmatpush3.msra.mxu0 %v4388_v39 }
0x12e0   :  { %11870 = vmatprep.subr.mxu0 %v4387_v32 }
0x12e1   :  { %11871 = vmatpush3.msra.mxu0 %v4387_v32 }
0x12e2   :  { %11872 = vmatprep.subr.mxu0 %v4386_v8 }
0x12e3   :  { %11873 = vmatpush3.msra.mxu0 %v4386_v8  ;;  %v4404_v8 = vld [vmem:[#allocation2 + $0x558] sm:$0xff] }
0x12e4   :  { %11874 = vmatprep.subr.mxu0 %v4385_v34 }
0x12e5   :  { %11875 = vmatpush3.msra.mxu0 %v4385_v34 }
0x12e6   :  { %11876 = vmatprep.subr.mxu0 %v4384_v10 }
0x12e7   :  { %11877 = vmatpush3.msra.mxu0 %v4384_v10 }
0x12e8   :  { %11878 = vmatprep.subr.mxu0 %v4383_v54 }
0x12e9   :  { %11879 = vmatpush3.msra.mxu0 %v4383_v54 }
0x12ea   :  { %11880 = vmatprep.subr.mxu0 %v4382_v59 }
0x12eb   :  { %11881 = vmatpush3.msra.mxu0 %v4382_v59 }
0x12ec   :  { %11882 = vmatprep.subr.mxu0 %v4381_v52 }
0x12ed   :  { %11883 = vmatpush3.msra.mxu0 %v4381_v52 }
0x12ee   :  { %11884 = vmatprep.subr.mxu0 %v4380_v37 }
0x12ef   :  { %11885 = vmatpush3.msra.mxu0 %v4380_v37  ;;  %v4403_v37 = vld [vmem:[#allocation2 + $0x550] sm:$0xff] }
0x12f0   :  { %11886 = vmatprep.subr.mxu0 %v4379_v19 }
0x12f1   :  { %11887 = vmatpush3.msra.mxu0 %v4379_v19 }
0x12f2   :  { %11888 = vmatprep.subr.mxu0 %v4378_v20 }
0x12f3   :  { %11889 = vmatpush3.msra.mxu0 %v4378_v20 }
0x12f4   :  { %11890 = vmatprep.subr.mxu0 %v4377_v30 }
0x12f5   :  { %11891 = vmatpush3.msra.mxu0 %v4377_v30 }
0x12f6   :  { %11893 = vmatmul.mubr.f32.vlgmr.msra.gmra.mxu0 %v14976_v27  ;;  %v4394_v27 = vld [vmem:[#allocation2 + $0x508] sm:$0xff] }
0x12f7   :  { %11895 = vmatprep.mubr.f32.mxu0 %v14979_v29  ;;  %v15178_v29 = vstv %s103_s11 }
0x12f8   :  { %v4414_v58 = vmul.f32 %v15178_v29, %v4397_v6  ;;  %v4417_v5 = vmul.f32 %v15178_v29, %v4400_v1  ;;  %v4416_v43 = vmul.f32 %v15178_v29, %v4399_v2  ;;  %v4419_v63 = vmul.f32 %v15178_v29, %v4402_v22 }
0x12f9   :  { %v4418_v54 = vmul.f32 %v15178_v29, %v4401_v18  ;;  %v4421_v30 = vmul.f32 %v15178_v29, %v4404_v8 }
0x12fa   :  { %11896 = vmatmul.mubr.f32.gmra.mxu0 %v14982_v31  ;;  %v4393_v31 = vld [vmem:[#allocation2 + $0x500] sm:$0xff] }
0x12fb   :  { %11898 = vmatprep.mubr.f32.mxu0 %v14985_v49  ;;  %v4411_v49 = vmul.f32 %v15178_v29, %v4394_v27 }
0x12fe   :  { %11899 = vmatmul.mubr.f32.gmra.mxu0 %v14988_v51 }
0x12ff   :  { %11901 = vmatprep.mubr.f32.mxu0 %v14991_v47  ;;  %v4396_v47 = vld [vmem:[#allocation2 + $0x518] sm:$0xff] }
0x1302   :  { %11902 = vmatmul.mubr.f32.gmra.mxu0 %v14994_v44 }
0x1303   :  { %11904 = vmatprep.mubr.f32.mxu0 %v14997_v38  ;;  %v4410_v38 = vmul.f32 %v15178_v29, %v4393_v31 }
0x1306   :  { %11905 = vmatmul.mubr.f32.gmra.mxu0 %v15000_v14 }
0x1307   :  { %11907 = vmatprep.mubr.f32.mxu0 %v15003_v41  ;;  %v4395_v41 = vld [vmem:[#allocation2 + $0x510] sm:$0xff] }
0x130a   :  { %11908 = vmatmul.mubr.f32.gmra.mxu0 %v15006_v16 }
0x130b   :  { %11910 = vmatprep.mubr.f32.mxu0 %v15009_v53  ;;  %v4413_v53 = vmul.f32 %v15178_v29, %v4396_v47 }
0x130e   :  { %11911 = vmatmul.mubr.f32.gmra.mxu0 %v15012_v57 }
0x130f   :  { %11913 = vmatprep.mubr.f32.mxu0 %v15015_v11  ;;  %v4398_v11 = vld [vmem:[#allocation2 + $0x528] sm:$0xff] }
0x1310   :  { %v4415_v17 = vmul.f32 %v15178_v29, %v4398_v11 }
0x1312   :  { %11914 = vmatmul.mubr.f32.gmra.mxu0 %v15071_v35  ;;  %v4412_v35 = vmul.f32 %v15178_v29, %v4395_v41 }
0x1313   :  { %12004 = vmatprep.mubr.f32.mxu0 %v15019_v13 }
0x13b6   :  { %v11894_v51 = vpop.f32.mrf.mxu0 }
0x13b7   :  { %v4498_v44 = vadd.f32 %v11894_v51, %v4411_v49  ;;  %v4406_v51 = vld [vmem:[#allocation2 + $0x568] sm:$0xff] }
0x13b8   :  { %v4492_v14 = vpop.f32.mrf.mxu0 }
0x13b9   :  { %4572 = vst.msk [vmem:[#allocation3 + $0x8] sm:$0xff] %vm321_vm0, %v4498_v44  ;;  %v4493_v16 = vadd.f32 %v4492_v14, %v4410_v38  ;;  %v4420_v14 = vmul.f32 %v15178_v29, %v4403_v37 }
0x13ba   :  { %v11897_v57 = vpop.f32.mrf.mxu0 }
0x13bb   :  { %4571 = vst.msk [vmem:[#allocation3] sm:$0xff] %vm321_vm0, %v4493_v16  ;;  %v4508_v13 = vadd.f32 %v11897_v57, %v4413_v53  ;;  %v4405_v57 = vld [vmem:[#allocation2 + $0x560] sm:$0xff] }
0x13bc   :  { %v4502_v62 = vpop.f32.mrf.mxu0 }
0x13bd   :  { %4574 = vst.msk [vmem:[#allocation3 + $0x18] sm:$0xff] %vm321_vm0, %v4508_v13  ;;  %v4503_v40 = vadd.f32 %v4502_v62, %v4412_v35  ;;  %v4423_v62 = vmul.f32 %v15178_v29, %v4406_v51 }
0x13be   :  { %v11900_v9 = vpop.f32.mrf.mxu0 }
0x13bf   :  { %4573 = vst.msk [vmem:[#allocation3 + $0x10] sm:$0xff] %vm321_vm0, %v4503_v40  ;;  %v4518_v48 = vadd.f32 %v11900_v9, %v4415_v17  ;;  %v4408_v9 = vld [vmem:[#allocation2 + $0x578] sm:$0xff] }
0x13c0   :  { %v4588_v7 = vld [vmem:[#allocation3 + $0x8] sm:$0xff]  ;;  %v4512_v12 = vpop.f32.mrf.mxu0  ;;  %v4425_v22 = vmul.f32 %v15178_v29, %v4408_v9 }
0x13c1   :  { %v4604_v55 = vmax.f32 %v4588_v7, 0.0  ;;  %4576 = vst.msk [vmem:[#allocation3 + $0x28] sm:$0xff] %vm321_vm0, %v4518_v48  ;;  %v4513_v21 = vadd.f32 %v4512_v12, %v4414_v58  ;;  %v4422_v7 = vmul.f32 %v15178_v29, %v4405_v57 }
0x13c2   :  { %v4587_v0 = vld [vmem:[#allocation3] sm:$0xff]  ;;  %v11903_v15 = vpop.f32.mrf.mxu0 }
0x13c3   :  { %4620 = vst.msk [vmem:[#allocation2 + $0x8] sm:$0xff] %vm321_vm0, %v4604_v55  ;;  %v4603_v23 = vmax.f32 %v4587_v0, 0.0  ;;  %4575 = vst.msk [vmem:[#allocation3 + $0x20] sm:$0xff] %vm321_vm0, %v4513_v21  ;;  %v4528_v26 = vadd.f32 %v11903_v15, %v4417_v5  ;;  %v4407_v21 = vld [vmem:[#allocation2 + $0x570] sm:$0xff] }
0x13c4   :  { %v4590_v28 = vld [vmem:[#allocation3 + $0x18] sm:$0xff]  ;;  %v4522_v46 = vpop.f32.mrf.mxu0 }
0x13c5   :  { %4619 = vst.msk [vmem:[#allocation2] sm:$0xff] %vm321_vm0, %v4603_v23  ;;  %v4606_v33 = vmax.f32 %v4590_v28, 0.0  ;;  %4578 = vst.msk [vmem:[#allocation3 + $0x38] sm:$0xff] %vm321_vm0, %v4528_v26  ;;  %v4523_v61 = vadd.f32 %v4522_v46, %v4416_v43 }
0x13c6   :  { %v4589_v39 = vld [vmem:[#allocation3 + $0x10] sm:$0xff]  ;;  %v11906_v32 = vpop.f32.mrf.mxu0 }
0x13c7   :  { %4622 = vst.msk [vmem:[#allocation2 + $0x18] sm:$0xff] %vm321_vm0, %v4606_v33  ;;  %v4605_v34 = vmax.f32 %v4589_v39, 0.0  ;;  %4577 = vst.msk [vmem:[#allocation3 + $0x30] sm:$0xff] %vm321_vm0, %v4523_v61  ;;  %v4538_v10 = vadd.f32 %v11906_v32, %v4419_v63  ;;  %v4424_v33 = vmul.f32 %v15178_v29, %v4407_v21  ;;  %v15346_v21 = vld [vmem:[#allocation9 + $0x18] sm:$0xff] }
0x13c8   :  { %v4592_v59 = vld [vmem:[#allocation3 + $0x28] sm:$0xff]  ;;  %v4532_v52 = vpop.f32.mrf.mxu0 }
0x13c9   :  { %4621 = vst.msk [vmem:[#allocation2 + $0x10] sm:$0xff] %vm321_vm0, %v4605_v34  ;;  %v4608_v19 = vmax.f32 %v4592_v59, 0.0  ;;  %4580 = vst.msk [vmem:[#allocation3 + $0x48] sm:$0xff] %vm321_vm0, %v4538_v10  ;;  %v4533_v20 = vadd.f32 %v4532_v52, %v4418_v54 }
0x13ca   :  { %v15204_v27 = vld [vmem:[#allocation2 + $0x8] sm:$0xff]  ;;  %v4591_v31 = vld [vmem:[#allocation3 + $0x20] sm:$0xff]  ;;  %v11909_v49 = vpop.f32.mrf.mxu0 }
0x13cb   :  { %v6742_v47 = vmul.f32 %v15204_v27, %v13561_v36  ;;  %4624 = vst.msk [vmem:[#allocation2 + $0x28] sm:$0xff] %vm321_vm0, %v4608_v19  ;;  %v4607_v44 = vmax.f32 %v4591_v31, 0.0  ;;  %4579 = vst.msk [vmem:[#allocation3 + $0x40] sm:$0xff] %vm321_vm0, %v4533_v20  ;;  %v4548_v38 = vadd.f32 %v11909_v49, %v4421_v30 }
0x13cc   :  { %v15211_v41 = vld [vmem:[#allocation2] sm:$0xff]  ;;  %v4594_v16 = vld [vmem:[#allocation3 + $0x38] sm:$0xff]  ;;  %v4542_v53 = vpop.f32.mrf.mxu0 }
0x13cd   :  { %6758 = vst.msk [vmem:[#allocation3 + $0x8] sm:$0xff] %vm321_vm0, %v6742_v47  ;;  %v6741_v11 = vmul.f32 %v15211_v41, %v13561_v36  ;;  %4623 = vst.msk [vmem:[#allocation2 + $0x20] sm:$0xff] %vm321_vm0, %v4607_v44  ;;  %v4610_v13 = vmax.f32 %v4594_v16, 0.0  ;;  %v4543_v35 = vadd.f32 %v4542_v53, %v4420_v14 }
0x13ce   :  { %4582 = vst.msk [vmem:[#allocation3 + $0x58] sm:$0xff] %vm321_vm0, %v4548_v38  ;;  %v15219_v6 = vld [vmem:[#allocation2 + $0x18] sm:$0xff]  ;;  %v4593_v40 = vld [vmem:[#allocation3 + $0x30] sm:$0xff]  ;;  %v11912_v17 = vpop.f32.mrf.mxu0 }
0x13cf   :  { %6757 = vst.msk [vmem:[#allocation3] sm:$0xff] %vm321_vm0, %v6741_v11  ;;  %v6744_v1 = vmul.f32 %v15219_v6, %v13561_v36  ;;  %4626 = vst.msk [vmem:[#allocation2 + $0x38] sm:$0xff] %vm321_vm0, %v4610_v13  ;;  %v4609_v48 = vmax.f32 %v4593_v40, 0.0  ;;  %v4558_v58 = vadd.f32 %v11912_v17, %v4423_v62 }
0x13d0   :  { %4581 = vst.msk [vmem:[#allocation3 + $0x50] sm:$0xff] %vm321_vm0, %v4543_v35  ;;  %v15227_v12 = vld [vmem:[#allocation2 + $0x10] sm:$0xff]  ;;  %v4596_v2 = vld [vmem:[#allocation3 + $0x48] sm:$0xff]  ;;  %v4552_v55 = vpop.f32.mrf.mxu0 }
0x13d1   :  { %6760 = vst.msk [vmem:[#allocation3 + $0x18] sm:$0xff] %vm321_vm0, %v6744_v1  ;;  %v6743_v5 = vmul.f32 %v15227_v12, %v13561_v36  ;;  %4625 = vst.msk [vmem:[#allocation2 + $0x30] sm:$0xff] %vm321_vm0, %v4609_v48  ;;  %v4612_v0 = vmax.f32 %v4596_v2, 0.0  ;;  %v4553_v15 = vadd.f32 %v4552_v55, %v4422_v7  ;;  %v15343_v55 = vld [vmem:[#allocation9 + $0x10] sm:$0xff] }
0x13d2   :  { %4584 = vst.msk [vmem:[#allocation3 + $0x68] sm:$0xff] %vm321_vm0, %v4558_v58  ;;  %v15235_v23 = vld [vmem:[#allocation2 + $0x28] sm:$0xff]  ;;  %v4595_v26 = vld [vmem:[#allocation3 + $0x40] sm:$0xff]  ;;  %v11915_v43 = vpop.f32.mrf.mxu0 }
0x13d3   :  { %6759 = vst.msk [vmem:[#allocation3 + $0x10] sm:$0xff] %vm321_vm0, %v6743_v5  ;;  %v6746_v28 = vmul.f32 %v15235_v23, %v13561_v36  ;;  %4628 = vst.msk [vmem:[#allocation2 + $0x48] sm:$0xff] %vm321_vm0, %v4612_v0  ;;  %v4611_v46 = vmax.f32 %v4595_v26, 0.0  ;;  %v4568_v18 = vadd.f32 %v11915_v43, %v4425_v22  ;;  %v15349_v5 = vld [vmem:[#allocation9 + $0x20] sm:$0xff]  ;;  %v15352_v0 = vld [vmem:[#allocation9 + $0x28] sm:$0xff] }
0x13d4   :  { %4583 = vst.msk [vmem:[#allocation3 + $0x60] sm:$0xff] %vm321_vm0, %v4553_v15  ;;  %v15243_v61 = vld [vmem:[#allocation2 + $0x20] sm:$0xff]  ;;  %v4562_v39 = vpop.f32.mrf.mxu0  ;;  %v15355_v15 = vld [vmem:[#allocation9 + $0x30] sm:$0xff]  ;;  %v15358_v22 = vld [vmem:[#allocation9 + $0x38] sm:$0xff] }
0x13d5   :  { %v4598_v63 = vld [vmem:[#allocation3 + $0x58] sm:$0xff]  ;;  %6762 = vst.msk [vmem:[#allocation3 + $0x28] sm:$0xff] %vm321_vm0, %v6746_v28  ;;  %v6745_v32 = vmul.f32 %v15243_v61, %v13561_v36  ;;  %4627 = vst.msk [vmem:[#allocation2 + $0x40] sm:$0xff] %vm321_vm0, %v4611_v46  ;;  %v4563_v34 = vadd.f32 %v4562_v39, %v4424_v33  ;;  %v15361_v26 = vld [vmem:[#allocation9 + $0x40] sm:$0xff] }
0x13d6   :  { %v4614_v8 = vmax.f32 %v4598_v63, 0.0  ;;  %4586 = vst.msk [vmem:[#allocation3 + $0x78] sm:$0xff] %vm321_vm0, %v4568_v18  ;;  %v15250_v10 = vld [vmem:[#allocation2 + $0x38] sm:$0xff]  ;;  %v15364_v43 = vld [vmem:[#allocation9 + $0x48] sm:$0xff]  ;;  %v15367_v28 = vld [vmem:[#allocation9 + $0x50] sm:$0xff] }
0x13d7   :  { %v4597_v54 = vld [vmem:[#allocation3 + $0x50] sm:$0xff]  ;;  %6761 = vst.msk [vmem:[#allocation3 + $0x20] sm:$0xff] %vm321_vm0, %v6745_v32  ;;  %v6748_v59 = vmul.f32 %v15250_v10, %v13561_v36  ;;  %4585 = vst.msk [vmem:[#allocation3 + $0x70] sm:$0xff] %vm321_vm0, %v4563_v34  ;;  %v15370_v46 = vld [vmem:[#allocation9 + $0x58] sm:$0xff] }
0x13d8   :  { %4630 = vst.msk [vmem:[#allocation2 + $0x58] sm:$0xff] %vm321_vm0, %v4614_v8  ;;  %v4613_v52 = vmax.f32 %v4597_v54, 0.0  ;;  %v15257_v37 = vld [vmem:[#allocation2 + $0x30] sm:$0xff]  ;;  %v15373_v18 = vld [vmem:[#allocation9 + $0x60] sm:$0xff]  ;;  %v15376_v33 = vld [vmem:[#allocation9 + $0x68] sm:$0xff]  ;;  %v4652_v8 = vmul.f32 2.0, %v15204_v27 }
0x13d9   :  { %v4600_v19 = vld [vmem:[#allocation3 + $0x68] sm:$0xff]  ;;  %6764 = vst.msk [vmem:[#allocation3 + $0x38] sm:$0xff] %vm321_vm0, %v6748_v59  ;;  %v6747_v20 = vmul.f32 %v15257_v37, %v13561_v36  ;;  %v15379_v63 = vld [vmem:[#allocation9 + $0x70] sm:$0xff]  ;;  %v15382_v39 = vld [vmem:[#allocation9 + $0x78] sm:$0xff]  ;;  %v4651_v59 = vmul.f32 2.0, %v15211_v41 }
0x13da   :  { %4629 = vst.msk [vmem:[#allocation2 + $0x50] sm:$0xff] %vm321_vm0, %v4613_v52  ;;  %v4616_v30 = vmax.f32 %v4600_v19, 0.0  ;;  %v15263_v31 = vld [vmem:[#allocation2 + $0x48] sm:$0xff]  ;;  %v15385_v32 = vld [vmem:[#allocation9] sm:$0xff] }
0x13db   :  { %v4599_v49 = vld [vmem:[#allocation3 + $0x60] sm:$0xff]  ;;  %6763 = vst.msk [vmem:[#allocation3 + $0x30] sm:$0xff] %vm321_vm0, %v6747_v20  ;;  %v6750_v51 = vmul.f32 %v15263_v31, %v13561_v36  ;;  %v4654_v20 = vmul.f32 2.0, %v15219_v6 }
0x13dc   :  { %4632 = vst.msk [vmem:[#allocation2 + $0x68] sm:$0xff] %vm321_vm0, %v4616_v30  ;;  %v4615_v47 = vmax.f32 %v4599_v49, 0.0  ;;  %v15269_v44 = vld [vmem:[#allocation2 + $0x40] sm:$0xff] }
0x13dd   :  { %v4602_v38 = vld [vmem:[#allocation3 + $0x78] sm:$0xff]  ;;  %6766 = vst.msk [vmem:[#allocation3 + $0x48] sm:$0xff] %vm321_vm0, %v6750_v51  ;;  %v6749_v14 = vmul.f32 %v15269_v44, %v13561_v36  ;;  %v4653_v51 = vmul.f32 2.0, %v15227_v12 }
0x13de   :  { %4631 = vst.msk [vmem:[#allocation2 + $0x60] sm:$0xff] %vm321_vm0, %v4615_v47  ;;  %v4618_v16 = vmax.f32 %v4602_v38, 0.0  ;;  %v4601_v57 = vld [vmem:[#allocation3 + $0x70] sm:$0xff]  ;;  %v4656_v38 = vmul.f32 2.0, %v15235_v23 }
0x13df   :  { %v15275_v53 = vld [vmem:[#allocation2 + $0x58] sm:$0xff]  ;;  %6765 = vst.msk [vmem:[#allocation3 + $0x40] sm:$0xff] %vm321_vm0, %v6749_v14  ;;  %v4617_v13 = vmax.f32 %v4601_v57, 0.0 }
0x13e0   :  { %v6752_v11 = vmul.f32 %v15275_v53, %v13561_v36  ;;  %4634 = vst.msk [vmem:[#allocation2 + $0x78] sm:$0xff] %vm321_vm0, %v4618_v16  ;;  %v4655_v16 = vmul.f32 2.0, %v15243_v61 }
0x13e1   :  { %v15281_v35 = vld [vmem:[#allocation2 + $0x50] sm:$0xff]  ;;  %4633 = vst.msk [vmem:[#allocation2 + $0x70] sm:$0xff] %vm321_vm0, %v4617_v13 }
0x13e2   :  { %6768 = vst.msk [vmem:[#allocation3 + $0x58] sm:$0xff] %vm321_vm0, %v6752_v11  ;;  %v6751_v62 = vmul.f32 %v15281_v35, %v13561_v36  ;;  %v4658_v11 = vmul.f32 2.0, %v15250_v10 }
0x13e3   :  { %v15287_v40 = vld [vmem:[#allocation2 + $0x68] sm:$0xff] }
0x13e4   :  { %6767 = vst.msk [vmem:[#allocation3 + $0x50] sm:$0xff] %vm321_vm0, %v6751_v62  ;;  %v6754_v17 = vmul.f32 %v15287_v40, %v13561_v36  ;;  %v4657_v62 = vmul.f32 2.0, %v15257_v37 }
0x13e5   :  { %v15292_v9 = vld [vmem:[#allocation2 + $0x60] sm:$0xff] }
0x13e6   :  { %6770 = vst.msk [vmem:[#allocation3 + $0x68] sm:$0xff] %vm321_vm0, %v6754_v17  ;;  %v6753_v1 = vmul.f32 %v15292_v9, %v13561_v36 }
0x13e7   :  { %v15297_v48 = vld [vmem:[#allocation2 + $0x78] sm:$0xff] }
0x13e8   :  { %6769 = vst.msk [vmem:[#allocation3 + $0x60] sm:$0xff] %vm321_vm0, %v6753_v1  ;;  %v6756_v58 = vmul.f32 %v15297_v48, %v13561_v36  ;;  %11916 = vmatprep.subr.mxu1 %v15297_v48  ;;  %v15303_v7 = vld [vmem:[#allocation2 + $0x70] sm:$0xff]  ;;  %v4660_v1 = vmul.f32 2.0, %v15263_v31 }
0x13e9   :  { %11917 = vmatpush3.msra.mxu1 %v15297_v48  ;;  %v6755_v2 = vmul.f32 %v15303_v7, %v13561_v36  ;;  %v15340_v36 = vld [vmem:[#allocation9 + $0x8] sm:$0xff] }
0x13ea   :  { %6772 = vst.msk [vmem:[#allocation3 + $0x78] sm:$0xff] %vm321_vm0, %v6756_v58  ;;  %11918 = vmatprep.subr.mxu1 %v15303_v7 }
0x13eb   :  { %11919 = vmatpush3.msra.mxu1 %v15303_v7  ;;  %6771 = vst.msk [vmem:[#allocation3 + $0x70] sm:$0xff] %vm321_vm0, %v6755_v2  ;;  %v4659_v2 = vmul.f32 2.0, %v15269_v44 }
0x13ec   :  { %11920 = vmatprep.subr.mxu1 %v15287_v40 }
0x13ed   :  { %11921 = vmatpush3.msra.mxu1 %v15287_v40 }
0x13ee   :  { %11922 = vmatprep.subr.mxu1 %v15292_v9 }
0x13ef   :  { %11923 = vmatpush3.msra.mxu1 %v15292_v9 }
0x13f0   :  { %11924 = vmatprep.subr.mxu1 %v15275_v53 }
0x13f1   :  { %11925 = vmatpush3.msra.mxu1 %v15275_v53 }
0x13f2   :  { %11926 = vmatprep.subr.mxu1 %v15281_v35 }
0x13f3   :  { %11927 = vmatpush3.msra.mxu1 %v15281_v35 }
0x13f4   :  { %11928 = vmatprep.subr.mxu1 %v15263_v31 }
0x13f5   :  { %11929 = vmatpush3.msra.mxu1 %v15263_v31 }
0x13f6   :  { %11930 = vmatprep.subr.mxu1 %v15269_v44 }
0x13f7   :  { %11931 = vmatpush3.msra.mxu1 %v15269_v44 }
0x13f8   :  { %11932 = vmatprep.subr.mxu1 %v15250_v10 }
0x13f9   :  { %11933 = vmatpush3.msra.mxu1 %v15250_v10 }
0x13fa   :  { %11934 = vmatprep.subr.mxu1 %v15257_v37 }
0x13fb   :  { %11935 = vmatpush3.msra.mxu1 %v15257_v37 }
0x13fc   :  { %11936 = vmatprep.subr.mxu1 %v15235_v23 }
0x13fd   :  { %11937 = vmatpush3.msra.mxu1 %v15235_v23 }
0x13fe   :  { %11938 = vmatprep.subr.mxu1 %v15243_v61 }
0x13ff   :  { %11939 = vmatpush3.msra.mxu1 %v15243_v61 }
0x1400   :  { %11940 = vmatprep.subr.mxu1 %v15219_v6 }
0x1401   :  { %11941 = vmatpush3.msra.mxu1 %v15219_v6 }
0x1402   :  { %11942 = vmatprep.subr.mxu1 %v15227_v12 }
0x1403   :  { %11943 = vmatpush3.msra.mxu1 %v15227_v12 }
0x1404   :  { %11944 = vmatprep.subr.mxu1 %v15204_v27 }
0x1405   :  { %11945 = vmatpush3.msra.mxu1 %v15204_v27 }
0x1406   :  { %11946 = vmatprep.subr.mxu1 %v15211_v41 }
0x1407   :  { %11947 = vmatpush3.msra.mxu1 %v15211_v41 }
0x1408   :  { %11949 = vmatmul.mubr.f32.vlgmr.msra.gmra.mxu1 %v15340_v36 }
0x1409   :  { %11951 = vmatprep.mubr.f32.mxu1 %v15343_v55 }
0x140c   :  { %11952 = vmatmul.mubr.f32.gmra.mxu1 %v15346_v21 }
0x140d   :  { %11954 = vmatprep.mubr.f32.mxu1 %v15349_v5 }
0x1410   :  { %11955 = vmatmul.mubr.f32.gmra.mxu1 %v15352_v0 }
0x1411   :  { %11957 = vmatprep.mubr.f32.mxu1 %v15355_v15 }
0x1414   :  { %11958 = vmatmul.mubr.f32.gmra.mxu1 %v15358_v22 }
0x1415   :  { %11960 = vmatprep.mubr.f32.mxu1 %v15361_v26 }
0x1418   :  { %11961 = vmatmul.mubr.f32.gmra.mxu1 %v15364_v43 }
0x1419   :  { %11963 = vmatprep.mubr.f32.mxu1 %v15367_v28 }
0x141c   :  { %11964 = vmatmul.mubr.f32.gmra.mxu1 %v15370_v46 }
0x141d   :  { %11966 = vmatprep.mubr.f32.mxu1 %v15373_v18 }
0x1420   :  { %11967 = vmatmul.mubr.f32.gmra.mxu1 %v15376_v33 }
0x1421   :  { %11969 = vmatprep.mubr.f32.mxu1 %v15379_v63 }
0x1424   :  { %11970 = vmatmul.mubr.f32.gmra.mxu1 %v15382_v39 }
0x1425   :  { %12060 = vmatprep.mubr.f32.mxu1 %v15385_v32 }
0x14c8   :  { %v11950_v34 = vpop.f32.mrf.mxu1 }
0x14c9   :  { %v4813_v54 = vsub.f32 %v4652_v8, %v11950_v34  ;;  %v4662_v34 = vmul.f32 2.0, %v15275_v53 }
0x14ca   :  { %v4733_v52 = vpop.f32.mrf.mxu1 }
0x14cb   :  { %4829 = vst.msk [vmem:[#allocation2 + $0x88] sm:$0xff] %vm321_vm0, %v4813_v54  ;;  %v4812_v19 = vsub.f32 %v4651_v59, %v4733_v52  ;;  %v4661_v59 = vmul.f32 2.0, %v15281_v35 }
0x14cc   :  { %v11953_v30 = vpop.f32.mrf.mxu1 }
0x14cd   :  { %4828 = vst.msk [vmem:[#allocation2 + $0x80] sm:$0xff] %vm321_vm0, %v4812_v19  ;;  %v4815_v49 = vsub.f32 %v4654_v20, %v11953_v30  ;;  %v4664_v19 = vmul.f32 2.0, %v15287_v40  ;;  %v4663_v30 = vmul.f32 2.0, %v15292_v9 }
0x14ce   :  { %v4743_v47 = vpop.f32.mrf.mxu1 }
0x14cf   :  { %4831 = vst.msk [vmem:[#allocation2 + $0x98] sm:$0xff] %vm321_vm0, %v4815_v49  ;;  %v4814_v27 = vsub.f32 %v4653_v51, %v4743_v47  ;;  %v4666_v51 = vmul.f32 2.0, %v15297_v48 }
0x14d0   :  { %v11956_v14 = vpop.f32.mrf.mxu1 }
0x14d1   :  { %4830 = vst.msk [vmem:[#allocation2 + $0x90] sm:$0xff] %vm321_vm0, %v4814_v27  ;;  %v4817_v41 = vsub.f32 %v4656_v38, %v11956_v14  ;;  %v4665_v27 = vmul.f32 2.0, %v15303_v7 }
0x14d2   :  { %v4753_v57 = vpop.f32.mrf.mxu1 }
0x14d3   :  { %4833 = vst.msk [vmem:[#allocation2 + $0xa8] sm:$0xff] %vm321_vm0, %v4817_v41  ;;  %v4816_v6 = vsub.f32 %v4655_v16, %v4753_v57 }
0x14d4   :  { %v11959_v13 = vpop.f32.mrf.mxu1 }
0x14d5   :  { %4832 = vst.msk [vmem:[#allocation2 + $0xa0] sm:$0xff] %vm321_vm0, %v4816_v6  ;;  %v4819_v12 = vsub.f32 %v4658_v11, %v11959_v13 }
0x14d6   :  { %v4763_v17 = vpop.f32.mrf.mxu1 }
0x14d7   :  { %4835 = vst.msk [vmem:[#allocation2 + $0xb8] sm:$0xff] %vm321_vm0, %v4819_v12  ;;  %v4818_v23 = vsub.f32 %v4657_v62, %v4763_v17  ;;  %v4847_v17 = vld [vmem:[#allocation2 + $0x98] sm:$0xff] }
0x14d8   :  { %v11962_v58 = vpop.f32.mrf.mxu1 }
0x14d9   :  { %4834 = vst.msk [vmem:[#allocation2 + $0xb0] sm:$0xff] %vm321_vm0, %v4818_v23  ;;  %v4821_v61 = vsub.f32 %v4660_v1, %v11962_v58  ;;  %v4846_v23 = vld [vmem:[#allocation2 + $0x90] sm:$0xff]  ;;  %v4845_v1 = vld [vmem:[#allocation2 + $0x88] sm:$0xff]  ;;  %v4844_v58 = vld [vmem:[#allocation2 + $0x80] sm:$0xff] }
0x14da   :  { %v4773_v8 = vpop.f32.mrf.mxu1  ;;  %v4849_v12 = vld [vmem:[#allocation2 + $0xa8] sm:$0xff] }
0x14db   :  { %4837 = vst.msk [vmem:[#allocation2 + $0xc8] sm:$0xff] %vm321_vm0, %v4821_v61  ;;  %v4820_v10 = vsub.f32 %v4659_v2, %v4773_v8  ;;  %v4861_v61 = vmul.f32 2.0, %v4845_v1 }
0x14dc   :  { %v11965_v54 = vpop.f32.mrf.mxu1  ;;  %v4848_v62 = vld [vmem:[#allocation2 + $0xa0] sm:$0xff] }
0x14dd   :  { %4836 = vst.msk [vmem:[#allocation2 + $0xc0] sm:$0xff] %vm321_vm0, %v4820_v10  ;;  %v4823_v37 = vsub.f32 %v4662_v34, %v11965_v54  ;;  %v4860_v10 = vmul.f32 2.0, %v4844_v58 }
0x14de   :  { %v4783_v52 = vpop.f32.mrf.mxu1  ;;  %v15452_v11 = vld [vmem:[#allocation2 + $0xb8] sm:$0xff] }
0x14df   :  { %4839 = vst.msk [vmem:[#allocation2 + $0xd8] sm:$0xff] %vm321_vm0, %v4823_v37  ;;  %v4822_v31 = vsub.f32 %v4661_v59, %v4783_v52  ;;  %v4863_v37 = vmul.f32 2.0, %v4847_v17 }
0x14e0   :  { %v11968_v20 = vpop.f32.mrf.mxu1  ;;  %v15456_v13 = vld [vmem:[#allocation2 + $0xb0] sm:$0xff] }
0x14e1   :  { %4838 = vst.msk [vmem:[#allocation2 + $0xd0] sm:$0xff] %vm321_vm0, %v4822_v31  ;;  %v4825_v44 = vsub.f32 %v4664_v19, %v11968_v20  ;;  %v4862_v31 = vmul.f32 2.0, %v4846_v23 }
0x14e2   :  { %v4793_v49 = vpop.f32.mrf.mxu1  ;;  %v15444_v57 = vld [vmem:[#allocation2 + $0xc8] sm:$0xff] }
0x14e3   :  { %4841 = vst.msk [vmem:[#allocation2 + $0xe8] sm:$0xff] %vm321_vm0, %v4825_v44  ;;  %v4824_v53 = vsub.f32 %v4663_v30, %v4793_v49  ;;  %v4865_v44 = vmul.f32 2.0, %v4849_v12 }
0x14e4   :  { %v11971_v47 = vpop.f32.mrf.mxu1  ;;  %v15448_v6 = vld [vmem:[#allocation2 + $0xc0] sm:$0xff] }
0x14e5   :  { %4840 = vst.msk [vmem:[#allocation2 + $0xe0] sm:$0xff] %vm321_vm0, %v4824_v53  ;;  %v4827_v35 = vsub.f32 %v4666_v51, %v11971_v47  ;;  %v4864_v53 = vmul.f32 2.0, %v4848_v62 }
0x14e6   :  { %v4803_v38 = vpop.f32.mrf.mxu1  ;;  %v15436_v41 = vld [vmem:[#allocation2 + $0xd8] sm:$0xff] }
0x14e7   :  { %4843 = vst.msk [vmem:[#allocation2 + $0xf8] sm:$0xff] %vm321_vm0, %v4827_v35  ;;  %v4826_v40 = vsub.f32 %v4665_v27, %v4803_v38  ;;  %v4867_v35 = vmul.f32 2.0, %v15452_v11 }
0x14e8   :  { %v15440_v16 = vld [vmem:[#allocation2 + $0xd0] sm:$0xff] }
0x14e9   :  { %4842 = vst.msk [vmem:[#allocation2 + $0xf0] sm:$0xff] %vm321_vm0, %v4826_v40  ;;  %v4866_v40 = vmul.f32 2.0, %v15456_v13 }
0x14ea   :  { %v15428_v48 = vld [vmem:[#allocation2 + $0xe8] sm:$0xff] }
0x14ec   :  { %v15432_v7 = vld [vmem:[#allocation2 + $0xe0] sm:$0xff] }
0x14ee   :  { %v15420_v14 = vld [vmem:[#allocation2 + $0xf8] sm:$0xff] }
0x14ef   :  { %11972 = vmatprep.subr.mxu0 %v15420_v14 }
0x14f0   :  { %11973 = vmatpush3.msra.mxu0 %v15420_v14  ;;  %v15424_v9 = vld [vmem:[#allocation2 + $0xf0] sm:$0xff] }
0x14f1   :  { %11974 = vmatprep.subr.mxu0 %v15424_v9 }
0x14f2   :  { %11975 = vmatpush3.msra.mxu0 %v15424_v9 }
0x14f3   :  { %11976 = vmatprep.subr.mxu0 %v15428_v48 }
0x14f4   :  { %11977 = vmatpush3.msra.mxu0 %v15428_v48 }
0x14f5   :  { %11978 = vmatprep.subr.mxu0 %v15432_v7 }
0x14f6   :  { %11979 = vmatpush3.msra.mxu0 %v15432_v7 }
0x14f7   :  { %11980 = vmatprep.subr.mxu0 %v15436_v41 }
0x14f8   :  { %11981 = vmatpush3.msra.mxu0 %v15436_v41 }
0x14f9   :  { %11982 = vmatprep.subr.mxu0 %v15440_v16 }
0x14fa   :  { %11983 = vmatpush3.msra.mxu0 %v15440_v16 }
0x14fb   :  { %11984 = vmatprep.subr.mxu0 %v15444_v57 }
0x14fc   :  { %11985 = vmatpush3.msra.mxu0 %v15444_v57 }
0x14fd   :  { %11986 = vmatprep.subr.mxu0 %v15448_v6 }
0x14fe   :  { %11987 = vmatpush3.msra.mxu0 %v15448_v6 }
0x14ff   :  { %11988 = vmatprep.subr.mxu0 %v15452_v11 }
0x1500   :  { %11989 = vmatpush3.msra.mxu0 %v15452_v11 }
0x1501   :  { %11990 = vmatprep.subr.mxu0 %v15456_v13 }
0x1502   :  { %11991 = vmatpush3.msra.mxu0 %v15456_v13 }
0x1503   :  { %11992 = vmatprep.subr.mxu0 %v4849_v12 }
0x1504   :  { %11993 = vmatpush3.msra.mxu0 %v4849_v12 }
0x1505   :  { %11994 = vmatprep.subr.mxu0 %v4848_v62 }
0x1506   :  { %11995 = vmatpush3.msra.mxu0 %v4848_v62 }
0x1507   :  { %11996 = vmatprep.subr.mxu0 %v4847_v17 }
0x1508   :  { %11997 = vmatpush3.msra.mxu0 %v4847_v17 }
0x1509   :  { %11998 = vmatprep.subr.mxu0 %v4846_v23 }
0x150a   :  { %11999 = vmatpush3.msra.mxu0 %v4846_v23  ;;  %v4869_v23 = vmul.f32 2.0, %v15444_v57 }
0x150b   :  { %12000 = vmatprep.subr.mxu0 %v4845_v1 }
0x150c   :  { %12001 = vmatpush3.msra.mxu0 %v4845_v1 }
0x150d   :  { %12002 = vmatprep.subr.mxu0 %v4844_v58 }
0x150e   :  { %12003 = vmatpush3.msra.mxu0 %v4844_v58  ;;  %v4868_v58 = vmul.f32 2.0, %v15448_v6 }
0x150f   :  { %12005 = vmatmul.mubr.f32.vlgmr.msra.gmra.mxu0 %v15340_v36 }
0x1510   :  { %12007 = vmatprep.mubr.f32.mxu0 %v15343_v55 }
0x1513   :  { %12008 = vmatmul.mubr.f32.gmra.mxu0 %v15346_v21 }
0x1514   :  { %12010 = vmatprep.mubr.f32.mxu0 %v15349_v5 }
0x1517   :  { %12011 = vmatmul.mubr.f32.gmra.mxu0 %v15352_v0 }
0x1518   :  { %12013 = vmatprep.mubr.f32.mxu0 %v15355_v15 }
0x151b   :  { %12014 = vmatmul.mubr.f32.gmra.mxu0 %v15358_v22 }
0x151c   :  { %12016 = vmatprep.mubr.f32.mxu0 %v15361_v26 }
0x151f   :  { %12017 = vmatmul.mubr.f32.gmra.mxu0 %v15364_v43 }
0x1520   :  { %12019 = vmatprep.mubr.f32.mxu0 %v15367_v28 }
0x1523   :  { %12020 = vmatmul.mubr.f32.gmra.mxu0 %v15370_v46 }
0x1524   :  { %12022 = vmatprep.mubr.f32.mxu0 %v15373_v18 }
0x1527   :  { %12023 = vmatmul.mubr.f32.gmra.mxu0 %v15376_v33 }
0x1528   :  { %12025 = vmatprep.mubr.f32.mxu0 %v15379_v63 }
0x152b   :  { %12026 = vmatmul.mubr.f32.gmra.mxu0 %v15382_v39 }
0x152c   :  { %12116 = vmatprep.mubr.f32.mxu0 %v15385_v32 }
0x15cf   :  { %v12006_v2 = vpop.f32.mrf.mxu0 }
0x15d0   :  { %v5022_v8 = vsub.f32 %v4861_v61, %v12006_v2  ;;  %v4871_v2 = vmul.f32 2.0, %v15436_v41 }
0x15d1   :  { %v4942_v34 = vpop.f32.mrf.mxu0 }
0x15d2   :  { %5038 = vst.msk [vmem:[#allocation2 + $0x108] sm:$0xff] %vm321_vm0, %v5022_v8  ;;  %v5021_v54 = vsub.f32 %v4860_v10, %v4942_v34  ;;  %v4870_v10 = vmul.f32 2.0, %v15440_v16 }
0x15d3   :  { %v12009_v59 = vpop.f32.mrf.mxu0 }
0x15d4   :  { %5037 = vst.msk [vmem:[#allocation2 + $0x100] sm:$0xff] %vm321_vm0, %v5021_v54  ;;  %v5024_v52 = vsub.f32 %v4863_v37, %v12009_v59  ;;  %v4873_v54 = vmul.f32 2.0, %v15428_v48  ;;  %v4872_v59 = vmul.f32 2.0, %v15432_v7 }
0x15d5   :  { %v4952_v19 = vpop.f32.mrf.mxu0 }
0x15d6   :  { %5040 = vst.msk [vmem:[#allocation2 + $0x118] sm:$0xff] %vm321_vm0, %v5024_v52  ;;  %v5023_v20 = vsub.f32 %v4862_v31, %v4952_v19  ;;  %v4875_v31 = vmul.f32 2.0, %v15420_v14 }
0x15d7   :  { %v12012_v30 = vpop.f32.mrf.mxu0 }
0x15d8   :  { %5039 = vst.msk [vmem:[#allocation2 + $0x110] sm:$0xff] %vm321_vm0, %v5023_v20  ;;  %v5026_v49 = vsub.f32 %v4865_v44, %v12012_v30  ;;  %v4874_v20 = vmul.f32 2.0, %v15424_v9 }
0x15d9   :  { %v4962_v51 = vpop.f32.mrf.mxu0 }
0x15da   :  { %5042 = vst.msk [vmem:[#allocation2 + $0x128] sm:$0xff] %vm321_vm0, %v5026_v49  ;;  %v5025_v47 = vsub.f32 %v4864_v53, %v4962_v51 }
0x15db   :  { %v12015_v27 = vpop.f32.mrf.mxu0 }
0x15dc   :  { %5041 = vst.msk [vmem:[#allocation2 + $0x120] sm:$0xff] %vm321_vm0, %v5025_v47  ;;  %v5028_v38 = vsub.f32 %v4867_v35, %v12015_v27 }
0x15dd   :  { %v4972_v17 = vpop.f32.mrf.mxu0 }
0x15de   :  { %5044 = vst.msk [vmem:[#allocation2 + $0x138] sm:$0xff] %vm321_vm0, %v5028_v38  ;;  %v5027_v12 = vsub.f32 %v4866_v40, %v4972_v17  ;;  %v5056_v17 = vld [vmem:[#allocation2 + $0x118] sm:$0xff] }
0x15df   :  { %v12018_v1 = vpop.f32.mrf.mxu0 }
0x15e0   :  { %5043 = vst.msk [vmem:[#allocation2 + $0x130] sm:$0xff] %vm321_vm0, %v5027_v12  ;;  %v5030_v62 = vsub.f32 %v4869_v23, %v12018_v1  ;;  %v5055_v12 = vld [vmem:[#allocation2 + $0x110] sm:$0xff]  ;;  %v5054_v23 = vld [vmem:[#allocation2 + $0x108] sm:$0xff]  ;;  %v5053_v1 = vld [vmem:[#allocation2 + $0x100] sm:$0xff] }
0x15e1   :  { %v4982_v61 = vpop.f32.mrf.mxu0  ;;  %v5058_v38 = vld [vmem:[#allocation2 + $0x128] sm:$0xff] }
0x15e2   :  { %5046 = vst.msk [vmem:[#allocation2 + $0x148] sm:$0xff] %vm321_vm0, %v5030_v62  ;;  %v5029_v11 = vsub.f32 %v4868_v58, %v4982_v61  ;;  %v5070_v62 = vmul.f32 2.0, %v5054_v23 }
0x15e3   :  { %v12021_v8 = vpop.f32.mrf.mxu0  ;;  %v5057_v40 = vld [vmem:[#allocation2 + $0x120] sm:$0xff] }
0x15e4   :  { %5045 = vst.msk [vmem:[#allocation2 + $0x140] sm:$0xff] %vm321_vm0, %v5029_v11  ;;  %v5032_v13 = vsub.f32 %v4871_v2, %v12021_v8  ;;  %v5069_v11 = vmul.f32 2.0, %v5053_v1 }
0x15e5   :  { %v4992_v34 = vpop.f32.mrf.mxu0  ;;  %v15534_v35 = vld [vmem:[#allocation2 + $0x138] sm:$0xff] }
0x15e6   :  { %5048 = vst.msk [vmem:[#allocation2 + $0x158] sm:$0xff] %vm321_vm0, %v5032_v13  ;;  %v5031_v57 = vsub.f32 %v4870_v10, %v4992_v34  ;;  %v5072_v13 = vmul.f32 2.0, %v5056_v17 }
0x15e7   :  { %v12024_v37 = vpop.f32.mrf.mxu0  ;;  %v15538_v27 = vld [vmem:[#allocation2 + $0x130] sm:$0xff] }
0x15e8   :  { %5047 = vst.msk [vmem:[#allocation2 + $0x150] sm:$0xff] %vm321_vm0, %v5031_v57  ;;  %v5034_v6 = vsub.f32 %v4873_v54, %v12024_v37  ;;  %v5071_v57 = vmul.f32 2.0, %v5055_v12 }
0x15e9   :  { %v5002_v52 = vpop.f32.mrf.mxu0  ;;  %v15526_v51 = vld [vmem:[#allocation2 + $0x148] sm:$0xff] }
0x15ea   :  { %5050 = vst.msk [vmem:[#allocation2 + $0x168] sm:$0xff] %vm321_vm0, %v5034_v6  ;;  %v5033_v41 = vsub.f32 %v4872_v59, %v5002_v52  ;;  %v5074_v6 = vmul.f32 2.0, %v5058_v38 }
0x15eb   :  { %v12027_v19 = vpop.f32.mrf.mxu0  ;;  %v15530_v47 = vld [vmem:[#allocation2 + $0x140] sm:$0xff] }
0x15ec   :  { %5049 = vst.msk [vmem:[#allocation2 + $0x160] sm:$0xff] %vm321_vm0, %v5033_v41  ;;  %v5036_v16 = vsub.f32 %v4875_v31, %v12027_v19  ;;  %v5073_v41 = vmul.f32 2.0, %v5057_v40 }
0x15ed   :  { %v5012_v44 = vpop.f32.mrf.mxu0  ;;  %v15518_v49 = vld [vmem:[#allocation2 + $0x158] sm:$0xff] }
0x15ee   :  { %5052 = vst.msk [vmem:[#allocation2 + $0x178] sm:$0xff] %vm321_vm0, %v5036_v16  ;;  %v5035_v48 = vsub.f32 %v4874_v20, %v5012_v44  ;;  %v5076_v16 = vmul.f32 2.0, %v15534_v35 }
0x15ef   :  { %v15522_v53 = vld [vmem:[#allocation2 + $0x150] sm:$0xff] }
0x15f0   :  { %5051 = vst.msk [vmem:[#allocation2 + $0x170] sm:$0xff] %vm321_vm0, %v5035_v48  ;;  %v5075_v48 = vmul.f32 2.0, %v15538_v27 }
0x15f1   :  { %v15510_v14 = vld [vmem:[#allocation2 + $0x168] sm:$0xff] }
0x15f3   :  { %v15514_v9 = vld [vmem:[#allocation2 + $0x160] sm:$0xff] }
0x15f5   :  { %v15502_v30 = vld [vmem:[#allocation2 + $0x178] sm:$0xff] }
0x15f6   :  { %12028 = vmatprep.subr.mxu1 %v15502_v30 }
0x15f7   :  { %12029 = vmatpush3.msra.mxu1 %v15502_v30  ;;  %v15506_v7 = vld [vmem:[#allocation2 + $0x170] sm:$0xff] }
0x15f8   :  { %12030 = vmatprep.subr.mxu1 %v15506_v7 }
0x15f9   :  { %12031 = vmatpush3.msra.mxu1 %v15506_v7 }
0x15fa   :  { %12032 = vmatprep.subr.mxu1 %v15510_v14 }
0x15fb   :  { %12033 = vmatpush3.msra.mxu1 %v15510_v14 }
0x15fc   :  { %12034 = vmatprep.subr.mxu1 %v15514_v9 }
0x15fd   :  { %12035 = vmatpush3.msra.mxu1 %v15514_v9 }
0x15fe   :  { %12036 = vmatprep.subr.mxu1 %v15518_v49 }
0x15ff   :  { %12037 = vmatpush3.msra.mxu1 %v15518_v49 }
0x1600   :  { %12038 = vmatprep.subr.mxu1 %v15522_v53 }
0x1601   :  { %12039 = vmatpush3.msra.mxu1 %v15522_v53 }
0x1602   :  { %12040 = vmatprep.subr.mxu1 %v15526_v51 }
0x1603   :  { %12041 = vmatpush3.msra.mxu1 %v15526_v51 }
0x1604   :  { %12042 = vmatprep.subr.mxu1 %v15530_v47 }
0x1605   :  { %12043 = vmatpush3.msra.mxu1 %v15530_v47 }
0x1606   :  { %12044 = vmatprep.subr.mxu1 %v15534_v35 }
0x1607   :  { %12045 = vmatpush3.msra.mxu1 %v15534_v35 }
0x1608   :  { %12046 = vmatprep.subr.mxu1 %v15538_v27 }
0x1609   :  { %12047 = vmatpush3.msra.mxu1 %v15538_v27 }
0x160a   :  { %12048 = vmatprep.subr.mxu1 %v5058_v38 }
0x160b   :  { %12049 = vmatpush3.msra.mxu1 %v5058_v38 }
0x160c   :  { %12050 = vmatprep.subr.mxu1 %v5057_v40 }
0x160d   :  { %12051 = vmatpush3.msra.mxu1 %v5057_v40 }
0x160e   :  { %12052 = vmatprep.subr.mxu1 %v5056_v17 }
0x160f   :  { %12053 = vmatpush3.msra.mxu1 %v5056_v17 }
0x1610   :  { %12054 = vmatprep.subr.mxu1 %v5055_v12 }
0x1611   :  { %12055 = vmatpush3.msra.mxu1 %v5055_v12  ;;  %v5078_v12 = vmul.f32 2.0, %v15526_v51 }
0x1612   :  { %12056 = vmatprep.subr.mxu1 %v5054_v23 }
0x1613   :  { %12057 = vmatpush3.msra.mxu1 %v5054_v23 }
0x1614   :  { %12058 = vmatprep.subr.mxu1 %v5053_v1 }
0x1615   :  { %12059 = vmatpush3.msra.mxu1 %v5053_v1  ;;  %v5077_v1 = vmul.f32 2.0, %v15530_v47 }
0x1616   :  { %12061 = vmatmul.mubr.f32.vlgmr.msra.gmra.mxu1 %v15340_v36 }
0x1617   :  { %12063 = vmatprep.mubr.f32.mxu1 %v15343_v55 }
0x161a   :  { %12064 = vmatmul.mubr.f32.gmra.mxu1 %v15346_v21 }
0x161b   :  { %12066 = vmatprep.mubr.f32.mxu1 %v15349_v5 }
0x161e   :  { %12067 = vmatmul.mubr.f32.gmra.mxu1 %v15352_v0 }
0x161f   :  { %12069 = vmatprep.mubr.f32.mxu1 %v15355_v15 }
0x1622   :  { %12070 = vmatmul.mubr.f32.gmra.mxu1 %v15358_v22 }
0x1623   :  { %12072 = vmatprep.mubr.f32.mxu1 %v15361_v26 }
0x1626   :  { %12073 = vmatmul.mubr.f32.gmra.mxu1 %v15364_v43 }
0x1627   :  { %12075 = vmatprep.mubr.f32.mxu1 %v15367_v28 }
0x162a   :  { %12076 = vmatmul.mubr.f32.gmra.mxu1 %v15370_v46 }
0x162b   :  { %12078 = vmatprep.mubr.f32.mxu1 %v15373_v18 }
0x162e   :  { %12079 = vmatmul.mubr.f32.gmra.mxu1 %v15376_v33 }
0x162f   :  { %12081 = vmatprep.mubr.f32.mxu1 %v15379_v63 }
0x1632   :  { %12082 = vmatmul.mubr.f32.gmra.mxu1 %v15382_v39 }
0x1633   :  { %12172 = vmatprep.mubr.f32.mxu1 %v15385_v32 }
0x16d6   :  { %v12062_v58 = vpop.f32.mrf.mxu1 }
0x16d7   :  { %v5231_v61 = vsub.f32 %v5070_v62, %v12062_v58  ;;  %v5080_v58 = vmul.f32 2.0, %v15518_v49 }
0x16d8   :  { %v5151_v2 = vpop.f32.mrf.mxu1 }
0x16d9   :  { %5247 = vst.msk [vmem:[#allocation2 + $0x188] sm:$0xff] %vm321_vm0, %v5231_v61  ;;  %v5230_v8 = vsub.f32 %v5069_v11, %v5151_v2  ;;  %v5079_v11 = vmul.f32 2.0, %v15522_v53 }
0x16da   :  { %v12065_v10 = vpop.f32.mrf.mxu1 }
0x16db   :  { %5246 = vst.msk [vmem:[#allocation2 + $0x180] sm:$0xff] %vm321_vm0, %v5230_v8  ;;  %v5233_v34 = vsub.f32 %v5072_v13, %v12065_v10  ;;  %v5082_v8 = vmul.f32 2.0, %v15510_v14  ;;  %v5081_v10 = vmul.f32 2.0, %v15514_v9 }
0x16dc   :  { %v5161_v54 = vpop.f32.mrf.mxu1 }
0x16dd   :  { %5249 = vst.msk [vmem:[#allocation2 + $0x198] sm:$0xff] %vm321_vm0, %v5233_v34  ;;  %v5232_v37 = vsub.f32 %v5071_v57, %v5161_v54  ;;  %v5084_v57 = vmul.f32 2.0, %v15502_v30 }
0x16de   :  { %v12068_v59 = vpop.f32.mrf.mxu1 }
0x16df   :  { %5248 = vst.msk [vmem:[#allocation2 + $0x190] sm:$0xff] %vm321_vm0, %v5232_v37  ;;  %v5235_v52 = vsub.f32 %v5074_v6, %v12068_v59  ;;  %v5083_v37 = vmul.f32 2.0, %v15506_v7 }
0x16e0   :  { %v5171_v31 = vpop.f32.mrf.mxu1 }
0x16e1   :  { %5251 = vst.msk [vmem:[#allocation2 + $0x1a8] sm:$0xff] %vm321_vm0, %v5235_v52  ;;  %v5234_v19 = vsub.f32 %v5073_v41, %v5171_v31 }
0x16e2   :  { %v12071_v20 = vpop.f32.mrf.mxu1 }
0x16e3   :  { %5250 = vst.msk [vmem:[#allocation2 + $0x1a0] sm:$0xff] %vm321_vm0, %v5234_v19  ;;  %v5237_v44 = vsub.f32 %v5076_v16, %v12071_v20 }
0x16e4   :  { %v5181_v17 = vpop.f32.mrf.mxu1 }
0x16e5   :  { %5253 = vst.msk [vmem:[#allocation2 + $0x1b8] sm:$0xff] %vm321_vm0, %v5237_v44  ;;  %v5236_v38 = vsub.f32 %v5075_v48, %v5181_v17  ;;  %v5265_v17 = vld [vmem:[#allocation2 + $0x198] sm:$0xff] }
0x16e6   :  { %v12074_v23 = vpop.f32.mrf.mxu1 }
0x16e7   :  { %5252 = vst.msk [vmem:[#allocation2 + $0x1b0] sm:$0xff] %vm321_vm0, %v5236_v38  ;;  %v5239_v40 = vsub.f32 %v5078_v12, %v12074_v23  ;;  %v5264_v38 = vld [vmem:[#allocation2 + $0x190] sm:$0xff]  ;;  %v5263_v12 = vld [vmem:[#allocation2 + $0x188] sm:$0xff]  ;;  %v5262_v23 = vld [vmem:[#allocation2 + $0x180] sm:$0xff] }
0x16e8   :  { %v5191_v62 = vpop.f32.mrf.mxu1  ;;  %v5267_v44 = vld [vmem:[#allocation2 + $0x1a8] sm:$0xff] }
0x16e9   :  { %5255 = vst.msk [vmem:[#allocation2 + $0x1c8] sm:$0xff] %vm321_vm0, %v5239_v40  ;;  %v5238_v35 = vsub.f32 %v5077_v1, %v5191_v62 }
0x16ea   :  { %v12077_v61 = vpop.f32.mrf.mxu1  ;;  %v5266_v48 = vld [vmem:[#allocation2 + $0x1a0] sm:$0xff] }
0x16eb   :  { %5254 = vst.msk [vmem:[#allocation2 + $0x1c0] sm:$0xff] %vm321_vm0, %v5238_v35  ;;  %v5241_v27 = vsub.f32 %v5080_v58, %v12077_v61 }
0x16ec   :  { %v5201_v2 = vpop.f32.mrf.mxu1  ;;  %v15616_v16 = vld [vmem:[#allocation2 + $0x1b8] sm:$0xff] }
0x16ed   :  { %5257 = vst.msk [vmem:[#allocation2 + $0x1d8] sm:$0xff] %vm321_vm0, %v5241_v27  ;;  %v5240_v51 = vsub.f32 %v5079_v11, %v5201_v2  ;;  %v5285_v62 = vmul.f32 2.0, %v15616_v16 }
0x16ee   :  { %v12080_v13 = vpop.f32.mrf.mxu1  ;;  %v15620_v20 = vld [vmem:[#allocation2 + $0x1b0] sm:$0xff] }
0x16ef   :  { %5256 = vst.msk [vmem:[#allocation2 + $0x1d0] sm:$0xff] %vm321_vm0, %v5240_v51  ;;  %v5243_v47 = vsub.f32 %v5082_v8, %v12080_v13  ;;  %v5284_v61 = vmul.f32 2.0, %v15620_v20 }
0x16f0   :  { %v5211_v34 = vpop.f32.mrf.mxu1  ;;  %v15608_v31 = vld [vmem:[#allocation2 + $0x1c8] sm:$0xff] }
0x16f1   :  { %5259 = vst.msk [vmem:[#allocation2 + $0x1e8] sm:$0xff] %vm321_vm0, %v5243_v47  ;;  %v5242_v49 = vsub.f32 %v5081_v10, %v5211_v34  ;;  %v5287_v2 = vmul.f32 2.0, %v15608_v31 }
0x16f2   :  { %v12083_v54 = vpop.f32.mrf.mxu1  ;;  %v15612_v19 = vld [vmem:[#allocation2 + $0x1c0] sm:$0xff] }
0x16f3   :  { %5258 = vst.msk [vmem:[#allocation2 + $0x1e0] sm:$0xff] %vm321_vm0, %v5242_v49  ;;  %v5245_v53 = vsub.f32 %v5084_v57, %v12083_v54  ;;  %v5286_v13 = vmul.f32 2.0, %v15612_v19 }
0x16f4   :  { %v5221_v6 = vpop.f32.mrf.mxu1  ;;  %v15600_v52 = vld [vmem:[#allocation2 + $0x1d8] sm:$0xff] }
0x16f5   :  { %5261 = vst.msk [vmem:[#allocation2 + $0x1f8] sm:$0xff] %vm321_vm0, %v5245_v53  ;;  %v5244_v14 = vsub.f32 %v5083_v37, %v5221_v6  ;;  %v5289_v34 = vmul.f32 2.0, %v15600_v52 }
0x16f6   :  { %v15604_v41 = vld [vmem:[#allocation2 + $0x1d0] sm:$0xff] }
0x16f7   :  { %5260 = vst.msk [vmem:[#allocation2 + $0x1f0] sm:$0xff] %vm321_vm0, %v5244_v14  ;;  %v5288_v54 = vmul.f32 2.0, %v15604_v41 }
0x16f8   :  { %v15592_v30 = vld [vmem:[#allocation2 + $0x1e8] sm:$0xff] }
0x16f9   :  { %v5291_v6 = vmul.f32 2.0, %v15592_v30 }
0x16fa   :  { %v15596_v7 = vld [vmem:[#allocation2 + $0x1e0] sm:$0xff] }
0x16fc   :  { %v15584_v59 = vld [vmem:[#allocation2 + $0x1f8] sm:$0xff] }
0x16fd   :  { %12084 = vmatprep.subr.mxu0 %v15584_v59 }
0x16fe   :  { %12085 = vmatpush3.msra.mxu0 %v15584_v59  ;;  %v15588_v9 = vld [vmem:[#allocation2 + $0x1f0] sm:$0xff] }
0x16ff   :  { %12086 = vmatprep.subr.mxu0 %v15588_v9 }
0x1700   :  { %12087 = vmatpush3.msra.mxu0 %v15588_v9 }
0x1701   :  { %12088 = vmatprep.subr.mxu0 %v15592_v30 }
0x1702   :  { %12089 = vmatpush3.msra.mxu0 %v15592_v30 }
0x1703   :  { %12090 = vmatprep.subr.mxu0 %v15596_v7 }
0x1704   :  { %12091 = vmatpush3.msra.mxu0 %v15596_v7 }
0x1705   :  { %12092 = vmatprep.subr.mxu0 %v15600_v52 }
0x1706   :  { %12093 = vmatpush3.msra.mxu0 %v15600_v52 }
0x1707   :  { %12094 = vmatprep.subr.mxu0 %v15604_v41 }
0x1708   :  { %12095 = vmatpush3.msra.mxu0 %v15604_v41 }
0x1709   :  { %12096 = vmatprep.subr.mxu0 %v15608_v31 }
0x170a   :  { %12097 = vmatpush3.msra.mxu0 %v15608_v31 }
0x170b   :  { %12098 = vmatprep.subr.mxu0 %v15612_v19 }
0x170c   :  { %12099 = vmatpush3.msra.mxu0 %v15612_v19  ;;  %v5290_v19 = vmul.f32 2.0, %v15596_v7 }
0x170d   :  { %12100 = vmatprep.subr.mxu0 %v15616_v16 }
0x170e   :  { %12101 = vmatpush3.msra.mxu0 %v15616_v16 }
0x170f   :  { %12102 = vmatprep.subr.mxu0 %v15620_v20 }
0x1710   :  { %12103 = vmatpush3.msra.mxu0 %v15620_v20  ;;  %v5293_v20 = vmul.f32 2.0, %v15584_v59 }
0x1711   :  { %12104 = vmatprep.subr.mxu0 %v5267_v44 }
0x1712   :  { %12105 = vmatpush3.msra.mxu0 %v5267_v44 }
0x1713   :  { %12106 = vmatprep.subr.mxu0 %v5266_v48 }
0x1714   :  { %12107 = vmatpush3.msra.mxu0 %v5266_v48 }
0x1715   :  { %12108 = vmatprep.subr.mxu0 %v5265_v17 }
0x1716   :  { %12109 = vmatpush3.msra.mxu0 %v5265_v17 }
0x1717   :  { %12110 = vmatprep.subr.mxu0 %v5264_v38 }
0x1718   :  { %12111 = vmatpush3.msra.mxu0 %v5264_v38 }
0x1719   :  { %12112 = vmatprep.subr.mxu0 %v5263_v12 }
0x171a   :  { %12113 = vmatpush3.msra.mxu0 %v5263_v12 }
0x171b   :  { %12114 = vmatprep.subr.mxu0 %v5262_v23 }
0x171c   :  { %12115 = vmatpush3.msra.mxu0 %v5262_v23 }
0x171d   :  { %12117 = vmatmul.mubr.f32.vlgmr.msra.gmra.mxu0 %v15340_v36  ;;  %v5279_v36 = vmul.f32 2.0, %v5263_v12 }
0x171e   :  { %12119 = vmatprep.mubr.f32.mxu0 %v15343_v55 }
0x1721   :  { %12120 = vmatmul.mubr.f32.gmra.mxu0 %v15346_v21 }
0x1722   :  { %12122 = vmatprep.mubr.f32.mxu0 %v15349_v5  ;;  %v5278_v5 = vmul.f32 2.0, %v5262_v23 }
0x1725   :  { %12123 = vmatmul.mubr.f32.gmra.mxu0 %v15352_v0 }
0x1726   :  { %12125 = vmatprep.mubr.f32.mxu0 %v15355_v15 }
0x1729   :  { %12126 = vmatmul.mubr.f32.gmra.mxu0 %v15358_v22  ;;  %v5281_v22 = vmul.f32 2.0, %v5265_v17 }
0x172a   :  { %12128 = vmatprep.mubr.f32.mxu0 %v15361_v26 }
0x172d   :  { %12129 = vmatmul.mubr.f32.gmra.mxu0 %v15364_v43 }
0x172e   :  { %12131 = vmatprep.mubr.f32.mxu0 %v15367_v28  ;;  %v5280_v28 = vmul.f32 2.0, %v5264_v38 }
0x1731   :  { %12132 = vmatmul.mubr.f32.gmra.mxu0 %v15370_v46 }
0x1732   :  { %12134 = vmatprep.mubr.f32.mxu0 %v15373_v18 }
0x1735   :  { %12135 = vmatmul.mubr.f32.gmra.mxu0 %v15376_v33  ;;  %v5283_v33 = vmul.f32 2.0, %v5267_v44 }
0x1736   :  { %12137 = vmatprep.mubr.f32.mxu0 %v15379_v63 }
0x1739   :  { %12138 = vmatmul.mubr.f32.gmra.mxu0 %v15382_v39 }
0x173a   :  { %12228 = vmatprep.mubr.f32.mxu0 %v15385_v32  ;;  %v5282_v32 = vmul.f32 2.0, %v5266_v48  ;;  %v5292_v48 = vmul.f32 2.0, %v15588_v9 }
0x17dd   :  { %v12118_v55 = vpop.f32.mrf.mxu0 }
0x17de   :  { %v5440_v21 = vsub.f32 %v5279_v36, %v12118_v55 }
0x17df   :  { %v5360_v0 = vpop.f32.mrf.mxu0 }
0x17e0   :  { %5456 = vst.msk [vmem:[#allocation2 + $0x208] sm:$0xff] %vm321_vm0, %v5440_v21  ;;  %v5439_v15 = vsub.f32 %v5278_v5, %v5360_v0 }
0x17e1   :  { %v12121_v26 = vpop.f32.mrf.mxu0 }
0x17e2   :  { %5455 = vst.msk [vmem:[#allocation2 + $0x200] sm:$0xff] %vm321_vm0, %v5439_v15  ;;  %v5442_v43 = vsub.f32 %v5281_v22, %v12121_v26 }
0x17e3   :  { %v5370_v46 = vpop.f32.mrf.mxu0 }
0x17e4   :  { %5458 = vst.msk [vmem:[#allocation2 + $0x218] sm:$0xff] %vm321_vm0, %v5442_v43  ;;  %v5441_v18 = vsub.f32 %v5280_v28, %v5370_v46  ;;  %v15714_v46 = vld [vmem:[#allocation9 + $0x8] sm:$0xff] }
0x17e5   :  { %v12124_v63 = vpop.f32.mrf.mxu0 }
0x17e6   :  { %5457 = vst.msk [vmem:[#allocation2 + $0x210] sm:$0xff] %vm321_vm0, %v5441_v18  ;;  %v5444_v39 = vsub.f32 %v5283_v33, %v12124_v63  ;;  %v15717_v18 = vld [vmem:[#allocation9 + $0x10] sm:$0xff]  ;;  %v15720_v33 = vld [vmem:[#allocation9 + $0x18] sm:$0xff]  ;;  %v15723_v63 = vld [vmem:[#allocation9 + $0x20] sm:$0xff] }
0x17e7   :  { %v5380_v40 = vpop.f32.mrf.mxu0  ;;  %v5472_v43 = vld [vmem:[#allocation2 + $0x208] sm:$0xff] }
0x17e8   :  { %5460 = vst.msk [vmem:[#allocation2 + $0x228] sm:$0xff] %vm321_vm0, %v5444_v39  ;;  %v5443_v1 = vsub.f32 %v5282_v32, %v5380_v40  ;;  %v15726_v39 = vld [vmem:[#allocation9 + $0x28] sm:$0xff]  ;;  %v15729_v32 = vld [vmem:[#allocation9 + $0x30] sm:$0xff]  ;;  %v15732_v40 = vld [vmem:[#allocation9 + $0x38] sm:$0xff] }
0x17e9   :  { %v12127_v35 = vpop.f32.mrf.mxu0  ;;  %v5471_v28 = vld [vmem:[#allocation2 + $0x200] sm:$0xff] }
0x17ea   :  { %5459 = vst.msk [vmem:[#allocation2 + $0x220] sm:$0xff] %vm321_vm0, %v5443_v1  ;;  %v5446_v58 = vsub.f32 %v5285_v62, %v12127_v35  ;;  %v15735_v1 = vld [vmem:[#allocation9 + $0x40] sm:$0xff]  ;;  %v15738_v62 = vld [vmem:[#allocation9 + $0x48] sm:$0xff]  ;;  %v15741_v35 = vld [vmem:[#allocation9 + $0x50] sm:$0xff] }
0x17eb   :  { %v5390_v27 = vpop.f32.mrf.mxu0  ;;  %v5474_v22 = vld [vmem:[#allocation2 + $0x218] sm:$0xff] }
0x17ec   :  { %5462 = vst.msk [vmem:[#allocation2 + $0x238] sm:$0xff] %vm321_vm0, %v5446_v58  ;;  %v5445_v11 = vsub.f32 %v5284_v61, %v5390_v27  ;;  %v15744_v58 = vld [vmem:[#allocation9 + $0x58] sm:$0xff]  ;;  %v15747_v61 = vld [vmem:[#allocation9 + $0x60] sm:$0xff]  ;;  %v15750_v27 = vld [vmem:[#allocation9 + $0x68] sm:$0xff] }
0x17ed   :  { %v12130_v51 = vpop.f32.mrf.mxu0  ;;  %v5473_v26 = vld [vmem:[#allocation2 + $0x210] sm:$0xff] }
0x17ee   :  { %5461 = vst.msk [vmem:[#allocation2 + $0x230] sm:$0xff] %vm321_vm0, %v5445_v11  ;;  %v5448_v8 = vsub.f32 %v5287_v2, %v12130_v51  ;;  %v15753_v11 = vld [vmem:[#allocation9 + $0x70] sm:$0xff]  ;;  %v15756_v2 = vld [vmem:[#allocation9 + $0x78] sm:$0xff]  ;;  %v15759_v51 = vld [vmem:[#allocation9] sm:$0xff] }
0x17ef   :  { %v5400_v47 = vpop.f32.mrf.mxu0  ;;  %v15706_v0 = vld [vmem:[#allocation2 + $0x228] sm:$0xff] }
0x17f0   :  { %5464 = vst.msk [vmem:[#allocation2 + $0x248] sm:$0xff] %vm321_vm0, %v5448_v8  ;;  %v5447_v10 = vsub.f32 %v5286_v13, %v5400_v47  ;;  %v5488_v8 = vmul.f32 2.0, %v5472_v43 }
0x17f1   :  { %v12133_v49 = vpop.f32.mrf.mxu0  ;;  %v15710_v15 = vld [vmem:[#allocation2 + $0x220] sm:$0xff] }
0x17f2   :  { %5463 = vst.msk [vmem:[#allocation2 + $0x240] sm:$0xff] %vm321_vm0, %v5447_v10  ;;  %v5450_v57 = vsub.f32 %v5289_v34, %v12133_v49  ;;  %v5487_v10 = vmul.f32 2.0, %v5471_v28 }
0x17f3   :  { %v5410_v53 = vpop.f32.mrf.mxu0  ;;  %v15698_v21 = vld [vmem:[#allocation2 + $0x238] sm:$0xff] }
0x17f4   :  { %5466 = vst.msk [vmem:[#allocation2 + $0x258] sm:$0xff] %vm321_vm0, %v5450_v57  ;;  %v5449_v37 = vsub.f32 %v5288_v54, %v5410_v53  ;;  %v5490_v57 = vmul.f32 2.0, %v5474_v22 }
0x17f5   :  { %v12136_v14 = vpop.f32.mrf.mxu0  ;;  %v15702_v5 = vld [vmem:[#allocation2 + $0x230] sm:$0xff] }
0x17f6   :  { %5465 = vst.msk [vmem:[#allocation2 + $0x250] sm:$0xff] %vm321_vm0, %v5449_v37  ;;  %v5452_v31 = vsub.f32 %v5291_v6, %v12136_v14  ;;  %v5489_v37 = vmul.f32 2.0, %v5473_v26 }
0x17f7   :  { %v5420_v16 = vpop.f32.mrf.mxu0  ;;  %v15690_v36 = vld [vmem:[#allocation2 + $0x248] sm:$0xff] }
0x17f8   :  { %5468 = vst.msk [vmem:[#allocation2 + $0x268] sm:$0xff] %vm321_vm0, %v5452_v31  ;;  %v5451_v52 = vsub.f32 %v5290_v19, %v5420_v16  ;;  %v5492_v31 = vmul.f32 2.0, %v15706_v0 }
0x17f9   :  { %v12139_v44 = vpop.f32.mrf.mxu0  ;;  %v15694_v55 = vld [vmem:[#allocation2 + $0x240] sm:$0xff] }
0x17fa   :  { %5467 = vst.msk [vmem:[#allocation2 + $0x260] sm:$0xff] %vm321_vm0, %v5451_v52  ;;  %v5454_v41 = vsub.f32 %v5293_v20, %v12139_v44  ;;  %v5491_v52 = vmul.f32 2.0, %v15710_v15 }
0x17fb   :  { %v5430_v17 = vpop.f32.mrf.mxu0  ;;  %v15682_v12 = vld [vmem:[#allocation2 + $0x258] sm:$0xff] }
0x17fc   :  { %5470 = vst.msk [vmem:[#allocation2 + $0x278] sm:$0xff] %vm321_vm0, %v5454_v41  ;;  %v5453_v30 = vsub.f32 %v5292_v48, %v5430_v17  ;;  %v5494_v41 = vmul.f32 2.0, %v15698_v21 }
0x17fd   :  { %v15686_v23 = vld [vmem:[#allocation2 + $0x250] sm:$0xff] }
0x17fe   :  { %5469 = vst.msk [vmem:[#allocation2 + $0x270] sm:$0xff] %vm321_vm0, %v5453_v30  ;;  %v5493_v30 = vmul.f32 2.0, %v15702_v5 }
0x17ff   :  { %v15674_v59 = vld [vmem:[#allocation2 + $0x268] sm:$0xff] }
0x1801   :  { %v15678_v9 = vld [vmem:[#allocation2 + $0x260] sm:$0xff] }
0x1803   :  { %v15666_v38 = vld [vmem:[#allocation2 + $0x278] sm:$0xff] }
0x1804   :  { %12140 = vmatprep.subr.mxu1 %v15666_v38 }
0x1805   :  { %12141 = vmatpush3.msra.mxu1 %v15666_v38  ;;  %v15670_v7 = vld [vmem:[#allocation2 + $0x270] sm:$0xff] }
0x1806   :  { %12142 = vmatprep.subr.mxu1 %v15670_v7 }
0x1807   :  { %12143 = vmatpush3.msra.mxu1 %v15670_v7 }
0x1808   :  { %12144 = vmatprep.subr.mxu1 %v15674_v59 }
0x1809   :  { %12145 = vmatpush3.msra.mxu1 %v15674_v59 }
0x180a   :  { %12146 = vmatprep.subr.mxu1 %v15678_v9 }
0x180b   :  { %12147 = vmatpush3.msra.mxu1 %v15678_v9 }
0x180c   :  { %12148 = vmatprep.subr.mxu1 %v15682_v12 }
0x180d   :  { %12149 = vmatpush3.msra.mxu1 %v15682_v12 }
0x180e   :  { %12150 = vmatprep.subr.mxu1 %v15686_v23 }
0x180f   :  { %12151 = vmatpush3.msra.mxu1 %v15686_v23 }
0x1810   :  { %12152 = vmatprep.subr.mxu1 %v15690_v36 }
0x1811   :  { %12153 = vmatpush3.msra.mxu1 %v15690_v36 }
0x1812   :  { %12154 = vmatprep.subr.mxu1 %v15694_v55 }
0x1813   :  { %12155 = vmatpush3.msra.mxu1 %v15694_v55 }
0x1814   :  { %12156 = vmatprep.subr.mxu1 %v15698_v21 }
0x1815   :  { %12157 = vmatpush3.msra.mxu1 %v15698_v21 }
0x1816   :  { %12158 = vmatprep.subr.mxu1 %v15702_v5 }
0x1817   :  { %12159 = vmatpush3.msra.mxu1 %v15702_v5 }
0x1818   :  { %12160 = vmatprep.subr.mxu1 %v15706_v0 }
0x1819   :  { %12161 = vmatpush3.msra.mxu1 %v15706_v0 }
0x181a   :  { %12162 = vmatprep.subr.mxu1 %v15710_v15 }
0x181b   :  { %12163 = vmatpush3.msra.mxu1 %v15710_v15 }
0x181c   :  { %12164 = vmatprep.subr.mxu1 %v5474_v22 }
0x181d   :  { %12165 = vmatpush3.msra.mxu1 %v5474_v22 }
0x181e   :  { %12166 = vmatprep.subr.mxu1 %v5473_v26 }
0x181f   :  { %12167 = vmatpush3.msra.mxu1 %v5473_v26  ;;  %v5496_v26 = vmul.f32 2.0, %v15690_v36 }
0x1820   :  { %12168 = vmatprep.subr.mxu1 %v5472_v43 }
0x1821   :  { %12169 = vmatpush3.msra.mxu1 %v5472_v43 }
0x1822   :  { %12170 = vmatprep.subr.mxu1 %v5471_v28 }
0x1823   :  { %12171 = vmatpush3.msra.mxu1 %v5471_v28  ;;  %v5495_v28 = vmul.f32 2.0, %v15694_v55 }
0x1824   :  { %12173 = vmatmul.mubr.f32.vlgmr.msra.gmra.mxu1 %v15714_v46 }
0x1825   :  { %12175 = vmatprep.mubr.f32.mxu1 %v15717_v18 }
0x1828   :  { %12176 = vmatmul.mubr.f32.gmra.mxu1 %v15720_v33 }
0x1829   :  { %12178 = vmatprep.mubr.f32.mxu1 %v15723_v63 }
0x182c   :  { %12179 = vmatmul.mubr.f32.gmra.mxu1 %v15726_v39 }
0x182d   :  { %12181 = vmatprep.mubr.f32.mxu1 %v15729_v32 }
0x1830   :  { %12182 = vmatmul.mubr.f32.gmra.mxu1 %v15732_v40 }
0x1831   :  { %12184 = vmatprep.mubr.f32.mxu1 %v15735_v1 }
0x1834   :  { %12185 = vmatmul.mubr.f32.gmra.mxu1 %v15738_v62 }
0x1835   :  { %12187 = vmatprep.mubr.f32.mxu1 %v15741_v35 }
0x1838   :  { %12188 = vmatmul.mubr.f32.gmra.mxu1 %v15744_v58 }
0x1839   :  { %12190 = vmatprep.mubr.f32.mxu1 %v15747_v61 }
0x183c   :  { %12191 = vmatmul.mubr.f32.gmra.mxu1 %v15750_v27 }
0x183d   :  { %12193 = vmatprep.mubr.f32.mxu1 %v15753_v11 }
0x1840   :  { %12194 = vmatmul.mubr.f32.gmra.mxu1 %v15756_v2 }
0x1841   :  { %12284 = vmatprep.mubr.f32.mxu1 %v15759_v51 }
0x18e4   :  { %v12174_v13 = vpop.f32.mrf.mxu1 }
0x18e5   :  { %v5649_v47 = vsub.f32 %v5488_v8, %v12174_v13  ;;  %v5498_v13 = vmul.f32 2.0, %v15682_v12 }
0x18e6   :  { %v5569_v34 = vpop.f32.mrf.mxu1 }
0x18e7   :  { %5665 = vst.msk [vmem:[#allocation2 + $0x288] sm:$0xff] %vm321_vm0, %v5649_v47  ;;  %v5648_v49 = vsub.f32 %v5487_v10, %v5569_v34  ;;  %v5497_v10 = vmul.f32 2.0, %v15686_v23 }
0x18e8   :  { %v12177_v54 = vpop.f32.mrf.mxu1 }
0x18e9   :  { %5664 = vst.msk [vmem:[#allocation2 + $0x280] sm:$0xff] %vm321_vm0, %v5648_v49  ;;  %v5651_v53 = vsub.f32 %v5490_v57, %v12177_v54  ;;  %v5500_v49 = vmul.f32 2.0, %v15674_v59  ;;  %v5499_v54 = vmul.f32 2.0, %v15678_v9 }
0x18ea   :  { %v5579_v6 = vpop.f32.mrf.mxu1 }
0x18eb   :  { %5667 = vst.msk [vmem:[#allocation2 + $0x298] sm:$0xff] %vm321_vm0, %v5651_v53  ;;  %v5650_v14 = vsub.f32 %v5489_v37, %v5579_v6  ;;  %v5502_v37 = vmul.f32 2.0, %v15666_v38 }
0x18ec   :  { %v12180_v19 = vpop.f32.mrf.mxu1 }
0x18ed   :  { %5666 = vst.msk [vmem:[#allocation2 + $0x290] sm:$0xff] %vm321_vm0, %v5650_v14  ;;  %v5653_v16 = vsub.f32 %v5492_v31, %v12180_v19  ;;  %v5501_v14 = vmul.f32 2.0, %v15670_v7 }
0x18ee   :  { %v5589_v20 = vpop.f32.mrf.mxu1 }
0x18ef   :  { %5669 = vst.msk [vmem:[#allocation2 + $0x2a8] sm:$0xff] %vm321_vm0, %v5653_v16  ;;  %v5652_v44 = vsub.f32 %v5491_v52, %v5589_v20 }
0x18f0   :  { %v12183_v48 = vpop.f32.mrf.mxu1 }
0x18f1   :  { %5668 = vst.msk [vmem:[#allocation2 + $0x2a0] sm:$0xff] %vm321_vm0, %v5652_v44  ;;  %v5655_v17 = vsub.f32 %v5494_v41, %v12183_v48 }
0x18f2   :  { %v5599_v22 = vpop.f32.mrf.mxu1 }
0x18f3   :  { %5671 = vst.msk [vmem:[#allocation2 + $0x2b8] sm:$0xff] %vm321_vm0, %v5655_v17  ;;  %v5654_v0 = vsub.f32 %v5493_v30, %v5599_v22  ;;  %v5683_v22 = vld [vmem:[#allocation2 + $0x298] sm:$0xff] }
0x18f4   :  { %v12186_v43 = vpop.f32.mrf.mxu1 }
0x18f5   :  { %5670 = vst.msk [vmem:[#allocation2 + $0x2b0] sm:$0xff] %vm321_vm0, %v5654_v0  ;;  %v5657_v15 = vsub.f32 %v5496_v26, %v12186_v43  ;;  %v5682_v0 = vld [vmem:[#allocation2 + $0x290] sm:$0xff]  ;;  %v5681_v26 = vld [vmem:[#allocation2 + $0x288] sm:$0xff]  ;;  %v5680_v43 = vld [vmem:[#allocation2 + $0x280] sm:$0xff] }
0x18f6   :  { %v5609_v8 = vpop.f32.mrf.mxu1  ;;  %v5685_v17 = vld [vmem:[#allocation2 + $0x2a8] sm:$0xff] }
0x18f7   :  { %5673 = vst.msk [vmem:[#allocation2 + $0x2c8] sm:$0xff] %vm321_vm0, %v5657_v15  ;;  %v5656_v21 = vsub.f32 %v5495_v28, %v5609_v8  ;;  %v5697_v15 = vmul.f32 2.0, %v5681_v26 }
0x18f8   :  { %v12189_v47 = vpop.f32.mrf.mxu1  ;;  %v5684_v30 = vld [vmem:[#allocation2 + $0x2a0] sm:$0xff] }
0x18f9   :  { %5672 = vst.msk [vmem:[#allocation2 + $0x2c0] sm:$0xff] %vm321_vm0, %v5656_v21  ;;  %v5659_v5 = vsub.f32 %v5498_v13, %v12189_v47  ;;  %v5696_v21 = vmul.f32 2.0, %v5680_v43 }
0x18fa   :  { %v5619_v34 = vpop.f32.mrf.mxu1  ;;  %v15822_v41 = vld [vmem:[#allocation2 + $0x2b8] sm:$0xff] }
0x18fb   :  { %5675 = vst.msk [vmem:[#allocation2 + $0x2d8] sm:$0xff] %vm321_vm0, %v5659_v5  ;;  %v5658_v36 = vsub.f32 %v5497_v10, %v5619_v34  ;;  %v5699_v5 = vmul.f32 2.0, %v5683_v22 }
0x18fc   :  { %v12192_v57 = vpop.f32.mrf.mxu1  ;;  %v15826_v48 = vld [vmem:[#allocation2 + $0x2b0] sm:$0xff] }
0x18fd   :  { %5674 = vst.msk [vmem:[#allocation2 + $0x2d0] sm:$0xff] %vm321_vm0, %v5658_v36  ;;  %v5661_v55 = vsub.f32 %v5500_v49, %v12192_v57  ;;  %v5698_v36 = vmul.f32 2.0, %v5682_v0 }
0x18fe   :  { %v5629_v53 = vpop.f32.mrf.mxu1  ;;  %v15814_v20 = vld [vmem:[#allocation2 + $0x2c8] sm:$0xff] }
0x18ff   :  { %5677 = vst.msk [vmem:[#allocation2 + $0x2e8] sm:$0xff] %vm321_vm0, %v5661_v55  ;;  %v5660_v12 = vsub.f32 %v5499_v54, %v5629_v53  ;;  %v5701_v55 = vmul.f32 2.0, %v5685_v17 }
0x1900   :  { %v12195_v6 = vpop.f32.mrf.mxu1  ;;  %v15818_v44 = vld [vmem:[#allocation2 + $0x2c0] sm:$0xff] }
0x1901   :  { %5676 = vst.msk [vmem:[#allocation2 + $0x2e0] sm:$0xff] %vm321_vm0, %v5660_v12  ;;  %v5663_v23 = vsub.f32 %v5502_v37, %v12195_v6  ;;  %v5700_v12 = vmul.f32 2.0, %v5684_v30 }
0x1902   :  { %v5639_v31 = vpop.f32.mrf.mxu1  ;;  %v15806_v16 = vld [vmem:[#allocation2 + $0x2d8] sm:$0xff] }
0x1903   :  { %5679 = vst.msk [vmem:[#allocation2 + $0x2f8] sm:$0xff] %vm321_vm0, %v5663_v23  ;;  %v5662_v59 = vsub.f32 %v5501_v14, %v5639_v31  ;;  %v5703_v23 = vmul.f32 2.0, %v15822_v41 }
0x1904   :  { %v15810_v52 = vld [vmem:[#allocation2 + $0x2d0] sm:$0xff] }
0x1905   :  { %5678 = vst.msk [vmem:[#allocation2 + $0x2f0] sm:$0xff] %vm321_vm0, %v5662_v59  ;;  %v5702_v59 = vmul.f32 2.0, %v15826_v48 }
0x1906   :  { %v15798_v38 = vld [vmem:[#allocation2 + $0x2e8] sm:$0xff] }
0x1908   :  { %v15802_v7 = vld [vmem:[#allocation2 + $0x2e0] sm:$0xff] }
0x190a   :  { %v15790_v19 = vld [vmem:[#allocation2 + $0x2f8] sm:$0xff] }
0x190b   :  { %12196 = vmatprep.subr.mxu0 %v15790_v19 }
0x190c   :  { %12197 = vmatpush3.msra.mxu0 %v15790_v19  ;;  %v15794_v9 = vld [vmem:[#allocation2 + $0x2f0] sm:$0xff] }
0x190d   :  { %12198 = vmatprep.subr.mxu0 %v15794_v9 }
0x190e   :  { %12199 = vmatpush3.msra.mxu0 %v15794_v9 }
0x190f   :  { %12200 = vmatprep.subr.mxu0 %v15798_v38 }
0x1910   :  { %12201 = vmatpush3.msra.mxu0 %v15798_v38 }
0x1911   :  { %12202 = vmatprep.subr.mxu0 %v15802_v7 }
0x1912   :  { %12203 = vmatpush3.msra.mxu0 %v15802_v7 }
0x1913   :  { %12204 = vmatprep.subr.mxu0 %v15806_v16 }
0x1914   :  { %12205 = vmatpush3.msra.mxu0 %v15806_v16 }
0x1915   :  { %12206 = vmatprep.subr.mxu0 %v15810_v52 }
0x1916   :  { %12207 = vmatpush3.msra.mxu0 %v15810_v52 }
0x1917   :  { %12208 = vmatprep.subr.mxu0 %v15814_v20 }
0x1918   :  { %12209 = vmatpush3.msra.mxu0 %v15814_v20 }
0x1919   :  { %12210 = vmatprep.subr.mxu0 %v15818_v44 }
0x191a   :  { %12211 = vmatpush3.msra.mxu0 %v15818_v44 }
0x191b   :  { %12212 = vmatprep.subr.mxu0 %v15822_v41 }
0x191c   :  { %12213 = vmatpush3.msra.mxu0 %v15822_v41 }
0x191d   :  { %12214 = vmatprep.subr.mxu0 %v15826_v48 }
0x191e   :  { %12215 = vmatpush3.msra.mxu0 %v15826_v48 }
0x191f   :  { %12216 = vmatprep.subr.mxu0 %v5685_v17 }
0x1920   :  { %12217 = vmatpush3.msra.mxu0 %v5685_v17 }
0x1921   :  { %12218 = vmatprep.subr.mxu0 %v5684_v30 }
0x1922   :  { %12219 = vmatpush3.msra.mxu0 %v5684_v30 }
0x1923   :  { %12220 = vmatprep.subr.mxu0 %v5683_v22 }
0x1924   :  { %12221 = vmatpush3.msra.mxu0 %v5683_v22 }
0x1925   :  { %12222 = vmatprep.subr.mxu0 %v5682_v0 }
0x1926   :  { %12223 = vmatpush3.msra.mxu0 %v5682_v0  ;;  %v5705_v0 = vmul.f32 2.0, %v15814_v20 }
0x1927   :  { %12224 = vmatprep.subr.mxu0 %v5681_v26 }
0x1928   :  { %12225 = vmatpush3.msra.mxu0 %v5681_v26 }
0x1929   :  { %12226 = vmatprep.subr.mxu0 %v5680_v43 }
0x192a   :  { %12227 = vmatpush3.msra.mxu0 %v5680_v43  ;;  %v5704_v43 = vmul.f32 2.0, %v15818_v44 }
0x192b   :  { %12229 = vmatmul.mubr.f32.vlgmr.msra.gmra.mxu0 %v15714_v46 }
0x192c   :  { %12231 = vmatprep.mubr.f32.mxu0 %v15717_v18 }
0x192f   :  { %12232 = vmatmul.mubr.f32.gmra.mxu0 %v15720_v33 }
0x1930   :  { %12234 = vmatprep.mubr.f32.mxu0 %v15723_v63 }
0x1933   :  { %12235 = vmatmul.mubr.f32.gmra.mxu0 %v15726_v39 }
0x1934   :  { %12237 = vmatprep.mubr.f32.mxu0 %v15729_v32 }
0x1937   :  { %12238 = vmatmul.mubr.f32.gmra.mxu0 %v15732_v40 }
0x1938   :  { %12240 = vmatprep.mubr.f32.mxu0 %v15735_v1 }
0x193b   :  { %12241 = vmatmul.mubr.f32.gmra.mxu0 %v15738_v62 }
0x193c   :  { %12243 = vmatprep.mubr.f32.mxu0 %v15741_v35 }
0x193f   :  { %12244 = vmatmul.mubr.f32.gmra.mxu0 %v15744_v58 }
0x1940   :  { %12246 = vmatprep.mubr.f32.mxu0 %v15747_v61 }
0x1943   :  { %12247 = vmatmul.mubr.f32.gmra.mxu0 %v15750_v27 }
0x1944   :  { %12249 = vmatprep.mubr.f32.mxu0 %v15753_v11 }
0x1947   :  { %12250 = vmatmul.mubr.f32.gmra.mxu0 %v15756_v2 }
0x1948   :  { %12340 = vmatprep.mubr.f32.mxu0 %v15759_v51 }
0x19eb   :  { %v12230_v28 = vpop.f32.mrf.mxu0 }
0x19ec   :  { %v5858_v8 = vsub.f32 %v5697_v15, %v12230_v28  ;;  %v5707_v28 = vmul.f32 2.0, %v15806_v16 }
0x19ed   :  { %v5778_v13 = vpop.f32.mrf.mxu0 }
0x19ee   :  { %5874 = vst.msk [vmem:[#allocation2 + $0x308] sm:$0xff] %vm321_vm0, %v5858_v8  ;;  %v5857_v47 = vsub.f32 %v5696_v21, %v5778_v13  ;;  %v5706_v21 = vmul.f32 2.0, %v15810_v52 }
0x19ef   :  { %v12233_v10 = vpop.f32.mrf.mxu0 }
0x19f0   :  { %5873 = vst.msk [vmem:[#allocation2 + $0x300] sm:$0xff] %vm321_vm0, %v5857_v47  ;;  %v5860_v34 = vsub.f32 %v5699_v5, %v12233_v10  ;;  %v5709_v47 = vmul.f32 2.0, %v15798_v38  ;;  %v5708_v10 = vmul.f32 2.0, %v15802_v7 }
0x19f1   :  { %v5788_v49 = vpop.f32.mrf.mxu0 }
0x19f2   :  { %5876 = vst.msk [vmem:[#allocation2 + $0x318] sm:$0xff] %vm321_vm0, %v5860_v34  ;;  %v5859_v57 = vsub.f32 %v5698_v36, %v5788_v49  ;;  %v5711_v36 = vmul.f32 2.0, %v15790_v19 }
0x19f3   :  { %v12236_v54 = vpop.f32.mrf.mxu0 }
0x19f4   :  { %5875 = vst.msk [vmem:[#allocation2 + $0x310] sm:$0xff] %vm321_vm0, %v5859_v57  ;;  %v5862_v53 = vsub.f32 %v5701_v55, %v12236_v54  ;;  %v5710_v57 = vmul.f32 2.0, %v15794_v9 }
0x19f5   :  { %v5798_v37 = vpop.f32.mrf.mxu0 }
0x19f6   :  { %5878 = vst.msk [vmem:[#allocation2 + $0x328] sm:$0xff] %vm321_vm0, %v5862_v53  ;;  %v5861_v6 = vsub.f32 %v5700_v12, %v5798_v37 }
0x19f7   :  { %v12239_v14 = vpop.f32.mrf.mxu0 }
0x19f8   :  { %5877 = vst.msk [vmem:[#allocation2 + $0x320] sm:$0xff] %vm321_vm0, %v5861_v6  ;;  %v5864_v31 = vsub.f32 %v5703_v23, %v12239_v14 }
0x19f9   :  { %v5808_v22 = vpop.f32.mrf.mxu0 }
0x19fa   :  { %5880 = vst.msk [vmem:[#allocation2 + $0x338] sm:$0xff] %vm321_vm0, %v5864_v31  ;;  %v5863_v17 = vsub.f32 %v5702_v59, %v5808_v22  ;;  %v5892_v22 = vld [vmem:[#allocation2 + $0x318] sm:$0xff] }
0x19fb   :  { %v12242_v26 = vpop.f32.mrf.mxu0 }
0x19fc   :  { %5879 = vst.msk [vmem:[#allocation2 + $0x330] sm:$0xff] %vm321_vm0, %v5863_v17  ;;  %v5866_v30 = vsub.f32 %v5705_v0, %v12242_v26  ;;  %v5891_v17 = vld [vmem:[#allocation2 + $0x310] sm:$0xff]  ;;  %v5890_v0 = vld [vmem:[#allocation2 + $0x308] sm:$0xff]  ;;  %v5889_v26 = vld [vmem:[#allocation2 + $0x300] sm:$0xff] }
0x19fd   :  { %v5818_v15 = vpop.f32.mrf.mxu0  ;;  %v5894_v31 = vld [vmem:[#allocation2 + $0x328] sm:$0xff] }
0x19fe   :  { %5882 = vst.msk [vmem:[#allocation2 + $0x348] sm:$0xff] %vm321_vm0, %v5866_v30  ;;  %v5865_v41 = vsub.f32 %v5704_v43, %v5818_v15  ;;  %v5906_v30 = vmul.f32 2.0, %v5890_v0 }
0x19ff   :  { %v12245_v8 = vpop.f32.mrf.mxu0  ;;  %v5893_v59 = vld [vmem:[#allocation2 + $0x320] sm:$0xff] }
0x1a00   :  { %5881 = vst.msk [vmem:[#allocation2 + $0x340] sm:$0xff] %vm321_vm0, %v5865_v41  ;;  %v5868_v48 = vsub.f32 %v5707_v28, %v12245_v8  ;;  %v5905_v41 = vmul.f32 2.0, %v5889_v26 }
0x1a01   :  { %v5828_v13 = vpop.f32.mrf.mxu0  ;;  %v15904_v23 = vld [vmem:[#allocation2 + $0x338] sm:$0xff] }
0x1a02   :  { %5884 = vst.msk [vmem:[#allocation2 + $0x358] sm:$0xff] %vm321_vm0, %v5868_v48  ;;  %v5867_v20 = vsub.f32 %v5706_v21, %v5828_v13  ;;  %v5908_v48 = vmul.f32 2.0, %v5892_v22 }
0x1a03   :  { %v12248_v5 = vpop.f32.mrf.mxu0  ;;  %v15908_v14 = vld [vmem:[#allocation2 + $0x330] sm:$0xff] }
0x1a04   :  { %5883 = vst.msk [vmem:[#allocation2 + $0x350] sm:$0xff] %vm321_vm0, %v5867_v20  ;;  %v5870_v44 = vsub.f32 %v5709_v47, %v12248_v5  ;;  %v5907_v20 = vmul.f32 2.0, %v5891_v17 }
0x1a05   :  { %v5838_v34 = vpop.f32.mrf.mxu0  ;;  %v15896_v37 = vld [vmem:[#allocation2 + $0x348] sm:$0xff] }
0x1a06   :  { %5886 = vst.msk [vmem:[#allocation2 + $0x368] sm:$0xff] %vm321_vm0, %v5870_v44  ;;  %v5869_v16 = vsub.f32 %v5708_v10, %v5838_v34  ;;  %v5910_v44 = vmul.f32 2.0, %v5894_v31 }
0x1a07   :  { %v12251_v49 = vpop.f32.mrf.mxu0  ;;  %v15900_v6 = vld [vmem:[#allocation2 + $0x340] sm:$0xff] }
0x1a08   :  { %5885 = vst.msk [vmem:[#allocation2 + $0x360] sm:$0xff] %vm321_vm0, %v5869_v16  ;;  %v5872_v52 = vsub.f32 %v5711_v36, %v12251_v49  ;;  %v5909_v16 = vmul.f32 2.0, %v5893_v59 }
0x1a09   :  { %v5848_v55 = vpop.f32.mrf.mxu0  ;;  %v15888_v53 = vld [vmem:[#allocation2 + $0x358] sm:$0xff] }
0x1a0a   :  { %5888 = vst.msk [vmem:[#allocation2 + $0x378] sm:$0xff] %vm321_vm0, %v5872_v52  ;;  %v5871_v38 = vsub.f32 %v5710_v57, %v5848_v55  ;;  %v5912_v52 = vmul.f32 2.0, %v15904_v23 }
0x1a0b   :  { %v15892_v12 = vld [vmem:[#allocation2 + $0x350] sm:$0xff] }
0x1a0c   :  { %5887 = vst.msk [vmem:[#allocation2 + $0x370] sm:$0xff] %vm321_vm0, %v5871_v38  ;;  %v5911_v38 = vmul.f32 2.0, %v15908_v14 }
0x1a0d   :  { %v15880_v19 = vld [vmem:[#allocation2 + $0x368] sm:$0xff] }
0x1a0f   :  { %v15884_v9 = vld [vmem:[#allocation2 + $0x360] sm:$0xff] }
0x1a11   :  { %v15872_v54 = vld [vmem:[#allocation2 + $0x378] sm:$0xff] }
0x1a12   :  { %12252 = vmatprep.subr.mxu1 %v15872_v54 }
0x1a13   :  { %12253 = vmatpush3.msra.mxu1 %v15872_v54  ;;  %v15876_v7 = vld [vmem:[#allocation2 + $0x370] sm:$0xff] }
0x1a14   :  { %12254 = vmatprep.subr.mxu1 %v15876_v7 }
0x1a15   :  { %12255 = vmatpush3.msra.mxu1 %v15876_v7 }
0x1a16   :  { %12256 = vmatprep.subr.mxu1 %v15880_v19 }
0x1a17   :  { %12257 = vmatpush3.msra.mxu1 %v15880_v19 }
0x1a18   :  { %12258 = vmatprep.subr.mxu1 %v15884_v9 }
0x1a19   :  { %12259 = vmatpush3.msra.mxu1 %v15884_v9 }
0x1a1a   :  { %12260 = vmatprep.subr.mxu1 %v15888_v53 }
0x1a1b   :  { %12261 = vmatpush3.msra.mxu1 %v15888_v53 }
0x1a1c   :  { %12262 = vmatprep.subr.mxu1 %v15892_v12 }
0x1a1d   :  { %12263 = vmatpush3.msra.mxu1 %v15892_v12 }
0x1a1e   :  { %12264 = vmatprep.subr.mxu1 %v15896_v37 }
0x1a1f   :  { %12265 = vmatpush3.msra.mxu1 %v15896_v37 }
0x1a20   :  { %12266 = vmatprep.subr.mxu1 %v15900_v6 }
0x1a21   :  { %12267 = vmatpush3.msra.mxu1 %v15900_v6 }
0x1a22   :  { %12268 = vmatprep.subr.mxu1 %v15904_v23 }
0x1a23   :  { %12269 = vmatpush3.msra.mxu1 %v15904_v23 }
0x1a24   :  { %12270 = vmatprep.subr.mxu1 %v15908_v14 }
0x1a25   :  { %12271 = vmatpush3.msra.mxu1 %v15908_v14 }
0x1a26   :  { %12272 = vmatprep.subr.mxu1 %v5894_v31 }
0x1a27   :  { %12273 = vmatpush3.msra.mxu1 %v5894_v31 }
0x1a28   :  { %12274 = vmatprep.subr.mxu1 %v5893_v59 }
0x1a29   :  { %12275 = vmatpush3.msra.mxu1 %v5893_v59 }
0x1a2a   :  { %12276 = vmatprep.subr.mxu1 %v5892_v22 }
0x1a2b   :  { %12277 = vmatpush3.msra.mxu1 %v5892_v22 }
0x1a2c   :  { %12278 = vmatprep.subr.mxu1 %v5891_v17 }
0x1a2d   :  { %12279 = vmatpush3.msra.mxu1 %v5891_v17  ;;  %v5914_v17 = vmul.f32 2.0, %v15896_v37 }
0x1a2e   :  { %12280 = vmatprep.subr.mxu1 %v5890_v0 }
0x1a2f   :  { %12281 = vmatpush3.msra.mxu1 %v5890_v0 }
0x1a30   :  { %12282 = vmatprep.subr.mxu1 %v5889_v26 }
0x1a31   :  { %12283 = vmatpush3.msra.mxu1 %v5889_v26  ;;  %v5913_v26 = vmul.f32 2.0, %v15900_v6 }
0x1a32   :  { %12285 = vmatmul.mubr.f32.vlgmr.msra.gmra.mxu1 %v15714_v46 }
0x1a33   :  { %12287 = vmatprep.mubr.f32.mxu1 %v15717_v18 }
0x1a36   :  { %12288 = vmatmul.mubr.f32.gmra.mxu1 %v15720_v33 }
0x1a37   :  { %12290 = vmatprep.mubr.f32.mxu1 %v15723_v63 }
0x1a3a   :  { %12291 = vmatmul.mubr.f32.gmra.mxu1 %v15726_v39 }
0x1a3b   :  { %12293 = vmatprep.mubr.f32.mxu1 %v15729_v32 }
0x1a3e   :  { %12294 = vmatmul.mubr.f32.gmra.mxu1 %v15732_v40 }
0x1a3f   :  { %12296 = vmatprep.mubr.f32.mxu1 %v15735_v1 }
0x1a42   :  { %12297 = vmatmul.mubr.f32.gmra.mxu1 %v15738_v62 }
0x1a43   :  { %12299 = vmatprep.mubr.f32.mxu1 %v15741_v35 }
0x1a46   :  { %12300 = vmatmul.mubr.f32.gmra.mxu1 %v15744_v58 }
0x1a47   :  { %12302 = vmatprep.mubr.f32.mxu1 %v15747_v61 }
0x1a4a   :  { %12303 = vmatmul.mubr.f32.gmra.mxu1 %v15750_v27 }
0x1a4b   :  { %12305 = vmatprep.mubr.f32.mxu1 %v15753_v11 }
0x1a4e   :  { %12306 = vmatmul.mubr.f32.gmra.mxu1 %v15756_v2 }
0x1a4f   :  { %12396 = vmatprep.mubr.f32.mxu1 %v15759_v51 }
0x1af2   :  { %v12286_v43 = vpop.f32.mrf.mxu1 }
0x1af3   :  { %v6067_v15 = vsub.f32 %v5906_v30, %v12286_v43  ;;  %v5916_v43 = vmul.f32 2.0, %v15888_v53 }
0x1af4   :  { %v5987_v28 = vpop.f32.mrf.mxu1 }
0x1af5   :  { %6083 = vst.msk [vmem:[#allocation2 + $0x388] sm:$0xff] %vm321_vm0, %v6067_v15  ;;  %v6066_v8 = vsub.f32 %v5905_v41, %v5987_v28  ;;  %v5915_v41 = vmul.f32 2.0, %v15892_v12 }
0x1af6   :  { %v12289_v21 = vpop.f32.mrf.mxu1 }
0x1af7   :  { %6082 = vst.msk [vmem:[#allocation2 + $0x380] sm:$0xff] %vm321_vm0, %v6066_v8  ;;  %v6069_v13 = vsub.f32 %v5908_v48, %v12289_v21  ;;  %v5918_v8 = vmul.f32 2.0, %v15880_v19  ;;  %v5917_v21 = vmul.f32 2.0, %v15884_v9 }
0x1af8   :  { %v5997_v47 = vpop.f32.mrf.mxu1 }
0x1af9   :  { %6085 = vst.msk [vmem:[#allocation2 + $0x398] sm:$0xff] %vm321_vm0, %v6069_v13  ;;  %v6068_v5 = vsub.f32 %v5907_v20, %v5997_v47  ;;  %v5920_v20 = vmul.f32 2.0, %v15872_v54 }
0x1afa   :  { %v12292_v10 = vpop.f32.mrf.mxu1 }
0x1afb   :  { %6084 = vst.msk [vmem:[#allocation2 + $0x390] sm:$0xff] %vm321_vm0, %v6068_v5  ;;  %v6071_v34 = vsub.f32 %v5910_v44, %v12292_v10  ;;  %v5919_v5 = vmul.f32 2.0, %v15876_v7 }
0x1afc   :  { %v6007_v36 = vpop.f32.mrf.mxu1 }
0x1afd   :  { %6087 = vst.msk [vmem:[#allocation2 + $0x3a8] sm:$0xff] %vm321_vm0, %v6071_v34  ;;  %v6070_v49 = vsub.f32 %v5909_v16, %v6007_v36 }
0x1afe   :  { %v12295_v57 = vpop.f32.mrf.mxu1 }
0x1aff   :  { %6086 = vst.msk [vmem:[#allocation2 + $0x3a0] sm:$0xff] %vm321_vm0, %v6070_v49  ;;  %v6073_v55 = vsub.f32 %v5912_v52, %v12295_v57 }
0x1b00   :  { %v6017_v22 = vpop.f32.mrf.mxu1 }
0x1b01   :  { %6089 = vst.msk [vmem:[#allocation2 + $0x3b8] sm:$0xff] %vm321_vm0, %v6073_v55  ;;  %v6072_v31 = vsub.f32 %v5911_v38, %v6017_v22  ;;  %v6101_v22 = vld [vmem:[#allocation2 + $0x398] sm:$0xff] }
0x1b02   :  { %v12298_v0 = vpop.f32.mrf.mxu1 }
0x1b03   :  { %6088 = vst.msk [vmem:[#allocation2 + $0x3b0] sm:$0xff] %vm321_vm0, %v6072_v31  ;;  %v6075_v59 = vsub.f32 %v5914_v17, %v12298_v0  ;;  %v6100_v31 = vld [vmem:[#allocation2 + $0x390] sm:$0xff]  ;;  %v6099_v17 = vld [vmem:[#allocation2 + $0x388] sm:$0xff]  ;;  %v6098_v0 = vld [vmem:[#allocation2 + $0x380] sm:$0xff] }
0x1b04   :  { %v6027_v30 = vpop.f32.mrf.mxu1  ;;  %v6103_v55 = vld [vmem:[#allocation2 + $0x3a8] sm:$0xff] }
0x1b05   :  { %6091 = vst.msk [vmem:[#allocation2 + $0x3c8] sm:$0xff] %vm321_vm0, %v6075_v59  ;;  %v6074_v23 = vsub.f32 %v5913_v26, %v6027_v30 }
0x1b06   :  { %v12301_v15 = vpop.f32.mrf.mxu1  ;;  %v6102_v38 = vld [vmem:[#allocation2 + $0x3a0] sm:$0xff] }
0x1b07   :  { %6090 = vst.msk [vmem:[#allocation2 + $0x3c0] sm:$0xff] %vm321_vm0, %v6074_v23  ;;  %v6077_v14 = vsub.f32 %v5916_v43, %v12301_v15 }
0x1b08   :  { %v6037_v28 = vpop.f32.mrf.mxu1  ;;  %v15986_v52 = vld [vmem:[#allocation2 + $0x3b8] sm:$0xff] }
0x1b09   :  { %6093 = vst.msk [vmem:[#allocation2 + $0x3d8] sm:$0xff] %vm321_vm0, %v6077_v14  ;;  %v6076_v37 = vsub.f32 %v5915_v41, %v6037_v28  ;;  %v6121_v30 = vmul.f32 2.0, %v15986_v52 }
0x1b0a   :  { %v12304_v48 = vpop.f32.mrf.mxu1  ;;  %v15990_v57 = vld [vmem:[#allocation2 + $0x3b0] sm:$0xff] }
0x1b0b   :  { %6092 = vst.msk [vmem:[#allocation2 + $0x3d0] sm:$0xff] %vm321_vm0, %v6076_v37  ;;  %v6079_v6 = vsub.f32 %v5918_v8, %v12304_v48  ;;  %v6120_v15 = vmul.f32 2.0, %v15990_v57 }
0x1b0c   :  { %v6047_v13 = vpop.f32.mrf.mxu1  ;;  %v15978_v36 = vld [vmem:[#allocation2 + $0x3c8] sm:$0xff] }
0x1b0d   :  { %6095 = vst.msk [vmem:[#allocation2 + $0x3e8] sm:$0xff] %vm321_vm0, %v6079_v6  ;;  %v6078_v53 = vsub.f32 %v5917_v21, %v6047_v13  ;;  %v6123_v28 = vmul.f32 2.0, %v15978_v36 }
0x1b0e   :  { %v12307_v47 = vpop.f32.mrf.mxu1  ;;  %v15982_v49 = vld [vmem:[#allocation2 + $0x3c0] sm:$0xff] }
0x1b0f   :  { %6094 = vst.msk [vmem:[#allocation2 + $0x3e0] sm:$0xff] %vm321_vm0, %v6078_v53  ;;  %v6081_v12 = vsub.f32 %v5920_v20, %v12307_v47  ;;  %v6122_v48 = vmul.f32 2.0, %v15982_v49 }
0x1b10   :  { %v6057_v44 = vpop.f32.mrf.mxu1  ;;  %v15970_v34 = vld [vmem:[#allocation2 + $0x3d8] sm:$0xff] }
0x1b11   :  { %6097 = vst.msk [vmem:[#allocation2 + $0x3f8] sm:$0xff] %vm321_vm0, %v6081_v12  ;;  %v6080_v19 = vsub.f32 %v5919_v5, %v6057_v44  ;;  %v6125_v13 = vmul.f32 2.0, %v15970_v34 }
0x1b12   :  { %v15974_v16 = vld [vmem:[#allocation2 + $0x3d0] sm:$0xff] }
0x1b13   :  { %6096 = vst.msk [vmem:[#allocation2 + $0x3f0] sm:$0xff] %vm321_vm0, %v6080_v19  ;;  %v6124_v47 = vmul.f32 2.0, %v15974_v16 }
0x1b14   :  { %v15962_v54 = vld [vmem:[#allocation2 + $0x3e8] sm:$0xff] }
0x1b15   :  { %v6127_v44 = vmul.f32 2.0, %v15962_v54 }
0x1b16   :  { %v15966_v7 = vld [vmem:[#allocation2 + $0x3e0] sm:$0xff] }
0x1b18   :  { %v15954_v10 = vld [vmem:[#allocation2 + $0x3f8] sm:$0xff] }
0x1b19   :  { %12308 = vmatprep.subr.mxu0 %v15954_v10 }
0x1b1a   :  { %12309 = vmatpush3.msra.mxu0 %v15954_v10  ;;  %v15958_v9 = vld [vmem:[#allocation2 + $0x3f0] sm:$0xff] }
0x1b1b   :  { %12310 = vmatprep.subr.mxu0 %v15958_v9 }
0x1b1c   :  { %12311 = vmatpush3.msra.mxu0 %v15958_v9 }
0x1b1d   :  { %12312 = vmatprep.subr.mxu0 %v15962_v54 }
0x1b1e   :  { %12313 = vmatpush3.msra.mxu0 %v15962_v54 }
0x1b1f   :  { %12314 = vmatprep.subr.mxu0 %v15966_v7 }
0x1b20   :  { %12315 = vmatpush3.msra.mxu0 %v15966_v7 }
0x1b21   :  { %12316 = vmatprep.subr.mxu0 %v15970_v34 }
0x1b22   :  { %12317 = vmatpush3.msra.mxu0 %v15970_v34 }
0x1b23   :  { %12318 = vmatprep.subr.mxu0 %v15974_v16 }
0x1b24   :  { %12319 = vmatpush3.msra.mxu0 %v15974_v16 }
0x1b25   :  { %12320 = vmatprep.subr.mxu0 %v15978_v36 }
0x1b26   :  { %12321 = vmatpush3.msra.mxu0 %v15978_v36 }
0x1b27   :  { %12322 = vmatprep.subr.mxu0 %v15982_v49 }
0x1b28   :  { %12323 = vmatpush3.msra.mxu0 %v15982_v49  ;;  %v6126_v49 = vmul.f32 2.0, %v15966_v7 }
0x1b29   :  { %12324 = vmatprep.subr.mxu0 %v15986_v52 }
0x1b2a   :  { %12325 = vmatpush3.msra.mxu0 %v15986_v52 }
0x1b2b   :  { %12326 = vmatprep.subr.mxu0 %v15990_v57 }
0x1b2c   :  { %12327 = vmatpush3.msra.mxu0 %v15990_v57  ;;  %v6129_v57 = vmul.f32 2.0, %v15954_v10 }
0x1b2d   :  { %12328 = vmatprep.subr.mxu0 %v6103_v55 }
0x1b2e   :  { %12329 = vmatpush3.msra.mxu0 %v6103_v55 }
0x1b2f   :  { %12330 = vmatprep.subr.mxu0 %v6102_v38 }
0x1b30   :  { %12331 = vmatpush3.msra.mxu0 %v6102_v38 }
0x1b31   :  { %12332 = vmatprep.subr.mxu0 %v6101_v22 }
0x1b32   :  { %12333 = vmatpush3.msra.mxu0 %v6101_v22 }
0x1b33   :  { %12334 = vmatprep.subr.mxu0 %v6100_v31 }
0x1b34   :  { %12335 = vmatpush3.msra.mxu0 %v6100_v31 }
0x1b35   :  { %12336 = vmatprep.subr.mxu0 %v6099_v17 }
0x1b36   :  { %12337 = vmatpush3.msra.mxu0 %v6099_v17 }
0x1b37   :  { %12338 = vmatprep.subr.mxu0 %v6098_v0 }
0x1b38   :  { %12339 = vmatpush3.msra.mxu0 %v6098_v0 }
0x1b39   :  { %12341 = vmatmul.mubr.f32.vlgmr.msra.gmra.mxu0 %v15714_v46  ;;  %v6115_v46 = vmul.f32 2.0, %v6099_v17 }
0x1b3a   :  { %12343 = vmatprep.mubr.f32.mxu0 %v15717_v18 }
0x1b3d   :  { %12344 = vmatmul.mubr.f32.gmra.mxu0 %v15720_v33 }
0x1b3e   :  { %12346 = vmatprep.mubr.f32.mxu0 %v15723_v63  ;;  %v6114_v63 = vmul.f32 2.0, %v6098_v0 }
0x1b41   :  { %12347 = vmatmul.mubr.f32.gmra.mxu0 %v15726_v39 }
0x1b42   :  { %12349 = vmatprep.mubr.f32.mxu0 %v15729_v32 }
0x1b45   :  { %12350 = vmatmul.mubr.f32.gmra.mxu0 %v15732_v40  ;;  %v6117_v40 = vmul.f32 2.0, %v6101_v22 }
0x1b46   :  { %12352 = vmatprep.mubr.f32.mxu0 %v15735_v1 }
0x1b49   :  { %12353 = vmatmul.mubr.f32.gmra.mxu0 %v15738_v62 }
0x1b4a   :  { %12355 = vmatprep.mubr.f32.mxu0 %v15741_v35  ;;  %v6116_v35 = vmul.f32 2.0, %v6100_v31 }
0x1b4d   :  { %12356 = vmatmul.mubr.f32.gmra.mxu0 %v15744_v58 }
0x1b4e   :  { %12358 = vmatprep.mubr.f32.mxu0 %v15747_v61 }
0x1b51   :  { %12359 = vmatmul.mubr.f32.gmra.mxu0 %v15750_v27  ;;  %v6119_v27 = vmul.f32 2.0, %v6103_v55 }
0x1b52   :  { %12361 = vmatprep.mubr.f32.mxu0 %v15753_v11 }
0x1b55   :  { %12362 = vmatmul.mubr.f32.gmra.mxu0 %v15756_v2 }
0x1b56   :  { %12452 = vmatprep.mubr.f32.mxu0 %v15759_v51  ;;  %v6118_v51 = vmul.f32 2.0, %v6102_v38  ;;  %v6128_v38 = vmul.f32 2.0, %v15958_v9 }
0x1bf9   :  { %v12342_v18 = vpop.f32.mrf.mxu0 }
0x1bfa   :  { %v6276_v33 = vsub.f32 %v6115_v46, %v12342_v18 }
0x1bfb   :  { %v6196_v39 = vpop.f32.mrf.mxu0 }
0x1bfc   :  { %6292 = vst.msk [vmem:[#allocation2 + $0x408] sm:$0xff] %vm321_vm0, %v6276_v33  ;;  %v6275_v32 = vsub.f32 %v6114_v63, %v6196_v39 }
0x1bfd   :  { %v12345_v1 = vpop.f32.mrf.mxu0 }
0x1bfe   :  { %6291 = vst.msk [vmem:[#allocation2 + $0x400] sm:$0xff] %vm321_vm0, %v6275_v32  ;;  %v6278_v62 = vsub.f32 %v6117_v40, %v12345_v1 }
0x1bff   :  { %v6206_v58 = vpop.f32.mrf.mxu0 }
0x1c00   :  { %6294 = vst.msk [vmem:[#allocation2 + $0x418] sm:$0xff] %vm321_vm0, %v6278_v62  ;;  %v6277_v61 = vsub.f32 %v6116_v35, %v6206_v58  ;;  %v6788_v58 = vld [vmem:[#allocation3 + $0x78] sm:$0xff] }
0x1c01   :  { %v12348_v11 = vpop.f32.mrf.mxu0 }
0x1c02   :  { %6293 = vst.msk [vmem:[#allocation2 + $0x410] sm:$0xff] %vm321_vm0, %v6277_v61  ;;  %v6280_v2 = vsub.f32 %v6119_v27, %v12348_v11  ;;  %v16100_v61 = vld [vmem:[#allocation9 + $0x8] sm:$0xff]  ;;  %v6787_v27 = vld [vmem:[#allocation3 + $0x70] sm:$0xff] }
0x1c03   :  { %v6216_v59 = vpop.f32.mrf.mxu0  ;;  %v16092_v62 = vld [vmem:[#allocation2 + $0x408] sm:$0xff]  ;;  %v16103_v11 = vld [vmem:[#allocation9 + $0x10] sm:$0xff] }
0x1c04   :  { %6296 = vst.msk [vmem:[#allocation2 + $0x428] sm:$0xff] %vm321_vm0, %v6280_v2  ;;  %v6279_v26 = vsub.f32 %v6118_v51, %v6216_v59  ;;  %v6786_v2 = vld [vmem:[#allocation3 + $0x68] sm:$0xff]  ;;  %v16106_v51 = vld [vmem:[#allocation9 + $0x18] sm:$0xff]  ;;  %v6785_v59 = vld [vmem:[#allocation3 + $0x60] sm:$0xff] }
0x1c05   :  { %v12351_v23 = vpop.f32.mrf.mxu0  ;;  %v16096_v35 = vld [vmem:[#allocation2 + $0x400] sm:$0xff] }
0x1c06   :  { %6295 = vst.msk [vmem:[#allocation2 + $0x420] sm:$0xff] %vm321_vm0, %v6279_v26  ;;  %v6282_v43 = vsub.f32 %v6121_v30, %v12351_v23  ;;  %v16109_v26 = vld [vmem:[#allocation9 + $0x20] sm:$0xff]  ;;  %v6784_v30 = vld [vmem:[#allocation3 + $0x58] sm:$0xff]  ;;  %v16112_v23 = vld [vmem:[#allocation9 + $0x28] sm:$0xff] }
0x1c07   :  { %v6226_v14 = vpop.f32.mrf.mxu0  ;;  %v16084_v40 = vld [vmem:[#allocation2 + $0x418] sm:$0xff] }
0x1c08   :  { %6298 = vst.msk [vmem:[#allocation2 + $0x438] sm:$0xff] %vm321_vm0, %v6282_v43  ;;  %v6281_v41 = vsub.f32 %v6120_v15, %v6226_v14  ;;  %v6783_v43 = vld [vmem:[#allocation3 + $0x50] sm:$0xff]  ;;  %v6782_v14 = vld [vmem:[#allocation3 + $0x48] sm:$0xff] }
0x1c09   :  { %v12354_v37 = vpop.f32.mrf.mxu0  ;;  %v16088_v1 = vld [vmem:[#allocation2 + $0x410] sm:$0xff] }
0x1c0a   :  { %6297 = vst.msk [vmem:[#allocation2 + $0x430] sm:$0xff] %vm321_vm0, %v6281_v41  ;;  %v6284_v8 = vsub.f32 %v6123_v28, %v12354_v37  ;;  %v16115_v15 = vld [vmem:[#allocation9 + $0x30] sm:$0xff]  ;;  %v16118_v41 = vld [vmem:[#allocation9 + $0x38] sm:$0xff]  ;;  %v6781_v28 = vld [vmem:[#allocation3 + $0x40] sm:$0xff] }
0x1c0b   :  { %v6236_v6 = vpop.f32.mrf.mxu0  ;;  %v16076_v39 = vld [vmem:[#allocation2 + $0x428] sm:$0xff]  ;;  %v16121_v37 = vld [vmem:[#allocation9 + $0x40] sm:$0xff] }
0x1c0c   :  { %6300 = vst.msk [vmem:[#allocation2 + $0x448] sm:$0xff] %vm321_vm0, %v6284_v8  ;;  %v6283_v21 = vsub.f32 %v6122_v48, %v6236_v6  ;;  %v6780_v8 = vld [vmem:[#allocation3 + $0x38] sm:$0xff]  ;;  %v16124_v48 = vld [vmem:[#allocation9 + $0x48] sm:$0xff]  ;;  %v6779_v6 = vld [vmem:[#allocation3 + $0x30] sm:$0xff] }
0x1c0d   :  { %v12357_v53 = vpop.f32.mrf.mxu0  ;;  %v16080_v32 = vld [vmem:[#allocation2 + $0x420] sm:$0xff] }
0x1c0e   :  { %6299 = vst.msk [vmem:[#allocation2 + $0x440] sm:$0xff] %vm321_vm0, %v6283_v21  ;;  %v6286_v20 = vsub.f32 %v6125_v13, %v12357_v53  ;;  %v16127_v21 = vld [vmem:[#allocation9 + $0x50] sm:$0xff]  ;;  %v6778_v13 = vld [vmem:[#allocation3 + $0x28] sm:$0xff]  ;;  %v16130_v53 = vld [vmem:[#allocation9 + $0x58] sm:$0xff] }
0x1c0f   :  { %v6246_v12 = vpop.f32.mrf.mxu0  ;;  %v16068_v33 = vld [vmem:[#allocation2 + $0x438] sm:$0xff] }
0x1c10   :  { %6302 = vst.msk [vmem:[#allocation2 + $0x458] sm:$0xff] %vm321_vm0, %v6286_v20  ;;  %v6285_v5 = vsub.f32 %v6124_v47, %v6246_v12  ;;  %v6777_v20 = vld [vmem:[#allocation3 + $0x20] sm:$0xff]  ;;  %v6776_v12 = vld [vmem:[#allocation3 + $0x18] sm:$0xff] }
0x1c11   :  { %v12360_v19 = vpop.f32.mrf.mxu0  ;;  %v16072_v63 = vld [vmem:[#allocation2 + $0x430] sm:$0xff]  ;;  %v16133_v47 = vld [vmem:[#allocation9 + $0x60] sm:$0xff] }
0x1c12   :  { %6301 = vst.msk [vmem:[#allocation2 + $0x450] sm:$0xff] %vm321_vm0, %v6285_v5  ;;  %v6288_v36 = vsub.f32 %v6127_v44, %v12360_v19  ;;  %v16136_v5 = vld [vmem:[#allocation9 + $0x68] sm:$0xff]  ;;  %v6775_v44 = vld [vmem:[#allocation3 + $0x10] sm:$0xff] }
0x1c13   :  { %v6256_v52 = vpop.f32.mrf.mxu0  ;;  %v16060_v46 = vld [vmem:[#allocation2 + $0x448] sm:$0xff]  ;;  %v16139_v19 = vld [vmem:[#allocation9 + $0x70] sm:$0xff] }
0x1c14   :  { %6304 = vst.msk [vmem:[#allocation2 + $0x468] sm:$0xff] %vm321_vm0, %v6288_v36  ;;  %v6287_v34 = vsub.f32 %v6126_v49, %v6256_v52  ;;  %v6774_v36 = vld [vmem:[#allocation3 + $0x8] sm:$0xff]  ;;  %v16142_v49 = vld [vmem:[#allocation9 + $0x78] sm:$0xff]  ;;  %v6773_v52 = vld [vmem:[#allocation3] sm:$0xff] }
0x1c15   :  { %v12363_v55 = vpop.f32.mrf.mxu0  ;;  %v16064_v18 = vld [vmem:[#allocation2 + $0x440] sm:$0xff] }
0x1c16   :  { %6303 = vst.msk [vmem:[#allocation2 + $0x460] sm:$0xff] %vm321_vm0, %v6287_v34  ;;  %v6290_v16 = vsub.f32 %v6129_v57, %v12363_v55  ;;  %v16145_v34 = vld [vmem:[#allocation9] sm:$0xff]  ;;  %v6324_v57 = vmul.f32 2.0, %v16092_v62 }
0x1c17   :  { %v6266_v22 = vpop.f32.mrf.mxu0  ;;  %v16052_v17 = vld [vmem:[#allocation2 + $0x458] sm:$0xff] }
0x1c18   :  { %6306 = vst.msk [vmem:[#allocation2 + $0x478] sm:$0xff] %vm321_vm0, %v6290_v16  ;;  %v6289_v54 = vsub.f32 %v6128_v38, %v6266_v22  ;;  %v6323_v38 = vmul.f32 2.0, %v16096_v35 }
0x1c19   :  { %v16056_v0 = vld [vmem:[#allocation2 + $0x450] sm:$0xff] }
0x1c1a   :  { %6305 = vst.msk [vmem:[#allocation2 + $0x470] sm:$0xff] %vm321_vm0, %v6289_v54 }
0x1c1b   :  { %v16044_v10 = vld [vmem:[#allocation2 + $0x468] sm:$0xff] }
0x1c1d   :  { %v16048_v9 = vld [vmem:[#allocation2 + $0x460] sm:$0xff] }
0x1c1f   :  { %v16036_v31 = vld [vmem:[#allocation2 + $0x478] sm:$0xff] }
0x1c20   :  { %12364 = vmatprep.subr.mxu1 %v16036_v31 }
0x1c21   :  { %12365 = vmatpush3.msra.mxu1 %v16036_v31  ;;  %v16040_v7 = vld [vmem:[#allocation2 + $0x470] sm:$0xff] }
0x1c22   :  { %12366 = vmatprep.subr.mxu1 %v16040_v7 }
0x1c23   :  { %12367 = vmatpush3.msra.mxu1 %v16040_v7 }
0x1c24   :  { %12368 = vmatprep.subr.mxu1 %v16044_v10 }
0x1c25   :  { %12369 = vmatpush3.msra.mxu1 %v16044_v10 }
0x1c26   :  { %12370 = vmatprep.subr.mxu1 %v16048_v9 }
0x1c27   :  { %12371 = vmatpush3.msra.mxu1 %v16048_v9 }
0x1c28   :  { %12372 = vmatprep.subr.mxu1 %v16052_v17 }
0x1c29   :  { %12373 = vmatpush3.msra.mxu1 %v16052_v17 }
0x1c2a   :  { %12374 = vmatprep.subr.mxu1 %v16056_v0 }
0x1c2b   :  { %12375 = vmatpush3.msra.mxu1 %v16056_v0 }
0x1c2c   :  { %12376 = vmatprep.subr.mxu1 %v16060_v46 }
0x1c2d   :  { %12377 = vmatpush3.msra.mxu1 %v16060_v46 }
0x1c2e   :  { %12378 = vmatprep.subr.mxu1 %v16064_v18 }
0x1c2f   :  { %12379 = vmatpush3.msra.mxu1 %v16064_v18 }
0x1c30   :  { %12380 = vmatprep.subr.mxu1 %v16068_v33 }
0x1c31   :  { %12381 = vmatpush3.msra.mxu1 %v16068_v33 }
0x1c32   :  { %12382 = vmatprep.subr.mxu1 %v16072_v63 }
0x1c33   :  { %12383 = vmatpush3.msra.mxu1 %v16072_v63 }
0x1c34   :  { %12384 = vmatprep.subr.mxu1 %v16076_v39 }
0x1c35   :  { %12385 = vmatpush3.msra.mxu1 %v16076_v39 }
0x1c36   :  { %12386 = vmatprep.subr.mxu1 %v16080_v32 }
0x1c37   :  { %12387 = vmatpush3.msra.mxu1 %v16080_v32 }
0x1c38   :  { %12388 = vmatprep.subr.mxu1 %v16084_v40 }
0x1c39   :  { %12389 = vmatpush3.msra.mxu1 %v16084_v40 }
0x1c3a   :  { %12390 = vmatprep.subr.mxu1 %v16088_v1 }
0x1c3b   :  { %12391 = vmatpush3.msra.mxu1 %v16088_v1 }
0x1c3c   :  { %12392 = vmatprep.subr.mxu1 %v16092_v62 }
0x1c3d   :  { %12393 = vmatpush3.msra.mxu1 %v16092_v62 }
0x1c3e   :  { %12394 = vmatprep.subr.mxu1 %v16096_v35 }
0x1c3f   :  { %12395 = vmatpush3.msra.mxu1 %v16096_v35 }
0x1c40   :  { %12397 = vmatmul.mubr.f32.vlgmr.msra.gmra.mxu1 %v16100_v61  ;;  %12476 = vmatprep.subr.mxu1 %v6788_v58 }
0x1c41   :  { %12477 = vmatpush3.msra.mxu1 %v6788_v58  ;;  %12399 = vmatprep.mubr.f32.mxu1 %v16103_v11  ;;  %v6326_v58 = vmul.f32 2.0, %v16084_v40 }
0x1c42   :  { %12478 = vmatprep.subr.mxu1 %v6787_v27 }
0x1c43   :  { %12479 = vmatpush3.msra.mxu1 %v6787_v27 }
0x1c44   :  { %12400 = vmatmul.mubr.f32.gmra.mxu1 %v16106_v51  ;;  %12480 = vmatprep.subr.mxu1 %v6786_v2 }
0x1c45   :  { %12481 = vmatpush3.msra.mxu1 %v6786_v2  ;;  %12402 = vmatprep.mubr.f32.mxu1 %v16109_v26 }
0x1c46   :  { %12482 = vmatprep.subr.mxu1 %v6785_v59 }
0x1c47   :  { %12483 = vmatpush3.msra.mxu1 %v6785_v59  ;;  %v6325_v59 = vmul.f32 2.0, %v16088_v1 }
0x1c48   :  { %12403 = vmatmul.mubr.f32.gmra.mxu1 %v16112_v23  ;;  %12484 = vmatprep.subr.mxu1 %v6784_v30 }
0x1c49   :  { %12485 = vmatpush3.msra.mxu1 %v6784_v30  ;;  %12405 = vmatprep.mubr.f32.mxu1 %v16115_v15 }
0x1c4a   :  { %12486 = vmatprep.subr.mxu1 %v6783_v43 }
0x1c4b   :  { %12487 = vmatpush3.msra.mxu1 %v6783_v43  ;;  %v6328_v43 = vmul.f32 2.0, %v16076_v39 }
0x1c4c   :  { %12406 = vmatmul.mubr.f32.gmra.mxu1 %v16118_v41  ;;  %12488 = vmatprep.subr.mxu1 %v6782_v14 }
0x1c4d   :  { %12489 = vmatpush3.msra.mxu1 %v6782_v14  ;;  %12408 = vmatprep.mubr.f32.mxu1 %v16121_v37 }
0x1c4e   :  { %12490 = vmatprep.subr.mxu1 %v6781_v28 }
0x1c4f   :  { %12491 = vmatpush3.msra.mxu1 %v6781_v28  ;;  %v6327_v28 = vmul.f32 2.0, %v16080_v32 }
0x1c50   :  { %12409 = vmatmul.mubr.f32.gmra.mxu1 %v16124_v48  ;;  %12492 = vmatprep.subr.mxu1 %v6780_v8 }
0x1c51   :  { %12493 = vmatpush3.msra.mxu1 %v6780_v8  ;;  %12411 = vmatprep.mubr.f32.mxu1 %v16127_v21 }
0x1c52   :  { %12494 = vmatprep.subr.mxu1 %v6779_v6 }
0x1c53   :  { %12495 = vmatpush3.msra.mxu1 %v6779_v6  ;;  %v6330_v6 = vmul.f32 2.0, %v16068_v33 }
0x1c54   :  { %12412 = vmatmul.mubr.f32.gmra.mxu1 %v16130_v53  ;;  %12496 = vmatprep.subr.mxu1 %v6778_v13 }
0x1c55   :  { %12497 = vmatpush3.msra.mxu1 %v6778_v13  ;;  %12414 = vmatprep.mubr.f32.mxu1 %v16133_v47 }
0x1c56   :  { %12498 = vmatprep.subr.mxu1 %v6777_v20 }
0x1c57   :  { %12499 = vmatpush3.msra.mxu1 %v6777_v20  ;;  %v6329_v20 = vmul.f32 2.0, %v16072_v63 }
0x1c58   :  { %12415 = vmatmul.mubr.f32.gmra.mxu1 %v16136_v5  ;;  %12500 = vmatprep.subr.mxu1 %v6776_v12 }
0x1c59   :  { %12501 = vmatpush3.msra.mxu1 %v6776_v12  ;;  %12417 = vmatprep.mubr.f32.mxu1 %v16139_v19 }
0x1c5a   :  { %12502 = vmatprep.subr.mxu1 %v6775_v44 }
0x1c5b   :  { %12503 = vmatpush3.msra.mxu1 %v6775_v44  ;;  %v6332_v44 = vmul.f32 2.0, %v16060_v46 }
0x1c5c   :  { %12418 = vmatmul.mubr.f32.gmra.mxu1 %v16142_v49  ;;  %12504 = vmatprep.subr.mxu1 %v6774_v36 }
0x1c5d   :  { %12505 = vmatpush3.msra.mxu1 %v6774_v36  ;;  %12508 = vmatprep.mubr.f32.mxu1 %v16145_v34 }
0x1c5e   :  { %12506 = vmatprep.subr.mxu1 %v6773_v52 }
0x1c5f   :  { %12507 = vmatpush3.msra.mxu1 %v6773_v52  ;;  %v6331_v52 = vmul.f32 2.0, %v16064_v18 }
0x1c60   :  { %12509 = vmatmul.mubr.f32.vlgmr.msra.gmra.mxu1 %v16100_v61 }
0x1c61   :  { %12511 = vmatprep.mubr.f32.mxu1 %v16103_v11 }
0x1c64   :  { %12512 = vmatmul.mubr.f32.gmra.mxu1 %v16106_v51 }
0x1c65   :  { %12514 = vmatprep.mubr.f32.mxu1 %v16109_v26 }
0x1c68   :  { %12515 = vmatmul.mubr.f32.gmra.mxu1 %v16112_v23 }
0x1c69   :  { %12517 = vmatprep.mubr.f32.mxu1 %v16115_v15 }
0x1c6c   :  { %12518 = vmatmul.mubr.f32.gmra.mxu1 %v16118_v41 }
0x1c6d   :  { %12520 = vmatprep.mubr.f32.mxu1 %v16121_v37 }
0x1c70   :  { %12521 = vmatmul.mubr.f32.gmra.mxu1 %v16124_v48 }
0x1c71   :  { %12523 = vmatprep.mubr.f32.mxu1 %v16127_v21 }
0x1c74   :  { %12524 = vmatmul.mubr.f32.gmra.mxu1 %v16130_v53 }
0x1c75   :  { %12526 = vmatprep.mubr.f32.mxu1 %v16133_v47 }
0x1c78   :  { %12527 = vmatmul.mubr.f32.gmra.mxu1 %v16136_v5 }
0x1c79   :  { %12529 = vmatprep.mubr.f32.mxu1 %v16139_v19 }
0x1c7c   :  { %12530 = vmatmul.mubr.f32.gmra.mxu1 %v16142_v49 }
0x1c7d   :  { %12620 = vmatprep.mubr.f32.mxu1 %v16145_v34 }
0x1d00   :  { %v12398_v55 = vpop.f32.mrf.mxu1 }
0x1d01   :  { %v6485_v16 = vsub.f32 %v6324_v57, %v12398_v55  ;;  %v6334_v55 = vmul.f32 2.0, %v16052_v17 }
0x1d02   :  { %v6405_v22 = vpop.f32.mrf.mxu1 }
0x1d03   :  { %6501 = vst.msk [vmem:[#allocation2 + $0x488] sm:$0xff] %vm321_vm0, %v6485_v16  ;;  %v6484_v54 = vsub.f32 %v6323_v38, %v6405_v22  ;;  %v6333_v38 = vmul.f32 2.0, %v16056_v0  ;;  %v6790_v0 = vld [vmem:[#allocation2 + $0x88] sm:$0xff] }
0x1d04   :  { %v12401_v27 = vpop.f32.mrf.mxu1 }
0x1d05   :  { %6500 = vst.msk [vmem:[#allocation2 + $0x480] sm:$0xff] %vm321_vm0, %v6484_v54  ;;  %v6487_v2 = vsub.f32 %v6326_v58, %v12401_v27  ;;  %v6336_v54 = vmul.f32 2.0, %v16044_v10  ;;  %v6335_v27 = vmul.f32 2.0, %v16048_v9  ;;  %v6806_v9 = vmul.f32 %v6790_v0, %v14539_v60 }
0x1d06   :  { %v6415_v30 = vpop.f32.mrf.mxu1 }
0x1d07   :  { %6503 = vst.msk [vmem:[#allocation2 + $0x498] sm:$0xff] %vm321_vm0, %v6487_v2  ;;  %v6486_v62 = vsub.f32 %v6325_v59, %v6415_v30  ;;  %v6338_v59 = vmul.f32 2.0, %v16036_v31 }
0x1d08   :  { %v12404_v14 = vpop.f32.mrf.mxu1 }
0x1d09   :  { %6502 = vst.msk [vmem:[#allocation2 + $0x490] sm:$0xff] %vm321_vm0, %v6486_v62  ;;  %v6489_v35 = vsub.f32 %v6328_v43, %v12404_v14  ;;  %v6337_v43 = vmul.f32 2.0, %v16040_v7  ;;  %v6789_v14 = vld [vmem:[#allocation2 + $0x80] sm:$0xff] }
0x1d0a   :  { %v6425_v8 = vpop.f32.mrf.mxu1  ;;  %v6805_v31 = vmul.f32 %v6789_v14, %v14539_v60 }
0x1d0b   :  { %6505 = vst.msk [vmem:[#allocation2 + $0x4a8] sm:$0xff] %vm321_vm0, %v6489_v35  ;;  %v6488_v40 = vsub.f32 %v6327_v28, %v6425_v8  ;;  %v6792_v8 = vld [vmem:[#allocation2 + $0x98] sm:$0xff] }
0x1d0c   :  { %v12407_v13 = vpop.f32.mrf.mxu1  ;;  %v6808_v7 = vmul.f32 %v6792_v8, %v14539_v60  ;;  %v6800_v8 = vld [vmem:[#allocation2 + $0xd8] sm:$0xff] }
0x1d0d   :  { %6504 = vst.msk [vmem:[#allocation2 + $0x4a0] sm:$0xff] %vm321_vm0, %v6488_v40  ;;  %v6491_v1 = vsub.f32 %v6330_v6, %v12407_v13  ;;  %v6791_v13 = vld [vmem:[#allocation2 + $0x90] sm:$0xff] }
0x1d0e   :  { %v6435_v12 = vpop.f32.mrf.mxu1 }
0x1d0f   :  { %6507 = vst.msk [vmem:[#allocation2 + $0x4b8] sm:$0xff] %vm321_vm0, %v6491_v1  ;;  %v6490_v39 = vsub.f32 %v6329_v20, %v6435_v12  ;;  %v6794_v12 = vld [vmem:[#allocation2 + $0xa8] sm:$0xff] }
0x1d10   :  { %v12410_v36 = vpop.f32.mrf.mxu1 }
0x1d11   :  { %6506 = vst.msk [vmem:[#allocation2 + $0x4b0] sm:$0xff] %vm321_vm0, %v6490_v39  ;;  %v6493_v32 = vsub.f32 %v6332_v44, %v12410_v36  ;;  %v6807_v44 = vmul.f32 %v6791_v13, %v14539_v60 }
0x1d12   :  { %v6445_v57 = vpop.f32.mrf.mxu1 }
0x1d13   :  { %6509 = vst.msk [vmem:[#allocation2 + $0x4c8] sm:$0xff] %vm321_vm0, %v6493_v32  ;;  %v6492_v33 = vsub.f32 %v6331_v52, %v6445_v57  ;;  %v6793_v52 = vld [vmem:[#allocation2 + $0xa0] sm:$0xff] }
0x1d14   :  { %v12413_v16 = vpop.f32.mrf.mxu1 }
0x1d15   :  { %6508 = vst.msk [vmem:[#allocation2 + $0x4c0] sm:$0xff] %vm321_vm0, %v6492_v33  ;;  %v6495_v63 = vsub.f32 %v6334_v55, %v12413_v16  ;;  %v6810_v33 = vmul.f32 %v6794_v12, %v14539_v60 }
0x1d16   :  { %v6455_v22 = vpop.f32.mrf.mxu1 }
0x1d17   :  { %6511 = vst.msk [vmem:[#allocation2 + $0x4d8] sm:$0xff] %vm321_vm0, %v6495_v63  ;;  %v6494_v46 = vsub.f32 %v6333_v38, %v6455_v22  ;;  %v6796_v63 = vld [vmem:[#allocation2 + $0xb8] sm:$0xff]  ;;  %v6809_v22 = vmul.f32 %v6793_v52, %v14539_v60 }
0x1d18   :  { %v12416_v58 = vpop.f32.mrf.mxu1 }
0x1d19   :  { %6510 = vst.msk [vmem:[#allocation2 + $0x4d0] sm:$0xff] %vm321_vm0, %v6494_v46  ;;  %v6497_v18 = vsub.f32 %v6336_v54, %v12416_v58  ;;  %v6795_v58 = vld [vmem:[#allocation2 + $0xb0] sm:$0xff] }
0x1d1a   :  { %v6465_v2 = vpop.f32.mrf.mxu1  ;;  %v6811_v0 = vmul.f32 %v6795_v58, %v14539_v60  ;;  %v16238_v13 = vld [vmem:[#allocation2 + $0x4c8] sm:$0xff]  ;;  %v6804_v58 = vld [vmem:[#allocation2 + $0xf8] sm:$0xff] }
0x1d1b   :  { %6513 = vst.msk [vmem:[#allocation2 + $0x4e8] sm:$0xff] %vm321_vm0, %v6497_v18  ;;  %v6496_v17 = vsub.f32 %v6335_v27, %v6465_v2  ;;  %v6812_v27 = vmul.f32 %v6796_v63, %v14539_v60 }
0x1d1c   :  { %v12419_v30 = vpop.f32.mrf.mxu1 }
0x1d1d   :  { %6512 = vst.msk [vmem:[#allocation2 + $0x4e0] sm:$0xff] %vm321_vm0, %v6496_v17  ;;  %v6499_v62 = vsub.f32 %v6338_v59, %v12419_v30  ;;  %v6798_v59 = vld [vmem:[#allocation2 + $0xc8] sm:$0xff] }
0x1d1e   :  { %v6475_v10 = vpop.f32.mrf.mxu1 }
0x1d1f   :  { %6515 = vst.msk [vmem:[#allocation2 + $0x4f8] sm:$0xff] %vm321_vm0, %v6499_v62  ;;  %v6498_v35 = vsub.f32 %v6337_v43, %v6475_v10  ;;  %v16226_v43 = vld [vmem:[#allocation2 + $0x4d8] sm:$0xff]  ;;  %v6797_v10 = vld [vmem:[#allocation2 + $0xc0] sm:$0xff] }
0x1d20   :  { %v12510_v28 = vpop.f32.mrf.mxu1 }
0x1d21   :  { %6514 = vst.msk [vmem:[#allocation2 + $0x4f0] sm:$0xff] %vm321_vm0, %v6498_v35  ;;  %v6893_v40 = vadd.f32 %v12510_v28, %v6806_v9  ;;  %v6814_v35 = vmul.f32 %v6798_v59, %v14539_v60  ;;  %v16232_v28 = vld [vmem:[#allocation2 + $0x4d0] sm:$0xff]  ;;  %v16262_v59 = vld [vmem:[#allocation2 + $0x4a8] sm:$0xff] }
0x1d22   :  { %v6887_v6 = vpop.f32.mrf.mxu1  ;;  %v16214_v54 = vld [vmem:[#allocation2 + $0x4e8] sm:$0xff] }
0x1d23   :  { %6967 = vst.msk [vmem:[#allocation3 + $0x8] sm:$0xff] %vm321_vm0, %v6893_v40  ;;  %v6888_v1 = vadd.f32 %v6887_v6, %v6805_v31  ;;  %v6813_v31 = vmul.f32 %v6797_v10, %v14539_v60 }
0x1d24   :  { %v12513_v20 = vpop.f32.mrf.mxu1  ;;  %v16220_v17 = vld [vmem:[#allocation2 + $0x4e0] sm:$0xff] }
0x1d25   :  { %6966 = vst.msk [vmem:[#allocation3] sm:$0xff] %vm321_vm0, %v6888_v1  ;;  %v6903_v39 = vadd.f32 %v12513_v20, %v6808_v7  ;;  %v6799_v1 = vld [vmem:[#allocation2 + $0xd0] sm:$0xff]  ;;  %v6816_v20 = vmul.f32 %v6800_v8, %v14539_v60 }
0x1d26   :  { %v6897_v36 = vpop.f32.mrf.mxu1  ;;  %v16202_v32 = vld [vmem:[#allocation2 + $0x4f8] sm:$0xff]  ;;  %v6815_v52 = vmul.f32 %v6799_v1, %v14539_v60  ;;  %v16288_v1 = vld [vmem:[#allocation2 + $0x480] sm:$0xff] }
0x1d27   :  { %6969 = vst.msk [vmem:[#allocation3 + $0x18] sm:$0xff] %vm321_vm0, %v6903_v39  ;;  %v6898_v57 = vadd.f32 %v6897_v36, %v6807_v44  ;;  %12420 = vmatprep.subr.mxu0 %v16202_v32  ;;  %v16244_v39 = vld [vmem:[#allocation2 + $0x4c0] sm:$0xff]  ;;  %v6802_v44 = vld [vmem:[#allocation2 + $0xe8] sm:$0xff] }
0x1d28   :  { %12421 = vmatpush3.msra.mxu0 %v16202_v32  ;;  %v12516_v55 = vpop.f32.mrf.mxu1  ;;  %v16208_v16 = vld [vmem:[#allocation2 + $0x4f0] sm:$0xff] }
0x1d29   :  { %6968 = vst.msk [vmem:[#allocation3 + $0x10] sm:$0xff] %vm321_vm0, %v6898_v57  ;;  %v6913_v38 = vadd.f32 %v12516_v55, %v6810_v33  ;;  %12422 = vmatprep.subr.mxu0 %v16208_v16  ;;  %v16250_v33 = vld [vmem:[#allocation2 + $0x4b8] sm:$0xff]  ;;  %v6801_v55 = vld [vmem:[#allocation2 + $0xe0] sm:$0xff] }
0x1d2a   :  { %12423 = vmatpush3.msra.mxu0 %v16208_v16  ;;  %v6907_v46 = vpop.f32.mrf.mxu1 }
0x1d2b   :  { %6971 = vst.msk [vmem:[#allocation3 + $0x28] sm:$0xff] %vm321_vm0, %v6913_v38  ;;  %v6908_v18 = vadd.f32 %v6907_v46, %v6809_v22  ;;  %12424 = vmatprep.subr.mxu0 %v16214_v54  ;;  %v6818_v38 = vmul.f32 %v6802_v44, %v14539_v60  ;;  %v16256_v46 = vld [vmem:[#allocation2 + $0x4b0] sm:$0xff] }
0x1d2c   :  { %12425 = vmatpush3.msra.mxu0 %v16214_v54  ;;  %v12519_v2 = vpop.f32.mrf.mxu1 }
0x1d2d   :  { %6970 = vst.msk [vmem:[#allocation3 + $0x20] sm:$0xff] %vm321_vm0, %v6908_v18  ;;  %v6923_v30 = vadd.f32 %v12519_v2, %v6812_v27  ;;  %12426 = vmatprep.subr.mxu0 %v16220_v17  ;;  %v6817_v27 = vmul.f32 %v6801_v55, %v14539_v60 }
0x1d2e   :  { %12427 = vmatpush3.msra.mxu0 %v16220_v17  ;;  %v6917_v62 = vpop.f32.mrf.mxu1 }
0x1d2f   :  { %6973 = vst.msk [vmem:[#allocation3 + $0x38] sm:$0xff] %vm321_vm0, %v6923_v30  ;;  %v6918_v14 = vadd.f32 %v6917_v62, %v6811_v0  ;;  %12428 = vmatprep.subr.mxu0 %v16226_v43  ;;  %v6803_v30 = vld [vmem:[#allocation2 + $0xf0] sm:$0xff]  ;;  %v6820_v62 = vmul.f32 %v6804_v58, %v14539_v60 }
0x1d30   :  { %12429 = vmatpush3.msra.mxu0 %v16226_v43  ;;  %v12522_v9 = vpop.f32.mrf.mxu1 }
0x1d31   :  { %6972 = vst.msk [vmem:[#allocation3 + $0x30] sm:$0xff] %vm321_vm0, %v6918_v14  ;;  %v6933_v40 = vadd.f32 %v12522_v9, %v6814_v35  ;;  %12430 = vmatprep.subr.mxu0 %v16232_v28  ;;  %v16268_v14 = vld [vmem:[#allocation2 + $0x4a0] sm:$0xff]  ;;  %v6819_v9 = vmul.f32 %v6803_v30, %v14539_v60  ;;  %v16284_v60 = vld [vmem:[#allocation2 + $0x488] sm:$0xff] }
0x1d32   :  { %12431 = vmatpush3.msra.mxu0 %v16232_v28  ;;  %v6927_v6 = vpop.f32.mrf.mxu1  ;;  %v6982_v30 = vld [vmem:[#allocation3] sm:$0xff] }
0x1d33   :  { %6975 = vst.msk [vmem:[#allocation3 + $0x48] sm:$0xff] %vm321_vm0, %v6933_v40  ;;  %v6928_v7 = vadd.f32 %v6927_v6, %v6813_v31  ;;  %12432 = vmatprep.subr.mxu0 %v16238_v13  ;;  %v16274_v40 = vld [vmem:[#allocation2 + $0x498] sm:$0xff]  ;;  %v16279_v6 = vld [vmem:[#allocation2 + $0x490] sm:$0xff] }
0x1d34   :  { %12433 = vmatpush3.msra.mxu0 %v16238_v13  ;;  %v12525_v12 = vpop.f32.mrf.mxu1  ;;  %v6986_v58 = vld [vmem:[#allocation3 + $0x20] sm:$0xff] }
0x1d35   :  { %6974 = vst.msk [vmem:[#allocation3 + $0x40] sm:$0xff] %vm321_vm0, %v6928_v7  ;;  %v6943_v36 = vadd.f32 %v12525_v12, %v6816_v20  ;;  %12434 = vmatprep.subr.mxu0 %v16244_v39 }
0x1d36   :  { %12435 = vmatpush3.msra.mxu0 %v16244_v39  ;;  %v6937_v57 = vpop.f32.mrf.mxu1 }
0x1d37   :  { %6977 = vst.msk [vmem:[#allocation3 + $0x58] sm:$0xff] %vm321_vm0, %v6943_v36  ;;  %v6938_v63 = vadd.f32 %v6937_v57, %v6815_v52  ;;  %12436 = vmatprep.subr.mxu0 %v16250_v33 }
0x1d38   :  { %12437 = vmatpush3.msra.mxu0 %v16250_v33  ;;  %v12528_v22 = vpop.f32.mrf.mxu1 }
0x1d39   :  { %6976 = vst.msk [vmem:[#allocation3 + $0x50] sm:$0xff] %vm321_vm0, %v6938_v63  ;;  %v6953_v18 = vadd.f32 %v12528_v22, %v6818_v38  ;;  %12438 = vmatprep.subr.mxu0 %v16256_v46  ;;  %v6989_v63 = vld [vmem:[#allocation3 + $0x38] sm:$0xff]  ;;  %v6988_v38 = vld [vmem:[#allocation3 + $0x30] sm:$0xff]  ;;  %v6987_v22 = vld [vmem:[#allocation3 + $0x28] sm:$0xff] }
0x1d3a   :  { %12439 = vmatpush3.msra.mxu0 %v16256_v46  ;;  %v6947_v2 = vpop.f32.mrf.mxu1  ;;  %v6991_v57 = vld [vmem:[#allocation3 + $0x48] sm:$0xff] }
0x1d3b   :  { %6979 = vst.msk [vmem:[#allocation3 + $0x68] sm:$0xff] %vm321_vm0, %v6953_v18  ;;  %v6948_v0 = vadd.f32 %v6947_v2, %v6817_v27  ;;  %12440 = vmatprep.subr.mxu0 %v16262_v59  ;;  %v6985_v18 = vld [vmem:[#allocation3 + $0x18] sm:$0xff]  ;;  %v6984_v27 = vld [vmem:[#allocation3 + $0x10] sm:$0xff]  ;;  %v6983_v2 = vld [vmem:[#allocation3 + $0x8] sm:$0xff] }
0x1d3c   :  { %12441 = vmatpush3.msra.mxu0 %v16262_v59  ;;  %v12531_v10 = vpop.f32.mrf.mxu1  ;;  %v6990_v55 = vld [vmem:[#allocation3 + $0x40] sm:$0xff] }
0x1d3d   :  { %6978 = vst.msk [vmem:[#allocation3 + $0x60] sm:$0xff] %vm321_vm0, %v6948_v0  ;;  %v6963_v35 = vadd.f32 %v12531_v10, %v6820_v62  ;;  %12442 = vmatprep.subr.mxu0 %v16268_v14  ;;  %v6537_v62 = vmul.f32 2.0, %v16262_v59 }
0x1d3e   :  { %12443 = vmatpush3.msra.mxu0 %v16268_v14  ;;  %v6957_v8 = vpop.f32.mrf.mxu1  ;;  %v6993_v36 = vld [vmem:[#allocation3 + $0x58] sm:$0xff] }
0x1d3f   :  { %6981 = vst.msk [vmem:[#allocation3 + $0x78] sm:$0xff] %vm321_vm0, %v6963_v35  ;;  %v6958_v31 = vadd.f32 %v6957_v8, %v6819_v9  ;;  %12444 = vmatprep.subr.mxu0 %v16274_v40  ;;  %v6536_v9 = vmul.f32 2.0, %v16268_v14 }
0x1d40   :  { %12445 = vmatpush3.msra.mxu0 %v16274_v40  ;;  %v6992_v52 = vld [vmem:[#allocation3 + $0x50] sm:$0xff] }
0x1d41   :  { %6980 = vst.msk [vmem:[#allocation3 + $0x70] sm:$0xff] %vm321_vm0, %v6958_v31  ;;  %12446 = vmatprep.subr.mxu0 %v16279_v6  ;;  %v6539_v31 = vmul.f32 2.0, %v16250_v33 }
0x1d42   :  { %12447 = vmatpush3.msra.mxu0 %v16279_v6  ;;  %v6995_v12 = vld [vmem:[#allocation3 + $0x68] sm:$0xff] }
0x1d43   :  { %12448 = vmatprep.subr.mxu0 %v16284_v60 }
0x1d44   :  { %12449 = vmatpush3.msra.mxu0 %v16284_v60  ;;  %v6994_v44 = vld [vmem:[#allocation3 + $0x60] sm:$0xff] }
0x1d45   :  { %12450 = vmatprep.subr.mxu0 %v16288_v1 }
0x1d46   :  { %12451 = vmatpush3.msra.mxu0 %v16288_v1  ;;  %v6997_v7 = vld [vmem:[#allocation3 + $0x78] sm:$0xff] }
0x1d47   :  { %12453 = vmatmul.mubr.f32.vlgmr.msra.gmra.mxu0 %v16100_v61  ;;  %12532 = vmatprep.subr.mxu0 %v6997_v7 }
0x1d48   :  { %12533 = vmatpush3.msra.mxu0 %v6997_v7  ;;  %v6996_v20 = vld [vmem:[#allocation3 + $0x70] sm:$0xff]  ;;  %12455 = vmatprep.mubr.f32.mxu0 %v16103_v11 }
0x1d49   :  { %12534 = vmatprep.subr.mxu0 %v6996_v20 }
0x1d4a   :  { %12535 = vmatpush3.msra.mxu0 %v6996_v20  ;;  %v6541_v20 = vmul.f32 2.0, %v16238_v13 }
0x1d4b   :  { %12456 = vmatmul.mubr.f32.gmra.mxu0 %v16106_v51  ;;  %12536 = vmatprep.subr.mxu0 %v6995_v12 }
0x1d4c   :  { %12537 = vmatpush3.msra.mxu0 %v6995_v12  ;;  %12458 = vmatprep.mubr.f32.mxu0 %v16109_v26 }
0x1d4d   :  { %12538 = vmatprep.subr.mxu0 %v6994_v44 }
0x1d4e   :  { %12539 = vmatpush3.msra.mxu0 %v6994_v44  ;;  %v6540_v44 = vmul.f32 2.0, %v16244_v39 }
0x1d4f   :  { %12459 = vmatmul.mubr.f32.gmra.mxu0 %v16112_v23  ;;  %12540 = vmatprep.subr.mxu0 %v6993_v36 }
0x1d50   :  { %12541 = vmatpush3.msra.mxu0 %v6993_v36  ;;  %12461 = vmatprep.mubr.f32.mxu0 %v16115_v15 }
0x1d51   :  { %12542 = vmatprep.subr.mxu0 %v6992_v52 }
0x1d52   :  { %12543 = vmatpush3.msra.mxu0 %v6992_v52  ;;  %v6543_v52 = vmul.f32 2.0, %v16226_v43 }
0x1d53   :  { %12462 = vmatmul.mubr.f32.gmra.mxu0 %v16118_v41  ;;  %12544 = vmatprep.subr.mxu0 %v6991_v57 }
0x1d54   :  { %12545 = vmatpush3.msra.mxu0 %v6991_v57  ;;  %12464 = vmatprep.mubr.f32.mxu0 %v16121_v37 }
0x1d55   :  { %12546 = vmatprep.subr.mxu0 %v6990_v55 }
0x1d56   :  { %12547 = vmatpush3.msra.mxu0 %v6990_v55  ;;  %v6542_v55 = vmul.f32 2.0, %v16232_v28  ;;  %v6999_v28 = vld [vmem:[#allocation2 + $0x108] sm:$0xff] }
0x1d57   :  { %12465 = vmatmul.mubr.f32.gmra.mxu0 %v16124_v48  ;;  %12548 = vmatprep.subr.mxu0 %v6989_v63 }
0x1d58   :  { %12549 = vmatpush3.msra.mxu0 %v6989_v63  ;;  %12467 = vmatprep.mubr.f32.mxu0 %v16127_v21 }
0x1d59   :  { %12550 = vmatprep.subr.mxu0 %v6988_v38 }
0x1d5a   :  { %12551 = vmatpush3.msra.mxu0 %v6988_v38  ;;  %v6545_v38 = vmul.f32 2.0, %v16214_v54 }
0x1d5b   :  { %12468 = vmatmul.mubr.f32.gmra.mxu0 %v16130_v53  ;;  %12552 = vmatprep.subr.mxu0 %v6987_v22 }
0x1d5c   :  { %12553 = vmatpush3.msra.mxu0 %v6987_v22  ;;  %12470 = vmatprep.mubr.f32.mxu0 %v16133_v47 }
0x1d5d   :  { %12554 = vmatprep.subr.mxu0 %v6986_v58 }
0x1d5e   :  { %12555 = vmatpush3.msra.mxu0 %v6986_v58  ;;  %v6544_v58 = vmul.f32 2.0, %v16220_v17  ;;  %v7015_v17 = vmul.f32 %v6999_v28, %v14702_v50 }
0x1d5f   :  { %12471 = vmatmul.mubr.f32.gmra.mxu0 %v16136_v5  ;;  %12556 = vmatprep.subr.mxu0 %v6985_v18 }
0x1d60   :  { %12557 = vmatpush3.msra.mxu0 %v6985_v18  ;;  %12473 = vmatprep.mubr.f32.mxu0 %v16139_v19 }
0x1d61   :  { %12558 = vmatprep.subr.mxu0 %v6984_v27 }
0x1d62   :  { %12559 = vmatpush3.msra.mxu0 %v6984_v27  ;;  %v6547_v27 = vmul.f32 2.0, %v16202_v32 }
0x1d63   :  { %12474 = vmatmul.mubr.f32.gmra.mxu0 %v16142_v49  ;;  %12560 = vmatprep.subr.mxu0 %v6983_v2 }
0x1d64   :  { %12561 = vmatpush3.msra.mxu0 %v6983_v2  ;;  %12564 = vmatprep.mubr.f32.mxu0 %v16145_v34 }
0x1d65   :  { %12562 = vmatprep.subr.mxu0 %v6982_v30 }
0x1d66   :  { %12563 = vmatpush3.msra.mxu0 %v6982_v30 }
0x1d67   :  { %12565 = vmatmul.mubr.f32.vlgmr.msra.gmra.mxu0 %v16100_v61  ;;  %v6533_v61 = vmul.f32 2.0, %v16284_v60 }
0x1d68   :  { %12567 = vmatprep.mubr.f32.mxu0 %v16103_v11 }
0x1d6b   :  { %12568 = vmatmul.mubr.f32.gmra.mxu0 %v16106_v51 }
0x1d6c   :  { %12570 = vmatprep.mubr.f32.mxu0 %v16109_v26  ;;  %v6532_v26 = vmul.f32 2.0, %v16288_v1  ;;  %v6538_v1 = vmul.f32 2.0, %v16256_v46 }
0x1d6f   :  { %12571 = vmatmul.mubr.f32.gmra.mxu0 %v16112_v23 }
0x1d70   :  { %12573 = vmatprep.mubr.f32.mxu0 %v16115_v15 }
0x1d73   :  { %12574 = vmatmul.mubr.f32.gmra.mxu0 %v16118_v41  ;;  %v6535_v41 = vmul.f32 2.0, %v16274_v40 }
0x1d74   :  { %12576 = vmatprep.mubr.f32.mxu0 %v16121_v37 }
0x1d77   :  { %12577 = vmatmul.mubr.f32.gmra.mxu0 %v16124_v48 }
0x1d78   :  { %12579 = vmatprep.mubr.f32.mxu0 %v16127_v21  ;;  %v6534_v21 = vmul.f32 2.0, %v16279_v6 }
0x1d7b   :  { %12580 = vmatmul.mubr.f32.gmra.mxu0 %v16130_v53 }
0x1d7c   :  { %12582 = vmatprep.mubr.f32.mxu0 %v16133_v47 }
0x1d7f   :  { %12583 = vmatmul.mubr.f32.gmra.mxu0 %v16136_v5 }
0x1d80   :  { %12585 = vmatprep.mubr.f32.mxu0 %v16139_v19 }
0x1d83   :  { %12586 = vmatmul.mubr.f32.gmra.mxu0 %v16142_v49 }
0x1d84   :  { %12676 = vmatprep.mubr.f32.mxu0 %v16145_v34 }
0x1e07   :  { %v12454_v11 = vpop.f32.mrf.mxu0 }
0x1e08   :  { %v6694_v51 = vsub.f32 %v6533_v61, %v12454_v11  ;;  %v6546_v61 = vmul.f32 2.0, %v16208_v16  ;;  %v6998_v11 = vld [vmem:[#allocation2 + $0x100] sm:$0xff] }
0x1e09   :  { %v6614_v23 = vpop.f32.mrf.mxu0  ;;  %v7014_v32 = vmul.f32 %v6998_v11, %v14702_v50 }
0x1e0a   :  { %6710 = vst.msk [vmem:[#allocation2 + $0x508] sm:$0xff] %vm321_vm0, %v6694_v51  ;;  %v6693_v15 = vsub.f32 %v6532_v26, %v6614_v23  ;;  %v7001_v23 = vld [vmem:[#allocation2 + $0x118] sm:$0xff] }
0x1e0b   :  { %v12457_v37 = vpop.f32.mrf.mxu0  ;;  %v7017_v16 = vmul.f32 %v7001_v23, %v14702_v50 }
0x1e0c   :  { %6709 = vst.msk [vmem:[#allocation2 + $0x500] sm:$0xff] %vm321_vm0, %v6693_v15  ;;  %v6696_v48 = vsub.f32 %v6535_v41, %v12457_v37  ;;  %v7000_v37 = vld [vmem:[#allocation2 + $0x110] sm:$0xff] }
0x1e0d   :  { %v6624_v53 = vpop.f32.mrf.mxu0 }
0x1e0e   :  { %6712 = vst.msk [vmem:[#allocation2 + $0x518] sm:$0xff] %vm321_vm0, %v6696_v48  ;;  %v6695_v0 = vsub.f32 %v6534_v21, %v6624_v53  ;;  %v7003_v53 = vld [vmem:[#allocation2 + $0x128] sm:$0xff] }
0x1e0f   :  { %v12460_v10 = vpop.f32.mrf.mxu0 }
0x1e10   :  { %6711 = vst.msk [vmem:[#allocation2 + $0x510] sm:$0xff] %vm321_vm0, %v6695_v0  ;;  %v6698_v35 = vsub.f32 %v6537_v62, %v12460_v10  ;;  %v7016_v62 = vmul.f32 %v7000_v37, %v14702_v50 }
0x1e11   :  { %v6634_v8 = vpop.f32.mrf.mxu0 }
0x1e12   :  { %6714 = vst.msk [vmem:[#allocation2 + $0x528] sm:$0xff] %vm321_vm0, %v6698_v35  ;;  %v6697_v40 = vsub.f32 %v6536_v9, %v6634_v8  ;;  %v7002_v35 = vld [vmem:[#allocation2 + $0x120] sm:$0xff]  ;;  %v7019_v8 = vmul.f32 %v7003_v53, %v14702_v50 }
0x1e13   :  { %v12463_v60 = vpop.f32.mrf.mxu0 }
0x1e14   :  { %6713 = vst.msk [vmem:[#allocation2 + $0x520] sm:$0xff] %vm321_vm0, %v6697_v40  ;;  %v6700_v6 = vsub.f32 %v6539_v31, %v12463_v60  ;;  %v7005_v31 = vld [vmem:[#allocation2 + $0x138] sm:$0xff] }
0x1e15   :  { %v6644_v7 = vpop.f32.mrf.mxu0 }
0x1e16   :  { %6716 = vst.msk [vmem:[#allocation2 + $0x538] sm:$0xff] %vm321_vm0, %v6700_v6  ;;  %v6699_v59 = vsub.f32 %v6538_v1, %v6644_v7  ;;  %v7018_v6 = vmul.f32 %v7002_v35, %v14702_v50  ;;  %v7004_v7 = vld [vmem:[#allocation2 + $0x130] sm:$0xff] }
0x1e17   :  { %v12466_v12 = vpop.f32.mrf.mxu0 }
0x1e18   :  { %6715 = vst.msk [vmem:[#allocation2 + $0x530] sm:$0xff] %vm321_vm0, %v6699_v59  ;;  %v6702_v14 = vsub.f32 %v6541_v20, %v12466_v12  ;;  %v7021_v20 = vmul.f32 %v7005_v31, %v14702_v50 }
0x1e19   :  { %v6654_v36 = vpop.f32.mrf.mxu0 }
0x1e1a   :  { %6718 = vst.msk [vmem:[#allocation2 + $0x548] sm:$0xff] %vm321_vm0, %v6702_v14  ;;  %v6701_v33 = vsub.f32 %v6540_v44, %v6654_v36  ;;  %v7007_v14 = vld [vmem:[#allocation2 + $0x148] sm:$0xff]  ;;  %v7020_v36 = vmul.f32 %v7004_v7, %v14702_v50 }
0x1e1b   :  { %v12469_v57 = vpop.f32.mrf.mxu0 }
0x1e1c   :  { %6717 = vst.msk [vmem:[#allocation2 + $0x540] sm:$0xff] %vm321_vm0, %v6701_v33  ;;  %v6704_v46 = vsub.f32 %v6543_v52, %v12469_v57  ;;  %v7006_v52 = vld [vmem:[#allocation2 + $0x140] sm:$0xff] }
0x1e1d   :  { %v6664_v63 = vpop.f32.mrf.mxu0 }
0x1e1e   :  { %6720 = vst.msk [vmem:[#allocation2 + $0x558] sm:$0xff] %vm321_vm0, %v6704_v46  ;;  %v6703_v13 = vsub.f32 %v6542_v55, %v6664_v63  ;;  %v7023_v46 = vmul.f32 %v7007_v14, %v14702_v50  ;;  %v7009_v63 = vld [vmem:[#allocation2 + $0x158] sm:$0xff] }
0x1e1f   :  { %v12472_v22 = vpop.f32.mrf.mxu0 }
0x1e20   :  { %6719 = vst.msk [vmem:[#allocation2 + $0x550] sm:$0xff] %vm321_vm0, %v6703_v13  ;;  %v6706_v39 = vsub.f32 %v6545_v38, %v12472_v22  ;;  %v7022_v38 = vmul.f32 %v7006_v52, %v14702_v50  ;;  %v16397_v52 = vld [vmem:[#allocation9 + $0x20] sm:$0xff] }
0x1e21   :  { %v6674_v18 = vpop.f32.mrf.mxu0 }
0x1e22   :  { %6722 = vst.msk [vmem:[#allocation2 + $0x568] sm:$0xff] %vm321_vm0, %v6706_v39  ;;  %v6705_v43 = vsub.f32 %v6544_v58, %v6674_v18  ;;  %v7008_v39 = vld [vmem:[#allocation2 + $0x150] sm:$0xff]  ;;  %v7025_v18 = vmul.f32 %v7009_v63, %v14702_v50  ;;  %v16409_v63 = vld [vmem:[#allocation9 + $0x40] sm:$0xff] }
0x1e23   :  { %v12475_v2 = vpop.f32.mrf.mxu0  ;;  %v7024_v28 = vmul.f32 %v7008_v39, %v14702_v50  ;;  %v7208_v39 = vld [vmem:[#allocation2 + $0x188] sm:$0xff] }
0x1e24   :  { %6721 = vst.msk [vmem:[#allocation2 + $0x560] sm:$0xff] %vm321_vm0, %v6705_v43  ;;  %v6708_v30 = vsub.f32 %v6547_v27, %v12475_v2  ;;  %v7011_v27 = vld [vmem:[#allocation2 + $0x168] sm:$0xff] }
0x1e25   :  { %v6684_v54 = vpop.f32.mrf.mxu0  ;;  %v7027_v11 = vmul.f32 %v7011_v27, %v14702_v50  ;;  %v7210_v27 = vld [vmem:[#allocation2 + $0x198] sm:$0xff] }
0x1e26   :  { %6724 = vst.msk [vmem:[#allocation2 + $0x578] sm:$0xff] %vm321_vm0, %v6708_v30  ;;  %v6707_v51 = vsub.f32 %v6546_v61, %v6684_v54  ;;  %v7010_v61 = vld [vmem:[#allocation2 + $0x160] sm:$0xff] }
0x1e27   :  { %v12566_v26 = vpop.f32.mrf.mxu0  ;;  %v7026_v23 = vmul.f32 %v7010_v61, %v14702_v50  ;;  %v7209_v61 = vld [vmem:[#allocation2 + $0x190] sm:$0xff] }
0x1e28   :  { %6723 = vst.msk [vmem:[#allocation2 + $0x570] sm:$0xff] %vm321_vm0, %v6707_v51  ;;  %v7102_v15 = vadd.f32 %v12566_v26, %v7015_v17  ;;  %v7013_v17 = vld [vmem:[#allocation2 + $0x178] sm:$0xff] }
0x1e29   :  { %v7096_v41 = vpop.f32.mrf.mxu0  ;;  %v7029_v37 = vmul.f32 %v7013_v17, %v14702_v50 }
0x1e2a   :  { %7176 = vst.msk [vmem:[#allocation3 + $0x8] sm:$0xff] %vm321_vm0, %v7102_v15  ;;  %v7097_v48 = vadd.f32 %v7096_v41, %v7014_v32  ;;  %v7012_v32 = vld [vmem:[#allocation2 + $0x170] sm:$0xff] }
0x1e2b   :  { %v12569_v21 = vpop.f32.mrf.mxu0 }
0x1e2c   :  { %7175 = vst.msk [vmem:[#allocation3] sm:$0xff] %vm321_vm0, %v7097_v48  ;;  %v7112_v0 = vadd.f32 %v12569_v21, %v7017_v16  ;;  %v7028_v21 = vmul.f32 %v7012_v32, %v14702_v50 }
0x1e2d   :  { %v7106_v10 = vpop.f32.mrf.mxu0 }
0x1e2e   :  { %7178 = vst.msk [vmem:[#allocation3 + $0x18] sm:$0xff] %vm321_vm0, %v7112_v0  ;;  %v7107_v9 = vadd.f32 %v7106_v10, %v7016_v62 }
0x1e2f   :  { %v12572_v40 = vpop.f32.mrf.mxu0 }
0x1e30   :  { %7177 = vst.msk [vmem:[#allocation3 + $0x10] sm:$0xff] %vm321_vm0, %v7107_v9  ;;  %v7122_v60 = vadd.f32 %v12572_v40, %v7019_v8 }
0x1e31   :  { %v7116_v1 = vpop.f32.mrf.mxu0 }
0x1e32   :  { %7180 = vst.msk [vmem:[#allocation3 + $0x28] sm:$0xff] %vm321_vm0, %v7122_v60  ;;  %v7117_v59 = vadd.f32 %v7116_v1, %v7018_v6 }
0x1e33   :  { %v12575_v12 = vpop.f32.mrf.mxu0  ;;  %v7191_v14 = vld [vmem:[#allocation3] sm:$0xff] }
0x1e34   :  { %7179 = vst.msk [vmem:[#allocation3 + $0x20] sm:$0xff] %vm321_vm0, %v7117_v59  ;;  %v7132_v44 = vadd.f32 %v12575_v12, %v7021_v20  ;;  %v7192_v12 = vld [vmem:[#allocation3 + $0x8] sm:$0xff] }
0x1e35   :  { %v7126_v33 = vpop.f32.mrf.mxu0  ;;  %v7194_v59 = vld [vmem:[#allocation3 + $0x18] sm:$0xff] }
0x1e36   :  { %7182 = vst.msk [vmem:[#allocation3 + $0x38] sm:$0xff] %vm321_vm0, %v7132_v44  ;;  %v7127_v57 = vadd.f32 %v7126_v33, %v7020_v36  ;;  %v16388_v44 = vld [vmem:[#allocation9 + $0x8] sm:$0xff]  ;;  %v16391_v36 = vld [vmem:[#allocation9 + $0x10] sm:$0xff]  ;;  %v16394_v33 = vld [vmem:[#allocation9 + $0x18] sm:$0xff] }
0x1e37   :  { %v12578_v55 = vpop.f32.mrf.mxu0  ;;  %v7193_v20 = vld [vmem:[#allocation3 + $0x10] sm:$0xff] }
0x1e38   :  { %7181 = vst.msk [vmem:[#allocation3 + $0x30] sm:$0xff] %vm321_vm0, %v7127_v57  ;;  %v7142_v13 = vadd.f32 %v12578_v55, %v7023_v46  ;;  %v16400_v57 = vld [vmem:[#allocation9 + $0x28] sm:$0xff]  ;;  %v16403_v46 = vld [vmem:[#allocation9 + $0x30] sm:$0xff]  ;;  %v16406_v55 = vld [vmem:[#allocation9 + $0x38] sm:$0xff] }
0x1e39   :  { %v7136_v22 = vpop.f32.mrf.mxu0  ;;  %v7196_v1 = vld [vmem:[#allocation3 + $0x28] sm:$0xff] }
0x1e3a   :  { %7184 = vst.msk [vmem:[#allocation3 + $0x48] sm:$0xff] %vm321_vm0, %v7142_v13  ;;  %v7137_v58 = vadd.f32 %v7136_v22, %v7022_v38  ;;  %v16412_v13 = vld [vmem:[#allocation9 + $0x48] sm:$0xff]  ;;  %v16415_v38 = vld [vmem:[#allocation9 + $0x50] sm:$0xff]  ;;  %v16418_v22 = vld [vmem:[#allocation9 + $0x58] sm:$0xff] }
0x1e3b   :  { %v12581_v43 = vpop.f32.mrf.mxu0  ;;  %v7195_v7 = vld [vmem:[#allocation3 + $0x20] sm:$0xff] }
0x1e3c   :  { %7183 = vst.msk [vmem:[#allocation3 + $0x40] sm:$0xff] %vm321_vm0, %v7137_v58  ;;  %v7152_v2 = vadd.f32 %v12581_v43, %v7025_v18  ;;  %v7207_v58 = vld [vmem:[#allocation2 + $0x180] sm:$0xff]  ;;  %v7224_v18 = vmul.f32 %v7208_v39, %v14787_v4 }
0x1e3d   :  { %v7146_v30 = vpop.f32.mrf.mxu0  ;;  %v7198_v60 = vld [vmem:[#allocation3 + $0x38] sm:$0xff] }
0x1e3e   :  { %7186 = vst.msk [vmem:[#allocation3 + $0x58] sm:$0xff] %vm321_vm0, %v7152_v2  ;;  %v7147_v54 = vadd.f32 %v7146_v30, %v7024_v28  ;;  %v7223_v28 = vmul.f32 %v7207_v58, %v14787_v4 }
0x1e3f   :  { %v12584_v51 = vpop.f32.mrf.mxu0  ;;  %v7197_v6 = vld [vmem:[#allocation3 + $0x30] sm:$0xff] }
0x1e40   :  { %7185 = vst.msk [vmem:[#allocation3 + $0x50] sm:$0xff] %vm321_vm0, %v7147_v54  ;;  %v7162_v26 = vadd.f32 %v12584_v51, %v7027_v11  ;;  %v7225_v54 = vmul.f32 %v7209_v61, %v14787_v4  ;;  %v7211_v51 = vld [vmem:[#allocation2 + $0x1a0] sm:$0xff] }
0x1e41   :  { %v7156_v15 = vpop.f32.mrf.mxu0  ;;  %v7200_v40 = vld [vmem:[#allocation3 + $0x48] sm:$0xff] }
0x1e42   :  { %7188 = vst.msk [vmem:[#allocation3 + $0x68] sm:$0xff] %vm321_vm0, %v7162_v26  ;;  %v7157_v41 = vadd.f32 %v7156_v15, %v7026_v23  ;;  %v7214_v15 = vld [vmem:[#allocation2 + $0x1b8] sm:$0xff] }
0x1e43   :  { %v12587_v48 = vpop.f32.mrf.mxu0  ;;  %v7199_v31 = vld [vmem:[#allocation3 + $0x40] sm:$0xff] }
0x1e44   :  { %7187 = vst.msk [vmem:[#allocation3 + $0x60] sm:$0xff] %vm321_vm0, %v7157_v41  ;;  %v7172_v16 = vadd.f32 %v12587_v48, %v7029_v37  ;;  %v7227_v41 = vmul.f32 %v7211_v51, %v14787_v4  ;;  %v7213_v48 = vld [vmem:[#allocation2 + $0x1b0] sm:$0xff] }
0x1e45   :  { %v7166_v53 = vpop.f32.mrf.mxu0  ;;  %v7202_v8 = vld [vmem:[#allocation3 + $0x58] sm:$0xff] }
0x1e46   :  { %7190 = vst.msk [vmem:[#allocation3 + $0x78] sm:$0xff] %vm321_vm0, %v7172_v16  ;;  %v7167_v0 = vadd.f32 %v7166_v53, %v7028_v21  ;;  %v7230_v21 = vmul.f32 %v7214_v15, %v14787_v4 }
0x1e47   :  { %v7201_v50 = vld [vmem:[#allocation3 + $0x50] sm:$0xff] }
0x1e48   :  { %7189 = vst.msk [vmem:[#allocation3 + $0x70] sm:$0xff] %vm321_vm0, %v7167_v0  ;;  %v7216_v0 = vld [vmem:[#allocation2 + $0x1c8] sm:$0xff] }
0x1e49   :  { %v7204_v35 = vld [vmem:[#allocation3 + $0x68] sm:$0xff] }
0x1e4b   :  { %v7203_v9 = vld [vmem:[#allocation3 + $0x60] sm:$0xff] }
0x1e4d   :  { %v7206_v62 = vld [vmem:[#allocation3 + $0x78] sm:$0xff] }
0x1e4e   :  { %12588 = vmatprep.subr.mxu1 %v7206_v62 }
0x1e4f   :  { %12589 = vmatpush3.msra.mxu1 %v7206_v62  ;;  %v7205_v10 = vld [vmem:[#allocation3 + $0x70] sm:$0xff] }
0x1e50   :  { %12590 = vmatprep.subr.mxu1 %v7205_v10 }
0x1e51   :  { %12591 = vmatpush3.msra.mxu1 %v7205_v10  ;;  %v7229_v10 = vmul.f32 %v7213_v48, %v14787_v4 }
0x1e52   :  { %12592 = vmatprep.subr.mxu1 %v7204_v35 }
0x1e53   :  { %12593 = vmatpush3.msra.mxu1 %v7204_v35 }
0x1e54   :  { %12594 = vmatprep.subr.mxu1 %v7203_v9 }
0x1e55   :  { %12595 = vmatpush3.msra.mxu1 %v7203_v9  ;;  %v7215_v9 = vld [vmem:[#allocation2 + $0x1c0] sm:$0xff] }
0x1e56   :  { %12596 = vmatprep.subr.mxu1 %v7202_v8 }
0x1e57   :  { %12597 = vmatpush3.msra.mxu1 %v7202_v8 }
0x1e58   :  { %12598 = vmatprep.subr.mxu1 %v7201_v50 }
0x1e59   :  { %12599 = vmatpush3.msra.mxu1 %v7201_v50  ;;  %v7232_v50 = vmul.f32 %v7216_v0, %v14787_v4 }
0x1e5a   :  { %12600 = vmatprep.subr.mxu1 %v7200_v40 }
0x1e5b   :  { %12601 = vmatpush3.msra.mxu1 %v7200_v40 }
0x1e5c   :  { %12602 = vmatprep.subr.mxu1 %v7199_v31 }
0x1e5d   :  { %12603 = vmatpush3.msra.mxu1 %v7199_v31  ;;  %v7218_v31 = vld [vmem:[#allocation2 + $0x1d8] sm:$0xff] }
0x1e5e   :  { %12604 = vmatprep.subr.mxu1 %v7198_v60 }
0x1e5f   :  { %12605 = vmatpush3.msra.mxu1 %v7198_v60 }
0x1e60   :  { %12606 = vmatprep.subr.mxu1 %v7197_v6 }
0x1e61   :  { %12607 = vmatpush3.msra.mxu1 %v7197_v6  ;;  %v7231_v6 = vmul.f32 %v7215_v9, %v14787_v4 }
0x1e62   :  { %12608 = vmatprep.subr.mxu1 %v7196_v1 }
0x1e63   :  { %12609 = vmatpush3.msra.mxu1 %v7196_v1 }
0x1e64   :  { %12610 = vmatprep.subr.mxu1 %v7195_v7 }
0x1e65   :  { %12611 = vmatpush3.msra.mxu1 %v7195_v7  ;;  %v7217_v7 = vld [vmem:[#allocation2 + $0x1d0] sm:$0xff] }
0x1e66   :  { %12612 = vmatprep.subr.mxu1 %v7194_v59  ;;  %v7233_v58 = vmul.f32 %v7217_v7, %v14787_v4  ;;  %v7416_v7 = vld [vmem:[#allocation2 + $0x200] sm:$0xff] }
0x1e67   :  { %12613 = vmatpush3.msra.mxu1 %v7194_v59 }
0x1e68   :  { %12614 = vmatprep.subr.mxu1 %v7193_v20 }
0x1e69   :  { %12615 = vmatpush3.msra.mxu1 %v7193_v20  ;;  %v7234_v20 = vmul.f32 %v7218_v31, %v14787_v4  ;;  %v16475_v31 = vld [vmem:[#allocation9 + $0x70] sm:$0xff] }
0x1e6a   :  { %12616 = vmatprep.subr.mxu1 %v7192_v12 }
0x1e6b   :  { %12617 = vmatpush3.msra.mxu1 %v7192_v12 }
0x1e6c   :  { %12618 = vmatprep.subr.mxu1 %v7191_v14 }
0x1e6d   :  { %12619 = vmatpush3.msra.mxu1 %v7191_v14  ;;  %v7220_v14 = vld [vmem:[#allocation2 + $0x1e8] sm:$0xff] }
0x1e6e   :  { %12621 = vmatmul.mubr.f32.vlgmr.msra.gmra.mxu1 %v16388_v44 }
0x1e6f   :  { %12623 = vmatprep.mubr.f32.mxu1 %v16391_v36 }
0x1e72   :  { %12624 = vmatmul.mubr.f32.gmra.mxu1 %v16394_v33 }
0x1e73   :  { %12626 = vmatprep.mubr.f32.mxu1 %v16397_v52 }
0x1e76   :  { %12627 = vmatmul.mubr.f32.gmra.mxu1 %v16400_v57 }
0x1e77   :  { %12629 = vmatprep.mubr.f32.mxu1 %v16403_v46 }
0x1e7a   :  { %12630 = vmatmul.mubr.f32.gmra.mxu1 %v16406_v55 }
0x1e7b   :  { %12632 = vmatprep.mubr.f32.mxu1 %v16409_v63 }
0x1e7e   :  { %12633 = vmatmul.mubr.f32.gmra.mxu1 %v16412_v13 }
0x1e7f   :  { %12635 = vmatprep.mubr.f32.mxu1 %v16415_v38 }
0x1e82   :  { %12636 = vmatmul.mubr.f32.gmra.mxu1 %v16418_v22 }
0x1e83   :  { %12638 = vmatprep.mubr.f32.mxu1 %v16133_v47 }
0x1e86   :  { %12639 = vmatmul.mubr.f32.gmra.mxu1 %v16136_v5  ;;  %v7226_v5 = vmul.f32 %v7210_v27, %v14787_v4 }
0x1e87   :  { %12641 = vmatprep.mubr.f32.mxu1 %v16139_v19 }
0x1e8a   :  { %12642 = vmatmul.mubr.f32.gmra.mxu1 %v16142_v49  ;;  %v7212_v49 = vld [vmem:[#allocation2 + $0x1a8] sm:$0xff] }
0x1e8b   :  { %12732 = vmatprep.mubr.f32.mxu1 %v16145_v34  ;;  %v7228_v26 = vmul.f32 %v7212_v49, %v14787_v4 }
0x1f2e   :  { %v12622_v43 = vpop.f32.mrf.mxu1 }
0x1f2f   :  { %v7311_v2 = vadd.f32 %v12622_v43, %v7224_v18  ;;  %v7219_v43 = vld [vmem:[#allocation2 + $0x1e0] sm:$0xff] }
0x1f30   :  { %v7305_v30 = vpop.f32.mrf.mxu1 }
0x1f31   :  { %7385 = vst.msk [vmem:[#allocation3 + $0x8] sm:$0xff] %vm321_vm0, %v7311_v2  ;;  %v7306_v47 = vadd.f32 %v7305_v30, %v7223_v28  ;;  %v7236_v2 = vmul.f32 %v7220_v14, %v14787_v4  ;;  %v7222_v30 = vld [vmem:[#allocation2 + $0x1f8] sm:$0xff] }
0x1f32   :  { %v12625_v19 = vpop.f32.mrf.mxu1 }
0x1f33   :  { %7384 = vst.msk [vmem:[#allocation3] sm:$0xff] %vm321_vm0, %v7306_v47  ;;  %v7321_v34 = vadd.f32 %v12625_v19, %v7226_v5  ;;  %v7235_v47 = vmul.f32 %v7219_v43, %v14787_v4  ;;  %v7221_v19 = vld [vmem:[#allocation2 + $0x1f0] sm:$0xff] }
0x1f34   :  { %v7315_v11 = vpop.f32.mrf.mxu1  ;;  %v7237_v51 = vmul.f32 %v7221_v19, %v14787_v4 }
0x1f35   :  { %7387 = vst.msk [vmem:[#allocation3 + $0x18] sm:$0xff] %vm321_vm0, %v7321_v34  ;;  %v7316_v17 = vadd.f32 %v7315_v11, %v7225_v54  ;;  %v7238_v34 = vmul.f32 %v7222_v30, %v14787_v4 }
0x1f36   :  { %v12628_v23 = vpop.f32.mrf.mxu1 }
0x1f37   :  { %7386 = vst.msk [vmem:[#allocation3 + $0x10] sm:$0xff] %vm321_vm0, %v7316_v17  ;;  %v7331_v32 = vadd.f32 %v12628_v23, %v7228_v26 }
0x1f38   :  { %v7325_v37 = vpop.f32.mrf.mxu1  ;;  %v7401_v9 = vld [vmem:[#allocation3 + $0x8] sm:$0xff] }
0x1f39   :  { %7389 = vst.msk [vmem:[#allocation3 + $0x28] sm:$0xff] %vm321_vm0, %v7331_v32  ;;  %v7326_v16 = vadd.f32 %v7325_v37, %v7227_v41 }
0x1f3a   :  { %v12631_v53 = vpop.f32.mrf.mxu1 }
0x1f3b   :  { %7388 = vst.msk [vmem:[#allocation3 + $0x20] sm:$0xff] %vm321_vm0, %v7326_v16  ;;  %v7341_v62 = vadd.f32 %v12631_v53, %v7230_v21 }
0x1f3c   :  { %v7335_v35 = vpop.f32.mrf.mxu1 }
0x1f3d   :  { %7391 = vst.msk [vmem:[#allocation3 + $0x38] sm:$0xff] %vm321_vm0, %v7341_v62  ;;  %v7336_v8 = vadd.f32 %v7335_v35, %v7229_v10  ;;  %v7403_v10 = vld [vmem:[#allocation3 + $0x18] sm:$0xff] }
0x1f3e   :  { %v12634_v40 = vpop.f32.mrf.mxu1  ;;  %v7402_v35 = vld [vmem:[#allocation3 + $0x10] sm:$0xff] }
0x1f3f   :  { %7390 = vst.msk [vmem:[#allocation3 + $0x30] sm:$0xff] %vm321_vm0, %v7336_v8  ;;  %v7351_v60 = vadd.f32 %v12634_v40, %v7232_v50  ;;  %v7400_v8 = vld [vmem:[#allocation3] sm:$0xff]  ;;  %v16472_v40 = vld [vmem:[#allocation9 + $0x68] sm:$0xff] }
0x1f40   :  { %v7345_v1 = vpop.f32.mrf.mxu1  ;;  %v7405_v0 = vld [vmem:[#allocation3 + $0x28] sm:$0xff]  ;;  %v16469_v50 = vld [vmem:[#allocation9 + $0x60] sm:$0xff] }
0x1f41   :  { %7393 = vst.msk [vmem:[#allocation3 + $0x48] sm:$0xff] %vm321_vm0, %v7351_v60  ;;  %v7346_v59 = vadd.f32 %v7345_v1, %v7231_v6  ;;  %v16478_v60 = vld [vmem:[#allocation9 + $0x78] sm:$0xff]  ;;  %v16481_v6 = vld [vmem:[#allocation9] sm:$0xff]  ;;  %v7417_v1 = vld [vmem:[#allocation2 + $0x208] sm:$0xff] }
0x1f42   :  { %v12637_v12 = vpop.f32.mrf.mxu1  ;;  %v7404_v62 = vld [vmem:[#allocation3 + $0x20] sm:$0xff] }
0x1f43   :  { %7392 = vst.msk [vmem:[#allocation3 + $0x40] sm:$0xff] %vm321_vm0, %v7346_v59  ;;  %v7361_v39 = vadd.f32 %v12637_v12, %v7234_v20  ;;  %v7433_v59 = vmul.f32 %v7417_v1, %v14840_v25  ;;  %v7419_v12 = vld [vmem:[#allocation2 + $0x218] sm:$0xff] }
0x1f44   :  { %v7355_v18 = vpop.f32.mrf.mxu1  ;;  %v7407_v21 = vld [vmem:[#allocation3 + $0x38] sm:$0xff] }
0x1f45   :  { %7395 = vst.msk [vmem:[#allocation3 + $0x58] sm:$0xff] %vm321_vm0, %v7361_v39  ;;  %v7356_v27 = vadd.f32 %v7355_v18, %v7233_v58  ;;  %v7432_v39 = vmul.f32 %v7416_v7, %v14840_v25  ;;  %v7418_v18 = vld [vmem:[#allocation2 + $0x210] sm:$0xff] }
0x1f46   :  { %v12640_v28 = vpop.f32.mrf.mxu1  ;;  %v7406_v53 = vld [vmem:[#allocation3 + $0x30] sm:$0xff] }
0x1f47   :  { %7394 = vst.msk [vmem:[#allocation3 + $0x50] sm:$0xff] %vm321_vm0, %v7356_v27  ;;  %v7371_v61 = vadd.f32 %v12640_v28, %v7236_v2  ;;  %v7435_v27 = vmul.f32 %v7419_v12, %v14840_v25  ;;  %v7421_v28 = vld [vmem:[#allocation2 + $0x228] sm:$0xff] }
0x1f48   :  { %v7365_v5 = vpop.f32.mrf.mxu1  ;;  %v7409_v48 = vld [vmem:[#allocation3 + $0x48] sm:$0xff] }
0x1f49   :  { %7397 = vst.msk [vmem:[#allocation3 + $0x68] sm:$0xff] %vm321_vm0, %v7371_v61  ;;  %v7366_v49 = vadd.f32 %v7365_v5, %v7235_v47  ;;  %v7434_v61 = vmul.f32 %v7418_v18, %v14840_v25  ;;  %v7420_v5 = vld [vmem:[#allocation2 + $0x220] sm:$0xff] }
0x1f4a   :  { %v12643_v54 = vpop.f32.mrf.mxu1  ;;  %v7408_v16 = vld [vmem:[#allocation3 + $0x40] sm:$0xff] }
0x1f4b   :  { %7396 = vst.msk [vmem:[#allocation3 + $0x60] sm:$0xff] %vm321_vm0, %v7366_v49  ;;  %v7381_v11 = vadd.f32 %v12643_v54, %v7238_v34  ;;  %v7437_v49 = vmul.f32 %v7421_v28, %v14840_v25  ;;  %v7423_v54 = vld [vmem:[#allocation2 + $0x238] sm:$0xff] }
0x1f4c   :  { %v7375_v17 = vpop.f32.mrf.mxu1  ;;  %v7411_v37 = vld [vmem:[#allocation3 + $0x58] sm:$0xff] }
0x1f4d   :  { %7399 = vst.msk [vmem:[#allocation3 + $0x78] sm:$0xff] %vm321_vm0, %v7381_v11  ;;  %v7376_v26 = vadd.f32 %v7375_v17, %v7237_v51  ;;  %v7436_v51 = vmul.f32 %v7420_v5, %v14840_v25 }
0x1f4e   :  { %v7410_v4 = vld [vmem:[#allocation3 + $0x50] sm:$0xff] }
0x1f4f   :  { %7398 = vst.msk [vmem:[#allocation3 + $0x70] sm:$0xff] %vm321_vm0, %v7376_v26  ;;  %v7422_v26 = vld [vmem:[#allocation2 + $0x230] sm:$0xff] }
0x1f50   :  { %v7413_v32 = vld [vmem:[#allocation3 + $0x68] sm:$0xff] }
0x1f52   :  { %v7412_v41 = vld [vmem:[#allocation3 + $0x60] sm:$0xff] }
0x1f54   :  { %v7415_v23 = vld [vmem:[#allocation3 + $0x78] sm:$0xff] }
0x1f55   :  { %12644 = vmatprep.subr.mxu0 %v7415_v23 }
0x1f56   :  { %12645 = vmatpush3.msra.mxu0 %v7415_v23  ;;  %v7414_v15 = vld [vmem:[#allocation3 + $0x70] sm:$0xff] }
0x1f57   :  { %12646 = vmatprep.subr.mxu0 %v7414_v15 }
0x1f58   :  { %12647 = vmatpush3.msra.mxu0 %v7414_v15  ;;  %v7439_v15 = vmul.f32 %v7423_v54, %v14840_v25 }
0x1f59   :  { %12648 = vmatprep.subr.mxu0 %v7413_v32 }
0x1f5a   :  { %12649 = vmatpush3.msra.mxu0 %v7413_v32 }
0x1f5b   :  { %12650 = vmatprep.subr.mxu0 %v7412_v41 }
0x1f5c   :  { %12651 = vmatpush3.msra.mxu0 %v7412_v41  ;;  %v7425_v41 = vld [vmem:[#allocation2 + $0x248] sm:$0xff] }
0x1f5d   :  { %12652 = vmatprep.subr.mxu0 %v7411_v37 }
0x1f5e   :  { %12653 = vmatpush3.msra.mxu0 %v7411_v37 }
0x1f5f   :  { %12654 = vmatprep.subr.mxu0 %v7410_v4 }
0x1f60   :  { %12655 = vmatpush3.msra.mxu0 %v7410_v4  ;;  %v7438_v4 = vmul.f32 %v7422_v26, %v14840_v25 }
0x1f61   :  { %12656 = vmatprep.subr.mxu0 %v7409_v48 }
0x1f62   :  { %12657 = vmatpush3.msra.mxu0 %v7409_v48 }
0x1f63   :  { %12658 = vmatprep.subr.mxu0 %v7408_v16 }
0x1f64   :  { %12659 = vmatpush3.msra.mxu0 %v7408_v16  ;;  %v7424_v16 = vld [vmem:[#allocation2 + $0x240] sm:$0xff] }
0x1f65   :  { %12660 = vmatprep.subr.mxu0 %v7407_v21 }
0x1f66   :  { %12661 = vmatpush3.msra.mxu0 %v7407_v21 }
0x1f67   :  { %12662 = vmatprep.subr.mxu0 %v7406_v53 }
0x1f68   :  { %12663 = vmatpush3.msra.mxu0 %v7406_v53  ;;  %v7441_v53 = vmul.f32 %v7425_v41, %v14840_v25 }
0x1f69   :  { %12664 = vmatprep.subr.mxu0 %v7405_v0 }
0x1f6a   :  { %12665 = vmatpush3.msra.mxu0 %v7405_v0 }
0x1f6b   :  { %12666 = vmatprep.subr.mxu0 %v7404_v62 }
0x1f6c   :  { %12667 = vmatpush3.msra.mxu0 %v7404_v62  ;;  %v7427_v62 = vld [vmem:[#allocation2 + $0x258] sm:$0xff] }
0x1f6d   :  { %12668 = vmatprep.subr.mxu0 %v7403_v10  ;;  %v7443_v7 = vmul.f32 %v7427_v62, %v14840_v25 }
0x1f6e   :  { %12669 = vmatpush3.msra.mxu0 %v7403_v10 }
0x1f6f   :  { %12670 = vmatprep.subr.mxu0 %v7402_v35 }
0x1f70   :  { %12671 = vmatpush3.msra.mxu0 %v7402_v35  ;;  %v7440_v35 = vmul.f32 %v7424_v16, %v14840_v25 }
0x1f71   :  { %12672 = vmatprep.subr.mxu0 %v7401_v9 }
0x1f72   :  { %12673 = vmatpush3.msra.mxu0 %v7401_v9 }
0x1f73   :  { %12674 = vmatprep.subr.mxu0 %v7400_v8 }
0x1f74   :  { %12675 = vmatpush3.msra.mxu0 %v7400_v8  ;;  %v7426_v8 = vld [vmem:[#allocation2 + $0x250] sm:$0xff] }
0x1f75   :  { %12677 = vmatmul.mubr.f32.vlgmr.msra.gmra.mxu0 %v16388_v44 }
0x1f76   :  { %12679 = vmatprep.mubr.f32.mxu0 %v16391_v36 }
0x1f79   :  { %12680 = vmatmul.mubr.f32.gmra.mxu0 %v16394_v33 }
0x1f7a   :  { %12682 = vmatprep.mubr.f32.mxu0 %v16397_v52 }
0x1f7d   :  { %12683 = vmatmul.mubr.f32.gmra.mxu0 %v16400_v57 }
0x1f7e   :  { %12685 = vmatprep.mubr.f32.mxu0 %v16403_v46 }
0x1f81   :  { %12686 = vmatmul.mubr.f32.gmra.mxu0 %v16406_v55 }
0x1f82   :  { %12688 = vmatprep.mubr.f32.mxu0 %v16409_v63 }
0x1f85   :  { %12689 = vmatmul.mubr.f32.gmra.mxu0 %v16412_v13 }
0x1f86   :  { %12691 = vmatprep.mubr.f32.mxu0 %v16415_v38 }
0x1f89   :  { %12692 = vmatmul.mubr.f32.gmra.mxu0 %v16418_v22 }
0x1f8a   :  { %12694 = vmatprep.mubr.f32.mxu0 %v16469_v50 }
0x1f8d   :  { %12695 = vmatmul.mubr.f32.gmra.mxu0 %v16472_v40 }
0x1f8e   :  { %12697 = vmatprep.mubr.f32.mxu0 %v16475_v31 }
0x1f91   :  { %12698 = vmatmul.mubr.f32.gmra.mxu0 %v16478_v60 }
0x1f92   :  { %12788 = vmatprep.mubr.f32.mxu0 %v16481_v6 }
0x2035   :  { %v12678_v20 = vpop.f32.mrf.mxu0 }
0x2036   :  { %v7520_v14 = vadd.f32 %v12678_v20, %v7433_v59  ;;  %v7429_v20 = vld [vmem:[#allocation2 + $0x268] sm:$0xff] }
0x2037   :  { %v7514_v58 = vpop.f32.mrf.mxu0 }
0x2038   :  { %7594 = vst.msk [vmem:[#allocation3 + $0x8] sm:$0xff] %vm321_vm0, %v7520_v14  ;;  %v7515_v43 = vadd.f32 %v7514_v58, %v7432_v39  ;;  %v7442_v14 = vmul.f32 %v7426_v8, %v14840_v25  ;;  %v7428_v58 = vld [vmem:[#allocation2 + $0x260] sm:$0xff] }
0x2039   :  { %v12681_v2 = vpop.f32.mrf.mxu0 }
0x203a   :  { %7593 = vst.msk [vmem:[#allocation3] sm:$0xff] %vm321_vm0, %v7515_v43  ;;  %v7530_v30 = vadd.f32 %v12681_v2, %v7435_v27  ;;  %v7445_v43 = vmul.f32 %v7429_v20, %v14840_v25  ;;  %v7431_v2 = vld [vmem:[#allocation2 + $0x278] sm:$0xff] }
0x203b   :  { %v7524_v47 = vpop.f32.mrf.mxu0 }
0x203c   :  { %7596 = vst.msk [vmem:[#allocation3 + $0x18] sm:$0xff] %vm321_vm0, %v7530_v30  ;;  %v7525_v19 = vadd.f32 %v7524_v47, %v7434_v61  ;;  %v7444_v30 = vmul.f32 %v7428_v58, %v14840_v25  ;;  %v7430_v47 = vld [vmem:[#allocation2 + $0x270] sm:$0xff] }
0x203d   :  { %v12684_v34 = vpop.f32.mrf.mxu0  ;;  %v7446_v54 = vmul.f32 %v7430_v47, %v14840_v25 }
0x203e   :  { %7595 = vst.msk [vmem:[#allocation3 + $0x10] sm:$0xff] %vm321_vm0, %v7525_v19  ;;  %v7540_v11 = vadd.f32 %v12684_v34, %v7437_v49  ;;  %v7447_v19 = vmul.f32 %v7431_v2, %v14840_v25 }
0x203f   :  { %v7534_v17 = vpop.f32.mrf.mxu0  ;;  %v7610_v62 = vld [vmem:[#allocation3 + $0x8] sm:$0xff] }
0x2040   :  { %7598 = vst.msk [vmem:[#allocation3 + $0x28] sm:$0xff] %vm321_vm0, %v7540_v11  ;;  %v7535_v23 = vadd.f32 %v7534_v17, %v7436_v51 }
0x2041   :  { %v12687_v32 = vpop.f32.mrf.mxu0 }
0x2042   :  { %7597 = vst.msk [vmem:[#allocation3 + $0x20] sm:$0xff] %vm321_vm0, %v7535_v23  ;;  %v7550_v37 = vadd.f32 %v12687_v32, %v7439_v15 }
0x2043   :  { %v7544_v48 = vpop.f32.mrf.mxu0 }
0x2044   :  { %7600 = vst.msk [vmem:[#allocation3 + $0x38] sm:$0xff] %vm321_vm0, %v7550_v37  ;;  %v7545_v21 = vadd.f32 %v7544_v48, %v7438_v4 }
0x2045   :  { %v12690_v0 = vpop.f32.mrf.mxu0 }
0x2046   :  { %7599 = vst.msk [vmem:[#allocation3 + $0x30] sm:$0xff] %vm321_vm0, %v7545_v21  ;;  %v7560_v10 = vadd.f32 %v12690_v0, %v7441_v53  ;;  %v7612_v53 = vld [vmem:[#allocation3 + $0x18] sm:$0xff]  ;;  %v7611_v0 = vld [vmem:[#allocation3 + $0x10] sm:$0xff] }
0x2047   :  { %v7554_v9 = vpop.f32.mrf.mxu0  ;;  %v7614_v16 = vld [vmem:[#allocation3 + $0x28] sm:$0xff] }
0x2048   :  { %7602 = vst.msk [vmem:[#allocation3 + $0x48] sm:$0xff] %vm321_vm0, %v7560_v10  ;;  %v7555_v1 = vadd.f32 %v7554_v9, %v7440_v35  ;;  %v7609_v10 = vld [vmem:[#allocation3] sm:$0xff]  ;;  %v7626_v35 = vld [vmem:[#allocation2 + $0x288] sm:$0xff] }
0x2049   :  { %v12693_v59 = vpop.f32.mrf.mxu0  ;;  %v7613_v21 = vld [vmem:[#allocation3 + $0x20] sm:$0xff]  ;;  %v7642_v8 = vmul.f32 %v7626_v35, %v14891_v24 }
0x204a   :  { %7601 = vst.msk [vmem:[#allocation3 + $0x40] sm:$0xff] %vm321_vm0, %v7555_v1  ;;  %v7570_v12 = vadd.f32 %v12693_v59, %v7443_v7  ;;  %v7625_v9 = vld [vmem:[#allocation2 + $0x280] sm:$0xff]  ;;  %v7628_v7 = vld [vmem:[#allocation2 + $0x298] sm:$0xff] }
0x204b   :  { %v7564_v39 = vpop.f32.mrf.mxu0  ;;  %v7616_v4 = vld [vmem:[#allocation3 + $0x38] sm:$0xff]  ;;  %v7641_v20 = vmul.f32 %v7625_v9, %v14891_v24  ;;  %v7644_v58 = vmul.f32 %v7628_v7, %v14891_v24 }
0x204c   :  { %7604 = vst.msk [vmem:[#allocation3 + $0x58] sm:$0xff] %vm321_vm0, %v7570_v12  ;;  %v7565_v18 = vadd.f32 %v7564_v39, %v7442_v14  ;;  %v7627_v14 = vld [vmem:[#allocation2 + $0x290] sm:$0xff] }
0x204d   :  { %v12696_v27 = vpop.f32.mrf.mxu0  ;;  %v7615_v48 = vld [vmem:[#allocation3 + $0x30] sm:$0xff]  ;;  %v7643_v2 = vmul.f32 %v7627_v14, %v14891_v24 }
0x204e   :  { %7603 = vst.msk [vmem:[#allocation3 + $0x50] sm:$0xff] %vm321_vm0, %v7565_v18  ;;  %v7580_v28 = vadd.f32 %v12696_v27, %v7445_v43  ;;  %v7630_v43 = vld [vmem:[#allocation2 + $0x2a8] sm:$0xff] }
0x204f   :  { %v7574_v61 = vpop.f32.mrf.mxu0  ;;  %v7618_v41 = vld [vmem:[#allocation3 + $0x48] sm:$0xff]  ;;  %v7646_v47 = vmul.f32 %v7630_v43, %v14891_v24 }
0x2050   :  { %7606 = vst.msk [vmem:[#allocation3 + $0x68] sm:$0xff] %vm321_vm0, %v7580_v28  ;;  %v7575_v5 = vadd.f32 %v7574_v61, %v7444_v30  ;;  %v7629_v30 = vld [vmem:[#allocation2 + $0x2a0] sm:$0xff] }
0x2051   :  { %v12699_v49 = vpop.f32.mrf.mxu0  ;;  %v7617_v37 = vld [vmem:[#allocation3 + $0x40] sm:$0xff] }
0x2052   :  { %7605 = vst.msk [vmem:[#allocation3 + $0x60] sm:$0xff] %vm321_vm0, %v7575_v5  ;;  %v7590_v34 = vadd.f32 %v12699_v49, %v7447_v19  ;;  %v7632_v19 = vld [vmem:[#allocation2 + $0x2b8] sm:$0xff] }
0x2053   :  { %v7584_v11 = vpop.f32.mrf.mxu0  ;;  %v7620_v32 = vld [vmem:[#allocation3 + $0x58] sm:$0xff] }
0x2054   :  { %7608 = vst.msk [vmem:[#allocation3 + $0x78] sm:$0xff] %vm321_vm0, %v7590_v34  ;;  %v7585_v51 = vadd.f32 %v7584_v11, %v7446_v54  ;;  %v7645_v34 = vmul.f32 %v7629_v30, %v14891_v24  ;;  %v7631_v11 = vld [vmem:[#allocation2 + $0x2b0] sm:$0xff] }
0x2055   :  { %v7619_v25 = vld [vmem:[#allocation3 + $0x50] sm:$0xff] }
0x2056   :  { %7607 = vst.msk [vmem:[#allocation3 + $0x70] sm:$0xff] %vm321_vm0, %v7585_v51 }
0x2057   :  { %v7622_v23 = vld [vmem:[#allocation3 + $0x68] sm:$0xff] }
0x2059   :  { %v7621_v15 = vld [vmem:[#allocation3 + $0x60] sm:$0xff] }
0x205b   :  { %v7624_v17 = vld [vmem:[#allocation3 + $0x78] sm:$0xff] }
0x205c   :  { %12700 = vmatprep.subr.mxu1 %v7624_v17 }
0x205d   :  { %12701 = vmatpush3.msra.mxu1 %v7624_v17  ;;  %v7623_v26 = vld [vmem:[#allocation3 + $0x70] sm:$0xff]  ;;  %v7648_v17 = vmul.f32 %v7632_v19, %v14891_v24 }
0x205e   :  { %12702 = vmatprep.subr.mxu1 %v7623_v26 }
0x205f   :  { %12703 = vmatpush3.msra.mxu1 %v7623_v26 }
0x2060   :  { %12704 = vmatprep.subr.mxu1 %v7622_v23 }
0x2061   :  { %12705 = vmatpush3.msra.mxu1 %v7622_v23  ;;  %v7634_v23 = vld [vmem:[#allocation2 + $0x2c8] sm:$0xff] }
0x2062   :  { %12706 = vmatprep.subr.mxu1 %v7621_v15 }
0x2063   :  { %12707 = vmatpush3.msra.mxu1 %v7621_v15 }
0x2064   :  { %12708 = vmatprep.subr.mxu1 %v7620_v32 }
0x2065   :  { %12709 = vmatpush3.msra.mxu1 %v7620_v32  ;;  %v7647_v32 = vmul.f32 %v7631_v11, %v14891_v24 }
0x2066   :  { %12710 = vmatprep.subr.mxu1 %v7619_v25 }
0x2067   :  { %12711 = vmatpush3.msra.mxu1 %v7619_v25 }
0x2068   :  { %12712 = vmatprep.subr.mxu1 %v7618_v41 }
0x2069   :  { %12713 = vmatpush3.msra.mxu1 %v7618_v41  ;;  %v7633_v41 = vld [vmem:[#allocation2 + $0x2c0] sm:$0xff] }
0x206a   :  { %12714 = vmatprep.subr.mxu1 %v7617_v37 }
0x206b   :  { %12715 = vmatpush3.msra.mxu1 %v7617_v37 }
0x206c   :  { %12716 = vmatprep.subr.mxu1 %v7616_v4 }
0x206d   :  { %12717 = vmatpush3.msra.mxu1 %v7616_v4  ;;  %v7650_v4 = vmul.f32 %v7634_v23, %v14891_v24 }
0x206e   :  { %12718 = vmatprep.subr.mxu1 %v7615_v48 }
0x206f   :  { %12719 = vmatpush3.msra.mxu1 %v7615_v48 }
0x2070   :  { %12720 = vmatprep.subr.mxu1 %v7614_v16 }
0x2071   :  { %12721 = vmatpush3.msra.mxu1 %v7614_v16  ;;  %v7636_v16 = vld [vmem:[#allocation2 + $0x2d8] sm:$0xff] }
0x2072   :  { %12722 = vmatprep.subr.mxu1 %v7613_v21  ;;  %v7652_v35 = vmul.f32 %v7636_v16, %v14891_v24 }
0x2073   :  { %12723 = vmatpush3.msra.mxu1 %v7613_v21 }
0x2074   :  { %12724 = vmatprep.subr.mxu1 %v7612_v53 }
0x2075   :  { %12725 = vmatpush3.msra.mxu1 %v7612_v53  ;;  %v7649_v53 = vmul.f32 %v7633_v41, %v14891_v24 }
0x2076   :  { %12726 = vmatprep.subr.mxu1 %v7611_v0 }
0x2077   :  { %12727 = vmatpush3.msra.mxu1 %v7611_v0 }
0x2078   :  { %12728 = vmatprep.subr.mxu1 %v7610_v62 }
0x2079   :  { %12729 = vmatpush3.msra.mxu1 %v7610_v62  ;;  %v7635_v62 = vld [vmem:[#allocation2 + $0x2d0] sm:$0xff] }
0x207a   :  { %12730 = vmatprep.subr.mxu1 %v7609_v10  ;;  %v7651_v7 = vmul.f32 %v7635_v62, %v14891_v24 }
0x207b   :  { %12731 = vmatpush3.msra.mxu1 %v7609_v10 }
0x207c   :  { %12733 = vmatmul.mubr.f32.vlgmr.msra.gmra.mxu1 %v16388_v44 }
0x207d   :  { %12735 = vmatprep.mubr.f32.mxu1 %v16391_v36 }
0x2080   :  { %12736 = vmatmul.mubr.f32.gmra.mxu1 %v16394_v33 }
0x2081   :  { %12738 = vmatprep.mubr.f32.mxu1 %v16397_v52 }
0x2084   :  { %12739 = vmatmul.mubr.f32.gmra.mxu1 %v16400_v57 }
0x2085   :  { %12741 = vmatprep.mubr.f32.mxu1 %v16403_v46 }
0x2088   :  { %12742 = vmatmul.mubr.f32.gmra.mxu1 %v16406_v55 }
0x2089   :  { %12744 = vmatprep.mubr.f32.mxu1 %v16409_v63 }
0x208c   :  { %12745 = vmatmul.mubr.f32.gmra.mxu1 %v16412_v13 }
0x208d   :  { %12747 = vmatprep.mubr.f32.mxu1 %v16415_v38 }
0x2090   :  { %12748 = vmatmul.mubr.f32.gmra.mxu1 %v16418_v22 }
0x2091   :  { %12750 = vmatprep.mubr.f32.mxu1 %v16469_v50 }
0x2094   :  { %12751 = vmatmul.mubr.f32.gmra.mxu1 %v16472_v40 }
0x2095   :  { %12753 = vmatprep.mubr.f32.mxu1 %v16475_v31 }
0x2098   :  { %12754 = vmatmul.mubr.f32.gmra.mxu1 %v16478_v60 }
0x2099   :  { %12844 = vmatprep.mubr.f32.mxu1 %v16481_v6 }
0x213c   :  { %v12734_v1 = vpop.f32.mrf.mxu1 }
0x213d   :  { %v7729_v59 = vadd.f32 %v12734_v1, %v7642_v8  ;;  %v7638_v8 = vld [vmem:[#allocation2 + $0x2e8] sm:$0xff] }
0x213e   :  { %v7723_v12 = vpop.f32.mrf.mxu1  ;;  %v7654_v14 = vmul.f32 %v7638_v8, %v14891_v24 }
0x213f   :  { %7803 = vst.msk [vmem:[#allocation3 + $0x8] sm:$0xff] %vm321_vm0, %v7729_v59  ;;  %v7724_v39 = vadd.f32 %v7723_v12, %v7641_v20  ;;  %v7637_v20 = vld [vmem:[#allocation2 + $0x2e0] sm:$0xff] }
0x2140   :  { %v12737_v18 = vpop.f32.mrf.mxu1  ;;  %v7653_v43 = vmul.f32 %v7637_v20, %v14891_v24 }
0x2141   :  { %7802 = vst.msk [vmem:[#allocation3] sm:$0xff] %vm321_vm0, %v7724_v39  ;;  %v7739_v27 = vadd.f32 %v12737_v18, %v7644_v58  ;;  %v7640_v58 = vld [vmem:[#allocation2 + $0x2f8] sm:$0xff] }
0x2142   :  { %v7733_v28 = vpop.f32.mrf.mxu1  ;;  %v7656_v30 = vmul.f32 %v7640_v58, %v14891_v24 }
0x2143   :  { %7805 = vst.msk [vmem:[#allocation3 + $0x18] sm:$0xff] %vm321_vm0, %v7739_v27  ;;  %v7734_v61 = vadd.f32 %v7733_v28, %v7643_v2  ;;  %v7639_v2 = vld [vmem:[#allocation2 + $0x2f0] sm:$0xff] }
0x2144   :  { %v12740_v5 = vpop.f32.mrf.mxu1 }
0x2145   :  { %7804 = vst.msk [vmem:[#allocation3 + $0x10] sm:$0xff] %vm321_vm0, %v7734_v61  ;;  %v7749_v49 = vadd.f32 %v12740_v5, %v7646_v47  ;;  %v7655_v5 = vmul.f32 %v7639_v2, %v14891_v24 }
0x2146   :  { %v7743_v54 = vpop.f32.mrf.mxu1 }
0x2147   :  { %7807 = vst.msk [vmem:[#allocation3 + $0x28] sm:$0xff] %vm321_vm0, %v7749_v49  ;;  %v7744_v51 = vadd.f32 %v7743_v54, %v7645_v34 }
0x2148   :  { %v12743_v26 = vpop.f32.mrf.mxu1  ;;  %v7818_v16 = vld [vmem:[#allocation3] sm:$0xff] }
0x2149   :  { %7806 = vst.msk [vmem:[#allocation3 + $0x20] sm:$0xff] %vm321_vm0, %v7744_v51  ;;  %v7759_v15 = vadd.f32 %v12743_v26, %v7648_v17 }
0x214a   :  { %v7753_v25 = vpop.f32.mrf.mxu1 }
0x214b   :  { %7809 = vst.msk [vmem:[#allocation3 + $0x38] sm:$0xff] %vm321_vm0, %v7759_v15  ;;  %v7754_v37 = vadd.f32 %v7753_v25, %v7647_v32 }
0x214c   :  { %v12746_v48 = vpop.f32.mrf.mxu1 }
0x214d   :  { %7808 = vst.msk [vmem:[#allocation3 + $0x30] sm:$0xff] %vm321_vm0, %v7754_v37  ;;  %v7769_v21 = vadd.f32 %v12746_v48, %v7650_v4  ;;  %v7821_v37 = vld [vmem:[#allocation3 + $0x18] sm:$0xff]  ;;  %v7820_v4 = vld [vmem:[#allocation3 + $0x10] sm:$0xff]  ;;  %v7819_v48 = vld [vmem:[#allocation3 + $0x8] sm:$0xff] }
0x214e   :  { %v7763_v0 = vpop.f32.mrf.mxu1  ;;  %v7823_v25 = vld [vmem:[#allocation3 + $0x28] sm:$0xff] }
0x214f   :  { %7811 = vst.msk [vmem:[#allocation3 + $0x48] sm:$0xff] %vm321_vm0, %v7769_v21  ;;  %v7764_v10 = vadd.f32 %v7763_v0, %v7649_v53  ;;  %v7839_v53 = vld [vmem:[#allocation2 + $0x328] sm:$0xff] }
0x2150   :  { %v12749_v9 = vpop.f32.mrf.mxu1  ;;  %v7822_v41 = vld [vmem:[#allocation3 + $0x20] sm:$0xff]  ;;  %v7855_v8 = vmul.f32 %v7839_v53, %v14942_v3 }
0x2151   :  { %7810 = vst.msk [vmem:[#allocation3 + $0x40] sm:$0xff] %vm321_vm0, %v7764_v10  ;;  %v7779_v1 = vadd.f32 %v12749_v9, %v7652_v35  ;;  %v7838_v35 = vld [vmem:[#allocation2 + $0x320] sm:$0xff] }
0x2152   :  { %v7773_v59 = vpop.f32.mrf.mxu1  ;;  %v7825_v15 = vld [vmem:[#allocation3 + $0x38] sm:$0xff]  ;;  %v7854_v20 = vmul.f32 %v7838_v35, %v14942_v3 }
0x2153   :  { %7813 = vst.msk [vmem:[#allocation3 + $0x58] sm:$0xff] %vm321_vm0, %v7779_v1  ;;  %v7774_v12 = vadd.f32 %v7773_v59, %v7651_v7  ;;  %v7841_v7 = vld [vmem:[#allocation2 + $0x338] sm:$0xff] }
0x2154   :  { %v12752_v39 = vpop.f32.mrf.mxu1  ;;  %v7824_v32 = vld [vmem:[#allocation3 + $0x30] sm:$0xff]  ;;  %v7857_v58 = vmul.f32 %v7841_v7, %v14942_v3 }
0x2155   :  { %7812 = vst.msk [vmem:[#allocation3 + $0x50] sm:$0xff] %vm321_vm0, %v7774_v12  ;;  %v7789_v18 = vadd.f32 %v12752_v39, %v7654_v14  ;;  %v7840_v14 = vld [vmem:[#allocation2 + $0x330] sm:$0xff] }
0x2156   :  { %v7783_v27 = vpop.f32.mrf.mxu1  ;;  %v7827_v26 = vld [vmem:[#allocation3 + $0x48] sm:$0xff]  ;;  %v7856_v2 = vmul.f32 %v7840_v14, %v14942_v3 }
0x2157   :  { %7815 = vst.msk [vmem:[#allocation3 + $0x68] sm:$0xff] %vm321_vm0, %v7789_v18  ;;  %v7784_v28 = vadd.f32 %v7783_v27, %v7653_v43  ;;  %v7843_v43 = vld [vmem:[#allocation2 + $0x348] sm:$0xff] }
0x2158   :  { %v12755_v61 = vpop.f32.mrf.mxu1  ;;  %v7826_v23 = vld [vmem:[#allocation3 + $0x40] sm:$0xff] }
0x2159   :  { %7814 = vst.msk [vmem:[#allocation3 + $0x60] sm:$0xff] %vm321_vm0, %v7784_v28  ;;  %v7799_v47 = vadd.f32 %v12755_v61, %v7656_v30  ;;  %v7842_v30 = vld [vmem:[#allocation2 + $0x340] sm:$0xff] }
0x215a   :  { %v7793_v19 = vpop.f32.mrf.mxu1  ;;  %v7829_v17 = vld [vmem:[#allocation3 + $0x58] sm:$0xff] }
0x215b   :  { %7817 = vst.msk [vmem:[#allocation3 + $0x78] sm:$0xff] %vm321_vm0, %v7799_v47  ;;  %v7794_v49 = vadd.f32 %v7793_v19, %v7655_v5  ;;  %v7859_v47 = vmul.f32 %v7843_v43, %v14942_v3  ;;  %v7845_v19 = vld [vmem:[#allocation2 + $0x358] sm:$0xff]  ;;  %v16621_v43 = vld [vmem:[#allocation9 + $0x20] sm:$0xff] }
0x215c   :  { %v7828_v24 = vld [vmem:[#allocation3 + $0x50] sm:$0xff] }
0x215d   :  { %7816 = vst.msk [vmem:[#allocation3 + $0x70] sm:$0xff] %vm321_vm0, %v7794_v49 }
0x215e   :  { %v7831_v11 = vld [vmem:[#allocation3 + $0x68] sm:$0xff] }
0x2160   :  { %v7830_v51 = vld [vmem:[#allocation3 + $0x60] sm:$0xff] }
0x2162   :  { %v7833_v34 = vld [vmem:[#allocation3 + $0x78] sm:$0xff] }
0x2163   :  { %12756 = vmatprep.subr.mxu0 %v7833_v34 }
0x2164   :  { %12757 = vmatpush3.msra.mxu0 %v7833_v34  ;;  %v7832_v54 = vld [vmem:[#allocation3 + $0x70] sm:$0xff]  ;;  %v7858_v34 = vmul.f32 %v7842_v30, %v14942_v3  ;;  %v16633_v30 = vld [vmem:[#allocation9 + $0x40] sm:$0xff] }
0x2165   :  { %12758 = vmatprep.subr.mxu0 %v7832_v54 }
0x2166   :  { %12759 = vmatpush3.msra.mxu0 %v7832_v54 }
0x2167   :  { %12760 = vmatprep.subr.mxu0 %v7831_v11 }
0x2168   :  { %12761 = vmatpush3.msra.mxu0 %v7831_v11  ;;  %v7844_v11 = vld [vmem:[#allocation2 + $0x350] sm:$0xff] }
0x2169   :  { %12762 = vmatprep.subr.mxu0 %v7830_v51 }
0x216a   :  { %12763 = vmatpush3.msra.mxu0 %v7830_v51 }
0x216b   :  { %12764 = vmatprep.subr.mxu0 %v7829_v17 }
0x216c   :  { %12765 = vmatpush3.msra.mxu0 %v7829_v17  ;;  %v7861_v17 = vmul.f32 %v7845_v19, %v14942_v3  ;;  %v8044_v19 = vld [vmem:[#allocation2 + $0x388] sm:$0xff] }
0x216d   :  { %12766 = vmatprep.subr.mxu0 %v7828_v24 }
0x216e   :  { %12767 = vmatpush3.msra.mxu0 %v7828_v24 }
0x216f   :  { %12768 = vmatprep.subr.mxu0 %v7827_v26 }
0x2170   :  { %12769 = vmatpush3.msra.mxu0 %v7827_v26  ;;  %v7847_v26 = vld [vmem:[#allocation2 + $0x368] sm:$0xff] }
0x2171   :  { %12770 = vmatprep.subr.mxu0 %v7826_v23 }
0x2172   :  { %12771 = vmatpush3.msra.mxu0 %v7826_v23 }
0x2173   :  { %12772 = vmatprep.subr.mxu0 %v7825_v15 }
0x2174   :  { %12773 = vmatpush3.msra.mxu0 %v7825_v15  ;;  %v7860_v15 = vmul.f32 %v7844_v11, %v14942_v3  ;;  %v8046_v11 = vld [vmem:[#allocation2 + $0x398] sm:$0xff] }
0x2175   :  { %12774 = vmatprep.subr.mxu0 %v7824_v32 }
0x2176   :  { %12775 = vmatpush3.msra.mxu0 %v7824_v32 }
0x2177   :  { %12776 = vmatprep.subr.mxu0 %v7823_v25 }
0x2178   :  { %12777 = vmatpush3.msra.mxu0 %v7823_v25  ;;  %v7846_v25 = vld [vmem:[#allocation2 + $0x360] sm:$0xff] }
0x2179   :  { %12778 = vmatprep.subr.mxu0 %v7822_v41 }
0x217a   :  { %12779 = vmatpush3.msra.mxu0 %v7822_v41 }
0x217b   :  { %12780 = vmatprep.subr.mxu0 %v7821_v37 }
0x217c   :  { %12781 = vmatpush3.msra.mxu0 %v7821_v37  ;;  %v7863_v37 = vmul.f32 %v7847_v26, %v14942_v3  ;;  %v8045_v26 = vld [vmem:[#allocation2 + $0x390] sm:$0xff] }
0x217d   :  { %12782 = vmatprep.subr.mxu0 %v7820_v4 }
0x217e   :  { %12783 = vmatpush3.msra.mxu0 %v7820_v4 }
0x217f   :  { %12784 = vmatprep.subr.mxu0 %v7819_v48 }
0x2180   :  { %12785 = vmatpush3.msra.mxu0 %v7819_v48  ;;  %v7849_v48 = vld [vmem:[#allocation2 + $0x378] sm:$0xff] }
0x2181   :  { %12786 = vmatprep.subr.mxu0 %v7818_v16 }
0x2182   :  { %12787 = vmatpush3.msra.mxu0 %v7818_v16 }
0x2183   :  { %12789 = vmatmul.mubr.f32.vlgmr.msra.gmra.mxu0 %v16388_v44  ;;  %v7835_v44 = vld [vmem:[#allocation2 + $0x308] sm:$0xff] }
0x2184   :  { %12791 = vmatprep.mubr.f32.mxu0 %v16391_v36  ;;  %v7834_v36 = vld [vmem:[#allocation2 + $0x300] sm:$0xff] }
0x2187   :  { %12792 = vmatmul.mubr.f32.gmra.mxu0 %v16394_v33  ;;  %v7851_v33 = vmul.f32 %v7835_v44, %v14942_v3  ;;  %v7862_v44 = vmul.f32 %v7846_v25, %v14942_v3 }
0x2188   :  { %12794 = vmatprep.mubr.f32.mxu0 %v16397_v52 }
0x218b   :  { %12795 = vmatmul.mubr.f32.gmra.mxu0 %v16400_v57  ;;  %v7837_v57 = vld [vmem:[#allocation2 + $0x318] sm:$0xff] }
0x218c   :  { %12797 = vmatprep.mubr.f32.mxu0 %v16403_v46 }
0x218f   :  { %12798 = vmatmul.mubr.f32.gmra.mxu0 %v16406_v55  ;;  %v7850_v55 = vmul.f32 %v7834_v36, %v14942_v3 }
0x2190   :  { %12800 = vmatprep.mubr.f32.mxu0 %v16409_v63 }
0x2193   :  { %12801 = vmatmul.mubr.f32.gmra.mxu0 %v16412_v13  ;;  %v7836_v13 = vld [vmem:[#allocation2 + $0x310] sm:$0xff] }
0x2194   :  { %12803 = vmatprep.mubr.f32.mxu0 %v16415_v38  ;;  %v7852_v62 = vmul.f32 %v7836_v13, %v14942_v3 }
0x2197   :  { %12804 = vmatmul.mubr.f32.gmra.mxu0 %v16418_v22  ;;  %v7853_v22 = vmul.f32 %v7837_v57, %v14942_v3  ;;  %v7865_v57 = vmul.f32 %v7849_v48, %v14942_v3 }
0x2198   :  { %12806 = vmatprep.mubr.f32.mxu0 %v16469_v50 }
0x219b   :  { %12807 = vmatmul.mubr.f32.gmra.mxu0 %v16472_v40 }
0x219c   :  { %12809 = vmatprep.mubr.f32.mxu0 %v16475_v31 }
0x219f   :  { %12810 = vmatmul.mubr.f32.gmra.mxu0 %v16478_v60 }
0x21a0   :  { %12900 = vmatprep.mubr.f32.mxu0 %v16481_v6 }
0x2243   :  { %v12790_v52 = vpop.f32.mrf.mxu0 }
0x2244   :  { %v7938_v46 = vadd.f32 %v12790_v52, %v7851_v33  ;;  %v7848_v33 = vld [vmem:[#allocation2 + $0x370] sm:$0xff] }
0x2245   :  { %v7932_v63 = vpop.f32.mrf.mxu0 }
0x2246   :  { %8012 = vst.msk [vmem:[#allocation3 + $0x8] sm:$0xff] %vm321_vm0, %v7938_v46  ;;  %v7933_v38 = vadd.f32 %v7932_v63, %v7850_v55  ;;  %v7864_v63 = vmul.f32 %v7848_v33, %v14942_v3 }
0x2247   :  { %v12793_v21 = vpop.f32.mrf.mxu0 }
0x2248   :  { %8011 = vst.msk [vmem:[#allocation3] sm:$0xff] %vm321_vm0, %v7933_v38  ;;  %v7948_v0 = vadd.f32 %v12793_v21, %v7853_v22 }
0x2249   :  { %v7942_v10 = vpop.f32.mrf.mxu0 }
0x224a   :  { %8014 = vst.msk [vmem:[#allocation3 + $0x18] sm:$0xff] %vm321_vm0, %v7948_v0  ;;  %v7943_v9 = vadd.f32 %v7942_v10, %v7852_v62 }
0x224b   :  { %v12796_v1 = vpop.f32.mrf.mxu0 }
0x224c   :  { %8013 = vst.msk [vmem:[#allocation3 + $0x10] sm:$0xff] %vm321_vm0, %v7943_v9  ;;  %v7958_v59 = vadd.f32 %v12796_v1, %v7855_v8 }
0x224d   :  { %v7952_v12 = vpop.f32.mrf.mxu0 }
0x224e   :  { %8016 = vst.msk [vmem:[#allocation3 + $0x28] sm:$0xff] %vm321_vm0, %v7958_v59  ;;  %v7953_v39 = vadd.f32 %v7952_v12, %v7854_v20  ;;  %v8028_v12 = vld [vmem:[#allocation3 + $0x8] sm:$0xff] }
0x224f   :  { %v12799_v18 = vpop.f32.mrf.mxu0  ;;  %v8027_v14 = vld [vmem:[#allocation3] sm:$0xff] }
0x2250   :  { %8015 = vst.msk [vmem:[#allocation3 + $0x20] sm:$0xff] %vm321_vm0, %v7953_v39  ;;  %v7968_v27 = vadd.f32 %v12799_v18, %v7857_v58  ;;  %v16612_v39 = vld [vmem:[#allocation9 + $0x8] sm:$0xff]  ;;  %v16615_v58 = vld [vmem:[#allocation9 + $0x10] sm:$0xff]  ;;  %v16618_v18 = vld [vmem:[#allocation9 + $0x18] sm:$0xff] }
0x2251   :  { %v7962_v28 = vpop.f32.mrf.mxu0  ;;  %v8030_v59 = vld [vmem:[#allocation3 + $0x18] sm:$0xff] }
0x2252   :  { %8018 = vst.msk [vmem:[#allocation3 + $0x38] sm:$0xff] %vm321_vm0, %v7968_v27  ;;  %v7963_v61 = vadd.f32 %v7962_v28, %v7856_v2  ;;  %v16624_v27 = vld [vmem:[#allocation9 + $0x28] sm:$0xff]  ;;  %v16627_v2 = vld [vmem:[#allocation9 + $0x30] sm:$0xff]  ;;  %v16630_v28 = vld [vmem:[#allocation9 + $0x38] sm:$0xff] }
0x2253   :  { %v12802_v5 = vpop.f32.mrf.mxu0  ;;  %v8029_v20 = vld [vmem:[#allocation3 + $0x10] sm:$0xff] }
0x2254   :  { %8017 = vst.msk [vmem:[#allocation3 + $0x30] sm:$0xff] %vm321_vm0, %v7963_v61  ;;  %v7978_v49 = vadd.f32 %v12802_v5, %v7859_v47  ;;  %v16636_v61 = vld [vmem:[#allocation9 + $0x48] sm:$0xff]  ;;  %v16639_v47 = vld [vmem:[#allocation9 + $0x50] sm:$0xff]  ;;  %v16642_v5 = vld [vmem:[#allocation9 + $0x58] sm:$0xff] }
0x2255   :  { %v7972_v54 = vpop.f32.mrf.mxu0  ;;  %v8032_v1 = vld [vmem:[#allocation3 + $0x28] sm:$0xff] }
0x2256   :  { %8020 = vst.msk [vmem:[#allocation3 + $0x48] sm:$0xff] %vm321_vm0, %v7978_v49  ;;  %v7973_v51 = vadd.f32 %v7972_v54, %v7858_v34  ;;  %v8043_v49 = vld [vmem:[#allocation2 + $0x380] sm:$0xff]  ;;  %v8060_v34 = vmul.f32 %v8044_v19, %v15023_v56 }
0x2257   :  { %v12805_v24 = vpop.f32.mrf.mxu0  ;;  %v8031_v7 = vld [vmem:[#allocation3 + $0x20] sm:$0xff] }
0x2258   :  { %8019 = vst.msk [vmem:[#allocation3 + $0x40] sm:$0xff] %vm321_vm0, %v7973_v51  ;;  %v7988_v23 = vadd.f32 %v12805_v24, %v7861_v17  ;;  %v8059_v17 = vmul.f32 %v8043_v49, %v15023_v56 }
0x2259   :  { %v7982_v32 = vpop.f32.mrf.mxu0  ;;  %v8034_v9 = vld [vmem:[#allocation3 + $0x38] sm:$0xff] }
0x225a   :  { %8022 = vst.msk [vmem:[#allocation3 + $0x58] sm:$0xff] %vm321_vm0, %v7988_v23  ;;  %v7983_v41 = vadd.f32 %v7982_v32, %v7860_v15  ;;  %v8061_v23 = vmul.f32 %v8045_v26, %v15023_v56  ;;  %v8047_v32 = vld [vmem:[#allocation2 + $0x3a0] sm:$0xff] }
0x225b   :  { %v12808_v4 = vpop.f32.mrf.mxu0  ;;  %v8033_v8 = vld [vmem:[#allocation3 + $0x30] sm:$0xff] }
0x225c   :  { %8021 = vst.msk [vmem:[#allocation3 + $0x50] sm:$0xff] %vm321_vm0, %v7983_v41  ;;  %v7998_v16 = vadd.f32 %v12808_v4, %v7863_v37  ;;  %v8050_v4 = vld [vmem:[#allocation2 + $0x3b8] sm:$0xff] }
0x225d   :  { %v7992_v36 = vpop.f32.mrf.mxu0  ;;  %v8036_v10 = vld [vmem:[#allocation3 + $0x48] sm:$0xff] }
0x225e   :  { %8024 = vst.msk [vmem:[#allocation3 + $0x68] sm:$0xff] %vm321_vm0, %v7998_v16  ;;  %v7993_v52 = vadd.f32 %v7992_v36, %v7862_v44  ;;  %v8063_v16 = vmul.f32 %v8047_v32, %v15023_v56  ;;  %v8049_v36 = vld [vmem:[#allocation2 + $0x3b0] sm:$0xff] }
0x225f   :  { %v12811_v46 = vpop.f32.mrf.mxu0  ;;  %v8035_v35 = vld [vmem:[#allocation3 + $0x40] sm:$0xff] }
0x2260   :  { %8023 = vst.msk [vmem:[#allocation3 + $0x60] sm:$0xff] %vm321_vm0, %v7993_v52  ;;  %v8008_v55 = vadd.f32 %v12811_v46, %v7865_v57  ;;  %v8066_v52 = vmul.f32 %v8050_v4, %v15023_v56  ;;  %v8052_v46 = vld [vmem:[#allocation2 + $0x3c8] sm:$0xff] }
0x2261   :  { %v8002_v13 = vpop.f32.mrf.mxu0  ;;  %v8038_v62 = vld [vmem:[#allocation3 + $0x58] sm:$0xff] }
0x2262   :  { %8026 = vst.msk [vmem:[#allocation3 + $0x78] sm:$0xff] %vm321_vm0, %v8008_v55  ;;  %v8003_v38 = vadd.f32 %v8002_v13, %v7864_v63  ;;  %v8065_v63 = vmul.f32 %v8049_v36, %v15023_v56 }
0x2263   :  { %v8037_v3 = vld [vmem:[#allocation3 + $0x50] sm:$0xff] }
0x2264   :  { %8025 = vst.msk [vmem:[#allocation3 + $0x70] sm:$0xff] %vm321_vm0, %v8003_v38  ;;  %v8051_v38 = vld [vmem:[#allocation2 + $0x3c0] sm:$0xff] }
0x2265   :  { %v8040_v53 = vld [vmem:[#allocation3 + $0x68] sm:$0xff] }
0x2267   :  { %v8039_v0 = vld [vmem:[#allocation3 + $0x60] sm:$0xff] }
0x2269   :  { %v8042_v22 = vld [vmem:[#allocation3 + $0x78] sm:$0xff] }
0x226a   :  { %12812 = vmatprep.subr.mxu1 %v8042_v22 }
0x226b   :  { %12813 = vmatpush3.msra.mxu1 %v8042_v22  ;;  %v8041_v21 = vld [vmem:[#allocation3 + $0x70] sm:$0xff] }
0x226c   :  { %12814 = vmatprep.subr.mxu1 %v8041_v21 }
0x226d   :  { %12815 = vmatpush3.msra.mxu1 %v8041_v21  ;;  %v8068_v21 = vmul.f32 %v8052_v46, %v15023_v56 }
0x226e   :  { %12816 = vmatprep.subr.mxu1 %v8040_v53 }
0x226f   :  { %12817 = vmatpush3.msra.mxu1 %v8040_v53 }
0x2270   :  { %12818 = vmatprep.subr.mxu1 %v8039_v0 }
0x2271   :  { %12819 = vmatpush3.msra.mxu1 %v8039_v0  ;;  %v8054_v0 = vld [vmem:[#allocation2 + $0x3d8] sm:$0xff] }
0x2272   :  { %12820 = vmatprep.subr.mxu1 %v8038_v62 }
0x2273   :  { %12821 = vmatpush3.msra.mxu1 %v8038_v62 }
0x2274   :  { %12822 = vmatprep.subr.mxu1 %v8037_v3 }
0x2275   :  { %12823 = vmatpush3.msra.mxu1 %v8037_v3  ;;  %v8067_v3 = vmul.f32 %v8051_v38, %v15023_v56  ;;  %v16699_v38 = vld [vmem:[#allocation9 + $0x70] sm:$0xff] }
0x2276   :  { %12824 = vmatprep.subr.mxu1 %v8036_v10 }
0x2277   :  { %12825 = vmatpush3.msra.mxu1 %v8036_v10 }
0x2278   :  { %12826 = vmatprep.subr.mxu1 %v8035_v35 }
0x2279   :  { %12827 = vmatpush3.msra.mxu1 %v8035_v35  ;;  %v8053_v35 = vld [vmem:[#allocation2 + $0x3d0] sm:$0xff] }
0x227a   :  { %12828 = vmatprep.subr.mxu1 %v8034_v9 }
0x227b   :  { %12829 = vmatpush3.msra.mxu1 %v8034_v9 }
0x227c   :  { %12830 = vmatprep.subr.mxu1 %v8033_v8 }
0x227d   :  { %12831 = vmatpush3.msra.mxu1 %v8033_v8  ;;  %v8070_v8 = vmul.f32 %v8054_v0, %v15023_v56  ;;  %v8252_v0 = vld [vmem:[#allocation2 + $0x400] sm:$0xff] }
0x227e   :  { %12832 = vmatprep.subr.mxu1 %v8032_v1 }
0x227f   :  { %12833 = vmatpush3.msra.mxu1 %v8032_v1 }
0x2280   :  { %12834 = vmatprep.subr.mxu1 %v8031_v7 }
0x2281   :  { %12835 = vmatpush3.msra.mxu1 %v8031_v7  ;;  %v8056_v7 = vld [vmem:[#allocation2 + $0x3e8] sm:$0xff] }
0x2282   :  { %12836 = vmatprep.subr.mxu1 %v8030_v59  ;;  %v8072_v49 = vmul.f32 %v8056_v7, %v15023_v56 }
0x2283   :  { %12837 = vmatpush3.msra.mxu1 %v8030_v59 }
0x2284   :  { %12838 = vmatprep.subr.mxu1 %v8029_v20 }
0x2285   :  { %12839 = vmatpush3.msra.mxu1 %v8029_v20  ;;  %v8069_v20 = vmul.f32 %v8053_v35, %v15023_v56 }
0x2286   :  { %12840 = vmatprep.subr.mxu1 %v8028_v12 }
0x2287   :  { %12841 = vmatpush3.msra.mxu1 %v8028_v12 }
0x2288   :  { %12842 = vmatprep.subr.mxu1 %v8027_v14 }
0x2289   :  { %12843 = vmatpush3.msra.mxu1 %v8027_v14  ;;  %v8055_v14 = vld [vmem:[#allocation2 + $0x3e0] sm:$0xff] }
0x228a   :  { %12845 = vmatmul.mubr.f32.vlgmr.msra.gmra.mxu1 %v16612_v39 }
0x228b   :  { %12847 = vmatprep.mubr.f32.mxu1 %v16615_v58 }
0x228e   :  { %12848 = vmatmul.mubr.f32.gmra.mxu1 %v16618_v18 }
0x228f   :  { %12850 = vmatprep.mubr.f32.mxu1 %v16621_v43 }
0x2292   :  { %12851 = vmatmul.mubr.f32.gmra.mxu1 %v16624_v27 }
0x2293   :  { %12853 = vmatprep.mubr.f32.mxu1 %v16627_v2 }
0x2296   :  { %12854 = vmatmul.mubr.f32.gmra.mxu1 %v16630_v28 }
0x2297   :  { %12856 = vmatprep.mubr.f32.mxu1 %v16633_v30 }
0x229a   :  { %12857 = vmatmul.mubr.f32.gmra.mxu1 %v16636_v61 }
0x229b   :  { %12859 = vmatprep.mubr.f32.mxu1 %v16639_v47 }
0x229e   :  { %12860 = vmatmul.mubr.f32.gmra.mxu1 %v16642_v5 }
0x229f   :  { %12862 = vmatprep.mubr.f32.mxu1 %v16469_v50 }
0x22a2   :  { %12863 = vmatmul.mubr.f32.gmra.mxu1 %v16472_v40  ;;  %v8062_v40 = vmul.f32 %v8046_v11, %v15023_v56 }
0x22a3   :  { %12865 = vmatprep.mubr.f32.mxu1 %v16475_v31 }
0x22a6   :  { %12866 = vmatmul.mubr.f32.gmra.mxu1 %v16478_v60  ;;  %v8048_v60 = vld [vmem:[#allocation2 + $0x3a8] sm:$0xff] }
0x22a7   :  { %12956 = vmatprep.mubr.f32.mxu1 %v16481_v6  ;;  %v8064_v41 = vmul.f32 %v8048_v60, %v15023_v56 }
0x234a   :  { %v12846_v54 = vpop.f32.mrf.mxu1 }
0x234b   :  { %v8147_v51 = vadd.f32 %v12846_v54, %v8060_v34  ;;  %v8058_v54 = vld [vmem:[#allocation2 + $0x3f8] sm:$0xff] }
0x234c   :  { %v8141_v24 = vpop.f32.mrf.mxu1 }
0x234d   :  { %8221 = vst.msk [vmem:[#allocation3 + $0x8] sm:$0xff] %vm321_vm0, %v8147_v51  ;;  %v8142_v50 = vadd.f32 %v8141_v24, %v8059_v17  ;;  %v8071_v51 = vmul.f32 %v8055_v14, %v15023_v56  ;;  %v8057_v24 = vld [vmem:[#allocation2 + $0x3f0] sm:$0xff] }
0x234e   :  { %v12849_v31 = vpop.f32.mrf.mxu1  ;;  %v8073_v60 = vmul.f32 %v8057_v24, %v15023_v56 }
0x234f   :  { %8220 = vst.msk [vmem:[#allocation3] sm:$0xff] %vm321_vm0, %v8142_v50  ;;  %v8157_v6 = vadd.f32 %v12849_v31, %v8062_v40  ;;  %v8074_v50 = vmul.f32 %v8058_v54, %v15023_v56 }
0x2350   :  { %v8151_v15 = vpop.f32.mrf.mxu1 }
0x2351   :  { %8223 = vst.msk [vmem:[#allocation3 + $0x18] sm:$0xff] %vm321_vm0, %v8157_v6  ;;  %v8152_v25 = vadd.f32 %v8151_v15, %v8061_v23 }
0x2352   :  { %v12852_v37 = vpop.f32.mrf.mxu1 }
0x2353   :  { %8222 = vst.msk [vmem:[#allocation3 + $0x10] sm:$0xff] %vm321_vm0, %v8152_v25  ;;  %v8167_v48 = vadd.f32 %v12852_v37, %v8064_v41 }
0x2354   :  { %v8161_v44 = vpop.f32.mrf.mxu1  ;;  %v8237_v46 = vld [vmem:[#allocation3 + $0x8] sm:$0xff] }
0x2355   :  { %8225 = vst.msk [vmem:[#allocation3 + $0x28] sm:$0xff] %vm321_vm0, %v8167_v48  ;;  %v8162_v33 = vadd.f32 %v8161_v44, %v8063_v16 }
0x2356   :  { %v12855_v57 = vpop.f32.mrf.mxu1 }
0x2357   :  { %8224 = vst.msk [vmem:[#allocation3 + $0x20] sm:$0xff] %vm321_vm0, %v8162_v33  ;;  %v8177_v55 = vadd.f32 %v12855_v57, %v8066_v52 }
0x2358   :  { %v8171_v13 = vpop.f32.mrf.mxu1  ;;  %v8239_v52 = vld [vmem:[#allocation3 + $0x18] sm:$0xff] }
0x2359   :  { %8227 = vst.msk [vmem:[#allocation3 + $0x38] sm:$0xff] %vm321_vm0, %v8177_v55  ;;  %v8172_v22 = vadd.f32 %v8171_v13, %v8065_v63  ;;  %v8236_v55 = vld [vmem:[#allocation3] sm:$0xff]  ;;  %v16696_v13 = vld [vmem:[#allocation9 + $0x68] sm:$0xff] }
0x235a   :  { %v12858_v53 = vpop.f32.mrf.mxu1  ;;  %v8238_v57 = vld [vmem:[#allocation3 + $0x10] sm:$0xff]  ;;  %v16693_v63 = vld [vmem:[#allocation9 + $0x60] sm:$0xff] }
0x235b   :  { %8226 = vst.msk [vmem:[#allocation3 + $0x30] sm:$0xff] %vm321_vm0, %v8172_v22  ;;  %v8187_v62 = vadd.f32 %v12858_v53, %v8068_v21  ;;  %v16702_v22 = vld [vmem:[#allocation9 + $0x78] sm:$0xff]  ;;  %v13291_v21 = vld [vmem:[#allocation9] sm:$0xff]  ;;  %v8253_v53 = vld [vmem:[#allocation2 + $0x408] sm:$0xff] }
0x235c   :  { %v8181_v10 = vpop.f32.mrf.mxu1  ;;  %v8241_v36 = vld [vmem:[#allocation3 + $0x28] sm:$0xff] }
0x235d   :  { %8229 = vst.msk [vmem:[#allocation3 + $0x48] sm:$0xff] %vm321_vm0, %v8187_v62  ;;  %v8182_v9 = vadd.f32 %v8181_v10, %v8067_v3  ;;  %v8269_v62 = vmul.f32 %v8253_v53, %v15076_v45  ;;  %v8255_v10 = vld [vmem:[#allocation2 + $0x418] sm:$0xff] }
0x235e   :  { %v12861_v1 = vpop.f32.mrf.mxu1  ;;  %v8240_v33 = vld [vmem:[#allocation3 + $0x20] sm:$0xff] }
0x235f   :  { %8228 = vst.msk [vmem:[#allocation3 + $0x40] sm:$0xff] %vm321_vm0, %v8182_v9  ;;  %v8197_v59 = vadd.f32 %v12861_v1, %v8070_v8  ;;  %v8268_v9 = vmul.f32 %v8252_v0, %v15076_v45  ;;  %v8254_v1 = vld [vmem:[#allocation2 + $0x410] sm:$0xff] }
0x2360   :  { %v8191_v12 = vpop.f32.mrf.mxu1  ;;  %v8243_v16 = vld [vmem:[#allocation3 + $0x38] sm:$0xff] }
0x2361   :  { %8231 = vst.msk [vmem:[#allocation3 + $0x58] sm:$0xff] %vm321_vm0, %v8197_v59  ;;  %v8192_v19 = vadd.f32 %v8191_v12, %v8069_v20  ;;  %v8271_v59 = vmul.f32 %v8255_v10, %v15076_v45  ;;  %v8257_v12 = vld [vmem:[#allocation2 + $0x428] sm:$0xff] }
0x2362   :  { %v12864_v34 = vpop.f32.mrf.mxu1  ;;  %v8242_v44 = vld [vmem:[#allocation3 + $0x30] sm:$0xff] }
0x2363   :  { %8230 = vst.msk [vmem:[#allocation3 + $0x50] sm:$0xff] %vm321_vm0, %v8192_v19  ;;  %v8207_v11 = vadd.f32 %v12864_v34, %v8072_v49  ;;  %v8270_v19 = vmul.f32 %v8254_v1, %v15076_v45  ;;  %v8256_v34 = vld [vmem:[#allocation2 + $0x420] sm:$0xff] }
0x2364   :  { %v8201_v17 = vpop.f32.mrf.mxu1  ;;  %v8245_v4 = vld [vmem:[#allocation3 + $0x48] sm:$0xff] }
0x2365   :  { %8233 = vst.msk [vmem:[#allocation3 + $0x68] sm:$0xff] %vm321_vm0, %v8207_v11  ;;  %v8202_v26 = vadd.f32 %v8201_v17, %v8071_v51  ;;  %v8273_v11 = vmul.f32 %v8257_v12, %v15076_v45  ;;  %v8259_v17 = vld [vmem:[#allocation2 + $0x438] sm:$0xff] }
0x2366   :  { %v12867_v40 = vpop.f32.mrf.mxu1  ;;  %v8244_v48 = vld [vmem:[#allocation3 + $0x40] sm:$0xff] }
0x2367   :  { %8232 = vst.msk [vmem:[#allocation3 + $0x60] sm:$0xff] %vm321_vm0, %v8202_v26  ;;  %v8217_v31 = vadd.f32 %v12867_v40, %v8074_v50  ;;  %v8272_v26 = vmul.f32 %v8256_v34, %v15076_v45  ;;  %v8258_v40 = vld [vmem:[#allocation2 + $0x430] sm:$0xff] }
0x2368   :  { %v8211_v6 = vpop.f32.mrf.mxu1  ;;  %v8247_v37 = vld [vmem:[#allocation3 + $0x58] sm:$0xff] }
0x2369   :  { %8235 = vst.msk [vmem:[#allocation3 + $0x78] sm:$0xff] %vm321_vm0, %v8217_v31  ;;  %v8212_v23 = vadd.f32 %v8211_v6, %v8073_v60  ;;  %v8275_v60 = vmul.f32 %v8259_v17, %v15076_v45 }
0x236a   :  { %v8246_v56 = vld [vmem:[#allocation3 + $0x50] sm:$0xff] }
0x236b   :  { %8234 = vst.msk [vmem:[#allocation3 + $0x70] sm:$0xff] %vm321_vm0, %v8212_v23  ;;  %v8261_v23 = vld [vmem:[#allocation2 + $0x448] sm:$0xff] }
0x236c   :  { %v8249_v25 = vld [vmem:[#allocation3 + $0x68] sm:$0xff] }
0x236e   :  { %v8248_v41 = vld [vmem:[#allocation3 + $0x60] sm:$0xff] }
0x2370   :  { %v8251_v15 = vld [vmem:[#allocation3 + $0x78] sm:$0xff] }
0x2371   :  { %12868 = vmatprep.subr.mxu0 %v8251_v15 }
0x2372   :  { %12869 = vmatpush3.msra.mxu0 %v8251_v15  ;;  %v8250_v32 = vld [vmem:[#allocation3 + $0x70] sm:$0xff] }
0x2373   :  { %12870 = vmatprep.subr.mxu0 %v8250_v32 }
0x2374   :  { %12871 = vmatpush3.msra.mxu0 %v8250_v32  ;;  %v8274_v32 = vmul.f32 %v8258_v40, %v15076_v45 }
0x2375   :  { %12872 = vmatprep.subr.mxu0 %v8249_v25 }
0x2376   :  { %12873 = vmatpush3.msra.mxu0 %v8249_v25 }
0x2377   :  { %12874 = vmatprep.subr.mxu0 %v8248_v41 }
0x2378   :  { %12875 = vmatpush3.msra.mxu0 %v8248_v41  ;;  %v8260_v41 = vld [vmem:[#allocation2 + $0x440] sm:$0xff] }
0x2379   :  { %12876 = vmatprep.subr.mxu0 %v8247_v37 }
0x237a   :  { %12877 = vmatpush3.msra.mxu0 %v8247_v37 }
0x237b   :  { %12878 = vmatprep.subr.mxu0 %v8246_v56 }
0x237c   :  { %12879 = vmatpush3.msra.mxu0 %v8246_v56  ;;  %v8277_v56 = vmul.f32 %v8261_v23, %v15076_v45 }
0x237d   :  { %12880 = vmatprep.subr.mxu0 %v8245_v4 }
0x237e   :  { %12881 = vmatpush3.msra.mxu0 %v8245_v4 }
0x237f   :  { %12882 = vmatprep.subr.mxu0 %v8244_v48 }
0x2380   :  { %12883 = vmatpush3.msra.mxu0 %v8244_v48  ;;  %v8263_v48 = vld [vmem:[#allocation2 + $0x458] sm:$0xff] }
0x2381   :  { %12884 = vmatprep.subr.mxu0 %v8243_v16 }
0x2382   :  { %12885 = vmatpush3.msra.mxu0 %v8243_v16 }
0x2383   :  { %12886 = vmatprep.subr.mxu0 %v8242_v44 }
0x2384   :  { %12887 = vmatpush3.msra.mxu0 %v8242_v44  ;;  %v8276_v44 = vmul.f32 %v8260_v41, %v15076_v45 }
0x2385   :  { %12888 = vmatprep.subr.mxu0 %v8241_v36 }
0x2386   :  { %12889 = vmatpush3.msra.mxu0 %v8241_v36 }
0x2387   :  { %12890 = vmatprep.subr.mxu0 %v8240_v33 }
0x2388   :  { %12891 = vmatpush3.msra.mxu0 %v8240_v33  ;;  %v8262_v33 = vld [vmem:[#allocation2 + $0x450] sm:$0xff] }
0x2389   :  { %12892 = vmatprep.subr.mxu0 %v8239_v52  ;;  %v8278_v53 = vmul.f32 %v8262_v33, %v15076_v45 }
0x238a   :  { %12893 = vmatpush3.msra.mxu0 %v8239_v52 }
0x238b   :  { %12894 = vmatprep.subr.mxu0 %v8238_v57 }
0x238c   :  { %12895 = vmatpush3.msra.mxu0 %v8238_v57  ;;  %v8279_v57 = vmul.f32 %v8263_v48, %v15076_v45 }
0x238d   :  { %12896 = vmatprep.subr.mxu0 %v8237_v46 }
0x238e   :  { %12897 = vmatpush3.msra.mxu0 %v8237_v46 }
0x238f   :  { %12898 = vmatprep.subr.mxu0 %v8236_v55 }
0x2390   :  { %12899 = vmatpush3.msra.mxu0 %v8236_v55  ;;  %v8265_v55 = vld [vmem:[#allocation2 + $0x468] sm:$0xff] }
0x2391   :  { %12901 = vmatmul.mubr.f32.vlgmr.msra.gmra.mxu0 %v16612_v39  ;;  %v8281_v10 = vmul.f32 %v8265_v55, %v15076_v45 }
0x2392   :  { %12903 = vmatprep.mubr.f32.mxu0 %v16615_v58 }
0x2395   :  { %12904 = vmatmul.mubr.f32.gmra.mxu0 %v16618_v18 }
0x2396   :  { %12906 = vmatprep.mubr.f32.mxu0 %v16621_v43 }
0x2399   :  { %12907 = vmatmul.mubr.f32.gmra.mxu0 %v16624_v27 }
0x239a   :  { %12909 = vmatprep.mubr.f32.mxu0 %v16627_v2 }
0x239d   :  { %12910 = vmatmul.mubr.f32.gmra.mxu0 %v16630_v28 }
0x239e   :  { %12912 = vmatprep.mubr.f32.mxu0 %v16633_v30 }
0x23a1   :  { %12913 = vmatmul.mubr.f32.gmra.mxu0 %v16636_v61 }
0x23a2   :  { %12915 = vmatprep.mubr.f32.mxu0 %v16639_v47 }
0x23a5   :  { %12916 = vmatmul.mubr.f32.gmra.mxu0 %v16642_v5 }
0x23a6   :  { %12918 = vmatprep.mubr.f32.mxu0 %v16693_v63 }
0x23a9   :  { %12919 = vmatmul.mubr.f32.gmra.mxu0 %v16696_v13 }
0x23aa   :  { %12921 = vmatprep.mubr.f32.mxu0 %v16699_v38 }
0x23ad   :  { %12922 = vmatmul.mubr.f32.gmra.mxu0 %v16702_v22 }
0x23ae   :  { %13012 = vmatprep.mubr.f32.mxu0 %v13291_v21 }
0x2451   :  { %v12902_v3 = vpop.f32.mrf.mxu0 }
0x2452   :  { %v8356_v35 = vadd.f32 %v12902_v3, %v8269_v62  ;;  %v8264_v62 = vld [vmem:[#allocation2 + $0x460] sm:$0xff] }
0x2453   :  { %v8350_v8 = vpop.f32.mrf.mxu0  ;;  %v8280_v1 = vmul.f32 %v8264_v62, %v15076_v45  ;;  %v8465_v62 = vld [vmem:[#allocation2 + $0x4a0] sm:$0xff] }
0x2454   :  { %8430 = vst.msk [vmem:[#allocation3 + $0x8] sm:$0xff] %vm321_vm0, %v8356_v35  ;;  %v8351_v7 = vadd.f32 %v8350_v8, %v8268_v9  ;;  %v8267_v9 = vld [vmem:[#allocation2 + $0x478] sm:$0xff] }
0x2455   :  { %v12905_v20 = vpop.f32.mrf.mxu0  ;;  %v8283_v12 = vmul.f32 %v8267_v9, %v15076_v45  ;;  %v8468_v9 = vld [vmem:[#allocation2 + $0x4b8] sm:$0xff] }
0x2456   :  { %8429 = vst.msk [vmem:[#allocation3] sm:$0xff] %vm321_vm0, %v8351_v7  ;;  %v8366_v14 = vadd.f32 %v12905_v20, %v8271_v59  ;;  %v8266_v59 = vld [vmem:[#allocation2 + $0x470] sm:$0xff] }
0x2457   :  { %v8360_v49 = vpop.f32.mrf.mxu0 }
0x2458   :  { %8432 = vst.msk [vmem:[#allocation3 + $0x18] sm:$0xff] %vm321_vm0, %v8366_v14  ;;  %v8361_v54 = vadd.f32 %v8360_v49, %v8270_v19  ;;  %v8282_v49 = vmul.f32 %v8266_v59, %v15076_v45  ;;  %v8467_v59 = vld [vmem:[#allocation2 + $0x4b0] sm:$0xff] }
0x2459   :  { %v12908_v51 = vpop.f32.mrf.mxu0 }
0x245a   :  { %8431 = vst.msk [vmem:[#allocation3 + $0x10] sm:$0xff] %vm321_vm0, %v8361_v54  ;;  %v8376_v24 = vadd.f32 %v12908_v51, %v8273_v11 }
0x245b   :  { %v8370_v50 = vpop.f32.mrf.mxu0 }
0x245c   :  { %8434 = vst.msk [vmem:[#allocation3 + $0x28] sm:$0xff] %vm321_vm0, %v8376_v24  ;;  %v8371_v31 = vadd.f32 %v8370_v50, %v8272_v26 }
0x245d   :  { %v12911_v6 = vpop.f32.mrf.mxu0  ;;  %v8445_v41 = vld [vmem:[#allocation3] sm:$0xff] }
0x245e   :  { %8433 = vst.msk [vmem:[#allocation3 + $0x20] sm:$0xff] %vm321_vm0, %v8371_v31  ;;  %v8386_v15 = vadd.f32 %v12911_v6, %v8275_v60 }
0x245f   :  { %v8380_v25 = vpop.f32.mrf.mxu0 }
0x2460   :  { %8436 = vst.msk [vmem:[#allocation3 + $0x38] sm:$0xff] %vm321_vm0, %v8386_v15  ;;  %v8381_v37 = vadd.f32 %v8380_v25, %v8274_v32  ;;  %v8448_v15 = vld [vmem:[#allocation3 + $0x18] sm:$0xff]  ;;  %v8446_v25 = vld [vmem:[#allocation3 + $0x8] sm:$0xff] }
0x2461   :  { %v12914_v4 = vpop.f32.mrf.mxu0  ;;  %v8447_v32 = vld [vmem:[#allocation3 + $0x10] sm:$0xff] }
0x2462   :  { %8435 = vst.msk [vmem:[#allocation3 + $0x30] sm:$0xff] %vm321_vm0, %v8381_v37  ;;  %v8396_v16 = vadd.f32 %v12914_v4, %v8277_v56  ;;  %v8462_v37 = vld [vmem:[#allocation2 + $0x488] sm:$0xff]  ;;  %v8461_v56 = vld [vmem:[#allocation2 + $0x480] sm:$0xff] }
0x2463   :  { %v8390_v36 = vpop.f32.mrf.mxu0  ;;  %v8450_v6 = vld [vmem:[#allocation3 + $0x28] sm:$0xff]  ;;  %v8478_v4 = vmul.f32 %v8462_v37, %v15127_v42  ;;  %v8473_v37 = vld [vmem:[#allocation2 + $0x4e0] sm:$0xff] }
0x2464   :  { %8438 = vst.msk [vmem:[#allocation3 + $0x48] sm:$0xff] %vm321_vm0, %v8396_v16  ;;  %v8391_v52 = vadd.f32 %v8390_v36, %v8276_v44  ;;  %v8464_v16 = vld [vmem:[#allocation2 + $0x498] sm:$0xff]  ;;  %v8477_v36 = vmul.f32 %v8461_v56, %v15127_v42 }
0x2465   :  { %v12917_v46 = vpop.f32.mrf.mxu0  ;;  %v8449_v23 = vld [vmem:[#allocation3 + $0x20] sm:$0xff] }
0x2466   :  { %8437 = vst.msk [vmem:[#allocation3 + $0x40] sm:$0xff] %vm321_vm0, %v8391_v52  ;;  %v8406_v21 = vadd.f32 %v12917_v46, %v8279_v57  ;;  %v8463_v52 = vld [vmem:[#allocation2 + $0x490] sm:$0xff]  ;;  %v8480_v46 = vmul.f32 %v8464_v16, %v15127_v42  ;;  %v8476_v16 = vld [vmem:[#allocation2 + $0x4f8] sm:$0xff] }
0x2467   :  { %v8400_v0 = vpop.f32.mrf.mxu0  ;;  %v8452_v31 = vld [vmem:[#allocation3 + $0x38] sm:$0xff] }
0x2468   :  { %8440 = vst.msk [vmem:[#allocation3 + $0x58] sm:$0xff] %vm321_vm0, %v8406_v21  ;;  %v8401_v3 = vadd.f32 %v8400_v0, %v8278_v53  ;;  %v8466_v21 = vld [vmem:[#allocation2 + $0x4a8] sm:$0xff]  ;;  %v8479_v53 = vmul.f32 %v8463_v52, %v15127_v42  ;;  %v8475_v52 = vld [vmem:[#allocation2 + $0x4f0] sm:$0xff] }
0x2469   :  { %v12920_v35 = vpop.f32.mrf.mxu0  ;;  %v8451_v60 = vld [vmem:[#allocation3 + $0x30] sm:$0xff] }
0x246a   :  { %8439 = vst.msk [vmem:[#allocation3 + $0x50] sm:$0xff] %vm321_vm0, %v8401_v3  ;;  %v8416_v8 = vadd.f32 %v12920_v35, %v8281_v10  ;;  %v8482_v10 = vmul.f32 %v8466_v21, %v15127_v42 }
0x246b   :  { %v8410_v7 = vpop.f32.mrf.mxu0  ;;  %v8454_v50 = vld [vmem:[#allocation3 + $0x48] sm:$0xff] }
0x246c   :  { %8442 = vst.msk [vmem:[#allocation3 + $0x68] sm:$0xff] %vm321_vm0, %v8416_v8  ;;  %v8411_v20 = vadd.f32 %v8410_v7, %v8280_v1  ;;  %v8481_v1 = vmul.f32 %v8465_v62, %v15127_v42 }
0x246d   :  { %v12923_v14 = vpop.f32.mrf.mxu0  ;;  %v8453_v40 = vld [vmem:[#allocation3 + $0x40] sm:$0xff] }
0x246e   :  { %8441 = vst.msk [vmem:[#allocation3 + $0x60] sm:$0xff] %vm321_vm0, %v8411_v20  ;;  %v8426_v19 = vadd.f32 %v12923_v14, %v8283_v12  ;;  %v8484_v12 = vmul.f32 %v8468_v9, %v15127_v42 }
0x246f   :  { %v8420_v34 = vpop.f32.mrf.mxu0  ;;  %v8456_v26 = vld [vmem:[#allocation3 + $0x58] sm:$0xff] }
0x2470   :  { %8444 = vst.msk [vmem:[#allocation3 + $0x78] sm:$0xff] %vm321_vm0, %v8426_v19  ;;  %v8421_v54 = vadd.f32 %v8420_v34, %v8282_v49  ;;  %v8470_v19 = vld [vmem:[#allocation2 + $0x4c8] sm:$0xff]  ;;  %v8483_v34 = vmul.f32 %v8467_v59, %v15127_v42 }
0x2471   :  { %v8455_v45 = vld [vmem:[#allocation3 + $0x50] sm:$0xff] }
0x2472   :  { %8443 = vst.msk [vmem:[#allocation3 + $0x70] sm:$0xff] %vm321_vm0, %v8421_v54 }
0x2473   :  { %v8458_v17 = vld [vmem:[#allocation3 + $0x68] sm:$0xff] }
0x2475   :  { %v8457_v24 = vld [vmem:[#allocation3 + $0x60] sm:$0xff] }
0x2477   :  { %v8460_v11 = vld [vmem:[#allocation3 + $0x78] sm:$0xff] }
0x2478   :  { %12924 = vmatprep.subr.mxu1 %v8460_v11 }
0x2479   :  { %12925 = vmatpush3.msra.mxu1 %v8460_v11  ;;  %v8459_v51 = vld [vmem:[#allocation3 + $0x70] sm:$0xff]  ;;  %v8469_v11 = vld [vmem:[#allocation2 + $0x4c0] sm:$0xff] }
0x247a   :  { %12926 = vmatprep.subr.mxu1 %v8459_v51 }
0x247b   :  { %12927 = vmatpush3.msra.mxu1 %v8459_v51 }
0x247c   :  { %12928 = vmatprep.subr.mxu1 %v8458_v17 }
0x247d   :  { %12929 = vmatpush3.msra.mxu1 %v8458_v17  ;;  %v8486_v17 = vmul.f32 %v8470_v19, %v15127_v42 }
0x247e   :  { %12930 = vmatprep.subr.mxu1 %v8457_v24 }
0x247f   :  { %12931 = vmatpush3.msra.mxu1 %v8457_v24 }
0x2480   :  { %12932 = vmatprep.subr.mxu1 %v8456_v26 }
0x2481   :  { %12933 = vmatpush3.msra.mxu1 %v8456_v26  ;;  %v8472_v26 = vld [vmem:[#allocation2 + $0x4d8] sm:$0xff] }
0x2482   :  { %12934 = vmatprep.subr.mxu1 %v8455_v45 }
0x2483   :  { %12935 = vmatpush3.msra.mxu1 %v8455_v45 }
0x2484   :  { %12936 = vmatprep.subr.mxu1 %v8454_v50 }
0x2485   :  { %12937 = vmatpush3.msra.mxu1 %v8454_v50  ;;  %v8485_v50 = vmul.f32 %v8469_v11, %v15127_v42 }
0x2486   :  { %12938 = vmatprep.subr.mxu1 %v8453_v40 }
0x2487   :  { %12939 = vmatpush3.msra.mxu1 %v8453_v40 }
0x2488   :  { %12940 = vmatprep.subr.mxu1 %v8452_v31 }
0x2489   :  { %12941 = vmatpush3.msra.mxu1 %v8452_v31  ;;  %v8471_v31 = vld [vmem:[#allocation2 + $0x4d0] sm:$0xff] }
0x248a   :  { %12942 = vmatprep.subr.mxu1 %v8451_v60 }
0x248b   :  { %12943 = vmatpush3.msra.mxu1 %v8451_v60 }
0x248c   :  { %12944 = vmatprep.subr.mxu1 %v8450_v6 }
0x248d   :  { %12945 = vmatpush3.msra.mxu1 %v8450_v6  ;;  %v8488_v6 = vmul.f32 %v8472_v26, %v15127_v42 }
0x248e   :  { %12946 = vmatprep.subr.mxu1 %v8449_v23 }
0x248f   :  { %12947 = vmatpush3.msra.mxu1 %v8449_v23 }
0x2490   :  { %12948 = vmatprep.subr.mxu1 %v8448_v15 }
0x2491   :  { %12949 = vmatpush3.msra.mxu1 %v8448_v15  ;;  %v8474_v15 = vld [vmem:[#allocation2 + $0x4e8] sm:$0xff] }
0x2492   :  { %12950 = vmatprep.subr.mxu1 %v8447_v32 }
0x2493   :  { %12951 = vmatpush3.msra.mxu1 %v8447_v32 }
0x2494   :  { %12952 = vmatprep.subr.mxu1 %v8446_v25 }
0x2495   :  { %12953 = vmatpush3.msra.mxu1 %v8446_v25  ;;  %v8487_v25 = vmul.f32 %v8471_v31, %v15127_v42 }
0x2496   :  { %12954 = vmatprep.subr.mxu1 %v8445_v41 }
0x2497   :  { %12955 = vmatpush3.msra.mxu1 %v8445_v41 }
0x2498   :  { %12957 = vmatmul.mubr.f32.vlgmr.msra.gmra.mxu1 %v16612_v39 }
0x2499   :  { %12959 = vmatprep.mubr.f32.mxu1 %v16615_v58 }
0x249c   :  { %12960 = vmatmul.mubr.f32.gmra.mxu1 %v16618_v18 }
0x249d   :  { %12962 = vmatprep.mubr.f32.mxu1 %v16621_v43 }
0x24a0   :  { %12963 = vmatmul.mubr.f32.gmra.mxu1 %v16624_v27 }
0x24a1   :  { %12965 = vmatprep.mubr.f32.mxu1 %v16627_v2 }
0x24a4   :  { %12966 = vmatmul.mubr.f32.gmra.mxu1 %v16630_v28 }
0x24a5   :  { %12968 = vmatprep.mubr.f32.mxu1 %v16633_v30 }
0x24a8   :  { %12969 = vmatmul.mubr.f32.gmra.mxu1 %v16636_v61 }
0x24a9   :  { %12971 = vmatprep.mubr.f32.mxu1 %v16639_v47 }
0x24ac   :  { %12972 = vmatmul.mubr.f32.gmra.mxu1 %v16642_v5 }
0x24ad   :  { %12974 = vmatprep.mubr.f32.mxu1 %v16693_v63 }
0x24b0   :  { %12975 = vmatmul.mubr.f32.gmra.mxu1 %v16696_v13 }
0x24b1   :  { %12977 = vmatprep.mubr.f32.mxu1 %v16699_v38 }
0x24b4   :  { %12978 = vmatmul.mubr.f32.gmra.mxu1 %v16702_v22 }
0x24b5   :  { %13024 = vmatprep.mubr.f32.mxu1 %v16633_v30 }
0x2558   :  { %v12958_v48 = vpop.f32.mrf.mxu1 }
0x2559   :  { %v8565_v44 = vadd.f32 %v12958_v48, %v8478_v4  ;;  %v8490_v4 = vmul.f32 %v8474_v15, %v15127_v42 }
0x255a   :  { %v8559_v33 = vpop.f32.mrf.mxu1 }
0x255b   :  { %8639 = vst.msk [vmem:[#allocation3 + $0x8] sm:$0xff] %vm321_vm0, %v8565_v44  ;;  %v8560_v57 = vadd.f32 %v8559_v33, %v8477_v36  ;;  %v8489_v36 = vmul.f32 %v8473_v37, %v15127_v42 }
0x255c   :  { %v12961_v55 = vpop.f32.mrf.mxu1 }
0x255d   :  { %8638 = vst.msk [vmem:[#allocation3] sm:$0xff] %vm321_vm0, %v8560_v57  ;;  %v8575_v30 = vadd.f32 %v12961_v55, %v8480_v46  ;;  %v8492_v46 = vmul.f32 %v8476_v16, %v15127_v42 }
0x255e   :  { %v8569_v0 = vpop.f32.mrf.mxu1 }
0x255f   :  { %8641 = vst.msk [vmem:[#allocation3 + $0x18] sm:$0xff] %vm321_vm0, %v8575_v30  ;;  %v8570_v3 = vadd.f32 %v8569_v0, %v8479_v53  ;;  %v8491_v30 = vmul.f32 %v8475_v52, %v15127_v42 }
0x2560   :  { %v12964_v35 = vpop.f32.mrf.mxu1 }
0x2561   :  { %8640 = vst.msk [vmem:[#allocation3 + $0x10] sm:$0xff] %vm321_vm0, %v8570_v3  ;;  %v8585_v8 = vadd.f32 %v12964_v35, %v8482_v10 }
0x2562   :  { %v8579_v7 = vpop.f32.mrf.mxu1 }
0x2563   :  { %8643 = vst.msk [vmem:[#allocation3 + $0x28] sm:$0xff] %vm321_vm0, %v8585_v8  ;;  %v8580_v20 = vadd.f32 %v8579_v7, %v8481_v1 }
0x2564   :  { %v12967_v14 = vpop.f32.mrf.mxu1 }
0x2565   :  { %8642 = vst.msk [vmem:[#allocation3 + $0x20] sm:$0xff] %vm321_vm0, %v8580_v20  ;;  %v8595_v49 = vadd.f32 %v12967_v14, %v8484_v12 }
0x2566   :  { %v8589_v54 = vpop.f32.mrf.mxu1  ;;  %v8657_v14 = vld [vmem:[#allocation3 + $0x18] sm:$0xff] }
0x2567   :  { %8645 = vst.msk [vmem:[#allocation3 + $0x38] sm:$0xff] %vm321_vm0, %v8595_v49  ;;  %v8590_v51 = vadd.f32 %v8589_v54, %v8483_v34  ;;  %v8655_v49 = vld [vmem:[#allocation3 + $0x8] sm:$0xff]  ;;  %v8654_v34 = vld [vmem:[#allocation3] sm:$0xff]  ;;  %v8882_v54 = vld [vmem:[%s16886_s2 + $0x18] sm:$0xff] }
0x2568   :  { %v12970_v24 = vpop.f32.mrf.mxu1  ;;  %v8656_v19 = vld [vmem:[#allocation3 + $0x10] sm:$0xff] }
0x2569   :  { %8644 = vst.msk [vmem:[#allocation3 + $0x30] sm:$0xff] %vm321_vm0, %v8590_v51  ;;  %v8605_v45 = vadd.f32 %v12970_v24, %v8486_v17  ;;  %v8673_v17 = vld [vmem:[#allocation2 + $0x518] sm:$0xff] }
0x256a   :  { %v8599_v40 = vpop.f32.mrf.mxu1  ;;  %v8659_v20 = vld [vmem:[#allocation3 + $0x28] sm:$0xff]  ;;  %v8681_v24 = vld [vmem:[#allocation2 + $0x558] sm:$0xff] }
0x256b   :  { %8647 = vst.msk [vmem:[#allocation3 + $0x48] sm:$0xff] %vm321_vm0, %v8605_v45  ;;  %v8600_v60 = vadd.f32 %v8599_v40, %v8485_v50 }
0x256c   :  { %v12973_v23 = vpop.f32.mrf.mxu1  ;;  %v8658_v12 = vld [vmem:[#allocation3 + $0x20] sm:$0xff] }
0x256d   :  { %8646 = vst.msk [vmem:[#allocation3 + $0x40] sm:$0xff] %vm321_vm0, %v8600_v60  ;;  %v8615_v32 = vadd.f32 %v12973_v23, %v8488_v6  ;;  %v8672_v6 = vld [vmem:[#allocation2 + $0x510] sm:$0xff] }
0x256e   :  { %v8609_v41 = vpop.f32.mrf.mxu1  ;;  %v8661_v7 = vld [vmem:[#allocation3 + $0x38] sm:$0xff]  ;;  %v8680_v23 = vld [vmem:[#allocation2 + $0x550] sm:$0xff] }
0x256f   :  { %8649 = vst.msk [vmem:[#allocation3 + $0x58] sm:$0xff] %vm321_vm0, %v8615_v32  ;;  %v8610_v56 = vadd.f32 %v8609_v41, %v8487_v25  ;;  %v8689_v25 = vmul.f32 %v8673_v17, %v15178_v29  ;;  %v8697_v41 = vmul.f32 %v8681_v24, %v15178_v29 }
0x2570   :  { %v12976_v48 = vpop.f32.mrf.mxu1  ;;  %v8660_v59 = vld [vmem:[#allocation3 + $0x30] sm:$0xff] }
0x2571   :  { %8648 = vst.msk [vmem:[#allocation3 + $0x50] sm:$0xff] %vm321_vm0, %v8610_v56  ;;  %v8625_v44 = vadd.f32 %v12976_v48, %v8490_v4  ;;  %v8675_v4 = vld [vmem:[#allocation2 + $0x528] sm:$0xff] }
0x2572   :  { %v8619_v33 = vpop.f32.mrf.mxu1  ;;  %v8663_v8 = vld [vmem:[#allocation3 + $0x48] sm:$0xff] }
0x2573   :  { %8651 = vst.msk [vmem:[#allocation3 + $0x68] sm:$0xff] %vm321_vm0, %v8625_v44  ;;  %v8620_v57 = vadd.f32 %v8619_v33, %v8489_v36  ;;  %v8683_v48 = vld [vmem:[#allocation2 + $0x568] sm:$0xff]  ;;  %v8688_v36 = vmul.f32 %v8672_v6, %v15178_v29  ;;  %v8696_v33 = vmul.f32 %v8680_v23, %v15178_v29  ;;  %v9094_v6 = vld [vmem:[#allocation5 + $0x10] sm:$0xff] }
0x2574   :  { %v12979_v55 = vpop.f32.mrf.mxu1  ;;  %v8662_v1 = vld [vmem:[#allocation3 + $0x40] sm:$0xff]  ;;  %v9093_v23 = vld [vmem:[#allocation5 + $0x8] sm:$0xff] }
0x2575   :  { %8650 = vst.msk [vmem:[#allocation3 + $0x60] sm:$0xff] %vm321_vm0, %v8620_v57  ;;  %v8635_v21 = vadd.f32 %v12979_v55, %v8492_v46  ;;  %v8674_v46 = vld [vmem:[#allocation2 + $0x520] sm:$0xff] }
0x2576   :  { %v8629_v53 = vpop.f32.mrf.mxu1  ;;  %v8665_v35 = vld [vmem:[#allocation3 + $0x58] sm:$0xff]  ;;  %v8682_v55 = vld [vmem:[#allocation2 + $0x560] sm:$0xff] }
0x2577   :  { %8653 = vst.msk [vmem:[#allocation3 + $0x78] sm:$0xff] %vm321_vm0, %v8635_v21  ;;  %v8630_v0 = vadd.f32 %v8629_v53, %v8491_v30  ;;  %v8691_v53 = vmul.f32 %v8675_v4, %v15178_v29 }
0x2578   :  { %v8664_v9 = vld [vmem:[#allocation3 + $0x50] sm:$0xff] }
0x2579   :  { %8652 = vst.msk [vmem:[#allocation3 + $0x70] sm:$0xff] %vm321_vm0, %v8630_v0  ;;  %v8699_v0 = vmul.f32 %v8683_v48, %v15178_v29 }
0x257a   :  { %v8667_v10 = vld [vmem:[#allocation3 + $0x68] sm:$0xff] }
0x257c   :  { %v8666_v42 = vld [vmem:[#allocation3 + $0x60] sm:$0xff] }
0x257e   :  { %v8669_v62 = vld [vmem:[#allocation3 + $0x78] sm:$0xff] }
0x257f   :  { %12980 = vmatprep.subr.mxu0 %v8669_v62  ;;  %13108 = vmatprep.subr.mxu1 %v8669_v62 }
0x2580   :  { %12981 = vmatpush3.msra.mxu0 %v8669_v62  ;;  %13124 = vmatpush3.msra.mxu1 %v8669_v62  ;;  %v8668_v3 = vld [vmem:[#allocation3 + $0x70] sm:$0xff] }
0x2581   :  { %12982 = vmatprep.subr.mxu0 %v8668_v3  ;;  %13109 = vmatprep.subr.mxu1 %v8668_v3 }
0x2582   :  { %12983 = vmatpush3.msra.mxu0 %v8668_v3  ;;  %13125 = vmatpush3.msra.mxu1 %v8668_v3 }
0x2583   :  { %12984 = vmatprep.subr.mxu0 %v8667_v10  ;;  %13110 = vmatprep.subr.mxu1 %v8667_v10 }
0x2584   :  { %12985 = vmatpush3.msra.mxu0 %v8667_v10  ;;  %13126 = vmatpush3.msra.mxu1 %v8667_v10  ;;  %v8677_v10 = vld [vmem:[#allocation2 + $0x538] sm:$0xff] }
0x2585   :  { %12986 = vmatprep.subr.mxu0 %v8666_v42  ;;  %13111 = vmatprep.subr.mxu1 %v8666_v42 }
0x2586   :  { %12987 = vmatpush3.msra.mxu0 %v8666_v42  ;;  %13127 = vmatpush3.msra.mxu1 %v8666_v42  ;;  %v8685_v42 = vld [vmem:[#allocation2 + $0x578] sm:$0xff] }
0x2587   :  { %12988 = vmatprep.subr.mxu0 %v8665_v35  ;;  %13112 = vmatprep.subr.mxu1 %v8665_v35 }
0x2588   :  { %12989 = vmatpush3.msra.mxu0 %v8665_v35  ;;  %13128 = vmatpush3.msra.mxu1 %v8665_v35 }
0x2589   :  { %12990 = vmatprep.subr.mxu0 %v8664_v9  ;;  %13113 = vmatprep.subr.mxu1 %v8664_v9 }
0x258a   :  { %12991 = vmatpush3.msra.mxu0 %v8664_v9  ;;  %13129 = vmatpush3.msra.mxu1 %v8664_v9 }
0x258b   :  { %12992 = vmatprep.subr.mxu0 %v8663_v8  ;;  %13114 = vmatprep.subr.mxu1 %v8663_v8 }
0x258c   :  { %12993 = vmatpush3.msra.mxu0 %v8663_v8  ;;  %13130 = vmatpush3.msra.mxu1 %v8663_v8  ;;  %v8690_v8 = vmul.f32 %v8674_v46, %v15178_v29 }
0x258d   :  { %12994 = vmatprep.subr.mxu0 %v8662_v1  ;;  %13115 = vmatprep.subr.mxu1 %v8662_v1 }
0x258e   :  { %12995 = vmatpush3.msra.mxu0 %v8662_v1  ;;  %13131 = vmatpush3.msra.mxu1 %v8662_v1  ;;  %v8698_v1 = vmul.f32 %v8682_v55, %v15178_v29 }
0x258f   :  { %12996 = vmatprep.subr.mxu0 %v8661_v7  ;;  %13116 = vmatprep.subr.mxu1 %v8661_v7 }
0x2590   :  { %12997 = vmatpush3.msra.mxu0 %v8661_v7  ;;  %13132 = vmatpush3.msra.mxu1 %v8661_v7 }
0x2591   :  { %12998 = vmatprep.subr.mxu0 %v8660_v59  ;;  %13117 = vmatprep.subr.mxu1 %v8660_v59 }
0x2592   :  { %12999 = vmatpush3.msra.mxu0 %v8660_v59  ;;  %13133 = vmatpush3.msra.mxu1 %v8660_v59 }
0x2593   :  { %13000 = vmatprep.subr.mxu0 %v8659_v20  ;;  %13118 = vmatprep.subr.mxu1 %v8659_v20 }
0x2594   :  { %13001 = vmatpush3.msra.mxu0 %v8659_v20  ;;  %13134 = vmatpush3.msra.mxu1 %v8659_v20  ;;  %v8676_v20 = vld [vmem:[#allocation2 + $0x530] sm:$0xff] }
0x2595   :  { %13002 = vmatprep.subr.mxu0 %v8658_v12  ;;  %13119 = vmatprep.subr.mxu1 %v8658_v12 }
0x2596   :  { %13003 = vmatpush3.msra.mxu0 %v8658_v12  ;;  %13135 = vmatpush3.msra.mxu1 %v8658_v12  ;;  %v8684_v12 = vld [vmem:[#allocation2 + $0x570] sm:$0xff] }
0x2597   :  { %13004 = vmatprep.subr.mxu0 %v8657_v14  ;;  %13120 = vmatprep.subr.mxu1 %v8657_v14 }
0x2598   :  { %13005 = vmatpush3.msra.mxu0 %v8657_v14  ;;  %13136 = vmatpush3.msra.mxu1 %v8657_v14 }
0x2599   :  { %13006 = vmatprep.subr.mxu0 %v8656_v19  ;;  %13121 = vmatprep.subr.mxu1 %v8656_v19 }
0x259a   :  { %13007 = vmatpush3.msra.mxu0 %v8656_v19  ;;  %13137 = vmatpush3.msra.mxu1 %v8656_v19 }
0x259b   :  { %13008 = vmatprep.subr.mxu0 %v8655_v49  ;;  %13122 = vmatprep.subr.mxu1 %v8655_v49 }
0x259c   :  { %13009 = vmatpush3.msra.mxu0 %v8655_v49  ;;  %13138 = vmatpush3.msra.mxu1 %v8655_v49  ;;  %v8693_v49 = vmul.f32 %v8677_v10, %v15178_v29 }
0x259d   :  { %13010 = vmatprep.subr.mxu0 %v8654_v34  ;;  %13123 = vmatprep.subr.mxu1 %v8654_v34 }
0x259e   :  { %13011 = vmatpush3.msra.mxu0 %v8654_v34  ;;  %13139 = vmatpush3.msra.mxu1 %v8654_v34  ;;  %v8701_v34 = vmul.f32 %v8685_v42, %v15178_v29 }
0x259f   :  { %13013 = vmatmul.mubr.f32.vlgmr.msra.gmra.mxu0 %v16612_v39  ;;  %13025 = vmatmul.mubr.f32.vlgmr.msra.gmra.mxu1 %v16636_v61  ;;  %v8881_v39 = vld [vmem:[%s16886_s2 + $0x10] sm:$0xff]  ;;  %v9095_v61 = vld [vmem:[#allocation5 + $0x18] sm:$0xff] }
0x25a0   :  { %13015 = vmatprep.mubr.f32.mxu0 %v16615_v58  ;;  %13027 = vmatprep.mubr.f32.mxu1 %v16639_v47  ;;  %v8880_v58 = vld [vmem:[%s16886_s2 + $0x8] sm:$0xff] }
0x25a1   :  { %13036 = vmatprep.subr.mxu1 %v8882_v54  ;;  %v8671_v47 = vld [vmem:[#allocation2 + $0x508] sm:$0xff] }
0x25a2   :  { %13037 = vmatpush3.msra.mxu1 %v8882_v54 }
0x25a3   :  { %13016 = vmatmul.mubr.f32.gmra.mxu0 %v16618_v18  ;;  %13028 = vmatmul.mubr.f32.gmra.mxu1 %v16642_v5  ;;  %v8879_v18 = vld [vmem:[%s16886_s2] sm:$0xff]  ;;  %v8679_v5 = vld [vmem:[#allocation2 + $0x548] sm:$0xff] }
0x25a4   :  { %13018 = vmatprep.mubr.f32.mxu0 %v16621_v43  ;;  %13030 = vmatprep.mubr.f32.mxu1 %v16693_v63  ;;  %v9099_v43 = vld [vmem:[#allocation5 + $0x38] sm:$0xff]  ;;  %v8670_v63 = vld [vmem:[#allocation2 + $0x500] sm:$0xff] }
0x25a5   :  { %13038 = vmatprep.subr.mxu1 %v8881_v39  ;;  %13068 = vmatprep.subr.mxu0 %v9099_v43  ;;  %v8686_v50 = vmul.f32 %v8670_v63, %v15178_v29 }
0x25a6   :  { %13039 = vmatpush3.msra.mxu1 %v8881_v39  ;;  %13069 = vmatpush3.msra.mxu0 %v9099_v43 }
0x25a7   :  { %13019 = vmatmul.mubr.f32.gmra.mxu0 %v16624_v27  ;;  %13031 = vmatmul.mubr.f32.gmra.mxu1 %v16696_v13  ;;  %v9098_v27 = vld [vmem:[#allocation5 + $0x30] sm:$0xff]  ;;  %v8678_v13 = vld [vmem:[#allocation2 + $0x540] sm:$0xff] }
0x25a8   :  { %13021 = vmatprep.mubr.f32.mxu0 %v16627_v2  ;;  %13033 = vmatprep.mubr.f32.mxu1 %v16699_v38  ;;  %v9097_v2 = vld [vmem:[#allocation5 + $0x28] sm:$0xff]  ;;  %v8687_v38 = vmul.f32 %v8671_v47, %v15178_v29  ;;  %v8694_v40 = vmul.f32 %v8678_v13, %v15178_v29 }
0x25a9   :  { %13040 = vmatprep.subr.mxu1 %v8880_v58  ;;  %13070 = vmatprep.subr.mxu0 %v9098_v27 }
0x25aa   :  { %13041 = vmatpush3.msra.mxu1 %v8880_v58  ;;  %13071 = vmatpush3.msra.mxu0 %v9098_v27  ;;  %v8692_v27 = vmul.f32 %v8676_v20, %v15178_v29 }
0x25ab   :  { %13022 = vmatmul.mubr.f32.gmra.mxu0 %v16630_v28  ;;  %13034 = vmatmul.mubr.f32.gmra.mxu1 %v16702_v22  ;;  %v9096_v28 = vld [vmem:[#allocation5 + $0x20] sm:$0xff]  ;;  %v8695_v22 = vmul.f32 %v8679_v5, %v15178_v29 }
0x25ac   :  { %13042 = vmatprep.subr.mxu1 %v8879_v18  ;;  %13072 = vmatprep.subr.mxu0 %v9097_v2 }
0x25ad   :  { %13043 = vmatpush3.msra.mxu1 %v8879_v18  ;;  %13073 = vmatpush3.msra.mxu0 %v9097_v2  ;;  %v8700_v2 = vmul.f32 %v8684_v12, %v15178_v29 }
0x25ae   :  { %13074 = vmatprep.subr.mxu0 %v9096_v28 }
0x25af   :  { %13075 = vmatpush3.msra.mxu0 %v9096_v28 }
0x25b0   :  { %13076 = vmatprep.subr.mxu0 %v9095_v61 }
0x25b1   :  { %13077 = vmatpush3.msra.mxu0 %v9095_v61 }
0x25b2   :  { %13078 = vmatprep.subr.mxu0 %v9094_v6 }
0x25b3   :  { %13079 = vmatpush3.msra.mxu0 %v9094_v6 }
0x25b4   :  { %13080 = vmatprep.subr.mxu0 %v9093_v23 }
0x25b5   :  { %13081 = vmatpush3.msra.mxu0 %v9093_v23 }
0x265f   :  { %v13014_v11 = vpop.f32.mrf.mxu0  ;;  %v13026_v51 = vpop.f32.mrf.mxu1 }
0x2660   :  { %v8774_v26 = vadd.f32 %v13014_v11, %v8687_v38  ;;  %v8814_v45 = vadd.f32 %v13026_v51, %v8695_v22 }
0x2661   :  { %v8768_v31 = vpop.f32.mrf.mxu0  ;;  %v8808_v60 = vpop.f32.mrf.mxu1 }
0x2662   :  { %8848 = vst.msk [vmem:[#allocation3 + $0x8] sm:$0xff] %vm321_vm0, %v8774_v26  ;;  %8856 = vst.msk [vmem:[#allocation3 + $0x48] sm:$0xff] %vm321_vm0, %v8814_v45  ;;  %v8769_v15 = vadd.f32 %v8768_v31, %v8686_v50  ;;  %v8809_v32 = vadd.f32 %v8808_v60, %v8694_v40 }
0x2663   :  { %v13017_v37 = vpop.f32.mrf.mxu0  ;;  %v13029_v56 = vpop.f32.mrf.mxu1 }
0x2664   :  { %8847 = vst.msk [vmem:[#allocation3] sm:$0xff] %vm321_vm0, %v8769_v15  ;;  %8855 = vst.msk [vmem:[#allocation3 + $0x40] sm:$0xff] %vm321_vm0, %v8809_v32  ;;  %v8784_v16 = vadd.f32 %v13017_v37, %v8689_v25  ;;  %v8824_v44 = vadd.f32 %v13029_v56, %v8697_v41  ;;  %v9092_v15 = vld [vmem:[#allocation5] sm:$0xff] }
0x2665   :  { %v8778_v52 = vpop.f32.mrf.mxu0  ;;  %v8818_v57 = vpop.f32.mrf.mxu1  ;;  %13082 = vmatprep.subr.mxu0 %v9092_v15 }
0x2666   :  { %8850 = vst.msk [vmem:[#allocation3 + $0x18] sm:$0xff] %vm321_vm0, %v8784_v16  ;;  %8858 = vst.msk [vmem:[#allocation3 + $0x58] sm:$0xff] %vm321_vm0, %v8824_v44  ;;  %v8779_v21 = vadd.f32 %v8778_v52, %v8688_v36  ;;  %v8819_v30 = vadd.f32 %v8818_v57, %v8696_v33  ;;  %13083 = vmatpush3.msra.mxu0 %v9092_v15 }
0x2667   :  { %v13020_v62 = vpop.f32.mrf.mxu0  ;;  %v13032_v3 = vpop.f32.mrf.mxu1 }
0x2668   :  { %8849 = vst.msk [vmem:[#allocation3 + $0x10] sm:$0xff] %vm321_vm0, %v8779_v21  ;;  %8857 = vst.msk [vmem:[#allocation3 + $0x50] sm:$0xff] %vm321_vm0, %v8819_v30  ;;  %v8794_v35 = vadd.f32 %v13020_v62, %v8691_v53  ;;  %v8834_v9 = vadd.f32 %v13032_v3, %v8699_v0 }
0x2669   :  { %v8788_v7 = vpop.f32.mrf.mxu0  ;;  %v8828_v59 = vpop.f32.mrf.mxu1  ;;  %v8864_v28 = vld [vmem:[#allocation3 + $0x8] sm:$0xff] }
0x266a   :  { %8852 = vst.msk [vmem:[#allocation3 + $0x28] sm:$0xff] %vm321_vm0, %v8794_v35  ;;  %8860 = vst.msk [vmem:[#allocation3 + $0x68] sm:$0xff] %vm321_vm0, %v8834_v9  ;;  %v8789_v14 = vadd.f32 %v8788_v7, %v8690_v8  ;;  %v8829_v19 = vadd.f32 %v8828_v59, %v8698_v1  ;;  %v8872_v24 = vld [vmem:[#allocation3 + $0x48] sm:$0xff] }
0x266b   :  { %v13023_v54 = vpop.f32.mrf.mxu0  ;;  %v13035_v39 = vpop.f32.mrf.mxu1  ;;  %v8863_v58 = vld [vmem:[#allocation3] sm:$0xff] }
0x266c   :  { %8851 = vst.msk [vmem:[#allocation3 + $0x20] sm:$0xff] %vm321_vm0, %v8789_v14  ;;  %8859 = vst.msk [vmem:[#allocation3 + $0x60] sm:$0xff] %vm321_vm0, %v8829_v19  ;;  %v8804_v18 = vadd.f32 %v13023_v54, %v8693_v49  ;;  %v8844_v43 = vadd.f32 %v13035_v39, %v8701_v34  ;;  %13044 = vmatprep.mubr.msk.f32.mxu1 %vm321_vm0, %v8863_v58  ;;  %v8871_v17 = vld [vmem:[#allocation3 + $0x40] sm:$0xff]  ;;  %v9101_v19 = vstv %s16891_s7  ;;  %s13393_s7 = smov [#allocation14]  }
0x266d   :  { %v8798_v61 = vpop.f32.mrf.mxu0  ;;  %v8838_v47 = vpop.f32.mrf.mxu1  ;;  %13045 = vmatmul.mubr.msk.f32.vlgmr.msra.gmra.mxu1 %vm321_vm0, %v8864_v28  ;;  %v8866_v38 = vld [vmem:[#allocation3 + $0x18] sm:$0xff]  ;;  %s9317_s19 = sshll.u32 %s13393_s7, 4  ;;  %s9318_s19 = int_to_ptr.vmem [resolvable:$true] %s9317_s19 }
0x266e   :  { %8854 = vst.msk [vmem:[#allocation3 + $0x38] sm:$0xff] %vm321_vm0, %v8804_v18  ;;  %8862 = vst.msk [vmem:[#allocation3 + $0x78] sm:$0xff] %vm321_vm0, %v8844_v43  ;;  %v8799_v5 = vadd.f32 %v8798_v61, %v8692_v27  ;;  %v8839_v63 = vadd.f32 %v8838_v47, %v8700_v2  ;;  %v8874_v45 = vld [vmem:[#allocation3 + $0x58] sm:$0xff]  ;;  %s13356_s20 = scalar_lea.vmem %s9318_s19, 2048  ;;  %p13361_p7 = scmp.lt.s32.totalorder %s9318_s19, %s9318_s19 }
0x266f   :  { %v8865_v13 = vld [vmem:[#allocation3 + $0x10] sm:$0xff]  ;;  %p13357_p6 = scmp.ne.s32.totalorder %s9318_s19, %s13356_s20  ;;  %p13362_p8 = scmp.lt.s32.totalorder %s13356_s20, %s13356_s20 }
0x2670   :  { %8853 = vst.msk [vmem:[#allocation3 + $0x30] sm:$0xff] %vm321_vm0, %v8799_v5  ;;  %8861 = vst.msk [vmem:[#allocation3 + $0x70] sm:$0xff] %vm321_vm0, %v8839_v63  ;;  %13047 = vmatprep.mubr.msk.f32.mxu1 %vm321_vm0, %v8865_v13  ;;  %v8873_v26 = vld [vmem:[#allocation3 + $0x50] sm:$0xff] }
0x2671   :  { %13048 = vmatmul.mubr.msk.f32.gmra.mxu1 %vm321_vm0, %v8866_v38  ;;  %v8868_v22 = vld [vmem:[#allocation3 + $0x28] sm:$0xff]  ;;  %p13363_p9 = por %p13362_p8, %p13361_p7 }
0x2672   :  { %v8876_v40 = vld [vmem:[#allocation3 + $0x68] sm:$0xff] }
0x2673   :  { %v8867_v29 = vld [vmem:[#allocation3 + $0x20] sm:$0xff]  ;;  %p13364_p10 = pnand %p13363_p9, %p13357_p6 }
0x2674   :  { %13050 = vmatprep.mubr.msk.f32.mxu1 %vm321_vm0, %v8867_v29  ;;  %v8875_v50 = vld [vmem:[#allocation3 + $0x60] sm:$0xff] }
0x2675   :  { %13051 = vmatmul.mubr.msk.f32.gmra.mxu1 %vm321_vm0, %v8868_v22  ;;  %v8870_v51 = vld [vmem:[#allocation3 + $0x38] sm:$0xff] }
0x2676   :  { %v8878_v60 = vld [vmem:[#allocation3 + $0x78] sm:$0xff] }
0x2677   :  { %v8869_v11 = vld [vmem:[#allocation3 + $0x30] sm:$0xff] }
0x2678   :  { %13053 = vmatprep.mubr.msk.f32.mxu1 %vm321_vm0, %v8869_v11  ;;  %v8877_v31 = vld [vmem:[#allocation3 + $0x70] sm:$0xff] }
0x2679   :  { %13054 = vmatmul.mubr.msk.f32.gmra.mxu1 %vm321_vm0, %v8870_v51 }
0x267a   :  { %13056 = vmatprep.mubr.msk.f32.mxu1 %vm321_vm0, %v8871_v17 }
0x267d   :  { %13057 = vmatmul.mubr.msk.f32.gmra.mxu1 %vm321_vm0, %v8872_v24 }
0x267e   :  { %13059 = vmatprep.mubr.msk.f32.mxu1 %vm321_vm0, %v8873_v26 }
0x2681   :  { %13060 = vmatmul.mubr.msk.f32.gmra.mxu1 %vm321_vm0, %v8874_v45 }
0x2682   :  { %13062 = vmatprep.mubr.msk.f32.mxu1 %vm321_vm0, %v8875_v50 }
0x2685   :  { %13063 = vmatmul.mubr.msk.f32.gmra.mxu1 %vm321_vm0, %v8876_v40 }
0x2686   :  { %13065 = vmatprep.mubr.msk.f32.mxu1 %vm321_vm0, %v8877_v31 }
0x2689   :  { %13066 = vmatmul.mubr.msk.f32.gmra.mxu1 %vm321_vm0, %v8878_v60 }
0x272d   :  { %v13046_v32 = vpop.f32.mrf.mxu1 }
0x272e   :  { %v9077_v37 = vmax.f32 %v13046_v32, 0.0 }
0x272f   :  { %v8997_v25 = vpop.f32.mrf.mxu1 }
0x2730   :  { %v9076_v41 = vmax.f32 %v8997_v25, 0.0 }
0x2731   :  { %v13049_v56 = vpop.f32.mrf.mxu1 }
0x2732   :  { %13084 = vmatprep.mubr.msk.f32.mxu0 %vm9102_vm1, %v9076_v41  ;;  %v9079_v16 = vmax.f32 %v13049_v56, 0.0 }
0x2733   :  { %v9007_v4 = vpop.f32.mrf.mxu1  ;;  %13085 = vmatmul.mubr.msk.f32.vlgmr.msra.gmra.mxu0 %vm9102_vm1, %v9077_v37 }
0x2734   :  { %v9078_v48 = vmax.f32 %v9007_v4, 0.0 }
0x2735   :  { %v13052_v44 = vpop.f32.mrf.mxu1 }
0x2736   :  { %13087 = vmatprep.mubr.msk.f32.mxu0 %vm9102_vm1, %v9078_v48  ;;  %v9081_v52 = vmax.f32 %v13052_v44, 0.0 }
0x2737   :  { %v9017_v36 = vpop.f32.mrf.mxu1  ;;  %13088 = vmatmul.mubr.msk.f32.gmra.mxu0 %vm9102_vm1, %v9079_v16 }
0x2738   :  { %v9080_v33 = vmax.f32 %v9017_v36, 0.0 }
0x2739   :  { %v13055_v57 = vpop.f32.mrf.mxu1 }
0x273a   :  { %13090 = vmatprep.mubr.msk.f32.mxu0 %vm9102_vm1, %v9080_v33  ;;  %v9083_v21 = vmax.f32 %v13055_v57, 0.0 }
0x273b   :  { %v9027_v46 = vpop.f32.mrf.mxu1  ;;  %13091 = vmatmul.mubr.msk.f32.gmra.mxu0 %vm9102_vm1, %v9081_v52 }
0x273c   :  { %v9082_v55 = vmax.f32 %v9027_v46, 0.0 }
0x273d   :  { %v13058_v30 = vpop.f32.mrf.mxu1 }
0x273e   :  { %13093 = vmatprep.mubr.msk.f32.mxu0 %vm9102_vm1, %v9082_v55  ;;  %v9085_v62 = vmax.f32 %v13058_v30, 0.0 }
0x273f   :  { %v9037_v53 = vpop.f32.mrf.mxu1  ;;  %13094 = vmatmul.mubr.msk.f32.gmra.mxu0 %vm9102_vm1, %v9083_v21 }
0x2740   :  { %v9084_v0 = vmax.f32 %v9037_v53, 0.0 }
0x2741   :  { %v13061_v3 = vpop.f32.mrf.mxu1 }
0x2742   :  { %13096 = vmatprep.mubr.msk.f32.mxu0 %vm9102_vm1, %v9084_v0  ;;  %v9087_v35 = vmax.f32 %v13061_v3, 0.0 }
0x2743   :  { %v9047_v10 = vpop.f32.mrf.mxu1  ;;  %13097 = vmatmul.mubr.msk.f32.gmra.mxu0 %vm9102_vm1, %v9085_v62 }
0x2744   :  { %v9086_v42 = vmax.f32 %v9047_v10, 0.0 }
0x2745   :  { %v13064_v9 = vpop.f32.mrf.mxu1 }
0x2746   :  { %13099 = vmatprep.mubr.msk.f32.mxu0 %vm9102_vm1, %v9086_v42  ;;  %v9089_v7 = vmax.f32 %v13064_v9, 0.0 }
0x2747   :  { %v9057_v8 = vpop.f32.mrf.mxu1  ;;  %13100 = vmatmul.mubr.msk.f32.gmra.mxu0 %vm9102_vm1, %v9087_v35 }
0x2748   :  { %v9088_v1 = vmax.f32 %v9057_v8, 0.0 }
0x2749   :  { %v13067_v59 = vpop.f32.mrf.mxu1 }
0x274a   :  { %13102 = vmatprep.mubr.msk.f32.mxu0 %vm9102_vm1, %v9088_v1  ;;  %v9091_v14 = vmax.f32 %v13067_v59, 0.0 }
0x274b   :  { %v9067_v20 = vpop.f32.mrf.mxu1  ;;  %13103 = vmatmul.mubr.msk.f32.gmra.mxu0 %vm9102_vm1, %v9089_v7 }
0x274c   :  { %v9090_v12 = vmax.f32 %v9067_v20, 0.0 }
0x274e   :  { %13105 = vmatprep.mubr.msk.f32.mxu0 %vm9102_vm1, %v9090_v12 }
0x274f   :  { %13106 = vmatmul.mubr.msk.f32.gmra.mxu0 %vm9102_vm1, %v9091_v14 }
0x27f3   :  { %v13086_v49 = vpop.f32.mrf.mxu0 }
0x27f4   :  { %v9223_v34 = vadd.f32 %v13086_v49, %v9101_v19 }
0x27f5   :  { %v9217_v54 = vpop.f32.mrf.mxu0 }
0x27f6   :  { %9297 = vst [vmem:[#allocation14 + $0x8] sm:$0xff] %v9223_v34  ;;  %v9218_v39 = vadd.f32 %v9217_v54, %v9101_v19 }
0x27f7   :  { %v13089_v58 = vpop.f32.mrf.mxu0 }
0x27f8   :  { %9296 = vst [vmem:[#allocation14] sm:$0xff] %v9218_v39  ;;  %v9233_v18 = vadd.f32 %v13089_v58, %v9101_v19 }
0x27f9   :  { %v9227_v43 = vpop.f32.mrf.mxu0 }
0x27fa   :  { %9299 = vst [vmem:[#allocation14 + $0x18] sm:$0xff] %v9233_v18  ;;  %v9228_v27 = vadd.f32 %v9227_v43, %v9101_v19 }
0x27fb   :  { %v13092_v2 = vpop.f32.mrf.mxu0 }
0x27fc   :  { %9298 = vst [vmem:[#allocation14 + $0x10] sm:$0xff] %v9228_v27  ;;  %v9243_v28 = vadd.f32 %v13092_v2, %v9101_v19 }
0x27fd   :  { %v9237_v61 = vpop.f32.mrf.mxu0 }
0x27fe   :  { %9301 = vst [vmem:[#allocation14 + $0x28] sm:$0xff] %v9243_v28  ;;  %v9238_v47 = vadd.f32 %v9237_v61, %v9101_v19 }
0x27ff   :  { %v13095_v5 = vpop.f32.mrf.mxu0 }
0x2800   :  { %9300 = vst [vmem:[#allocation14 + $0x20] sm:$0xff] %v9238_v47  ;;  %v9253_v63 = vadd.f32 %v13095_v5, %v9101_v19 }
0x2801   :  { %v9247_v13 = vpop.f32.mrf.mxu0 }
0x2802   :  { %9303 = vst [vmem:[#allocation14 + $0x38] sm:$0xff] %v9253_v63  ;;  %v9248_v38 = vadd.f32 %v9247_v13, %v9101_v19 }
0x2803   :  { %v13098_v29 = vpop.f32.mrf.mxu0 }
0x2804   :  { %9302 = vst [vmem:[#allocation14 + $0x30] sm:$0xff] %v9248_v38  ;;  %v9263_v22 = vadd.f32 %v13098_v29, %v9101_v19 }
0x2805   :  { %v9257_v11 = vpop.f32.mrf.mxu0 }
0x2806   :  { %9305 = vst [vmem:[#allocation14 + $0x48] sm:$0xff] %v9263_v22  ;;  %v9258_v51 = vadd.f32 %v9257_v11, %v9101_v19 }
0x2807   :  { %v13101_v17 = vpop.f32.mrf.mxu0 }
0x2808   :  { %9304 = vst [vmem:[#allocation14 + $0x40] sm:$0xff] %v9258_v51  ;;  %v9273_v24 = vadd.f32 %v13101_v17, %v9101_v19 }
0x2809   :  { %v9267_v26 = vpop.f32.mrf.mxu0 }
0x280a   :  { %9307 = vst [vmem:[#allocation14 + $0x58] sm:$0xff] %v9273_v24  ;;  %v9268_v45 = vadd.f32 %v9267_v26, %v9101_v19 }
0x280b   :  { %v13104_v50 = vpop.f32.mrf.mxu0 }
0x280c   :  { %9306 = vst [vmem:[#allocation14 + $0x50] sm:$0xff] %v9268_v45  ;;  %v9283_v40 = vadd.f32 %v13104_v50, %v9101_v19 }
0x280d   :  { %v9277_v31 = vpop.f32.mrf.mxu0 }
0x280e   :  { %9309 = vst [vmem:[#allocation14 + $0x68] sm:$0xff] %v9283_v40  ;;  %v9278_v60 = vadd.f32 %v9277_v31, %v9101_v19 }
0x280f   :  { %v13107_v6 = vpop.f32.mrf.mxu0 }
0x2810   :  { %9308 = vst [vmem:[#allocation14 + $0x60] sm:$0xff] %v9278_v60  ;;  %v9293_v23 = vadd.f32 %v13107_v6, %v9101_v19 }
0x2811   :  { %v9287_v15 = vpop.f32.mrf.mxu0 }
0x2812   :  { %9311 = vst [vmem:[#allocation14 + $0x78] sm:$0xff] %v9293_v23  ;;  %v9288_v32 = vadd.f32 %v9287_v15, %v9101_v19 }
0x2814   :  { %9310 = vst [vmem:[#allocation14 + $0x70] sm:$0xff] %v9288_v32 }
0x2815   :  { %13367 = shalt.err (!%p13364_p10)
}
0x2816   :  { %9323 = dma.vmem_to_hbm [thread:$0]  %s9318_s19, 2048, %s16892_s8, [#allocation7], %s13387_s30, %s13387_s30, %s13388_s9  }
0x2817   :  { %13384 = dma.done.wait [#allocation7], 2048  }
0x2818   :  { %13385 = vsyncadd [#allocation7], 4294965248 }
0x2819   :  { %9327 = vsyncpa [#allocation6], 1 }
0x281a   :  { %9328 = vsyncpa [#allocation10], 1 }
0x281b   :  { %9329 = vsyncpa [#allocation7], 1 }
0x281c   :  { %9330 = vsyncpa [#allocation8], 1 }
0x281d   :  { %9331 = vsyncpa [#allocation13], 1 }

</bundles_post_ra>
